<compile_context>
chip_gen: v7x
topology: tpu7x:2x2x1
jax: 0.10.0
libtpu: 0.0.40
codegen_flags: <defaults>
</compile_context>

<pallas_src>
import jax
import jax.numpy as jnp
from jax.experimental import pallas as pl
from jax.experimental.pallas import tpu as pltpu

DIM = 32          # encoder.gEncoder.conv4.out_channels (scaled-down synthetic CPC)
EPS = 1e-5        # LayerNorm / ChannelNorm eps (PyTorch default)

# CPC gEncoder conv stack: (kernel, stride, symmetric padding) per layer.
ENC_SPEC = [(10, 5, 3), (8, 4, 2), (4, 2, 1), (4, 2, 1), (4, 2, 1)]


def _cdiv(a, b):
    return -(-a // b)


# -----------------------------------------------------------------------------
# Static geometry ("plan") for the fused kernel
# -----------------------------------------------------------------------------
def _phase_plan(padL, S, t_in):
    """How a length-t_in sequence maps into a packed buffer whose row r holds S
    consecutive samples of the left-padded sequence xpad (xpad[j] = seq[j-padL]).
    For lane-block s the valid packed rows are [r0, r0+n) holding seq rows
    t0, t0+S, t0+2S, ..."""
    out = []
    for s in range(S):
        r0 = max(0, _cdiv(padL - s, S))
        t0 = r0 * S + s - padL
        r1 = (t_in - 1 + padL - s) // S
        n = r1 - r0 + 1
        out.append((s, r0, t0, n))
    return out


def _build_plan(L, down_conf, U):
    K1, S1, P1 = ENC_SPEC[0]
    assert L + 2 * P1 >= K1, "waveform too short for the encoder"
    T1 = (L + 2 * P1 - K1) // S1 + 1

    specs = []
    t_in = T1
    for (K, S, P) in ENC_SPEC[1:]:
        t_out = (t_in + 2 * P - K) // S + 1
        assert t_out >= 1, "waveform too short for the encoder stack"
        specs.append(dict(kind="enc", K=K, S=S, padL=P, t_in=t_in, t_out=t_out,
                          act="ReLU"))
        t_in = t_out

    n_ds = 0
    if down_conf:
        act = down_conf["activation"]
        for K, S, D in zip(down_conf["kernel"], down_conf["stride"],
                           down_conf["dilation"]):
            # TODO(synk): dilation > 1 needs a per-tap fallback path (packed-tap
            # grouping assumes contiguous taps); conf uses dilation = 1.
            assert D == 1, "dilation > 1 not supported by the packed-tap layout"
            padL = (K - 1) * D
            t_out = (t_in + padL - D * (K - 1) - 1) // S + 1
            assert t_out >= 1, "sequence too short for the downsample stack"
            specs.append(dict(kind="ds", ds_idx=n_ds, K=K, S=S, padL=padL,
                              t_in=t_in, t_out=t_out, act=act))
            t_in = t_out
            n_ds += 1

    # Packed-row count per user per layer input buffer:
    #   * row r of the buffer holds S consecutive samples of the padded input,
    #   * R >= t_out + G - 1 so the group-g slab read (length (U-1)*R + t_out)
    #     stays in bounds with both users stacked,
    #   * for non-final layers R is a multiple of the NEXT stride so both users
    #     share one strided slab read per output phase.
    for i, sp in enumerate(specs):
        G = _cdiv(sp["K"], sp["S"])
        padR = sp["padL"] if sp["kind"] == "enc" else 0   # enc pads symmetrically
        p_len = sp["padL"] + sp["t_in"] + padR
        R = max(_cdiv(p_len, sp["S"]), sp["t_out"] + G - 1)
        if i + 1 < len(specs):
            R = _cdiv(R, specs[i + 1]["S"]) * specs[i + 1]["S"]
        sp["G"], sp["R"] = G, R

    S2 = specs[0]["S"]
    T1r = _cdiv(T1, S2) * S2       # per-user row pitch of the layer-1 patch slab
    return dict(T1=T1, T1r=T1r, specs=specs, n_ds=n_ds, T_final=t_in, U=U)


# -----------------------------------------------------------------------------
# In-kernel helpers
# -----------------------------------------------------------------------------
def _norm_act(y, nrm, act):
    """Per-timestep channel norm (over the channel/lane dim) + affine + activation.
    nrm is (3, C): [conv bias; gamma; beta]."""
    y = y + nrm[0:1, :]
    mu = jnp.mean(y, axis=-1, keepdims=True)
    var = jnp.mean(jnp.square(y - mu), axis=-1, keepdims=True)
    y = (y - mu) * jax.lax.rsqrt(var + EPS)
    y = y * nrm[1:2, :] + nrm[2:3, :]
    if act == "ReLU":
        return jnp.maximum(y, 0.0)
    if act == "GELU":
        return jax.nn.gelu(y, approximate=False)
    raise NotImplementedError(f"activation {act}")


def _rows(ref, start, size, stride):
    if stride == 1:
        return ref[pl.ds(start, size), :]
    return ref[pl.ds(start, size, stride=stride), :]


def _make_fused_kernel(plan, n_layers, n_ds, U):
    C = DIM
    T1, T1r, specs = plan["T1"], plan["T1r"], plan["specs"]

    def kernel(*refs):
        patches_ref, w1_ref, enc_nrm_ref = refs[0], refs[1], refs[2]
        w_refs = refs[3:3 + n_layers]
        ds_nrm_refs = refs[3 + n_layers:3 + n_layers + n_ds]
        out_ref = refs[3 + n_layers + n_ds]
        pbufs = refs[3 + n_layers + n_ds + 1:]

        # ---- re-zero pad/alignment rows of every packed input buffer ---------
        # (a handful of 128-lane rows per step; intentionally not gated on
        #  program_id==0: the "parallel" batch axis may be split across v7x's
        #  two TensorCores, each with its own scratch.)
        for i, sp in enumerate(specs):
            pb, S, R = pbufs[i], sp["S"], sp["R"]
            r_lo = _cdiv(sp["padL"], S)
            r_hi = (sp["padL"] + sp["t_in"]) // S
            for u in range(U):
                if r_lo > 0:
                    pb[pl.ds(u * R, r_lo), :] = jnp.zeros((r_lo, S * C), jnp.float32)
                if R > r_hi:
                    pb[pl.ds(u * R + r_hi, R - r_hi), :] = jnp.zeros(
                        (R - r_hi, S * C), jnp.float32)

        enc_nrm = enc_nrm_ref[...]                           # (5, 3, C) f32

        # ---- layer 1: Conv1d(1 -> C, k=10, s=5) as one MXU dot per output ----
        # phase of layer 2's packed layout; both users share the M dimension.
        nxt, pb_next = specs[0], pbufs[0]
        w1 = w1_ref[...]                                     # (KP, C) f32
        q_src = T1r // nxt["S"]
        for (p, r0, t0, n) in _phase_plan(nxt["padL"], nxt["S"], T1):
            if n <= 0:
                continue
            n_comb = (U - 1) * q_src + n
            lhs = _rows(patches_ref, t0, n_comb, nxt["S"])   # (n_comb, KP) f32
            acc = jnp.dot(lhs, w1, preferred_element_type=jnp.float32)
            for u in range(U):
                y_u = _norm_act(acc[u * q_src:u * q_src + n, :], enc_nrm[0], "ReLU")
                pb_next[pl.ds(u * nxt["R"] + r0, n), pl.ds(p * C, C)] = y_u

        # ---- encoder layers 2-5 (shared weights) + per-user downsample conv --
        for i, sp in enumerate(specs):
            pb, w_ref = pbufs[i], w_refs[i]
            G, R, t_out, act = sp["G"], sp["R"], sp["t_out"], sp["act"]
            per_user = sp["kind"] == "ds"

            def layer_dot(start, m, stride):
                # conv as G = K/S accumulated dots of depth S*C over the packed buffer
                acc = None
                for g in range(G):
                    slab = _rows(pb, start + g, m, stride).astype(jnp.bfloat16)
                    d = jnp.dot(slab, w_ref[g], preferred_element_type=jnp.float32)
                    acc = d if acc is None else acc + d
                return acc

            if i + 1 < n_layers:
                # write straight into the next layer's packed buffer, one output
                # phase at a time (no staging buffers / repack copies).
                nxt, pb_next = specs[i + 1], pbufs[i + 1]
                q_src = R // nxt["S"]
                for (p, r0, t0, n) in _phase_plan(nxt["padL"], nxt["S"], t_out):
                    if n <= 0:
                        continue
                    n_comb = (U - 1) * q_src + n
                    acc = layer_dot(t0, n_comb, nxt["S"])
                    for u in range(U):
                        col = u * C if per_user else 0
                        nrm = (ds_nrm_refs[sp["ds_idx"]][u] if per_user
                               else enc_nrm[i + 1])
                        y_u = _norm_act(acc[u * q_src:u * q_src + n, col:col + C],
                                        nrm, act)
                        pb_next[pl.ds(u * nxt["R"] + r0, n), pl.ds(p * C, C)] = y_u
            else:
                # final layer: z = sum over enabled users, stored lane-dense.
                m = (U - 1) * R + t_out
                acc = layer_dot(0, m, 1)
                z = None
                for u in range(U):
                    col = u * C if per_user else 0
                    nrm = (ds_nrm_refs[sp["ds_idx"]][u] if per_user
                           else enc_nrm[i + 1])
                    y_u = _norm_act(acc[u * R:u * R + t_out, col:col + C], nrm, act)
                    z = y_u if z is None else z + y_u
                for t in range(t_out):
                    out_ref[:, pl.ds(t * C, C)] = z[t:t + 1, :]

    return kernel


# -----------------------------------------------------------------------------
# pallas_call builder + thin JAX wrapper (wrapper-side layer-1 im2col, no gather)
# -----------------------------------------------------------------------------
def _build_forward_fn(plan, U, B, L, params):
    C = DIM
    K1, S1, P1 = ENC_SPEC[0]
    T1, T1r, specs = plan["T1"], plan["T1r"], plan["specs"]
    n_ds, T_f = plan["n_ds"], plan["T_final"]
    n_layers = len(specs)
    KP = params["KP"]

    layer_ws = [params["enc_ws"][i] if sp["kind"] == "enc"
                else params["ds_ws"][sp["ds_idx"]]
                for i, sp in enumerate(specs)]

    in_specs = [
        pl.BlockSpec((pl.Squeezed(), U * T1r, KP), lambda b: (b, 0, 0)),
        pl.BlockSpec((KP, C), lambda b: (0, 0)),
        pl.BlockSpec((len(ENC_SPEC), 3, C), lambda b: (0, 0, 0)),
    ]
    in_specs += [pl.BlockSpec(w.shape, lambda b: (0, 0, 0)) for w in layer_ws]
    in_specs += [pl.BlockSpec(nrm.shape, lambda b: (0, 0, 0))
                 for nrm in params["ds_nrms"]]

    out_spec = pl.BlockSpec((pl.Squeezed(), 1, T_f * C), lambda b: (b, 0, 0))
    scratch = [pltpu.VMEM((U * sp["R"], sp["S"] * C), jnp.float32) for sp in specs]

    # advisory scheduling hint
    flops = 2 * U * T1 * KP * C
    transcendentals = U * T1
    for sp in specs:
        n_out = U * C if sp["kind"] == "ds" else C
        flops += 2 * U * sp["t_out"] * sp["G"] * sp["S"] * C * n_out
        transcendentals += U * sp["t_out"]
    bytes_accessed = B * (U * T1r * KP + T_f * C) * 4
    bytes_accessed += sum(int(w.size) * 2 for w in layer_ws)
    cost = pl.CostEstimate(flops=int(B * flops),
                           transcendentals=int(B * transcendentals),
                           bytes_accessed=int(bytes_accessed))

    fused = pl.pallas_call(
        _make_fused_kernel(plan, n_layers, n_ds, U),
        out_shape=jax.ShapeDtypeStruct((B, 1, T_f * C), jnp.float32),
        grid_spec=pltpu.PrefetchScalarGridSpec(
            num_scalar_prefetch=0,
            grid=(B,),
            in_specs=in_specs,
            out_specs=out_spec,
            scratch_shapes=scratch,
        ),
        compiler_params=pltpu.CompilerParams(
            dimension_semantics=("parallel",)),
        cost_estimate=cost,
    )

    w1, enc_nrm, ds_nrms = params["w1"], params["enc_nrm"], params["ds_nrms"]

    def fwd(waves):                       # waves: (U, B, L) f32
        # wrapper-side im2col for layer 1 (pure layout plumbing, no gather):
        #   patches[u, b, t, k] = padded_wave[u, b, t*S1 + k]
        need = (T1 - 1) * S1 + K1
        pad_r = max(0, need - P1 - L)
        xpad = jnp.pad(waves, ((0, 0), (0, 0), (P1, pad_r)))
        cols = [xpad[:, :, k:k + (T1 - 1) * S1 + 1:S1] for k in range(K1)]
        patches = jnp.stack(cols, axis=-1)                       # (U, B, T1, K1)
        patches = jnp.pad(patches,
                          ((0, 0), (0, 0), (0, T1r - T1), (0, KP - K1)))
        patches = jnp.transpose(patches, (1, 0, 2, 3)).reshape(B, U * T1r, KP)
        out = fused(patches, w1, enc_nrm, *layer_ws, *ds_nrms)   # (B, 1, T_f*C)
        return out.reshape(B, T_f, C)

    return jax.jit(fwd)


# -----------------------------------------------------------------------------
# Synthetic parameter construction (deterministic)
# -----------------------------------------------------------------------------
def _init_conv_norm(key, cin, cout, k):
    """Deterministic synthetic params for Conv1d(cin, cout, k) + channel norm."""
    k1, k2, k3, k4 = jax.random.split(key, 4)
    fan_in = cin * k
    w = jax.random.normal(k1, (cout, cin, k), jnp.float32) / jnp.sqrt(float(fan_in))
    b = 0.1 * jax.random.normal(k2, (cout,), jnp.float32)
    gamma = 1.0 + 0.05 * jax.random.normal(k3, (cout,), jnp.float32)
    beta = 0.05 * jax.random.normal(k4, (cout,), jnp.float32)
    w_kcc = jnp.transpose(w, (2, 1, 0))          # (k, cin, cout): patch order [k, c_in]
    nrm = jnp.stack([b, gamma, beta])            # (3, cout)
    return {"w": w_kcc, "nrm": nrm}


def init_encoder_params(key, dim):
    params, cin = [], 1
    for kk, (k, _s, _p) in zip(jax.random.split(key, len(ENC_SPEC)), ENC_SPEC):
        params.append(_init_conv_norm(kk, cin, dim, k))
        cin = dim
    return params


def init_downsample_params(key, dim, kernels):
    keys = jax.random.split(key, len(kernels))
    return [_init_conv_norm(kk, dim, dim, k) for kk, k in zip(keys, kernels)]


def _pack_taps(w_kcc, S, G):
    """(K, Cin, Cout) conv taps -> (G, S*Cin, Cout) grouped-tap matmul weights
    (missing taps zero-padded)."""
    K, Cin, Cout = w_kcc.shape
    Kp = G * S
    if Kp > K:
        w_kcc = jnp.pad(w_kcc, ((0, Kp - K), (0, 0), (0, 0)))
    return w_kcc.reshape(G, S * Cin, Cout)


# -----------------------------------------------------------------------------
# Module wrapper
# -----------------------------------------------------------------------------
class EncoderSeparatedPallas:
    def __init__(self, conf, key):
        self.conf = conf
        self.name = conf["name"]
        self.encoder_layer = conf["output_layer"]
        self.output_dim = DIM
        ke, k1, k2 = jax.random.split(key, 3)
        self.encoder_params = init_encoder_params(ke, DIM)  # shared CPC gEncoder
        down = conf.get("downsample", False)
        self.down_conf = down
        self.down_params_1 = (init_downsample_params(k1, DIM, down["kernel"])
                              if (conf["user1_input"] and down) else None)
        self.down_params_2 = (init_downsample_params(k2, DIM, down["kernel"])
                              if (conf["user2_input"] and down) else None)
        # TODO(synk): CPC gAR (output_layer > 0) and the AR module (use_module=True)
        # are recurrent (GRU/LSTM) and not implemented; conf pins them off (Identity).
        self._params = self._pack_params()
        self._fwd_cache = {}

    def _pack_params(self):
        C = DIM
        enc = self.encoder_params
        K1 = ENC_SPEC[0][0]
        KP = _cdiv(K1, 8) * 8
        w1 = enc[0]["w"].reshape(K1, C)                              # (10, C) f32
        w1 = jnp.pad(w1, ((0, KP - K1), (0, 0)))                     # (16, C)
        enc_nrm = jnp.stack([p["nrm"] for p in enc])                 # (5, 3, C)
        enc_ws = []
        for p, (K, S, _P) in zip(enc[1:], ENC_SPEC[1:]):
            enc_ws.append(_pack_taps(p["w"], S, _cdiv(K, S)).astype(jnp.bfloat16))
        ds_ws, ds_nrms = (), ()
        if self.down_conf:
            user_params = []
            if self.conf["user1_input"]:
                user_params.append(self.down_params_1)
            if self.conf["user2_input"]:
                user_params.append(self.down_params_2)
            dws, dnrms = [], []
            for j, (K, S, _D) in enumerate(zip(self.down_conf["kernel"],
                                               self.down_conf["stride"],
                                               self.down_conf["dilation"])):
                G = _cdiv(K, S)
                w_cat = jnp.concatenate(
                    [_pack_taps(up[j]["w"], S, G) for up in user_params], axis=-1)
                dws.append(w_cat.astype(jnp.bfloat16))               # (G, S*C, U*C)
                dnrms.append(jnp.stack([up[j]["nrm"] for up in user_params]))  # (U,3,C)
            ds_ws, ds_nrms = tuple(dws), tuple(dnrms)
        return {"w1": w1, "enc_nrm": enc_nrm, "enc_ws": tuple(enc_ws),
                "ds_ws": ds_ws, "ds_nrms": ds_nrms, "KP": KP}

    def forward(self, waveform_1, waveform_2):
        waves = []
        if self.conf["user1_input"]:
            waves.append(waveform_1)
        if self.conf["user2_input"]:
            waves.append(waveform_2)
        assert waves, "Encoder_Separated: at least one of user1/user2 must be enabled"
        waves = jnp.stack(waves, axis=0).astype(jnp.float32)         # (U, B, L)
        U, B, L = waves.shape
        sig = (U, B, L)
        if sig not in self._fwd_cache:
            plan = _build_plan(L, self.down_conf, U)
            self._fwd_cache[sig] = _build_forward_fn(plan, U, B, L, self._params)
        z = self._fwd_cache[sig](waves)
        return {"z": z}


CONF = {
    "name": "encoder_separated_pallas",
    "output_layer": 0,          # skip gAR
    "user1_input": True,
    "user2_input": True,
    "user_1": {"module": {"use_module": False}},
    "user_2": {"module": {"use_module": False}},
    "downsample": {"kernel": [3], "stride": [2], "dilation": [1], "activation": "ReLU"},
}


if __name__ == "__main__":
    B, L = 2, 1280  # 1280 samples -> 8 encoder frames (factor 160) -> 4 after downsample
    key = jax.random.PRNGKey(0)
    kp, kw1, kw2 = jax.random.split(key, 3)

    model = EncoderSeparatedPallas(CONF, kp)
    waveform_1 = 0.5 * jax.random.normal(kw1, (B, L), jnp.float32)
    waveform_2 = 0.5 * jax.random.normal(kw2, (B, L), jnp.float32)

    out = model.forward(waveform_1, waveform_2)
    z = jax.block_until_ready(out["z"])
    assert z.shape == (B, 4, DIM), z.shape
    assert bool(jnp.all(jnp.isfinite(z)))
    print("KERNEL_OK")
</pallas_src>

<mosaic_0001>
module attributes {stable_mosaic.version = 11 : i64} {
  func.func @kernel(%arg0: i32, %arg1: memref<1x512x16xf32, #tpu.memory_space<vmem>>, %arg2: memref<16x32xf32, #tpu.memory_space<vmem>>, %arg3: memref<5x3x32xf32, #tpu.memory_space<vmem>>, %arg4: memref<2x128x32xbf16, #tpu.memory_space<vmem>>, %arg5: memref<2x64x32xbf16, #tpu.memory_space<vmem>>, %arg6: memref<2x64x32xbf16, #tpu.memory_space<vmem>>, %arg7: memref<2x64x32xbf16, #tpu.memory_space<vmem>>, %arg8: memref<2x64x64xbf16, #tpu.memory_space<vmem>>, %arg9: memref<2x3x32xf32, #tpu.memory_space<vmem>>, %arg10: memref<1x1x128xf32, #tpu.memory_space<vmem>>, %arg11: memref<132x128xf32, #tpu.memory_space<vmem>>, %arg12: memref<68x64xf32, #tpu.memory_space<vmem>>, %arg13: memref<36x64xf32, #tpu.memory_space<vmem>>, %arg14: memref<20x64xf32, #tpu.memory_space<vmem>>, %arg15: memref<10x64xf32, #tpu.memory_space<vmem>>) attributes {dimension_semantics = [#tpu.dimension_semantics<parallel>], iteration_bounds = array<i64: 2>, scalar_prefetch = 0 : i64, scratch_operands = 5 : i64, tpu.core_type = #tpu.core_type<tc>, window_params = [{transform_indices = @transform_0, window_bounds = array<i64: 1, 512, 16>}, {pipeline_mode = #tpu.pipeline_mode<synchronous>, transform_indices = @transform_1, window_bounds = array<i64: 16, 32>}, {pipeline_mode = #tpu.pipeline_mode<synchronous>, transform_indices = @transform_2, window_bounds = array<i64: 5, 3, 32>}, {pipeline_mode = #tpu.pipeline_mode<synchronous>, transform_indices = @transform_3, window_bounds = array<i64: 2, 128, 32>}, {pipeline_mode = #tpu.pipeline_mode<synchronous>, transform_indices = @transform_4, window_bounds = array<i64: 2, 64, 32>}, {pipeline_mode = #tpu.pipeline_mode<synchronous>, transform_indices = @transform_5, window_bounds = array<i64: 2, 64, 32>}, {pipeline_mode = #tpu.pipeline_mode<synchronous>, transform_indices = @transform_6, window_bounds = array<i64: 2, 64, 32>}, {pipeline_mode = #tpu.pipeline_mode<synchronous>, transform_indices = @transform_7, window_bounds = array<i64: 2, 64, 64>}, {pipeline_mode = #tpu.pipeline_mode<synchronous>, transform_indices = @transform_8, window_bounds = array<i64: 2, 3, 32>}, {transform_indices = @transform_9, window_bounds = array<i64: 1, 1, 128>}]} {
    %cst = arith.constant 0.000000e+00 : f32
    %0 = vector.broadcast %cst : f32 to vector<1x128xf32>
    %c0 = arith.constant 0 : index
    %c0_0 = arith.constant 0 : index
    %1 = vector.load %arg11[%c0, %c0_0] : memref<132x128xf32, #tpu.memory_space<vmem>>, vector<1x128xf32>
    tpu.vector_store %arg11[%c0, %c0_0], %0 {strides = array<i32>} : memref<132x128xf32, #tpu.memory_space<vmem>>, vector<1x128xf32>,
    %cst_1 = arith.constant 0.000000e+00 : f32
    %2 = vector.broadcast %cst_1 : f32 to vector<2x128xf32>
    %c64 = arith.constant 64 : index
    %c0_2 = arith.constant 0 : index
    %3 = vector.load %arg11[%c64, %c0_2] : memref<132x128xf32, #tpu.memory_space<vmem>>, vector<2x128xf32>
    tpu.vector_store %arg11[%c64, %c0_2], %2 {strides = array<i32>} : memref<132x128xf32, #tpu.memory_space<vmem>>, vector<2x128xf32>,
    %cst_3 = arith.constant 0.000000e+00 : f32
    %4 = vector.broadcast %cst_3 : f32 to vector<1x128xf32>
    %c66 = arith.constant 66 : index
    %c0_4 = arith.constant 0 : index
    %5 = vector.load %arg11[%c66, %c0_4] : memref<132x128xf32, #tpu.memory_space<vmem>>, vector<1x128xf32>
    tpu.vector_store %arg11[%c66, %c0_4], %4 {strides = array<i32>} : memref<132x128xf32, #tpu.memory_space<vmem>>, vector<1x128xf32>,
    %cst_5 = arith.constant 0.000000e+00 : f32
    %6 = vector.broadcast %cst_5 : f32 to vector<2x128xf32>
    %c130 = arith.constant 130 : index
    %c0_6 = arith.constant 0 : index
    %7 = vector.load %arg11[%c130, %c0_6] : memref<132x128xf32, #tpu.memory_space<vmem>>, vector<2x128xf32>
    tpu.vector_store %arg11[%c130, %c0_6], %6 {strides = array<i32>} : memref<132x128xf32, #tpu.memory_space<vmem>>, vector<2x128xf32>,
    %cst_7 = arith.constant 0.000000e+00 : f32
    %8 = vector.broadcast %cst_7 : f32 to vector<1x64xf32>
    %c0_8 = arith.constant 0 : index
    %c0_9 = arith.constant 0 : index
    %9 = vector.load %arg12[%c0_8, %c0_9] : memref<68x64xf32, #tpu.memory_space<vmem>>, vector<1x64xf32>
    tpu.vector_store %arg12[%c0_8, %c0_9], %8 {strides = array<i32>} : memref<68x64xf32, #tpu.memory_space<vmem>>, vector<1x64xf32>,
    %cst_10 = arith.constant 0.000000e+00 : f32
    %10 = vector.broadcast %cst_10 : f32 to vector<2x64xf32>
    %c32 = arith.constant 32 : index
    %c0_11 = arith.constant 0 : index
    %11 = vector.load %arg12[%c32, %c0_11] : memref<68x64xf32, #tpu.memory_space<vmem>>, vector<2x64xf32>
    tpu.vector_store %arg12[%c32, %c0_11], %10 {strides = array<i32>} : memref<68x64xf32, #tpu.memory_space<vmem>>, vector<2x64xf32>,
    %cst_12 = arith.constant 0.000000e+00 : f32
    %12 = vector.broadcast %cst_12 : f32 to vector<1x64xf32>
    %c34 = arith.constant 34 : index
    %c0_13 = arith.constant 0 : index
    %13 = vector.load %arg12[%c34, %c0_13] : memref<68x64xf32, #tpu.memory_space<vmem>>, vector<1x64xf32>
    tpu.vector_store %arg12[%c34, %c0_13], %12 {strides = array<i32>} : memref<68x64xf32, #tpu.memory_space<vmem>>, vector<1x64xf32>,
    %cst_14 = arith.constant 0.000000e+00 : f32
    %14 = vector.broadcast %cst_14 : f32 to vector<2x64xf32>
    %c66_15 = arith.constant 66 : index
    %c0_16 = arith.constant 0 : index
    %15 = vector.load %arg12[%c66_15, %c0_16] : memref<68x64xf32, #tpu.memory_space<vmem>>, vector<2x64xf32>
    tpu.vector_store %arg12[%c66_15, %c0_16], %14 {strides = array<i32>} : memref<68x64xf32, #tpu.memory_space<vmem>>, vector<2x64xf32>,
    %cst_17 = arith.constant 0.000000e+00 : f32
    %16 = vector.broadcast %cst_17 : f32 to vector<1x64xf32>
    %c0_18 = arith.constant 0 : index
    %c0_19 = arith.constant 0 : index
    %17 = vector.load %arg13[%c0_18, %c0_19] : memref<36x64xf32, #tpu.memory_space<vmem>>, vector<1x64xf32>
    tpu.vector_store %arg13[%c0_18, %c0_19], %16 {strides = array<i32>} : memref<36x64xf32, #tpu.memory_space<vmem>>, vector<1x64xf32>,
    %cst_20 = arith.constant 0.000000e+00 : f32
    %18 = vector.broadcast %cst_20 : f32 to vector<2x64xf32>
    %c16 = arith.constant 16 : index
    %c0_21 = arith.constant 0 : index
    %19 = vector.load %arg13[%c16, %c0_21] : memref<36x64xf32, #tpu.memory_space<vmem>>, vector<2x64xf32>
    tpu.vector_store %arg13[%c16, %c0_21], %18 {strides = array<i32>} : memref<36x64xf32, #tpu.memory_space<vmem>>, vector<2x64xf32>,
    %cst_22 = arith.constant 0.000000e+00 : f32
    %20 = vector.broadcast %cst_22 : f32 to vector<1x64xf32>
    %c18 = arith.constant 18 : index
    %c0_23 = arith.constant 0 : index
    %21 = vector.load %arg13[%c18, %c0_23] : memref<36x64xf32, #tpu.memory_space<vmem>>, vector<1x64xf32>
    tpu.vector_store %arg13[%c18, %c0_23], %20 {strides = array<i32>} : memref<36x64xf32, #tpu.memory_space<vmem>>, vector<1x64xf32>,
    %cst_24 = arith.constant 0.000000e+00 : f32
    %22 = vector.broadcast %cst_24 : f32 to vector<2x64xf32>
    %c34_25 = arith.constant 34 : index
    %c0_26 = arith.constant 0 : index
    %23 = vector.load %arg13[%c34_25, %c0_26] : memref<36x64xf32, #tpu.memory_space<vmem>>, vector<2x64xf32>
    tpu.vector_store %arg13[%c34_25, %c0_26], %22 {strides = array<i32>} : memref<36x64xf32, #tpu.memory_space<vmem>>, vector<2x64xf32>,
    %cst_27 = arith.constant 0.000000e+00 : f32
    %24 = vector.broadcast %cst_27 : f32 to vector<1x64xf32>
    %c0_28 = arith.constant 0 : index
    %c0_29 = arith.constant 0 : index
    %25 = vector.load %arg14[%c0_28, %c0_29] : memref<20x64xf32, #tpu.memory_space<vmem>>, vector<1x64xf32>
    tpu.vector_store %arg14[%c0_28, %c0_29], %24 {strides = array<i32>} : memref<20x64xf32, #tpu.memory_space<vmem>>, vector<1x64xf32>,
    %cst_30 = arith.constant 0.000000e+00 : f32
    %26 = vector.broadcast %cst_30 : f32 to vector<2x64xf32>
    %c8 = arith.constant 8 : index
    %c0_31 = arith.constant 0 : index
    %27 = vector.load %arg14[%c8, %c0_31] : memref<20x64xf32, #tpu.memory_space<vmem>>, vector<2x64xf32>
    tpu.vector_store %arg14[%c8, %c0_31], %26 {strides = array<i32>} : memref<20x64xf32, #tpu.memory_space<vmem>>, vector<2x64xf32>,
    %cst_32 = arith.constant 0.000000e+00 : f32
    %28 = vector.broadcast %cst_32 : f32 to vector<1x64xf32>
    %c10 = arith.constant 10 : index
    %c0_33 = arith.constant 0 : index
    %29 = vector.load %arg14[%c10, %c0_33] : memref<20x64xf32, #tpu.memory_space<vmem>>, vector<1x64xf32>
    tpu.vector_store %arg14[%c10, %c0_33], %28 {strides = array<i32>} : memref<20x64xf32, #tpu.memory_space<vmem>>, vector<1x64xf32>,
    %cst_34 = arith.constant 0.000000e+00 : f32
    %30 = vector.broadcast %cst_34 : f32 to vector<2x64xf32>
    %c18_35 = arith.constant 18 : index
    %c0_36 = arith.constant 0 : index
    %31 = vector.load %arg14[%c18_35, %c0_36] : memref<20x64xf32, #tpu.memory_space<vmem>>, vector<2x64xf32>
    tpu.vector_store %arg14[%c18_35, %c0_36], %30 {strides = array<i32>} : memref<20x64xf32, #tpu.memory_space<vmem>>, vector<2x64xf32>,
    %cst_37 = arith.constant 0.000000e+00 : f32
    %32 = vector.broadcast %cst_37 : f32 to vector<1x64xf32>
    %c0_38 = arith.constant 0 : index
    %c0_39 = arith.constant 0 : index
    %33 = vector.load %arg15[%c0_38, %c0_39] : memref<10x64xf32, #tpu.memory_space<vmem>>, vector<1x64xf32>
    tpu.vector_store %arg15[%c0_38, %c0_39], %32 {strides = array<i32>} : memref<10x64xf32, #tpu.memory_space<vmem>>, vector<1x64xf32>,
    %cst_40 = arith.constant 0.000000e+00 : f32
    %34 = vector.broadcast %cst_40 : f32 to vector<1x64xf32>
    %c5 = arith.constant 5 : index
    %c0_41 = arith.constant 0 : index
    %35 = vector.load %arg15[%c5, %c0_41] : memref<10x64xf32, #tpu.memory_space<vmem>>, vector<1x64xf32>
    tpu.vector_store %arg15[%c5, %c0_41], %34 {strides = array<i32>} : memref<10x64xf32, #tpu.memory_space<vmem>>, vector<1x64xf32>,
    %c0_42 = arith.constant 0 : index
    %c0_43 = arith.constant 0 : index
    %c0_44 = arith.constant 0 : index
    %36 = vector.load %arg3[%c0_42, %c0_43, %c0_44] : memref<5x3x32xf32, #tpu.memory_space<vmem>>, vector<5x3x32xf32>
    %c0_45 = arith.constant 0 : index
    %c0_46 = arith.constant 0 : index
    %37 = vector.load %arg2[%c0_45, %c0_46] : memref<16x32xf32, #tpu.memory_space<vmem>>, vector<16x32xf32>
    %c0_47 = arith.constant 0 : index
    %c2 = arith.constant 2 : index
    %c0_48 = arith.constant 0 : index
    %38 = tpu.strided_load %arg1[%c0_47, %c2, %c0_48] {strides = array<i32: 1, 4, 1>} : memref<1x512x16xf32, #tpu.memory_space<vmem>>, vector<1x128x16xf32>
    %39 = vector.shape_cast %38 : vector<1x128x16xf32> to vector<128x16xf32>
    %cst_49 = arith.constant dense<0.000000e+00> : vector<128x32xf32>
    %40 = tpu.matmul %39, %37, %cst_49 {dimension_numbers = #tpu.dot_dimension_numbers<[1], [0], [0], [1], [0, 0, 1, 1], [], []>} : vector<128x16xf32>, vector<16x32xf32>, vector<128x32xf32> -> vector<128x32xf32>
    %41 = vector.extract_strided_slice %40 {offsets = [0, 0], sizes = [64, 32], strides = [1, 1]} : vector<128x32xf32> to vector<64x32xf32>
    %42 = vector.extract_strided_slice %36 {offsets = [0, 0, 0], sizes = [1, 3, 32], strides = [1, 1, 1]} : vector<5x3x32xf32> to vector<1x3x32xf32>
    %43 = vector.shape_cast %42 : vector<1x3x32xf32> to vector<3x32xf32>
    %44 = vector.extract_strided_slice %43 {offsets = [0, 0], sizes = [1, 32], strides = [1, 1]} : vector<3x32xf32> to vector<1x32xf32>
    %45 = vector.broadcast %44 : vector<1x32xf32> to vector<64x32xf32>
    %46 = arith.addf %41, %45 : vector<64x32xf32>
    %cst_50 = arith.constant dense<0.000000e+00> : vector<64xf32>
    %47 = vector.multi_reduction <add>, %46, %cst_50 [1] : vector<64x32xf32> to vector<64xf32>
    %48 = vector.shape_cast %47 : vector<64xf32> to vector<64x1xf32>
    %cst_51 = arith.constant 3.200000e+01 : f32
    %49 = vector.broadcast %cst_51 : f32 to vector<64x1xf32>
    %50 = arith.divf %48, %49 : vector<64x1xf32>
    %51 = vector.broadcast %50 : vector<64x1xf32> to vector<64x32xf32>
    %52 = arith.subf %46, %51 : vector<64x32xf32>
    %53 = arith.mulf %52, %52 : vector<64x32xf32>
    %cst_52 = arith.constant dense<0.000000e+00> : vector<64xf32>
    %54 = vector.multi_reduction <add>, %53, %cst_52 [1] : vector<64x32xf32> to vector<64xf32>
    %55 = vector.shape_cast %54 : vector<64xf32> to vector<64x1xf32>
    %cst_53 = arith.constant 3.200000e+01 : f32
    %56 = vector.broadcast %cst_53 : f32 to vector<64x1xf32>
    %57 = arith.divf %55, %56 : vector<64x1xf32>
    %58 = vector.broadcast %50 : vector<64x1xf32> to vector<64x32xf32>
    %59 = arith.subf %46, %58 : vector<64x32xf32>
    %cst_54 = arith.constant 9.99999974E-6 : f32
    %60 = vector.broadcast %cst_54 : f32 to vector<64x1xf32>
    %61 = arith.addf %57, %60 : vector<64x1xf32>
    %62 = math.rsqrt %61 : vector<64x1xf32>
    %63 = vector.broadcast %62 : vector<64x1xf32> to vector<64x32xf32>
    %64 = arith.mulf %59, %63 : vector<64x32xf32>
    %65 = vector.extract_strided_slice %43 {offsets = [1, 0], sizes = [1, 32], strides = [1, 1]} : vector<3x32xf32> to vector<1x32xf32>
    %66 = vector.broadcast %65 : vector<1x32xf32> to vector<64x32xf32>
    %67 = arith.mulf %64, %66 : vector<64x32xf32>
    %68 = vector.extract_strided_slice %43 {offsets = [2, 0], sizes = [1, 32], strides = [1, 1]} : vector<3x32xf32> to vector<1x32xf32>
    %69 = vector.broadcast %68 : vector<1x32xf32> to vector<64x32xf32>
    %70 = arith.addf %67, %69 : vector<64x32xf32>
    %cst_55 = arith.constant 0.000000e+00 : f32
    %71 = vector.broadcast %cst_55 : f32 to vector<64x32xf32>
    %72 = arith.maximumf %70, %71 : vector<64x32xf32>
    %c1 = arith.constant 1 : index
    %c0_56 = arith.constant 0 : index
    %73 = vector.load %arg11[%c1, %c0_56] : memref<132x128xf32, #tpu.memory_space<vmem>>, vector<64x32xf32>
    tpu.vector_store %arg11[%c1, %c0_56], %72 {strides = array<i32>} : memref<132x128xf32, #tpu.memory_space<vmem>>, vector<64x32xf32>,
    %74 = vector.extract_strided_slice %40 {offsets = [64, 0], sizes = [64, 32], strides = [1, 1]} : vector<128x32xf32> to vector<64x32xf32>
    %75 = vector.extract_strided_slice %36 {offsets = [0, 0, 0], sizes = [1, 3, 32], strides = [1, 1, 1]} : vector<5x3x32xf32> to vector<1x3x32xf32>
    %76 = vector.shape_cast %75 : vector<1x3x32xf32> to vector<3x32xf32>
    %77 = vector.extract_strided_slice %76 {offsets = [0, 0], sizes = [1, 32], strides = [1, 1]} : vector<3x32xf32> to vector<1x32xf32>
    %78 = vector.broadcast %77 : vector<1x32xf32> to vector<64x32xf32>
    %79 = arith.addf %74, %78 : vector<64x32xf32>
    %cst_57 = arith.constant dense<0.000000e+00> : vector<64xf32>
    %80 = vector.multi_reduction <add>, %79, %cst_57 [1] : vector<64x32xf32> to vector<64xf32>
    %81 = vector.shape_cast %80 : vector<64xf32> to vector<64x1xf32>
    %cst_58 = arith.constant 3.200000e+01 : f32
    %82 = vector.broadcast %cst_58 : f32 to vector<64x1xf32>
    %83 = arith.divf %81, %82 : vector<64x1xf32>
    %84 = vector.broadcast %83 : vector<64x1xf32> to vector<64x32xf32>
    %85 = arith.subf %79, %84 : vector<64x32xf32>
    %86 = arith.mulf %85, %85 : vector<64x32xf32>
    %cst_59 = arith.constant dense<0.000000e+00> : vector<64xf32>
    %87 = vector.multi_reduction <add>, %86, %cst_59 [1] : vector<64x32xf32> to vector<64xf32>
    %88 = vector.shape_cast %87 : vector<64xf32> to vector<64x1xf32>
    %cst_60 = arith.constant 3.200000e+01 : f32
    %89 = vector.broadcast %cst_60 : f32 to vector<64x1xf32>
    %90 = arith.divf %88, %89 : vector<64x1xf32>
    %91 = vector.broadcast %83 : vector<64x1xf32> to vector<64x32xf32>
    %92 = arith.subf %79, %91 : vector<64x32xf32>
    %cst_61 = arith.constant 9.99999974E-6 : f32
    %93 = vector.broadcast %cst_61 : f32 to vector<64x1xf32>
    %94 = arith.addf %90, %93 : vector<64x1xf32>
    %95 = math.rsqrt %94 : vector<64x1xf32>
    %96 = vector.broadcast %95 : vector<64x1xf32> to vector<64x32xf32>
    %97 = arith.mulf %92, %96 : vector<64x32xf32>
    %98 = vector.extract_strided_slice %76 {offsets = [1, 0], sizes = [1, 32], strides = [1, 1]} : vector<3x32xf32> to vector<1x32xf32>
    %99 = vector.broadcast %98 : vector<1x32xf32> to vector<64x32xf32>
    %100 = arith.mulf %97, %99 : vector<64x32xf32>
    %101 = vector.extract_strided_slice %76 {offsets = [2, 0], sizes = [1, 32], strides = [1, 1]} : vector<3x32xf32> to vector<1x32xf32>
    %102 = vector.broadcast %101 : vector<1x32xf32> to vector<64x32xf32>
    %103 = arith.addf %100, %102 : vector<64x32xf32>
    %cst_62 = arith.constant 0.000000e+00 : f32
    %104 = vector.broadcast %cst_62 : f32 to vector<64x32xf32>
    %105 = arith.maximumf %103, %104 : vector<64x32xf32>
    %c67 = arith.constant 67 : index
    %c0_63 = arith.constant 0 : index
    %106 = vector.load %arg11[%c67, %c0_63] : memref<132x128xf32, #tpu.memory_space<vmem>>, vector<64x32xf32>
    tpu.vector_store %arg11[%c67, %c0_63], %105 {strides = array<i32>} : memref<132x128xf32, #tpu.memory_space<vmem>>, vector<64x32xf32>,
    %c0_64 = arith.constant 0 : index
    %c3 = arith.constant 3 : index
    %c0_65 = arith.constant 0 : index
    %107 = tpu.strided_load %arg1[%c0_64, %c3, %c0_65] {strides = array<i32: 1, 4, 1>} : memref<1x512x16xf32, #tpu.memory_space<vmem>>, vector<1x128x16xf32>
    %108 = vector.shape_cast %107 : vector<1x128x16xf32> to vector<128x16xf32>
    %cst_66 = arith.constant dense<0.000000e+00> : vector<128x32xf32>
    %109 = tpu.matmul %108, %37, %cst_66 {dimension_numbers = #tpu.dot_dimension_numbers<[1], [0], [0], [1], [0, 0, 1, 1], [], []>} : vector<128x16xf32>, vector<16x32xf32>, vector<128x32xf32> -> vector<128x32xf32>
    %110 = vector.extract_strided_slice %109 {offsets = [0, 0], sizes = [64, 32], strides = [1, 1]} : vector<128x32xf32> to vector<64x32xf32>
    %111 = vector.extract_strided_slice %36 {offsets = [0, 0, 0], sizes = [1, 3, 32], strides = [1, 1, 1]} : vector<5x3x32xf32> to vector<1x3x32xf32>
    %112 = vector.shape_cast %111 : vector<1x3x32xf32> to vector<3x32xf32>
    %113 = vector.extract_strided_slice %112 {offsets = [0, 0], sizes = [1, 32], strides = [1, 1]} : vector<3x32xf32> to vector<1x32xf32>
    %114 = vector.broadcast %113 : vector<1x32xf32> to vector<64x32xf32>
    %115 = arith.addf %110, %114 : vector<64x32xf32>
    %cst_67 = arith.constant dense<0.000000e+00> : vector<64xf32>
    %116 = vector.multi_reduction <add>, %115, %cst_67 [1] : vector<64x32xf32> to vector<64xf32>
    %117 = vector.shape_cast %116 : vector<64xf32> to vector<64x1xf32>
    %cst_68 = arith.constant 3.200000e+01 : f32
    %118 = vector.broadcast %cst_68 : f32 to vector<64x1xf32>
    %119 = arith.divf %117, %118 : vector<64x1xf32>
    %120 = vector.broadcast %119 : vector<64x1xf32> to vector<64x32xf32>
    %121 = arith.subf %115, %120 : vector<64x32xf32>
    %122 = arith.mulf %121, %121 : vector<64x32xf32>
    %cst_69 = arith.constant dense<0.000000e+00> : vector<64xf32>
    %123 = vector.multi_reduction <add>, %122, %cst_69 [1] : vector<64x32xf32> to vector<64xf32>
    %124 = vector.shape_cast %123 : vector<64xf32> to vector<64x1xf32>
    %cst_70 = arith.constant 3.200000e+01 : f32
    %125 = vector.broadcast %cst_70 : f32 to vector<64x1xf32>
    %126 = arith.divf %124, %125 : vector<64x1xf32>
    %127 = vector.broadcast %119 : vector<64x1xf32> to vector<64x32xf32>
    %128 = arith.subf %115, %127 : vector<64x32xf32>
    %cst_71 = arith.constant 9.99999974E-6 : f32
    %129 = vector.broadcast %cst_71 : f32 to vector<64x1xf32>
    %130 = arith.addf %126, %129 : vector<64x1xf32>
    %131 = math.rsqrt %130 : vector<64x1xf32>
    %132 = vector.broadcast %131 : vector<64x1xf32> to vector<64x32xf32>
    %133 = arith.mulf %128, %132 : vector<64x32xf32>
    %134 = vector.extract_strided_slice %112 {offsets = [1, 0], sizes = [1, 32], strides = [1, 1]} : vector<3x32xf32> to vector<1x32xf32>
    %135 = vector.broadcast %134 : vector<1x32xf32> to vector<64x32xf32>
    %136 = arith.mulf %133, %135 : vector<64x32xf32>
    %137 = vector.extract_strided_slice %112 {offsets = [2, 0], sizes = [1, 32], strides = [1, 1]} : vector<3x32xf32> to vector<1x32xf32>
    %138 = vector.broadcast %137 : vector<1x32xf32> to vector<64x32xf32>
    %139 = arith.addf %136, %138 : vector<64x32xf32>
    %cst_72 = arith.constant 0.000000e+00 : f32
    %140 = vector.broadcast %cst_72 : f32 to vector<64x32xf32>
    %141 = arith.maximumf %139, %140 : vector<64x32xf32>
    %c1_73 = arith.constant 1 : index
    %c32_74 = arith.constant 32 : index
    %142 = vector.load %arg11[%c1_73, %c32_74] : memref<132x128xf32, #tpu.memory_space<vmem>>, vector<64x32xf32>
    tpu.vector_store %arg11[%c1_73, %c32_74], %141 {strides = array<i32>} : memref<132x128xf32, #tpu.memory_space<vmem>>, vector<64x32xf32>,
    %143 = vector.extract_strided_slice %109 {offsets = [64, 0], sizes = [64, 32], strides = [1, 1]} : vector<128x32xf32> to vector<64x32xf32>
    %144 = vector.extract_strided_slice %36 {offsets = [0, 0, 0], sizes = [1, 3, 32], strides = [1, 1, 1]} : vector<5x3x32xf32> to vector<1x3x32xf32>
    %145 = vector.shape_cast %144 : vector<1x3x32xf32> to vector<3x32xf32>
    %146 = vector.extract_strided_slice %145 {offsets = [0, 0], sizes = [1, 32], strides = [1, 1]} : vector<3x32xf32> to vector<1x32xf32>
    %147 = vector.broadcast %146 : vector<1x32xf32> to vector<64x32xf32>
    %148 = arith.addf %143, %147 : vector<64x32xf32>
    %cst_75 = arith.constant dense<0.000000e+00> : vector<64xf32>
    %149 = vector.multi_reduction <add>, %148, %cst_75 [1] : vector<64x32xf32> to vector<64xf32>
    %150 = vector.shape_cast %149 : vector<64xf32> to vector<64x1xf32>
    %cst_76 = arith.constant 3.200000e+01 : f32
    %151 = vector.broadcast %cst_76 : f32 to vector<64x1xf32>
    %152 = arith.divf %150, %151 : vector<64x1xf32>
    %153 = vector.broadcast %152 : vector<64x1xf32> to vector<64x32xf32>
    %154 = arith.subf %148, %153 : vector<64x32xf32>
    %155 = arith.mulf %154, %154 : vector<64x32xf32>
    %cst_77 = arith.constant dense<0.000000e+00> : vector<64xf32>
    %156 = vector.multi_reduction <add>, %155, %cst_77 [1] : vector<64x32xf32> to vector<64xf32>
    %157 = vector.shape_cast %156 : vector<64xf32> to vector<64x1xf32>
    %cst_78 = arith.constant 3.200000e+01 : f32
    %158 = vector.broadcast %cst_78 : f32 to vector<64x1xf32>
    %159 = arith.divf %157, %158 : vector<64x1xf32>
    %160 = vector.broadcast %152 : vector<64x1xf32> to vector<64x32xf32>
    %161 = arith.subf %148, %160 : vector<64x32xf32>
    %cst_79 = arith.constant 9.99999974E-6 : f32
    %162 = vector.broadcast %cst_79 : f32 to vector<64x1xf32>
    %163 = arith.addf %159, %162 : vector<64x1xf32>
    %164 = math.rsqrt %163 : vector<64x1xf32>
    %165 = vector.broadcast %164 : vector<64x1xf32> to vector<64x32xf32>
    %166 = arith.mulf %161, %165 : vector<64x32xf32>
    %167 = vector.extract_strided_slice %145 {offsets = [1, 0], sizes = [1, 32], strides = [1, 1]} : vector<3x32xf32> to vector<1x32xf32>
    %168 = vector.broadcast %167 : vector<1x32xf32> to vector<64x32xf32>
    %169 = arith.mulf %166, %168 : vector<64x32xf32>
    %170 = vector.extract_strided_slice %145 {offsets = [2, 0], sizes = [1, 32], strides = [1, 1]} : vector<3x32xf32> to vector<1x32xf32>
    %171 = vector.broadcast %170 : vector<1x32xf32> to vector<64x32xf32>
    %172 = arith.addf %169, %171 : vector<64x32xf32>
    %cst_80 = arith.constant 0.000000e+00 : f32
    %173 = vector.broadcast %cst_80 : f32 to vector<64x32xf32>
    %174 = arith.maximumf %172, %173 : vector<64x32xf32>
    %c67_81 = arith.constant 67 : index
    %c32_82 = arith.constant 32 : index
    %175 = vector.load %arg11[%c67_81, %c32_82] : memref<132x128xf32, #tpu.memory_space<vmem>>, vector<64x32xf32>
    tpu.vector_store %arg11[%c67_81, %c32_82], %174 {strides = array<i32>} : memref<132x128xf32, #tpu.memory_space<vmem>>, vector<64x32xf32>,
    %c0_83 = arith.constant 0 : index
    %c0_84 = arith.constant 0 : index
    %c0_85 = arith.constant 0 : index
    %176 = tpu.strided_load %arg1[%c0_83, %c0_84, %c0_85] {strides = array<i32: 1, 4, 1>} : memref<1x512x16xf32, #tpu.memory_space<vmem>>, vector<1x128x16xf32>
    %177 = vector.shape_cast %176 : vector<1x128x16xf32> to vector<128x16xf32>
    %cst_86 = arith.constant dense<0.000000e+00> : vector<128x32xf32>
    %178 = tpu.matmul %177, %37, %cst_86 {dimension_numbers = #tpu.dot_dimension_numbers<[1], [0], [0], [1], [0, 0, 1, 1], [], []>} : vector<128x16xf32>, vector<16x32xf32>, vector<128x32xf32> -> vector<128x32xf32>
    %179 = vector.extract_strided_slice %178 {offsets = [0, 0], sizes = [64, 32], strides = [1, 1]} : vector<128x32xf32> to vector<64x32xf32>
    %180 = vector.extract_strided_slice %36 {offsets = [0, 0, 0], sizes = [1, 3, 32], strides = [1, 1, 1]} : vector<5x3x32xf32> to vector<1x3x32xf32>
    %181 = vector.shape_cast %180 : vector<1x3x32xf32> to vector<3x32xf32>
    %182 = vector.extract_strided_slice %181 {offsets = [0, 0], sizes = [1, 32], strides = [1, 1]} : vector<3x32xf32> to vector<1x32xf32>
    %183 = vector.broadcast %182 : vector<1x32xf32> to vector<64x32xf32>
    %184 = arith.addf %179, %183 : vector<64x32xf32>
    %cst_87 = arith.constant dense<0.000000e+00> : vector<64xf32>
    %185 = vector.multi_reduction <add>, %184, %cst_87 [1] : vector<64x32xf32> to vector<64xf32>
    %186 = vector.shape_cast %185 : vector<64xf32> to vector<64x1xf32>
    %cst_88 = arith.constant 3.200000e+01 : f32
    %187 = vector.broadcast %cst_88 : f32 to vector<64x1xf32>
    %188 = arith.divf %186, %187 : vector<64x1xf32>
    %189 = vector.broadcast %188 : vector<64x1xf32> to vector<64x32xf32>
    %190 = arith.subf %184, %189 : vector<64x32xf32>
    %191 = arith.mulf %190, %190 : vector<64x32xf32>
    %cst_89 = arith.constant dense<0.000000e+00> : vector<64xf32>
    %192 = vector.multi_reduction <add>, %191, %cst_89 [1] : vector<64x32xf32> to vector<64xf32>
    %193 = vector.shape_cast %192 : vector<64xf32> to vector<64x1xf32>
    %cst_90 = arith.constant 3.200000e+01 : f32
    %194 = vector.broadcast %cst_90 : f32 to vector<64x1xf32>
    %195 = arith.divf %193, %194 : vector<64x1xf32>
    %196 = vector.broadcast %188 : vector<64x1xf32> to vector<64x32xf32>
    %197 = arith.subf %184, %196 : vector<64x32xf32>
    %cst_91 = arith.constant 9.99999974E-6 : f32
    %198 = vector.broadcast %cst_91 : f32 to vector<64x1xf32>
    %199 = arith.addf %195, %198 : vector<64x1xf32>
    %200 = math.rsqrt %199 : vector<64x1xf32>
    %201 = vector.broadcast %200 : vector<64x1xf32> to vector<64x32xf32>
    %202 = arith.mulf %197, %201 : vector<64x32xf32>
    %203 = vector.extract_strided_slice %181 {offsets = [1, 0], sizes = [1, 32], strides = [1, 1]} : vector<3x32xf32> to vector<1x32xf32>
    %204 = vector.broadcast %203 : vector<1x32xf32> to vector<64x32xf32>
    %205 = arith.mulf %202, %204 : vector<64x32xf32>
    %206 = vector.extract_strided_slice %181 {offsets = [2, 0], sizes = [1, 32], strides = [1, 1]} : vector<3x32xf32> to vector<1x32xf32>
    %207 = vector.broadcast %206 : vector<1x32xf32> to vector<64x32xf32>
    %208 = arith.addf %205, %207 : vector<64x32xf32>
    %cst_92 = arith.constant 0.000000e+00 : f32
    %209 = vector.broadcast %cst_92 : f32 to vector<64x32xf32>
    %210 = arith.maximumf %208, %209 : vector<64x32xf32>
    %c0_93 = arith.constant 0 : index
    %c64_94 = arith.constant 64 : index
    %211 = vector.load %arg11[%c0_93, %c64_94] : memref<132x128xf32, #tpu.memory_space<vmem>>, vector<64x32xf32>
    tpu.vector_store %arg11[%c0_93, %c64_94], %210 {strides = array<i32>} : memref<132x128xf32, #tpu.memory_space<vmem>>, vector<64x32xf32>,
    %212 = vector.extract_strided_slice %178 {offsets = [64, 0], sizes = [64, 32], strides = [1, 1]} : vector<128x32xf32> to vector<64x32xf32>
    %213 = vector.extract_strided_slice %36 {offsets = [0, 0, 0], sizes = [1, 3, 32], strides = [1, 1, 1]} : vector<5x3x32xf32> to vector<1x3x32xf32>
    %214 = vector.shape_cast %213 : vector<1x3x32xf32> to vector<3x32xf32>
    %215 = vector.extract_strided_slice %214 {offsets = [0, 0], sizes = [1, 32], strides = [1, 1]} : vector<3x32xf32> to vector<1x32xf32>
    %216 = vector.broadcast %215 : vector<1x32xf32> to vector<64x32xf32>
    %217 = arith.addf %212, %216 : vector<64x32xf32>
    %cst_95 = arith.constant dense<0.000000e+00> : vector<64xf32>
    %218 = vector.multi_reduction <add>, %217, %cst_95 [1] : vector<64x32xf32> to vector<64xf32>
    %219 = vector.shape_cast %218 : vector<64xf32> to vector<64x1xf32>
    %cst_96 = arith.constant 3.200000e+01 : f32
    %220 = vector.broadcast %cst_96 : f32 to vector<64x1xf32>
    %221 = arith.divf %219, %220 : vector<64x1xf32>
    %222 = vector.broadcast %221 : vector<64x1xf32> to vector<64x32xf32>
    %223 = arith.subf %217, %222 : vector<64x32xf32>
    %224 = arith.mulf %223, %223 : vector<64x32xf32>
    %cst_97 = arith.constant dense<0.000000e+00> : vector<64xf32>
    %225 = vector.multi_reduction <add>, %224, %cst_97 [1] : vector<64x32xf32> to vector<64xf32>
    %226 = vector.shape_cast %225 : vector<64xf32> to vector<64x1xf32>
    %cst_98 = arith.constant 3.200000e+01 : f32
    %227 = vector.broadcast %cst_98 : f32 to vector<64x1xf32>
    %228 = arith.divf %226, %227 : vector<64x1xf32>
    %229 = vector.broadcast %221 : vector<64x1xf32> to vector<64x32xf32>
    %230 = arith.subf %217, %229 : vector<64x32xf32>
    %cst_99 = arith.constant 9.99999974E-6 : f32
    %231 = vector.broadcast %cst_99 : f32 to vector<64x1xf32>
    %232 = arith.addf %228, %231 : vector<64x1xf32>
    %233 = math.rsqrt %232 : vector<64x1xf32>
    %234 = vector.broadcast %233 : vector<64x1xf32> to vector<64x32xf32>
    %235 = arith.mulf %230, %234 : vector<64x32xf32>
    %236 = vector.extract_strided_slice %214 {offsets = [1, 0], sizes = [1, 32], strides = [1, 1]} : vector<3x32xf32> to vector<1x32xf32>
    %237 = vector.broadcast %236 : vector<1x32xf32> to vector<64x32xf32>
    %238 = arith.mulf %235, %237 : vector<64x32xf32>
    %239 = vector.extract_strided_slice %214 {offsets = [2, 0], sizes = [1, 32], strides = [1, 1]} : vector<3x32xf32> to vector<1x32xf32>
    %240 = vector.broadcast %239 : vector<1x32xf32> to vector<64x32xf32>
    %241 = arith.addf %238, %240 : vector<64x32xf32>
    %cst_100 = arith.constant 0.000000e+00 : f32
    %242 = vector.broadcast %cst_100 : f32 to vector<64x32xf32>
    %243 = arith.maximumf %241, %242 : vector<64x32xf32>
    %c66_101 = arith.constant 66 : index
    %c64_102 = arith.constant 64 : index
    %244 = vector.load %arg11[%c66_101, %c64_102] : memref<132x128xf32, #tpu.memory_space<vmem>>, vector<64x32xf32>
    tpu.vector_store %arg11[%c66_101, %c64_102], %243 {strides = array<i32>} : memref<132x128xf32, #tpu.memory_space<vmem>>, vector<64x32xf32>,
    %c0_103 = arith.constant 0 : index
    %c1_104 = arith.constant 1 : index
    %c0_105 = arith.constant 0 : index
    %245 = tpu.strided_load %arg1[%c0_103, %c1_104, %c0_105] {strides = array<i32: 1, 4, 1>} : memref<1x512x16xf32, #tpu.memory_space<vmem>>, vector<1x128x16xf32>
    %246 = vector.shape_cast %245 : vector<1x128x16xf32> to vector<128x16xf32>
    %cst_106 = arith.constant dense<0.000000e+00> : vector<128x32xf32>
    %247 = tpu.matmul %246, %37, %cst_106 {dimension_numbers = #tpu.dot_dimension_numbers<[1], [0], [0], [1], [0, 0, 1, 1], [], []>} : vector<128x16xf32>, vector<16x32xf32>, vector<128x32xf32> -> vector<128x32xf32>
    %248 = vector.extract_strided_slice %247 {offsets = [0, 0], sizes = [64, 32], strides = [1, 1]} : vector<128x32xf32> to vector<64x32xf32>
    %249 = vector.extract_strided_slice %36 {offsets = [0, 0, 0], sizes = [1, 3, 32], strides = [1, 1, 1]} : vector<5x3x32xf32> to vector<1x3x32xf32>
    %250 = vector.shape_cast %249 : vector<1x3x32xf32> to vector<3x32xf32>
    %251 = vector.extract_strided_slice %250 {offsets = [0, 0], sizes = [1, 32], strides = [1, 1]} : vector<3x32xf32> to vector<1x32xf32>
    %252 = vector.broadcast %251 : vector<1x32xf32> to vector<64x32xf32>
    %253 = arith.addf %248, %252 : vector<64x32xf32>
    %cst_107 = arith.constant dense<0.000000e+00> : vector<64xf32>
    %254 = vector.multi_reduction <add>, %253, %cst_107 [1] : vector<64x32xf32> to vector<64xf32>
    %255 = vector.shape_cast %254 : vector<64xf32> to vector<64x1xf32>
    %cst_108 = arith.constant 3.200000e+01 : f32
    %256 = vector.broadcast %cst_108 : f32 to vector<64x1xf32>
    %257 = arith.divf %255, %256 : vector<64x1xf32>
    %258 = vector.broadcast %257 : vector<64x1xf32> to vector<64x32xf32>
    %259 = arith.subf %253, %258 : vector<64x32xf32>
    %260 = arith.mulf %259, %259 : vector<64x32xf32>
    %cst_109 = arith.constant dense<0.000000e+00> : vector<64xf32>
    %261 = vector.multi_reduction <add>, %260, %cst_109 [1] : vector<64x32xf32> to vector<64xf32>
    %262 = vector.shape_cast %261 : vector<64xf32> to vector<64x1xf32>
    %cst_110 = arith.constant 3.200000e+01 : f32
    %263 = vector.broadcast %cst_110 : f32 to vector<64x1xf32>
    %264 = arith.divf %262, %263 : vector<64x1xf32>
    %265 = vector.broadcast %257 : vector<64x1xf32> to vector<64x32xf32>
    %266 = arith.subf %253, %265 : vector<64x32xf32>
    %cst_111 = arith.constant 9.99999974E-6 : f32
    %267 = vector.broadcast %cst_111 : f32 to vector<64x1xf32>
    %268 = arith.addf %264, %267 : vector<64x1xf32>
    %269 = math.rsqrt %268 : vector<64x1xf32>
    %270 = vector.broadcast %269 : vector<64x1xf32> to vector<64x32xf32>
    %271 = arith.mulf %266, %270 : vector<64x32xf32>
    %272 = vector.extract_strided_slice %250 {offsets = [1, 0], sizes = [1, 32], strides = [1, 1]} : vector<3x32xf32> to vector<1x32xf32>
    %273 = vector.broadcast %272 : vector<1x32xf32> to vector<64x32xf32>
    %274 = arith.mulf %271, %273 : vector<64x32xf32>
    %275 = vector.extract_strided_slice %250 {offsets = [2, 0], sizes = [1, 32], strides = [1, 1]} : vector<3x32xf32> to vector<1x32xf32>
    %276 = vector.broadcast %275 : vector<1x32xf32> to vector<64x32xf32>
    %277 = arith.addf %274, %276 : vector<64x32xf32>
    %cst_112 = arith.constant 0.000000e+00 : f32
    %278 = vector.broadcast %cst_112 : f32 to vector<64x32xf32>
    %279 = arith.maximumf %277, %278 : vector<64x32xf32>
    %c0_113 = arith.constant 0 : index
    %c96 = arith.constant 96 : index
    %280 = vector.load %arg11[%c0_113, %c96] : memref<132x128xf32, #tpu.memory_space<vmem>>, vector<64x32xf32>
    tpu.vector_store %arg11[%c0_113, %c96], %279 {strides = array<i32>} : memref<132x128xf32, #tpu.memory_space<vmem>>, vector<64x32xf32>,
    %281 = vector.extract_strided_slice %247 {offsets = [64, 0], sizes = [64, 32], strides = [1, 1]} : vector<128x32xf32> to vector<64x32xf32>
    %282 = vector.extract_strided_slice %36 {offsets = [0, 0, 0], sizes = [1, 3, 32], strides = [1, 1, 1]} : vector<5x3x32xf32> to vector<1x3x32xf32>
    %283 = vector.shape_cast %282 : vector<1x3x32xf32> to vector<3x32xf32>
    %284 = vector.extract_strided_slice %283 {offsets = [0, 0], sizes = [1, 32], strides = [1, 1]} : vector<3x32xf32> to vector<1x32xf32>
    %285 = vector.broadcast %284 : vector<1x32xf32> to vector<64x32xf32>
    %286 = arith.addf %281, %285 : vector<64x32xf32>
    %cst_114 = arith.constant dense<0.000000e+00> : vector<64xf32>
    %287 = vector.multi_reduction <add>, %286, %cst_114 [1] : vector<64x32xf32> to vector<64xf32>
    %288 = vector.shape_cast %287 : vector<64xf32> to vector<64x1xf32>
    %cst_115 = arith.constant 3.200000e+01 : f32
    %289 = vector.broadcast %cst_115 : f32 to vector<64x1xf32>
    %290 = arith.divf %288, %289 : vector<64x1xf32>
    %291 = vector.broadcast %290 : vector<64x1xf32> to vector<64x32xf32>
    %292 = arith.subf %286, %291 : vector<64x32xf32>
    %293 = arith.mulf %292, %292 : vector<64x32xf32>
    %cst_116 = arith.constant dense<0.000000e+00> : vector<64xf32>
    %294 = vector.multi_reduction <add>, %293, %cst_116 [1] : vector<64x32xf32> to vector<64xf32>
    %295 = vector.shape_cast %294 : vector<64xf32> to vector<64x1xf32>
    %cst_117 = arith.constant 3.200000e+01 : f32
    %296 = vector.broadcast %cst_117 : f32 to vector<64x1xf32>
    %297 = arith.divf %295, %296 : vector<64x1xf32>
    %298 = vector.broadcast %290 : vector<64x1xf32> to vector<64x32xf32>
    %299 = arith.subf %286, %298 : vector<64x32xf32>
    %cst_118 = arith.constant 9.99999974E-6 : f32
    %300 = vector.broadcast %cst_118 : f32 to vector<64x1xf32>
    %301 = arith.addf %297, %300 : vector<64x1xf32>
    %302 = math.rsqrt %301 : vector<64x1xf32>
    %303 = vector.broadcast %302 : vector<64x1xf32> to vector<64x32xf32>
    %304 = arith.mulf %299, %303 : vector<64x32xf32>
    %305 = vector.extract_strided_slice %283 {offsets = [1, 0], sizes = [1, 32], strides = [1, 1]} : vector<3x32xf32> to vector<1x32xf32>
    %306 = vector.broadcast %305 : vector<1x32xf32> to vector<64x32xf32>
    %307 = arith.mulf %304, %306 : vector<64x32xf32>
    %308 = vector.extract_strided_slice %283 {offsets = [2, 0], sizes = [1, 32], strides = [1, 1]} : vector<3x32xf32> to vector<1x32xf32>
    %309 = vector.broadcast %308 : vector<1x32xf32> to vector<64x32xf32>
    %310 = arith.addf %307, %309 : vector<64x32xf32>
    %cst_119 = arith.constant 0.000000e+00 : f32
    %311 = vector.broadcast %cst_119 : f32 to vector<64x32xf32>
    %312 = arith.maximumf %310, %311 : vector<64x32xf32>
    %c66_120 = arith.constant 66 : index
    %c96_121 = arith.constant 96 : index
    %313 = vector.load %arg11[%c66_120, %c96_121] : memref<132x128xf32, #tpu.memory_space<vmem>>, vector<64x32xf32>
    tpu.vector_store %arg11[%c66_120, %c96_121], %312 {strides = array<i32>} : memref<132x128xf32, #tpu.memory_space<vmem>>, vector<64x32xf32>,
    %c1_122 = arith.constant 1 : index
    %c0_123 = arith.constant 0 : index
    %314 = tpu.strided_load %arg11[%c1_122, %c0_123] {strides = array<i32: 2, 1>} : memref<132x128xf32, #tpu.memory_space<vmem>>, vector<65x128xf32>
    %315 = arith.truncf %314 : vector<65x128xf32> to vector<65x128xbf16>
    %c0_124 = arith.constant 0 : index
    %c0_125 = arith.constant 0 : index
    %c0_126 = arith.constant 0 : index
    %316 = vector.load %arg4[%c0_124, %c0_125, %c0_126] : memref<2x128x32xbf16, #tpu.memory_space<vmem>>, vector<1x128x32xbf16>
    %317 = vector.shape_cast %316 : vector<1x128x32xbf16> to vector<128x32xbf16>
    %cst_127 = arith.constant dense<0.000000e+00> : vector<65x32xf32>
    %318 = tpu.matmul %315, %317, %cst_127 {dimension_numbers = #tpu.dot_dimension_numbers<[1], [0], [0], [1], [0, 0, 1, 1], [], []>} : vector<65x128xbf16>, vector<128x32xbf16>, vector<65x32xf32> -> vector<65x32xf32>
    %c2_128 = arith.constant 2 : index
    %c0_129 = arith.constant 0 : index
    %319 = tpu.strided_load %arg11[%c2_128, %c0_129] {strides = array<i32: 2, 1>} : memref<132x128xf32, #tpu.memory_space<vmem>>, vector<65x128xf32>
    %320 = arith.truncf %319 : vector<65x128xf32> to vector<65x128xbf16>
    %c1_130 = arith.constant 1 : index
    %c0_131 = arith.constant 0 : index
    %c0_132 = arith.constant 0 : index
    %321 = vector.load %arg4[%c1_130, %c0_131, %c0_132] : memref<2x128x32xbf16, #tpu.memory_space<vmem>>, vector<1x128x32xbf16>
    %322 = vector.shape_cast %321 : vector<1x128x32xbf16> to vector<128x32xbf16>
    %cst_133 = arith.constant dense<0.000000e+00> : vector<65x32xf32>
    %323 = tpu.matmul %320, %322, %cst_133 {dimension_numbers = #tpu.dot_dimension_numbers<[1], [0], [0], [1], [0, 0, 1, 1], [], []>} : vector<65x128xbf16>, vector<128x32xbf16>, vector<65x32xf32> -> vector<65x32xf32>
    %324 = arith.addf %318, %323 : vector<65x32xf32>
    %325 = vector.extract_strided_slice %36 {offsets = [1, 0, 0], sizes = [1, 3, 32], strides = [1, 1, 1]} : vector<5x3x32xf32> to vector<1x3x32xf32>
    %326 = vector.shape_cast %325 : vector<1x3x32xf32> to vector<3x32xf32>
    %327 = vector.extract_strided_slice %324 {offsets = [0, 0], sizes = [32, 32], strides = [1, 1]} : vector<65x32xf32> to vector<32x32xf32>
    %328 = vector.extract_strided_slice %326 {offsets = [0, 0], sizes = [1, 32], strides = [1, 1]} : vector<3x32xf32> to vector<1x32xf32>
    %329 = vector.broadcast %328 : vector<1x32xf32> to vector<32x32xf32>
    %330 = arith.addf %327, %329 : vector<32x32xf32>
    %cst_134 = arith.constant dense<0.000000e+00> : vector<32xf32>
    %331 = vector.multi_reduction <add>, %330, %cst_134 [1] : vector<32x32xf32> to vector<32xf32>
    %332 = vector.shape_cast %331 : vector<32xf32> to vector<32x1xf32>
    %cst_135 = arith.constant 3.200000e+01 : f32
    %333 = vector.broadcast %cst_135 : f32 to vector<32x1xf32>
    %334 = arith.divf %332, %333 : vector<32x1xf32>
    %335 = vector.broadcast %334 : vector<32x1xf32> to vector<32x32xf32>
    %336 = arith.subf %330, %335 : vector<32x32xf32>
    %337 = arith.mulf %336, %336 : vector<32x32xf32>
    %cst_136 = arith.constant dense<0.000000e+00> : vector<32xf32>
    %338 = vector.multi_reduction <add>, %337, %cst_136 [1] : vector<32x32xf32> to vector<32xf32>
    %339 = vector.shape_cast %338 : vector<32xf32> to vector<32x1xf32>
    %cst_137 = arith.constant 3.200000e+01 : f32
    %340 = vector.broadcast %cst_137 : f32 to vector<32x1xf32>
    %341 = arith.divf %339, %340 : vector<32x1xf32>
    %342 = vector.broadcast %334 : vector<32x1xf32> to vector<32x32xf32>
    %343 = arith.subf %330, %342 : vector<32x32xf32>
    %cst_138 = arith.constant 9.99999974E-6 : f32
    %344 = vector.broadcast %cst_138 : f32 to vector<32x1xf32>
    %345 = arith.addf %341, %344 : vector<32x1xf32>
    %346 = math.rsqrt %345 : vector<32x1xf32>
    %347 = vector.broadcast %346 : vector<32x1xf32> to vector<32x32xf32>
    %348 = arith.mulf %343, %347 : vector<32x32xf32>
    %349 = vector.extract_strided_slice %326 {offsets = [1, 0], sizes = [1, 32], strides = [1, 1]} : vector<3x32xf32> to vector<1x32xf32>
    %350 = vector.broadcast %349 : vector<1x32xf32> to vector<32x32xf32>
    %351 = arith.mulf %348, %350 : vector<32x32xf32>
    %352 = vector.extract_strided_slice %326 {offsets = [2, 0], sizes = [1, 32], strides = [1, 1]} : vector<3x32xf32> to vector<1x32xf32>
    %353 = vector.broadcast %352 : vector<1x32xf32> to vector<32x32xf32>
    %354 = arith.addf %351, %353 : vector<32x32xf32>
    %cst_139 = arith.constant 0.000000e+00 : f32
    %355 = vector.broadcast %cst_139 : f32 to vector<32x32xf32>
    %356 = arith.maximumf %354, %355 : vector<32x32xf32>
    %c1_140 = arith.constant 1 : index
    %c0_141 = arith.constant 0 : index
    %357 = vector.load %arg12[%c1_140, %c0_141] : memref<68x64xf32, #tpu.memory_space<vmem>>, vector<32x32xf32>
    tpu.vector_store %arg12[%c1_140, %c0_141], %356 {strides = array<i32>} : memref<68x64xf32, #tpu.memory_space<vmem>>, vector<32x32xf32>,
    %358 = vector.extract_strided_slice %36 {offsets = [1, 0, 0], sizes = [1, 3, 32], strides = [1, 1, 1]} : vector<5x3x32xf32> to vector<1x3x32xf32>
    %359 = vector.shape_cast %358 : vector<1x3x32xf32> to vector<3x32xf32>
    %360 = vector.extract_strided_slice %324 {offsets = [33, 0], sizes = [32, 32], strides = [1, 1]} : vector<65x32xf32> to vector<32x32xf32>
    %361 = vector.extract_strided_slice %359 {offsets = [0, 0], sizes = [1, 32], strides = [1, 1]} : vector<3x32xf32> to vector<1x32xf32>
    %362 = vector.broadcast %361 : vector<1x32xf32> to vector<32x32xf32>
    %363 = arith.addf %360, %362 : vector<32x32xf32>
    %cst_142 = arith.constant dense<0.000000e+00> : vector<32xf32>
    %364 = vector.multi_reduction <add>, %363, %cst_142 [1] : vector<32x32xf32> to vector<32xf32>
    %365 = vector.shape_cast %364 : vector<32xf32> to vector<32x1xf32>
    %cst_143 = arith.constant 3.200000e+01 : f32
    %366 = vector.broadcast %cst_143 : f32 to vector<32x1xf32>
    %367 = arith.divf %365, %366 : vector<32x1xf32>
    %368 = vector.broadcast %367 : vector<32x1xf32> to vector<32x32xf32>
    %369 = arith.subf %363, %368 : vector<32x32xf32>
    %370 = arith.mulf %369, %369 : vector<32x32xf32>
    %cst_144 = arith.constant dense<0.000000e+00> : vector<32xf32>
    %371 = vector.multi_reduction <add>, %370, %cst_144 [1] : vector<32x32xf32> to vector<32xf32>
    %372 = vector.shape_cast %371 : vector<32xf32> to vector<32x1xf32>
    %cst_145 = arith.constant 3.200000e+01 : f32
    %373 = vector.broadcast %cst_145 : f32 to vector<32x1xf32>
    %374 = arith.divf %372, %373 : vector<32x1xf32>
    %375 = vector.broadcast %367 : vector<32x1xf32> to vector<32x32xf32>
    %376 = arith.subf %363, %375 : vector<32x32xf32>
    %cst_146 = arith.constant 9.99999974E-6 : f32
    %377 = vector.broadcast %cst_146 : f32 to vector<32x1xf32>
    %378 = arith.addf %374, %377 : vector<32x1xf32>
    %379 = math.rsqrt %378 : vector<32x1xf32>
    %380 = vector.broadcast %379 : vector<32x1xf32> to vector<32x32xf32>
    %381 = arith.mulf %376, %380 : vector<32x32xf32>
    %382 = vector.extract_strided_slice %359 {offsets = [1, 0], sizes = [1, 32], strides = [1, 1]} : vector<3x32xf32> to vector<1x32xf32>
    %383 = vector.broadcast %382 : vector<1x32xf32> to vector<32x32xf32>
    %384 = arith.mulf %381, %383 : vector<32x32xf32>
    %385 = vector.extract_strided_slice %359 {offsets = [2, 0], sizes = [1, 32], strides = [1, 1]} : vector<3x32xf32> to vector<1x32xf32>
    %386 = vector.broadcast %385 : vector<1x32xf32> to vector<32x32xf32>
    %387 = arith.addf %384, %386 : vector<32x32xf32>
    %cst_147 = arith.constant 0.000000e+00 : f32
    %388 = vector.broadcast %cst_147 : f32 to vector<32x32xf32>
    %389 = arith.maximumf %387, %388 : vector<32x32xf32>
    %c35 = arith.constant 35 : index
    %c0_148 = arith.constant 0 : index
    %390 = vector.load %arg12[%c35, %c0_148] : memref<68x64xf32, #tpu.memory_space<vmem>>, vector<32x32xf32>
    tpu.vector_store %arg12[%c35, %c0_148], %389 {strides = array<i32>} : memref<68x64xf32, #tpu.memory_space<vmem>>, vector<32x32xf32>,
    %c0_149 = arith.constant 0 : index
    %c0_150 = arith.constant 0 : index
    %391 = tpu.strided_load %arg11[%c0_149, %c0_150] {strides = array<i32: 2, 1>} : memref<132x128xf32, #tpu.memory_space<vmem>>, vector<65x128xf32>
    %392 = arith.truncf %391 : vector<65x128xf32> to vector<65x128xbf16>
    %c0_151 = arith.constant 0 : index
    %c0_152 = arith.constant 0 : index
    %c0_153 = arith.constant 0 : index
    %393 = vector.load %arg4[%c0_151, %c0_152, %c0_153] : memref<2x128x32xbf16, #tpu.memory_space<vmem>>, vector<1x128x32xbf16>
    %394 = vector.shape_cast %393 : vector<1x128x32xbf16> to vector<128x32xbf16>
    %cst_154 = arith.constant dense<0.000000e+00> : vector<65x32xf32>
    %395 = tpu.matmul %392, %394, %cst_154 {dimension_numbers = #tpu.dot_dimension_numbers<[1], [0], [0], [1], [0, 0, 1, 1], [], []>} : vector<65x128xbf16>, vector<128x32xbf16>, vector<65x32xf32> -> vector<65x32xf32>
    %c1_155 = arith.constant 1 : index
    %c0_156 = arith.constant 0 : index
    %396 = tpu.strided_load %arg11[%c1_155, %c0_156] {strides = array<i32: 2, 1>} : memref<132x128xf32, #tpu.memory_space<vmem>>, vector<65x128xf32>
    %397 = arith.truncf %396 : vector<65x128xf32> to vector<65x128xbf16>
    %c1_157 = arith.constant 1 : index
    %c0_158 = arith.constant 0 : index
    %c0_159 = arith.constant 0 : index
    %398 = vector.load %arg4[%c1_157, %c0_158, %c0_159] : memref<2x128x32xbf16, #tpu.memory_space<vmem>>, vector<1x128x32xbf16>
    %399 = vector.shape_cast %398 : vector<1x128x32xbf16> to vector<128x32xbf16>
    %cst_160 = arith.constant dense<0.000000e+00> : vector<65x32xf32>
    %400 = tpu.matmul %397, %399, %cst_160 {dimension_numbers = #tpu.dot_dimension_numbers<[1], [0], [0], [1], [0, 0, 1, 1], [], []>} : vector<65x128xbf16>, vector<128x32xbf16>, vector<65x32xf32> -> vector<65x32xf32>
    %401 = arith.addf %395, %400 : vector<65x32xf32>
    %402 = vector.extract_strided_slice %36 {offsets = [1, 0, 0], sizes = [1, 3, 32], strides = [1, 1, 1]} : vector<5x3x32xf32> to vector<1x3x32xf32>
    %403 = vector.shape_cast %402 : vector<1x3x32xf32> to vector<3x32xf32>
    %404 = vector.extract_strided_slice %401 {offsets = [0, 0], sizes = [32, 32], strides = [1, 1]} : vector<65x32xf32> to vector<32x32xf32>
    %405 = vector.extract_strided_slice %403 {offsets = [0, 0], sizes = [1, 32], strides = [1, 1]} : vector<3x32xf32> to vector<1x32xf32>
    %406 = vector.broadcast %405 : vector<1x32xf32> to vector<32x32xf32>
    %407 = arith.addf %404, %406 : vector<32x32xf32>
    %cst_161 = arith.constant dense<0.000000e+00> : vector<32xf32>
    %408 = vector.multi_reduction <add>, %407, %cst_161 [1] : vector<32x32xf32> to vector<32xf32>
    %409 = vector.shape_cast %408 : vector<32xf32> to vector<32x1xf32>
    %cst_162 = arith.constant 3.200000e+01 : f32
    %410 = vector.broadcast %cst_162 : f32 to vector<32x1xf32>
    %411 = arith.divf %409, %410 : vector<32x1xf32>
    %412 = vector.broadcast %411 : vector<32x1xf32> to vector<32x32xf32>
    %413 = arith.subf %407, %412 : vector<32x32xf32>
    %414 = arith.mulf %413, %413 : vector<32x32xf32>
    %cst_163 = arith.constant dense<0.000000e+00> : vector<32xf32>
    %415 = vector.multi_reduction <add>, %414, %cst_163 [1] : vector<32x32xf32> to vector<32xf32>
    %416 = vector.shape_cast %415 : vector<32xf32> to vector<32x1xf32>
    %cst_164 = arith.constant 3.200000e+01 : f32
    %417 = vector.broadcast %cst_164 : f32 to vector<32x1xf32>
    %418 = arith.divf %416, %417 : vector<32x1xf32>
    %419 = vector.broadcast %411 : vector<32x1xf32> to vector<32x32xf32>
    %420 = arith.subf %407, %419 : vector<32x32xf32>
    %cst_165 = arith.constant 9.99999974E-6 : f32
    %421 = vector.broadcast %cst_165 : f32 to vector<32x1xf32>
    %422 = arith.addf %418, %421 : vector<32x1xf32>
    %423 = math.rsqrt %422 : vector<32x1xf32>
    %424 = vector.broadcast %423 : vector<32x1xf32> to vector<32x32xf32>
    %425 = arith.mulf %420, %424 : vector<32x32xf32>
    %426 = vector.extract_strided_slice %403 {offsets = [1, 0], sizes = [1, 32], strides = [1, 1]} : vector<3x32xf32> to vector<1x32xf32>
    %427 = vector.broadcast %426 : vector<1x32xf32> to vector<32x32xf32>
    %428 = arith.mulf %425, %427 : vector<32x32xf32>
    %429 = vector.extract_strided_slice %403 {offsets = [2, 0], sizes = [1, 32], strides = [1, 1]} : vector<3x32xf32> to vector<1x32xf32>
    %430 = vector.broadcast %429 : vector<1x32xf32> to vector<32x32xf32>
    %431 = arith.addf %428, %430 : vector<32x32xf32>
    %cst_166 = arith.constant 0.000000e+00 : f32
    %432 = vector.broadcast %cst_166 : f32 to vector<32x32xf32>
    %433 = arith.maximumf %431, %432 : vector<32x32xf32>
    %c0_167 = arith.constant 0 : index
    %c32_168 = arith.constant 32 : index
    %434 = vector.load %arg12[%c0_167, %c32_168] : memref<68x64xf32, #tpu.memory_space<vmem>>, vector<32x32xf32>
    tpu.vector_store %arg12[%c0_167, %c32_168], %433 {strides = array<i32>} : memref<68x64xf32, #tpu.memory_space<vmem>>, vector<32x32xf32>,
    %435 = vector.extract_strided_slice %36 {offsets = [1, 0, 0], sizes = [1, 3, 32], strides = [1, 1, 1]} : vector<5x3x32xf32> to vector<1x3x32xf32>
    %436 = vector.shape_cast %435 : vector<1x3x32xf32> to vector<3x32xf32>
    %437 = vector.extract_strided_slice %401 {offsets = [33, 0], sizes = [32, 32], strides = [1, 1]} : vector<65x32xf32> to vector<32x32xf32>
    %438 = vector.extract_strided_slice %436 {offsets = [0, 0], sizes = [1, 32], strides = [1, 1]} : vector<3x32xf32> to vector<1x32xf32>
    %439 = vector.broadcast %438 : vector<1x32xf32> to vector<32x32xf32>
    %440 = arith.addf %437, %439 : vector<32x32xf32>
    %cst_169 = arith.constant dense<0.000000e+00> : vector<32xf32>
    %441 = vector.multi_reduction <add>, %440, %cst_169 [1] : vector<32x32xf32> to vector<32xf32>
    %442 = vector.shape_cast %441 : vector<32xf32> to vector<32x1xf32>
    %cst_170 = arith.constant 3.200000e+01 : f32
    %443 = vector.broadcast %cst_170 : f32 to vector<32x1xf32>
    %444 = arith.divf %442, %443 : vector<32x1xf32>
    %445 = vector.broadcast %444 : vector<32x1xf32> to vector<32x32xf32>
    %446 = arith.subf %440, %445 : vector<32x32xf32>
    %447 = arith.mulf %446, %446 : vector<32x32xf32>
    %cst_171 = arith.constant dense<0.000000e+00> : vector<32xf32>
    %448 = vector.multi_reduction <add>, %447, %cst_171 [1] : vector<32x32xf32> to vector<32xf32>
    %449 = vector.shape_cast %448 : vector<32xf32> to vector<32x1xf32>
    %cst_172 = arith.constant 3.200000e+01 : f32
    %450 = vector.broadcast %cst_172 : f32 to vector<32x1xf32>
    %451 = arith.divf %449, %450 : vector<32x1xf32>
    %452 = vector.broadcast %444 : vector<32x1xf32> to vector<32x32xf32>
    %453 = arith.subf %440, %452 : vector<32x32xf32>
    %cst_173 = arith.constant 9.99999974E-6 : f32
    %454 = vector.broadcast %cst_173 : f32 to vector<32x1xf32>
    %455 = arith.addf %451, %454 : vector<32x1xf32>
    %456 = math.rsqrt %455 : vector<32x1xf32>
    %457 = vector.broadcast %456 : vector<32x1xf32> to vector<32x32xf32>
    %458 = arith.mulf %453, %457 : vector<32x32xf32>
    %459 = vector.extract_strided_slice %436 {offsets = [1, 0], sizes = [1, 32], strides = [1, 1]} : vector<3x32xf32> to vector<1x32xf32>
    %460 = vector.broadcast %459 : vector<1x32xf32> to vector<32x32xf32>
    %461 = arith.mulf %458, %460 : vector<32x32xf32>
    %462 = vector.extract_strided_slice %436 {offsets = [2, 0], sizes = [1, 32], strides = [1, 1]} : vector<3x32xf32> to vector<1x32xf32>
    %463 = vector.broadcast %462 : vector<1x32xf32> to vector<32x32xf32>
    %464 = arith.addf %461, %463 : vector<32x32xf32>
    %cst_174 = arith.constant 0.000000e+00 : f32
    %465 = vector.broadcast %cst_174 : f32 to vector<32x32xf32>
    %466 = arith.maximumf %464, %465 : vector<32x32xf32>
    %c34_175 = arith.constant 34 : index
    %c32_176 = arith.constant 32 : index
    %467 = vector.load %arg12[%c34_175, %c32_176] : memref<68x64xf32, #tpu.memory_space<vmem>>, vector<32x32xf32>
    tpu.vector_store %arg12[%c34_175, %c32_176], %466 {strides = array<i32>} : memref<68x64xf32, #tpu.memory_space<vmem>>, vector<32x32xf32>,
    %c1_177 = arith.constant 1 : index
    %c0_178 = arith.constant 0 : index
    %468 = tpu.strided_load %arg12[%c1_177, %c0_178] {strides = array<i32: 2, 1>} : memref<68x64xf32, #tpu.memory_space<vmem>>, vector<33x64xf32>
    %469 = arith.truncf %468 : vector<33x64xf32> to vector<33x64xbf16>
    %c0_179 = arith.constant 0 : index
    %c0_180 = arith.constant 0 : index
    %c0_181 = arith.constant 0 : index
    %470 = vector.load %arg5[%c0_179, %c0_180, %c0_181] : memref<2x64x32xbf16, #tpu.memory_space<vmem>>, vector<1x64x32xbf16>
    %471 = vector.shape_cast %470 : vector<1x64x32xbf16> to vector<64x32xbf16>
    %cst_182 = arith.constant dense<0.000000e+00> : vector<33x32xf32>
    %472 = tpu.matmul %469, %471, %cst_182 {dimension_numbers = #tpu.dot_dimension_numbers<[1], [0], [0], [1], [0, 0, 1, 1], [], []>} : vector<33x64xbf16>, vector<64x32xbf16>, vector<33x32xf32> -> vector<33x32xf32>
    %c2_183 = arith.constant 2 : index
    %c0_184 = arith.constant 0 : index
    %473 = tpu.strided_load %arg12[%c2_183, %c0_184] {strides = array<i32: 2, 1>} : memref<68x64xf32, #tpu.memory_space<vmem>>, vector<33x64xf32>
    %474 = arith.truncf %473 : vector<33x64xf32> to vector<33x64xbf16>
    %c1_185 = arith.constant 1 : index
    %c0_186 = arith.constant 0 : index
    %c0_187 = arith.constant 0 : index
    %475 = vector.load %arg5[%c1_185, %c0_186, %c0_187] : memref<2x64x32xbf16, #tpu.memory_space<vmem>>, vector<1x64x32xbf16>
    %476 = vector.shape_cast %475 : vector<1x64x32xbf16> to vector<64x32xbf16>
    %cst_188 = arith.constant dense<0.000000e+00> : vector<33x32xf32>
    %477 = tpu.matmul %474, %476, %cst_188 {dimension_numbers = #tpu.dot_dimension_numbers<[1], [0], [0], [1], [0, 0, 1, 1], [], []>} : vector<33x64xbf16>, vector<64x32xbf16>, vector<33x32xf32> -> vector<33x32xf32>
    %478 = arith.addf %472, %477 : vector<33x32xf32>
    %479 = vector.extract_strided_slice %36 {offsets = [2, 0, 0], sizes = [1, 3, 32], strides = [1, 1, 1]} : vector<5x3x32xf32> to vector<1x3x32xf32>
    %480 = vector.shape_cast %479 : vector<1x3x32xf32> to vector<3x32xf32>
    %481 = vector.extract_strided_slice %478 {offsets = [0, 0], sizes = [16, 32], strides = [1, 1]} : vector<33x32xf32> to vector<16x32xf32>
    %482 = vector.extract_strided_slice %480 {offsets = [0, 0], sizes = [1, 32], strides = [1, 1]} : vector<3x32xf32> to vector<1x32xf32>
    %483 = vector.broadcast %482 : vector<1x32xf32> to vector<16x32xf32>
    %484 = arith.addf %481, %483 : vector<16x32xf32>
    %cst_189 = arith.constant dense<0.000000e+00> : vector<16xf32>
    %485 = vector.multi_reduction <add>, %484, %cst_189 [1] : vector<16x32xf32> to vector<16xf32>
    %486 = vector.shape_cast %485 : vector<16xf32> to vector<16x1xf32>
    %cst_190 = arith.constant 3.200000e+01 : f32
    %487 = vector.broadcast %cst_190 : f32 to vector<16x1xf32>
    %488 = arith.divf %486, %487 : vector<16x1xf32>
    %489 = vector.broadcast %488 : vector<16x1xf32> to vector<16x32xf32>
    %490 = arith.subf %484, %489 : vector<16x32xf32>
    %491 = arith.mulf %490, %490 : vector<16x32xf32>
    %cst_191 = arith.constant dense<0.000000e+00> : vector<16xf32>
    %492 = vector.multi_reduction <add>, %491, %cst_191 [1] : vector<16x32xf32> to vector<16xf32>
    %493 = vector.shape_cast %492 : vector<16xf32> to vector<16x1xf32>
    %cst_192 = arith.constant 3.200000e+01 : f32
    %494 = vector.broadcast %cst_192 : f32 to vector<16x1xf32>
    %495 = arith.divf %493, %494 : vector<16x1xf32>
    %496 = vector.broadcast %488 : vector<16x1xf32> to vector<16x32xf32>
    %497 = arith.subf %484, %496 : vector<16x32xf32>
    %cst_193 = arith.constant 9.99999974E-6 : f32
    %498 = vector.broadcast %cst_193 : f32 to vector<16x1xf32>
    %499 = arith.addf %495, %498 : vector<16x1xf32>
    %500 = math.rsqrt %499 : vector<16x1xf32>
    %501 = vector.broadcast %500 : vector<16x1xf32> to vector<16x32xf32>
    %502 = arith.mulf %497, %501 : vector<16x32xf32>
    %503 = vector.extract_strided_slice %480 {offsets = [1, 0], sizes = [1, 32], strides = [1, 1]} : vector<3x32xf32> to vector<1x32xf32>
    %504 = vector.broadcast %503 : vector<1x32xf32> to vector<16x32xf32>
    %505 = arith.mulf %502, %504 : vector<16x32xf32>
    %506 = vector.extract_strided_slice %480 {offsets = [2, 0], sizes = [1, 32], strides = [1, 1]} : vector<3x32xf32> to vector<1x32xf32>
    %507 = vector.broadcast %506 : vector<1x32xf32> to vector<16x32xf32>
    %508 = arith.addf %505, %507 : vector<16x32xf32>
    %cst_194 = arith.constant 0.000000e+00 : f32
    %509 = vector.broadcast %cst_194 : f32 to vector<16x32xf32>
    %510 = arith.maximumf %508, %509 : vector<16x32xf32>
    %c1_195 = arith.constant 1 : index
    %c0_196 = arith.constant 0 : index
    %511 = vector.load %arg13[%c1_195, %c0_196] : memref<36x64xf32, #tpu.memory_space<vmem>>, vector<16x32xf32>
    tpu.vector_store %arg13[%c1_195, %c0_196], %510 {strides = array<i32>} : memref<36x64xf32, #tpu.memory_space<vmem>>, vector<16x32xf32>,
    %512 = vector.extract_strided_slice %36 {offsets = [2, 0, 0], sizes = [1, 3, 32], strides = [1, 1, 1]} : vector<5x3x32xf32> to vector<1x3x32xf32>
    %513 = vector.shape_cast %512 : vector<1x3x32xf32> to vector<3x32xf32>
    %514 = vector.extract_strided_slice %478 {offsets = [17, 0], sizes = [16, 32], strides = [1, 1]} : vector<33x32xf32> to vector<16x32xf32>
    %515 = vector.extract_strided_slice %513 {offsets = [0, 0], sizes = [1, 32], strides = [1, 1]} : vector<3x32xf32> to vector<1x32xf32>
    %516 = vector.broadcast %515 : vector<1x32xf32> to vector<16x32xf32>
    %517 = arith.addf %514, %516 : vector<16x32xf32>
    %cst_197 = arith.constant dense<0.000000e+00> : vector<16xf32>
    %518 = vector.multi_reduction <add>, %517, %cst_197 [1] : vector<16x32xf32> to vector<16xf32>
    %519 = vector.shape_cast %518 : vector<16xf32> to vector<16x1xf32>
    %cst_198 = arith.constant 3.200000e+01 : f32
    %520 = vector.broadcast %cst_198 : f32 to vector<16x1xf32>
    %521 = arith.divf %519, %520 : vector<16x1xf32>
    %522 = vector.broadcast %521 : vector<16x1xf32> to vector<16x32xf32>
    %523 = arith.subf %517, %522 : vector<16x32xf32>
    %524 = arith.mulf %523, %523 : vector<16x32xf32>
    %cst_199 = arith.constant dense<0.000000e+00> : vector<16xf32>
    %525 = vector.multi_reduction <add>, %524, %cst_199 [1] : vector<16x32xf32> to vector<16xf32>
    %526 = vector.shape_cast %525 : vector<16xf32> to vector<16x1xf32>
    %cst_200 = arith.constant 3.200000e+01 : f32
    %527 = vector.broadcast %cst_200 : f32 to vector<16x1xf32>
    %528 = arith.divf %526, %527 : vector<16x1xf32>
    %529 = vector.broadcast %521 : vector<16x1xf32> to vector<16x32xf32>
    %530 = arith.subf %517, %529 : vector<16x32xf32>
    %cst_201 = arith.constant 9.99999974E-6 : f32
    %531 = vector.broadcast %cst_201 : f32 to vector<16x1xf32>
    %532 = arith.addf %528, %531 : vector<16x1xf32>
    %533 = math.rsqrt %532 : vector<16x1xf32>
    %534 = vector.broadcast %533 : vector<16x1xf32> to vector<16x32xf32>
    %535 = arith.mulf %530, %534 : vector<16x32xf32>
    %536 = vector.extract_strided_slice %513 {offsets = [1, 0], sizes = [1, 32], strides = [1, 1]} : vector<3x32xf32> to vector<1x32xf32>
    %537 = vector.broadcast %536 : vector<1x32xf32> to vector<16x32xf32>
    %538 = arith.mulf %535, %537 : vector<16x32xf32>
    %539 = vector.extract_strided_slice %513 {offsets = [2, 0], sizes = [1, 32], strides = [1, 1]} : vector<3x32xf32> to vector<1x32xf32>
    %540 = vector.broadcast %539 : vector<1x32xf32> to vector<16x32xf32>
    %541 = arith.addf %538, %540 : vector<16x32xf32>
    %cst_202 = arith.constant 0.000000e+00 : f32
    %542 = vector.broadcast %cst_202 : f32 to vector<16x32xf32>
    %543 = arith.maximumf %541, %542 : vector<16x32xf32>
    %c19 = arith.constant 19 : index
    %c0_203 = arith.constant 0 : index
    %544 = vector.load %arg13[%c19, %c0_203] : memref<36x64xf32, #tpu.memory_space<vmem>>, vector<16x32xf32>
    tpu.vector_store %arg13[%c19, %c0_203], %543 {strides = array<i32>} : memref<36x64xf32, #tpu.memory_space<vmem>>, vector<16x32xf32>,
    %c0_204 = arith.constant 0 : index
    %c0_205 = arith.constant 0 : index
    %545 = tpu.strided_load %arg12[%c0_204, %c0_205] {strides = array<i32: 2, 1>} : memref<68x64xf32, #tpu.memory_space<vmem>>, vector<33x64xf32>
    %546 = arith.truncf %545 : vector<33x64xf32> to vector<33x64xbf16>
    %c0_206 = arith.constant 0 : index
    %c0_207 = arith.constant 0 : index
    %c0_208 = arith.constant 0 : index
    %547 = vector.load %arg5[%c0_206, %c0_207, %c0_208] : memref<2x64x32xbf16, #tpu.memory_space<vmem>>, vector<1x64x32xbf16>
    %548 = vector.shape_cast %547 : vector<1x64x32xbf16> to vector<64x32xbf16>
    %cst_209 = arith.constant dense<0.000000e+00> : vector<33x32xf32>
    %549 = tpu.matmul %546, %548, %cst_209 {dimension_numbers = #tpu.dot_dimension_numbers<[1], [0], [0], [1], [0, 0, 1, 1], [], []>} : vector<33x64xbf16>, vector<64x32xbf16>, vector<33x32xf32> -> vector<33x32xf32>
    %c1_210 = arith.constant 1 : index
    %c0_211 = arith.constant 0 : index
    %550 = tpu.strided_load %arg12[%c1_210, %c0_211] {strides = array<i32: 2, 1>} : memref<68x64xf32, #tpu.memory_space<vmem>>, vector<33x64xf32>
    %551 = arith.truncf %550 : vector<33x64xf32> to vector<33x64xbf16>
    %c1_212 = arith.constant 1 : index
    %c0_213 = arith.constant 0 : index
    %c0_214 = arith.constant 0 : index
    %552 = vector.load %arg5[%c1_212, %c0_213, %c0_214] : memref<2x64x32xbf16, #tpu.memory_space<vmem>>, vector<1x64x32xbf16>
    %553 = vector.shape_cast %552 : vector<1x64x32xbf16> to vector<64x32xbf16>
    %cst_215 = arith.constant dense<0.000000e+00> : vector<33x32xf32>
    %554 = tpu.matmul %551, %553, %cst_215 {dimension_numbers = #tpu.dot_dimension_numbers<[1], [0], [0], [1], [0, 0, 1, 1], [], []>} : vector<33x64xbf16>, vector<64x32xbf16>, vector<33x32xf32> -> vector<33x32xf32>
    %555 = arith.addf %549, %554 : vector<33x32xf32>
    %556 = vector.extract_strided_slice %36 {offsets = [2, 0, 0], sizes = [1, 3, 32], strides = [1, 1, 1]} : vector<5x3x32xf32> to vector<1x3x32xf32>
    %557 = vector.shape_cast %556 : vector<1x3x32xf32> to vector<3x32xf32>
    %558 = vector.extract_strided_slice %555 {offsets = [0, 0], sizes = [16, 32], strides = [1, 1]} : vector<33x32xf32> to vector<16x32xf32>
    %559 = vector.extract_strided_slice %557 {offsets = [0, 0], sizes = [1, 32], strides = [1, 1]} : vector<3x32xf32> to vector<1x32xf32>
    %560 = vector.broadcast %559 : vector<1x32xf32> to vector<16x32xf32>
    %561 = arith.addf %558, %560 : vector<16x32xf32>
    %cst_216 = arith.constant dense<0.000000e+00> : vector<16xf32>
    %562 = vector.multi_reduction <add>, %561, %cst_216 [1] : vector<16x32xf32> to vector<16xf32>
    %563 = vector.shape_cast %562 : vector<16xf32> to vector<16x1xf32>
    %cst_217 = arith.constant 3.200000e+01 : f32
    %564 = vector.broadcast %cst_217 : f32 to vector<16x1xf32>
    %565 = arith.divf %563, %564 : vector<16x1xf32>
    %566 = vector.broadcast %565 : vector<16x1xf32> to vector<16x32xf32>
    %567 = arith.subf %561, %566 : vector<16x32xf32>
    %568 = arith.mulf %567, %567 : vector<16x32xf32>
    %cst_218 = arith.constant dense<0.000000e+00> : vector<16xf32>
    %569 = vector.multi_reduction <add>, %568, %cst_218 [1] : vector<16x32xf32> to vector<16xf32>
    %570 = vector.shape_cast %569 : vector<16xf32> to vector<16x1xf32>
    %cst_219 = arith.constant 3.200000e+01 : f32
    %571 = vector.broadcast %cst_219 : f32 to vector<16x1xf32>
    %572 = arith.divf %570, %571 : vector<16x1xf32>
    %573 = vector.broadcast %565 : vector<16x1xf32> to vector<16x32xf32>
    %574 = arith.subf %561, %573 : vector<16x32xf32>
    %cst_220 = arith.constant 9.99999974E-6 : f32
    %575 = vector.broadcast %cst_220 : f32 to vector<16x1xf32>
    %576 = arith.addf %572, %575 : vector<16x1xf32>
    %577 = math.rsqrt %576 : vector<16x1xf32>
    %578 = vector.broadcast %577 : vector<16x1xf32> to vector<16x32xf32>
    %579 = arith.mulf %574, %578 : vector<16x32xf32>
    %580 = vector.extract_strided_slice %557 {offsets = [1, 0], sizes = [1, 32], strides = [1, 1]} : vector<3x32xf32> to vector<1x32xf32>
    %581 = vector.broadcast %580 : vector<1x32xf32> to vector<16x32xf32>
    %582 = arith.mulf %579, %581 : vector<16x32xf32>
    %583 = vector.extract_strided_slice %557 {offsets = [2, 0], sizes = [1, 32], strides = [1, 1]} : vector<3x32xf32> to vector<1x32xf32>
    %584 = vector.broadcast %583 : vector<1x32xf32> to vector<16x32xf32>
    %585 = arith.addf %582, %584 : vector<16x32xf32>
    %cst_221 = arith.constant 0.000000e+00 : f32
    %586 = vector.broadcast %cst_221 : f32 to vector<16x32xf32>
    %587 = arith.maximumf %585, %586 : vector<16x32xf32>
    %c0_222 = arith.constant 0 : index
    %c32_223 = arith.constant 32 : index
    %588 = vector.load %arg13[%c0_222, %c32_223] : memref<36x64xf32, #tpu.memory_space<vmem>>, vector<16x32xf32>
    tpu.vector_store %arg13[%c0_222, %c32_223], %587 {strides = array<i32>} : memref<36x64xf32, #tpu.memory_space<vmem>>, vector<16x32xf32>,
    %589 = vector.extract_strided_slice %36 {offsets = [2, 0, 0], sizes = [1, 3, 32], strides = [1, 1, 1]} : vector<5x3x32xf32> to vector<1x3x32xf32>
    %590 = vector.shape_cast %589 : vector<1x3x32xf32> to vector<3x32xf32>
    %591 = vector.extract_strided_slice %555 {offsets = [17, 0], sizes = [16, 32], strides = [1, 1]} : vector<33x32xf32> to vector<16x32xf32>
    %592 = vector.extract_strided_slice %590 {offsets = [0, 0], sizes = [1, 32], strides = [1, 1]} : vector<3x32xf32> to vector<1x32xf32>
    %593 = vector.broadcast %592 : vector<1x32xf32> to vector<16x32xf32>
    %594 = arith.addf %591, %593 : vector<16x32xf32>
    %cst_224 = arith.constant dense<0.000000e+00> : vector<16xf32>
    %595 = vector.multi_reduction <add>, %594, %cst_224 [1] : vector<16x32xf32> to vector<16xf32>
    %596 = vector.shape_cast %595 : vector<16xf32> to vector<16x1xf32>
    %cst_225 = arith.constant 3.200000e+01 : f32
    %597 = vector.broadcast %cst_225 : f32 to vector<16x1xf32>
    %598 = arith.divf %596, %597 : vector<16x1xf32>
    %599 = vector.broadcast %598 : vector<16x1xf32> to vector<16x32xf32>
    %600 = arith.subf %594, %599 : vector<16x32xf32>
    %601 = arith.mulf %600, %600 : vector<16x32xf32>
    %cst_226 = arith.constant dense<0.000000e+00> : vector<16xf32>
    %602 = vector.multi_reduction <add>, %601, %cst_226 [1] : vector<16x32xf32> to vector<16xf32>
    %603 = vector.shape_cast %602 : vector<16xf32> to vector<16x1xf32>
    %cst_227 = arith.constant 3.200000e+01 : f32
    %604 = vector.broadcast %cst_227 : f32 to vector<16x1xf32>
    %605 = arith.divf %603, %604 : vector<16x1xf32>
    %606 = vector.broadcast %598 : vector<16x1xf32> to vector<16x32xf32>
    %607 = arith.subf %594, %606 : vector<16x32xf32>
    %cst_228 = arith.constant 9.99999974E-6 : f32
    %608 = vector.broadcast %cst_228 : f32 to vector<16x1xf32>
    %609 = arith.addf %605, %608 : vector<16x1xf32>
    %610 = math.rsqrt %609 : vector<16x1xf32>
    %611 = vector.broadcast %610 : vector<16x1xf32> to vector<16x32xf32>
    %612 = arith.mulf %607, %611 : vector<16x32xf32>
    %613 = vector.extract_strided_slice %590 {offsets = [1, 0], sizes = [1, 32], strides = [1, 1]} : vector<3x32xf32> to vector<1x32xf32>
    %614 = vector.broadcast %613 : vector<1x32xf32> to vector<16x32xf32>
    %615 = arith.mulf %612, %614 : vector<16x32xf32>
    %616 = vector.extract_strided_slice %590 {offsets = [2, 0], sizes = [1, 32], strides = [1, 1]} : vector<3x32xf32> to vector<1x32xf32>
    %617 = vector.broadcast %616 : vector<1x32xf32> to vector<16x32xf32>
    %618 = arith.addf %615, %617 : vector<16x32xf32>
    %cst_229 = arith.constant 0.000000e+00 : f32
    %619 = vector.broadcast %cst_229 : f32 to vector<16x32xf32>
    %620 = arith.maximumf %618, %619 : vector<16x32xf32>
    %c18_230 = arith.constant 18 : index
    %c32_231 = arith.constant 32 : index
    %621 = vector.load %arg13[%c18_230, %c32_231] : memref<36x64xf32, #tpu.memory_space<vmem>>, vector<16x32xf32>
    tpu.vector_store %arg13[%c18_230, %c32_231], %620 {strides = array<i32>} : memref<36x64xf32, #tpu.memory_space<vmem>>, vector<16x32xf32>,
    %c1_232 = arith.constant 1 : index
    %c0_233 = arith.constant 0 : index
    %622 = tpu.strided_load %arg13[%c1_232, %c0_233] {strides = array<i32: 2, 1>} : memref<36x64xf32, #tpu.memory_space<vmem>>, vector<17x64xf32>
    %623 = arith.truncf %622 : vector<17x64xf32> to vector<17x64xbf16>
    %c0_234 = arith.constant 0 : index
    %c0_235 = arith.constant 0 : index
    %c0_236 = arith.constant 0 : index
    %624 = vector.load %arg6[%c0_234, %c0_235, %c0_236] : memref<2x64x32xbf16, #tpu.memory_space<vmem>>, vector<1x64x32xbf16>
    %625 = vector.shape_cast %624 : vector<1x64x32xbf16> to vector<64x32xbf16>
    %cst_237 = arith.constant dense<0.000000e+00> : vector<17x32xf32>
    %626 = tpu.matmul %623, %625, %cst_237 {dimension_numbers = #tpu.dot_dimension_numbers<[1], [0], [0], [1], [0, 0, 1, 1], [], []>} : vector<17x64xbf16>, vector<64x32xbf16>, vector<17x32xf32> -> vector<17x32xf32>
    %c2_238 = arith.constant 2 : index
    %c0_239 = arith.constant 0 : index
    %627 = tpu.strided_load %arg13[%c2_238, %c0_239] {strides = array<i32: 2, 1>} : memref<36x64xf32, #tpu.memory_space<vmem>>, vector<17x64xf32>
    %628 = arith.truncf %627 : vector<17x64xf32> to vector<17x64xbf16>
    %c1_240 = arith.constant 1 : index
    %c0_241 = arith.constant 0 : index
    %c0_242 = arith.constant 0 : index
    %629 = vector.load %arg6[%c1_240, %c0_241, %c0_242] : memref<2x64x32xbf16, #tpu.memory_space<vmem>>, vector<1x64x32xbf16>
    %630 = vector.shape_cast %629 : vector<1x64x32xbf16> to vector<64x32xbf16>
    %cst_243 = arith.constant dense<0.000000e+00> : vector<17x32xf32>
    %631 = tpu.matmul %628, %630, %cst_243 {dimension_numbers = #tpu.dot_dimension_numbers<[1], [0], [0], [1], [0, 0, 1, 1], [], []>} : vector<17x64xbf16>, vector<64x32xbf16>, vector<17x32xf32> -> vector<17x32xf32>
    %632 = arith.addf %626, %631 : vector<17x32xf32>
    %633 = vector.extract_strided_slice %36 {offsets = [3, 0, 0], sizes = [1, 3, 32], strides = [1, 1, 1]} : vector<5x3x32xf32> to vector<1x3x32xf32>
    %634 = vector.shape_cast %633 : vector<1x3x32xf32> to vector<3x32xf32>
    %635 = vector.extract_strided_slice %632 {offsets = [0, 0], sizes = [8, 32], strides = [1, 1]} : vector<17x32xf32> to vector<8x32xf32>
    %636 = vector.extract_strided_slice %634 {offsets = [0, 0], sizes = [1, 32], strides = [1, 1]} : vector<3x32xf32> to vector<1x32xf32>
    %637 = vector.broadcast %636 : vector<1x32xf32> to vector<8x32xf32>
    %638 = arith.addf %635, %637 : vector<8x32xf32>
    %cst_244 = arith.constant dense<0.000000e+00> : vector<8xf32>
    %639 = vector.multi_reduction <add>, %638, %cst_244 [1] : vector<8x32xf32> to vector<8xf32>
    %640 = vector.shape_cast %639 : vector<8xf32> to vector<8x1xf32>
    %cst_245 = arith.constant 3.200000e+01 : f32
    %641 = vector.broadcast %cst_245 : f32 to vector<8x1xf32>
    %642 = arith.divf %640, %641 : vector<8x1xf32>
    %643 = vector.broadcast %642 : vector<8x1xf32> to vector<8x32xf32>
    %644 = arith.subf %638, %643 : vector<8x32xf32>
    %645 = arith.mulf %644, %644 : vector<8x32xf32>
    %cst_246 = arith.constant dense<0.000000e+00> : vector<8xf32>
    %646 = vector.multi_reduction <add>, %645, %cst_246 [1] : vector<8x32xf32> to vector<8xf32>
    %647 = vector.shape_cast %646 : vector<8xf32> to vector<8x1xf32>
    %cst_247 = arith.constant 3.200000e+01 : f32
    %648 = vector.broadcast %cst_247 : f32 to vector<8x1xf32>
    %649 = arith.divf %647, %648 : vector<8x1xf32>
    %650 = vector.broadcast %642 : vector<8x1xf32> to vector<8x32xf32>
    %651 = arith.subf %638, %650 : vector<8x32xf32>
    %cst_248 = arith.constant 9.99999974E-6 : f32
    %652 = vector.broadcast %cst_248 : f32 to vector<8x1xf32>
    %653 = arith.addf %649, %652 : vector<8x1xf32>
    %654 = math.rsqrt %653 : vector<8x1xf32>
    %655 = vector.broadcast %654 : vector<8x1xf32> to vector<8x32xf32>
    %656 = arith.mulf %651, %655 : vector<8x32xf32>
    %657 = vector.extract_strided_slice %634 {offsets = [1, 0], sizes = [1, 32], strides = [1, 1]} : vector<3x32xf32> to vector<1x32xf32>
    %658 = vector.broadcast %657 : vector<1x32xf32> to vector<8x32xf32>
    %659 = arith.mulf %656, %658 : vector<8x32xf32>
    %660 = vector.extract_strided_slice %634 {offsets = [2, 0], sizes = [1, 32], strides = [1, 1]} : vector<3x32xf32> to vector<1x32xf32>
    %661 = vector.broadcast %660 : vector<1x32xf32> to vector<8x32xf32>
    %662 = arith.addf %659, %661 : vector<8x32xf32>
    %cst_249 = arith.constant 0.000000e+00 : f32
    %663 = vector.broadcast %cst_249 : f32 to vector<8x32xf32>
    %664 = arith.maximumf %662, %663 : vector<8x32xf32>
    %c1_250 = arith.constant 1 : index
    %c0_251 = arith.constant 0 : index
    %665 = vector.load %arg14[%c1_250, %c0_251] : memref<20x64xf32, #tpu.memory_space<vmem>>, vector<8x32xf32>
    tpu.vector_store %arg14[%c1_250, %c0_251], %664 {strides = array<i32>} : memref<20x64xf32, #tpu.memory_space<vmem>>, vector<8x32xf32>,
    %666 = vector.extract_strided_slice %36 {offsets = [3, 0, 0], sizes = [1, 3, 32], strides = [1, 1, 1]} : vector<5x3x32xf32> to vector<1x3x32xf32>
    %667 = vector.shape_cast %666 : vector<1x3x32xf32> to vector<3x32xf32>
    %668 = vector.extract_strided_slice %632 {offsets = [9, 0], sizes = [8, 32], strides = [1, 1]} : vector<17x32xf32> to vector<8x32xf32>
    %669 = vector.extract_strided_slice %667 {offsets = [0, 0], sizes = [1, 32], strides = [1, 1]} : vector<3x32xf32> to vector<1x32xf32>
    %670 = vector.broadcast %669 : vector<1x32xf32> to vector<8x32xf32>
    %671 = arith.addf %668, %670 : vector<8x32xf32>
    %cst_252 = arith.constant dense<0.000000e+00> : vector<8xf32>
    %672 = vector.multi_reduction <add>, %671, %cst_252 [1] : vector<8x32xf32> to vector<8xf32>
    %673 = vector.shape_cast %672 : vector<8xf32> to vector<8x1xf32>
    %cst_253 = arith.constant 3.200000e+01 : f32
    %674 = vector.broadcast %cst_253 : f32 to vector<8x1xf32>
    %675 = arith.divf %673, %674 : vector<8x1xf32>
    %676 = vector.broadcast %675 : vector<8x1xf32> to vector<8x32xf32>
    %677 = arith.subf %671, %676 : vector<8x32xf32>
    %678 = arith.mulf %677, %677 : vector<8x32xf32>
    %cst_254 = arith.constant dense<0.000000e+00> : vector<8xf32>
    %679 = vector.multi_reduction <add>, %678, %cst_254 [1] : vector<8x32xf32> to vector<8xf32>
    %680 = vector.shape_cast %679 : vector<8xf32> to vector<8x1xf32>
    %cst_255 = arith.constant 3.200000e+01 : f32
    %681 = vector.broadcast %cst_255 : f32 to vector<8x1xf32>
    %682 = arith.divf %680, %681 : vector<8x1xf32>
    %683 = vector.broadcast %675 : vector<8x1xf32> to vector<8x32xf32>
    %684 = arith.subf %671, %683 : vector<8x32xf32>
    %cst_256 = arith.constant 9.99999974E-6 : f32
    %685 = vector.broadcast %cst_256 : f32 to vector<8x1xf32>
    %686 = arith.addf %682, %685 : vector<8x1xf32>
    %687 = math.rsqrt %686 : vector<8x1xf32>
    %688 = vector.broadcast %687 : vector<8x1xf32> to vector<8x32xf32>
    %689 = arith.mulf %684, %688 : vector<8x32xf32>
    %690 = vector.extract_strided_slice %667 {offsets = [1, 0], sizes = [1, 32], strides = [1, 1]} : vector<3x32xf32> to vector<1x32xf32>
    %691 = vector.broadcast %690 : vector<1x32xf32> to vector<8x32xf32>
    %692 = arith.mulf %689, %691 : vector<8x32xf32>
    %693 = vector.extract_strided_slice %667 {offsets = [2, 0], sizes = [1, 32], strides = [1, 1]} : vector<3x32xf32> to vector<1x32xf32>
    %694 = vector.broadcast %693 : vector<1x32xf32> to vector<8x32xf32>
    %695 = arith.addf %692, %694 : vector<8x32xf32>
    %cst_257 = arith.constant 0.000000e+00 : f32
    %696 = vector.broadcast %cst_257 : f32 to vector<8x32xf32>
    %697 = arith.maximumf %695, %696 : vector<8x32xf32>
    %c11 = arith.constant 11 : index
    %c0_258 = arith.constant 0 : index
    %698 = vector.load %arg14[%c11, %c0_258] : memref<20x64xf32, #tpu.memory_space<vmem>>, vector<8x32xf32>
    tpu.vector_store %arg14[%c11, %c0_258], %697 {strides = array<i32>} : memref<20x64xf32, #tpu.memory_space<vmem>>, vector<8x32xf32>,
    %c0_259 = arith.constant 0 : index
    %c0_260 = arith.constant 0 : index
    %699 = tpu.strided_load %arg13[%c0_259, %c0_260] {strides = array<i32: 2, 1>} : memref<36x64xf32, #tpu.memory_space<vmem>>, vector<17x64xf32>
    %700 = arith.truncf %699 : vector<17x64xf32> to vector<17x64xbf16>
    %c0_261 = arith.constant 0 : index
    %c0_262 = arith.constant 0 : index
    %c0_263 = arith.constant 0 : index
    %701 = vector.load %arg6[%c0_261, %c0_262, %c0_263] : memref<2x64x32xbf16, #tpu.memory_space<vmem>>, vector<1x64x32xbf16>
    %702 = vector.shape_cast %701 : vector<1x64x32xbf16> to vector<64x32xbf16>
    %cst_264 = arith.constant dense<0.000000e+00> : vector<17x32xf32>
    %703 = tpu.matmul %700, %702, %cst_264 {dimension_numbers = #tpu.dot_dimension_numbers<[1], [0], [0], [1], [0, 0, 1, 1], [], []>} : vector<17x64xbf16>, vector<64x32xbf16>, vector<17x32xf32> -> vector<17x32xf32>
    %c1_265 = arith.constant 1 : index
    %c0_266 = arith.constant 0 : index
    %704 = tpu.strided_load %arg13[%c1_265, %c0_266] {strides = array<i32: 2, 1>} : memref<36x64xf32, #tpu.memory_space<vmem>>, vector<17x64xf32>
    %705 = arith.truncf %704 : vector<17x64xf32> to vector<17x64xbf16>
    %c1_267 = arith.constant 1 : index
    %c0_268 = arith.constant 0 : index
    %c0_269 = arith.constant 0 : index
    %706 = vector.load %arg6[%c1_267, %c0_268, %c0_269] : memref<2x64x32xbf16, #tpu.memory_space<vmem>>, vector<1x64x32xbf16>
    %707 = vector.shape_cast %706 : vector<1x64x32xbf16> to vector<64x32xbf16>
    %cst_270 = arith.constant dense<0.000000e+00> : vector<17x32xf32>
    %708 = tpu.matmul %705, %707, %cst_270 {dimension_numbers = #tpu.dot_dimension_numbers<[1], [0], [0], [1], [0, 0, 1, 1], [], []>} : vector<17x64xbf16>, vector<64x32xbf16>, vector<17x32xf32> -> vector<17x32xf32>
    %709 = arith.addf %703, %708 : vector<17x32xf32>
    %710 = vector.extract_strided_slice %36 {offsets = [3, 0, 0], sizes = [1, 3, 32], strides = [1, 1, 1]} : vector<5x3x32xf32> to vector<1x3x32xf32>
    %711 = vector.shape_cast %710 : vector<1x3x32xf32> to vector<3x32xf32>
    %712 = vector.extract_strided_slice %709 {offsets = [0, 0], sizes = [8, 32], strides = [1, 1]} : vector<17x32xf32> to vector<8x32xf32>
    %713 = vector.extract_strided_slice %711 {offsets = [0, 0], sizes = [1, 32], strides = [1, 1]} : vector<3x32xf32> to vector<1x32xf32>
    %714 = vector.broadcast %713 : vector<1x32xf32> to vector<8x32xf32>
    %715 = arith.addf %712, %714 : vector<8x32xf32>
    %cst_271 = arith.constant dense<0.000000e+00> : vector<8xf32>
    %716 = vector.multi_reduction <add>, %715, %cst_271 [1] : vector<8x32xf32> to vector<8xf32>
    %717 = vector.shape_cast %716 : vector<8xf32> to vector<8x1xf32>
    %cst_272 = arith.constant 3.200000e+01 : f32
    %718 = vector.broadcast %cst_272 : f32 to vector<8x1xf32>
    %719 = arith.divf %717, %718 : vector<8x1xf32>
    %720 = vector.broadcast %719 : vector<8x1xf32> to vector<8x32xf32>
    %721 = arith.subf %715, %720 : vector<8x32xf32>
    %722 = arith.mulf %721, %721 : vector<8x32xf32>
    %cst_273 = arith.constant dense<0.000000e+00> : vector<8xf32>
    %723 = vector.multi_reduction <add>, %722, %cst_273 [1] : vector<8x32xf32> to vector<8xf32>
    %724 = vector.shape_cast %723 : vector<8xf32> to vector<8x1xf32>
    %cst_274 = arith.constant 3.200000e+01 : f32
    %725 = vector.broadcast %cst_274 : f32 to vector<8x1xf32>
    %726 = arith.divf %724, %725 : vector<8x1xf32>
    %727 = vector.broadcast %719 : vector<8x1xf32> to vector<8x32xf32>
    %728 = arith.subf %715, %727 : vector<8x32xf32>
    %cst_275 = arith.constant 9.99999974E-6 : f32
    %729 = vector.broadcast %cst_275 : f32 to vector<8x1xf32>
    %730 = arith.addf %726, %729 : vector<8x1xf32>
    %731 = math.rsqrt %730 : vector<8x1xf32>
    %732 = vector.broadcast %731 : vector<8x1xf32> to vector<8x32xf32>
    %733 = arith.mulf %728, %732 : vector<8x32xf32>
    %734 = vector.extract_strided_slice %711 {offsets = [1, 0], sizes = [1, 32], strides = [1, 1]} : vector<3x32xf32> to vector<1x32xf32>
    %735 = vector.broadcast %734 : vector<1x32xf32> to vector<8x32xf32>
    %736 = arith.mulf %733, %735 : vector<8x32xf32>
    %737 = vector.extract_strided_slice %711 {offsets = [2, 0], sizes = [1, 32], strides = [1, 1]} : vector<3x32xf32> to vector<1x32xf32>
    %738 = vector.broadcast %737 : vector<1x32xf32> to vector<8x32xf32>
    %739 = arith.addf %736, %738 : vector<8x32xf32>
    %cst_276 = arith.constant 0.000000e+00 : f32
    %740 = vector.broadcast %cst_276 : f32 to vector<8x32xf32>
    %741 = arith.maximumf %739, %740 : vector<8x32xf32>
    %c0_277 = arith.constant 0 : index
    %c32_278 = arith.constant 32 : index
    %742 = vector.load %arg14[%c0_277, %c32_278] : memref<20x64xf32, #tpu.memory_space<vmem>>, vector<8x32xf32>
    tpu.vector_store %arg14[%c0_277, %c32_278], %741 {strides = array<i32>} : memref<20x64xf32, #tpu.memory_space<vmem>>, vector<8x32xf32>,
    %743 = vector.extract_strided_slice %36 {offsets = [3, 0, 0], sizes = [1, 3, 32], strides = [1, 1, 1]} : vector<5x3x32xf32> to vector<1x3x32xf32>
    %744 = vector.shape_cast %743 : vector<1x3x32xf32> to vector<3x32xf32>
    %745 = vector.extract_strided_slice %709 {offsets = [9, 0], sizes = [8, 32], strides = [1, 1]} : vector<17x32xf32> to vector<8x32xf32>
    %746 = vector.extract_strided_slice %744 {offsets = [0, 0], sizes = [1, 32], strides = [1, 1]} : vector<3x32xf32> to vector<1x32xf32>
    %747 = vector.broadcast %746 : vector<1x32xf32> to vector<8x32xf32>
    %748 = arith.addf %745, %747 : vector<8x32xf32>
    %cst_279 = arith.constant dense<0.000000e+00> : vector<8xf32>
    %749 = vector.multi_reduction <add>, %748, %cst_279 [1] : vector<8x32xf32> to vector<8xf32>
    %750 = vector.shape_cast %749 : vector<8xf32> to vector<8x1xf32>
    %cst_280 = arith.constant 3.200000e+01 : f32
    %751 = vector.broadcast %cst_280 : f32 to vector<8x1xf32>
    %752 = arith.divf %750, %751 : vector<8x1xf32>
    %753 = vector.broadcast %752 : vector<8x1xf32> to vector<8x32xf32>
    %754 = arith.subf %748, %753 : vector<8x32xf32>
    %755 = arith.mulf %754, %754 : vector<8x32xf32>
    %cst_281 = arith.constant dense<0.000000e+00> : vector<8xf32>
    %756 = vector.multi_reduction <add>, %755, %cst_281 [1] : vector<8x32xf32> to vector<8xf32>
    %757 = vector.shape_cast %756 : vector<8xf32> to vector<8x1xf32>
    %cst_282 = arith.constant 3.200000e+01 : f32
    %758 = vector.broadcast %cst_282 : f32 to vector<8x1xf32>
    %759 = arith.divf %757, %758 : vector<8x1xf32>
    %760 = vector.broadcast %752 : vector<8x1xf32> to vector<8x32xf32>
    %761 = arith.subf %748, %760 : vector<8x32xf32>
    %cst_283 = arith.constant 9.99999974E-6 : f32
    %762 = vector.broadcast %cst_283 : f32 to vector<8x1xf32>
    %763 = arith.addf %759, %762 : vector<8x1xf32>
    %764 = math.rsqrt %763 : vector<8x1xf32>
    %765 = vector.broadcast %764 : vector<8x1xf32> to vector<8x32xf32>
    %766 = arith.mulf %761, %765 : vector<8x32xf32>
    %767 = vector.extract_strided_slice %744 {offsets = [1, 0], sizes = [1, 32], strides = [1, 1]} : vector<3x32xf32> to vector<1x32xf32>
    %768 = vector.broadcast %767 : vector<1x32xf32> to vector<8x32xf32>
    %769 = arith.mulf %766, %768 : vector<8x32xf32>
    %770 = vector.extract_strided_slice %744 {offsets = [2, 0], sizes = [1, 32], strides = [1, 1]} : vector<3x32xf32> to vector<1x32xf32>
    %771 = vector.broadcast %770 : vector<1x32xf32> to vector<8x32xf32>
    %772 = arith.addf %769, %771 : vector<8x32xf32>
    %cst_284 = arith.constant 0.000000e+00 : f32
    %773 = vector.broadcast %cst_284 : f32 to vector<8x32xf32>
    %774 = arith.maximumf %772, %773 : vector<8x32xf32>
    %c10_285 = arith.constant 10 : index
    %c32_286 = arith.constant 32 : index
    %775 = vector.load %arg14[%c10_285, %c32_286] : memref<20x64xf32, #tpu.memory_space<vmem>>, vector<8x32xf32>
    tpu.vector_store %arg14[%c10_285, %c32_286], %774 {strides = array<i32>} : memref<20x64xf32, #tpu.memory_space<vmem>>, vector<8x32xf32>,
    %c0_287 = arith.constant 0 : index
    %c0_288 = arith.constant 0 : index
    %776 = tpu.strided_load %arg14[%c0_287, %c0_288] {strides = array<i32: 2, 1>} : memref<20x64xf32, #tpu.memory_space<vmem>>, vector<9x64xf32>
    %777 = arith.truncf %776 : vector<9x64xf32> to vector<9x64xbf16>
    %c0_289 = arith.constant 0 : index
    %c0_290 = arith.constant 0 : index
    %c0_291 = arith.constant 0 : index
    %778 = vector.load %arg7[%c0_289, %c0_290, %c0_291] : memref<2x64x32xbf16, #tpu.memory_space<vmem>>, vector<1x64x32xbf16>
    %779 = vector.shape_cast %778 : vector<1x64x32xbf16> to vector<64x32xbf16>
    %cst_292 = arith.constant dense<0.000000e+00> : vector<9x32xf32>
    %780 = tpu.matmul %777, %779, %cst_292 {dimension_numbers = #tpu.dot_dimension_numbers<[1], [0], [0], [1], [0, 0, 1, 1], [], []>} : vector<9x64xbf16>, vector<64x32xbf16>, vector<9x32xf32> -> vector<9x32xf32>
    %c1_293 = arith.constant 1 : index
    %c0_294 = arith.constant 0 : index
    %781 = tpu.strided_load %arg14[%c1_293, %c0_294] {strides = array<i32: 2, 1>} : memref<20x64xf32, #tpu.memory_space<vmem>>, vector<9x64xf32>
    %782 = arith.truncf %781 : vector<9x64xf32> to vector<9x64xbf16>
    %c1_295 = arith.constant 1 : index
    %c0_296 = arith.constant 0 : index
    %c0_297 = arith.constant 0 : index
    %783 = vector.load %arg7[%c1_295, %c0_296, %c0_297] : memref<2x64x32xbf16, #tpu.memory_space<vmem>>, vector<1x64x32xbf16>
    %784 = vector.shape_cast %783 : vector<1x64x32xbf16> to vector<64x32xbf16>
    %cst_298 = arith.constant dense<0.000000e+00> : vector<9x32xf32>
    %785 = tpu.matmul %782, %784, %cst_298 {dimension_numbers = #tpu.dot_dimension_numbers<[1], [0], [0], [1], [0, 0, 1, 1], [], []>} : vector<9x64xbf16>, vector<64x32xbf16>, vector<9x32xf32> -> vector<9x32xf32>
    %786 = arith.addf %780, %785 : vector<9x32xf32>
    %787 = vector.extract_strided_slice %36 {offsets = [4, 0, 0], sizes = [1, 3, 32], strides = [1, 1, 1]} : vector<5x3x32xf32> to vector<1x3x32xf32>
    %788 = vector.shape_cast %787 : vector<1x3x32xf32> to vector<3x32xf32>
    %789 = vector.extract_strided_slice %786 {offsets = [0, 0], sizes = [4, 32], strides = [1, 1]} : vector<9x32xf32> to vector<4x32xf32>
    %790 = vector.extract_strided_slice %788 {offsets = [0, 0], sizes = [1, 32], strides = [1, 1]} : vector<3x32xf32> to vector<1x32xf32>
    %791 = vector.broadcast %790 : vector<1x32xf32> to vector<4x32xf32>
    %792 = arith.addf %789, %791 : vector<4x32xf32>
    %cst_299 = arith.constant dense<0.000000e+00> : vector<4xf32>
    %793 = vector.multi_reduction <add>, %792, %cst_299 [1] : vector<4x32xf32> to vector<4xf32>
    %794 = vector.shape_cast %793 : vector<4xf32> to vector<4x1xf32>
    %cst_300 = arith.constant 3.200000e+01 : f32
    %795 = vector.broadcast %cst_300 : f32 to vector<4x1xf32>
    %796 = arith.divf %794, %795 : vector<4x1xf32>
    %797 = vector.broadcast %796 : vector<4x1xf32> to vector<4x32xf32>
    %798 = arith.subf %792, %797 : vector<4x32xf32>
    %799 = arith.mulf %798, %798 : vector<4x32xf32>
    %cst_301 = arith.constant dense<0.000000e+00> : vector<4xf32>
    %800 = vector.multi_reduction <add>, %799, %cst_301 [1] : vector<4x32xf32> to vector<4xf32>
    %801 = vector.shape_cast %800 : vector<4xf32> to vector<4x1xf32>
    %cst_302 = arith.constant 3.200000e+01 : f32
    %802 = vector.broadcast %cst_302 : f32 to vector<4x1xf32>
    %803 = arith.divf %801, %802 : vector<4x1xf32>
    %804 = vector.broadcast %796 : vector<4x1xf32> to vector<4x32xf32>
    %805 = arith.subf %792, %804 : vector<4x32xf32>
    %cst_303 = arith.constant 9.99999974E-6 : f32
    %806 = vector.broadcast %cst_303 : f32 to vector<4x1xf32>
    %807 = arith.addf %803, %806 : vector<4x1xf32>
    %808 = math.rsqrt %807 : vector<4x1xf32>
    %809 = vector.broadcast %808 : vector<4x1xf32> to vector<4x32xf32>
    %810 = arith.mulf %805, %809 : vector<4x32xf32>
    %811 = vector.extract_strided_slice %788 {offsets = [1, 0], sizes = [1, 32], strides = [1, 1]} : vector<3x32xf32> to vector<1x32xf32>
    %812 = vector.broadcast %811 : vector<1x32xf32> to vector<4x32xf32>
    %813 = arith.mulf %810, %812 : vector<4x32xf32>
    %814 = vector.extract_strided_slice %788 {offsets = [2, 0], sizes = [1, 32], strides = [1, 1]} : vector<3x32xf32> to vector<1x32xf32>
    %815 = vector.broadcast %814 : vector<1x32xf32> to vector<4x32xf32>
    %816 = arith.addf %813, %815 : vector<4x32xf32>
    %cst_304 = arith.constant 0.000000e+00 : f32
    %817 = vector.broadcast %cst_304 : f32 to vector<4x32xf32>
    %818 = arith.maximumf %816, %817 : vector<4x32xf32>
    %c1_305 = arith.constant 1 : index
    %c0_306 = arith.constant 0 : index
    %819 = vector.load %arg15[%c1_305, %c0_306] : memref<10x64xf32, #tpu.memory_space<vmem>>, vector<4x32xf32>
    tpu.vector_store %arg15[%c1_305, %c0_306], %818 {strides = array<i32>} : memref<10x64xf32, #tpu.memory_space<vmem>>, vector<4x32xf32>,
    %820 = vector.extract_strided_slice %36 {offsets = [4, 0, 0], sizes = [1, 3, 32], strides = [1, 1, 1]} : vector<5x3x32xf32> to vector<1x3x32xf32>
    %821 = vector.shape_cast %820 : vector<1x3x32xf32> to vector<3x32xf32>
    %822 = vector.extract_strided_slice %786 {offsets = [5, 0], sizes = [4, 32], strides = [1, 1]} : vector<9x32xf32> to vector<4x32xf32>
    %823 = vector.extract_strided_slice %821 {offsets = [0, 0], sizes = [1, 32], strides = [1, 1]} : vector<3x32xf32> to vector<1x32xf32>
    %824 = vector.broadcast %823 : vector<1x32xf32> to vector<4x32xf32>
    %825 = arith.addf %822, %824 : vector<4x32xf32>
    %cst_307 = arith.constant dense<0.000000e+00> : vector<4xf32>
    %826 = vector.multi_reduction <add>, %825, %cst_307 [1] : vector<4x32xf32> to vector<4xf32>
    %827 = vector.shape_cast %826 : vector<4xf32> to vector<4x1xf32>
    %cst_308 = arith.constant 3.200000e+01 : f32
    %828 = vector.broadcast %cst_308 : f32 to vector<4x1xf32>
    %829 = arith.divf %827, %828 : vector<4x1xf32>
    %830 = vector.broadcast %829 : vector<4x1xf32> to vector<4x32xf32>
    %831 = arith.subf %825, %830 : vector<4x32xf32>
    %832 = arith.mulf %831, %831 : vector<4x32xf32>
    %cst_309 = arith.constant dense<0.000000e+00> : vector<4xf32>
    %833 = vector.multi_reduction <add>, %832, %cst_309 [1] : vector<4x32xf32> to vector<4xf32>
    %834 = vector.shape_cast %833 : vector<4xf32> to vector<4x1xf32>
    %cst_310 = arith.constant 3.200000e+01 : f32
    %835 = vector.broadcast %cst_310 : f32 to vector<4x1xf32>
    %836 = arith.divf %834, %835 : vector<4x1xf32>
    %837 = vector.broadcast %829 : vector<4x1xf32> to vector<4x32xf32>
    %838 = arith.subf %825, %837 : vector<4x32xf32>
    %cst_311 = arith.constant 9.99999974E-6 : f32
    %839 = vector.broadcast %cst_311 : f32 to vector<4x1xf32>
    %840 = arith.addf %836, %839 : vector<4x1xf32>
    %841 = math.rsqrt %840 : vector<4x1xf32>
    %842 = vector.broadcast %841 : vector<4x1xf32> to vector<4x32xf32>
    %843 = arith.mulf %838, %842 : vector<4x32xf32>
    %844 = vector.extract_strided_slice %821 {offsets = [1, 0], sizes = [1, 32], strides = [1, 1]} : vector<3x32xf32> to vector<1x32xf32>
    %845 = vector.broadcast %844 : vector<1x32xf32> to vector<4x32xf32>
    %846 = arith.mulf %843, %845 : vector<4x32xf32>
    %847 = vector.extract_strided_slice %821 {offsets = [2, 0], sizes = [1, 32], strides = [1, 1]} : vector<3x32xf32> to vector<1x32xf32>
    %848 = vector.broadcast %847 : vector<1x32xf32> to vector<4x32xf32>
    %849 = arith.addf %846, %848 : vector<4x32xf32>
    %cst_312 = arith.constant 0.000000e+00 : f32
    %850 = vector.broadcast %cst_312 : f32 to vector<4x32xf32>
    %851 = arith.maximumf %849, %850 : vector<4x32xf32>
    %c6 = arith.constant 6 : index
    %c0_313 = arith.constant 0 : index
    %852 = vector.load %arg15[%c6, %c0_313] : memref<10x64xf32, #tpu.memory_space<vmem>>, vector<4x32xf32>
    tpu.vector_store %arg15[%c6, %c0_313], %851 {strides = array<i32>} : memref<10x64xf32, #tpu.memory_space<vmem>>, vector<4x32xf32>,
    %c1_314 = arith.constant 1 : index
    %c0_315 = arith.constant 0 : index
    %853 = tpu.strided_load %arg14[%c1_314, %c0_315] {strides = array<i32: 2, 1>} : memref<20x64xf32, #tpu.memory_space<vmem>>, vector<9x64xf32>
    %854 = arith.truncf %853 : vector<9x64xf32> to vector<9x64xbf16>
    %c0_316 = arith.constant 0 : index
    %c0_317 = arith.constant 0 : index
    %c0_318 = arith.constant 0 : index
    %855 = vector.load %arg7[%c0_316, %c0_317, %c0_318] : memref<2x64x32xbf16, #tpu.memory_space<vmem>>, vector<1x64x32xbf16>
    %856 = vector.shape_cast %855 : vector<1x64x32xbf16> to vector<64x32xbf16>
    %cst_319 = arith.constant dense<0.000000e+00> : vector<9x32xf32>
    %857 = tpu.matmul %854, %856, %cst_319 {dimension_numbers = #tpu.dot_dimension_numbers<[1], [0], [0], [1], [0, 0, 1, 1], [], []>} : vector<9x64xbf16>, vector<64x32xbf16>, vector<9x32xf32> -> vector<9x32xf32>
    %c2_320 = arith.constant 2 : index
    %c0_321 = arith.constant 0 : index
    %858 = tpu.strided_load %arg14[%c2_320, %c0_321] {strides = array<i32: 2, 1>} : memref<20x64xf32, #tpu.memory_space<vmem>>, vector<9x64xf32>
    %859 = arith.truncf %858 : vector<9x64xf32> to vector<9x64xbf16>
    %c1_322 = arith.constant 1 : index
    %c0_323 = arith.constant 0 : index
    %c0_324 = arith.constant 0 : index
    %860 = vector.load %arg7[%c1_322, %c0_323, %c0_324] : memref<2x64x32xbf16, #tpu.memory_space<vmem>>, vector<1x64x32xbf16>
    %861 = vector.shape_cast %860 : vector<1x64x32xbf16> to vector<64x32xbf16>
    %cst_325 = arith.constant dense<0.000000e+00> : vector<9x32xf32>
    %862 = tpu.matmul %859, %861, %cst_325 {dimension_numbers = #tpu.dot_dimension_numbers<[1], [0], [0], [1], [0, 0, 1, 1], [], []>} : vector<9x64xbf16>, vector<64x32xbf16>, vector<9x32xf32> -> vector<9x32xf32>
    %863 = arith.addf %857, %862 : vector<9x32xf32>
    %864 = vector.extract_strided_slice %36 {offsets = [4, 0, 0], sizes = [1, 3, 32], strides = [1, 1, 1]} : vector<5x3x32xf32> to vector<1x3x32xf32>
    %865 = vector.shape_cast %864 : vector<1x3x32xf32> to vector<3x32xf32>
    %866 = vector.extract_strided_slice %863 {offsets = [0, 0], sizes = [4, 32], strides = [1, 1]} : vector<9x32xf32> to vector<4x32xf32>
    %867 = vector.extract_strided_slice %865 {offsets = [0, 0], sizes = [1, 32], strides = [1, 1]} : vector<3x32xf32> to vector<1x32xf32>
    %868 = vector.broadcast %867 : vector<1x32xf32> to vector<4x32xf32>
    %869 = arith.addf %866, %868 : vector<4x32xf32>
    %cst_326 = arith.constant dense<0.000000e+00> : vector<4xf32>
    %870 = vector.multi_reduction <add>, %869, %cst_326 [1] : vector<4x32xf32> to vector<4xf32>
    %871 = vector.shape_cast %870 : vector<4xf32> to vector<4x1xf32>
    %cst_327 = arith.constant 3.200000e+01 : f32
    %872 = vector.broadcast %cst_327 : f32 to vector<4x1xf32>
    %873 = arith.divf %871, %872 : vector<4x1xf32>
    %874 = vector.broadcast %873 : vector<4x1xf32> to vector<4x32xf32>
    %875 = arith.subf %869, %874 : vector<4x32xf32>
    %876 = arith.mulf %875, %875 : vector<4x32xf32>
    %cst_328 = arith.constant dense<0.000000e+00> : vector<4xf32>
    %877 = vector.multi_reduction <add>, %876, %cst_328 [1] : vector<4x32xf32> to vector<4xf32>
    %878 = vector.shape_cast %877 : vector<4xf32> to vector<4x1xf32>
    %cst_329 = arith.constant 3.200000e+01 : f32
    %879 = vector.broadcast %cst_329 : f32 to vector<4x1xf32>
    %880 = arith.divf %878, %879 : vector<4x1xf32>
    %881 = vector.broadcast %873 : vector<4x1xf32> to vector<4x32xf32>
    %882 = arith.subf %869, %881 : vector<4x32xf32>
    %cst_330 = arith.constant 9.99999974E-6 : f32
    %883 = vector.broadcast %cst_330 : f32 to vector<4x1xf32>
    %884 = arith.addf %880, %883 : vector<4x1xf32>
    %885 = math.rsqrt %884 : vector<4x1xf32>
    %886 = vector.broadcast %885 : vector<4x1xf32> to vector<4x32xf32>
    %887 = arith.mulf %882, %886 : vector<4x32xf32>
    %888 = vector.extract_strided_slice %865 {offsets = [1, 0], sizes = [1, 32], strides = [1, 1]} : vector<3x32xf32> to vector<1x32xf32>
    %889 = vector.broadcast %888 : vector<1x32xf32> to vector<4x32xf32>
    %890 = arith.mulf %887, %889 : vector<4x32xf32>
    %891 = vector.extract_strided_slice %865 {offsets = [2, 0], sizes = [1, 32], strides = [1, 1]} : vector<3x32xf32> to vector<1x32xf32>
    %892 = vector.broadcast %891 : vector<1x32xf32> to vector<4x32xf32>
    %893 = arith.addf %890, %892 : vector<4x32xf32>
    %cst_331 = arith.constant 0.000000e+00 : f32
    %894 = vector.broadcast %cst_331 : f32 to vector<4x32xf32>
    %895 = arith.maximumf %893, %894 : vector<4x32xf32>
    %c1_332 = arith.constant 1 : index
    %c32_333 = arith.constant 32 : index
    %896 = vector.load %arg15[%c1_332, %c32_333] : memref<10x64xf32, #tpu.memory_space<vmem>>, vector<4x32xf32>
    tpu.vector_store %arg15[%c1_332, %c32_333], %895 {strides = array<i32>} : memref<10x64xf32, #tpu.memory_space<vmem>>, vector<4x32xf32>,
    %897 = vector.extract_strided_slice %36 {offsets = [4, 0, 0], sizes = [1, 3, 32], strides = [1, 1, 1]} : vector<5x3x32xf32> to vector<1x3x32xf32>
    %898 = vector.shape_cast %897 : vector<1x3x32xf32> to vector<3x32xf32>
    %899 = vector.extract_strided_slice %863 {offsets = [5, 0], sizes = [4, 32], strides = [1, 1]} : vector<9x32xf32> to vector<4x32xf32>
    %900 = vector.extract_strided_slice %898 {offsets = [0, 0], sizes = [1, 32], strides = [1, 1]} : vector<3x32xf32> to vector<1x32xf32>
    %901 = vector.broadcast %900 : vector<1x32xf32> to vector<4x32xf32>
    %902 = arith.addf %899, %901 : vector<4x32xf32>
    %cst_334 = arith.constant dense<0.000000e+00> : vector<4xf32>
    %903 = vector.multi_reduction <add>, %902, %cst_334 [1] : vector<4x32xf32> to vector<4xf32>
    %904 = vector.shape_cast %903 : vector<4xf32> to vector<4x1xf32>
    %cst_335 = arith.constant 3.200000e+01 : f32
    %905 = vector.broadcast %cst_335 : f32 to vector<4x1xf32>
    %906 = arith.divf %904, %905 : vector<4x1xf32>
    %907 = vector.broadcast %906 : vector<4x1xf32> to vector<4x32xf32>
    %908 = arith.subf %902, %907 : vector<4x32xf32>
    %909 = arith.mulf %908, %908 : vector<4x32xf32>
    %cst_336 = arith.constant dense<0.000000e+00> : vector<4xf32>
    %910 = vector.multi_reduction <add>, %909, %cst_336 [1] : vector<4x32xf32> to vector<4xf32>
    %911 = vector.shape_cast %910 : vector<4xf32> to vector<4x1xf32>
    %cst_337 = arith.constant 3.200000e+01 : f32
    %912 = vector.broadcast %cst_337 : f32 to vector<4x1xf32>
    %913 = arith.divf %911, %912 : vector<4x1xf32>
    %914 = vector.broadcast %906 : vector<4x1xf32> to vector<4x32xf32>
    %915 = arith.subf %902, %914 : vector<4x32xf32>
    %cst_338 = arith.constant 9.99999974E-6 : f32
    %916 = vector.broadcast %cst_338 : f32 to vector<4x1xf32>
    %917 = arith.addf %913, %916 : vector<4x1xf32>
    %918 = math.rsqrt %917 : vector<4x1xf32>
    %919 = vector.broadcast %918 : vector<4x1xf32> to vector<4x32xf32>
    %920 = arith.mulf %915, %919 : vector<4x32xf32>
    %921 = vector.extract_strided_slice %898 {offsets = [1, 0], sizes = [1, 32], strides = [1, 1]} : vector<3x32xf32> to vector<1x32xf32>
    %922 = vector.broadcast %921 : vector<1x32xf32> to vector<4x32xf32>
    %923 = arith.mulf %920, %922 : vector<4x32xf32>
    %924 = vector.extract_strided_slice %898 {offsets = [2, 0], sizes = [1, 32], strides = [1, 1]} : vector<3x32xf32> to vector<1x32xf32>
    %925 = vector.broadcast %924 : vector<1x32xf32> to vector<4x32xf32>
    %926 = arith.addf %923, %925 : vector<4x32xf32>
    %cst_339 = arith.constant 0.000000e+00 : f32
    %927 = vector.broadcast %cst_339 : f32 to vector<4x32xf32>
    %928 = arith.maximumf %926, %927 : vector<4x32xf32>
    %c6_340 = arith.constant 6 : index
    %c32_341 = arith.constant 32 : index
    %929 = vector.load %arg15[%c6_340, %c32_341] : memref<10x64xf32, #tpu.memory_space<vmem>>, vector<4x32xf32>
    tpu.vector_store %arg15[%c6_340, %c32_341], %928 {strides = array<i32>} : memref<10x64xf32, #tpu.memory_space<vmem>>, vector<4x32xf32>,
    %c0_342 = arith.constant 0 : index
    %c0_343 = arith.constant 0 : index
    %930 = vector.load %arg15[%c0_342, %c0_343] : memref<10x64xf32, #tpu.memory_space<vmem>>, vector<9x64xf32>
    %931 = arith.truncf %930 : vector<9x64xf32> to vector<9x64xbf16>
    %c0_344 = arith.constant 0 : index
    %c0_345 = arith.constant 0 : index
    %c0_346 = arith.constant 0 : index
    %932 = vector.load %arg8[%c0_344, %c0_345, %c0_346] : memref<2x64x64xbf16, #tpu.memory_space<vmem>>, vector<1x64x64xbf16>
    %933 = vector.shape_cast %932 : vector<1x64x64xbf16> to vector<64x64xbf16>
    %cst_347 = arith.constant dense<0.000000e+00> : vector<9x64xf32>
    %934 = tpu.matmul %931, %933, %cst_347 {dimension_numbers = #tpu.dot_dimension_numbers<[1], [0], [0], [1], [0, 0, 1, 1], [], []>} : vector<9x64xbf16>, vector<64x64xbf16>, vector<9x64xf32> -> vector<9x64xf32>
    %c1_348 = arith.constant 1 : index
    %c0_349 = arith.constant 0 : index
    %935 = vector.load %arg15[%c1_348, %c0_349] : memref<10x64xf32, #tpu.memory_space<vmem>>, vector<9x64xf32>
    %936 = arith.truncf %935 : vector<9x64xf32> to vector<9x64xbf16>
    %c1_350 = arith.constant 1 : index
    %c0_351 = arith.constant 0 : index
    %c0_352 = arith.constant 0 : index
    %937 = vector.load %arg8[%c1_350, %c0_351, %c0_352] : memref<2x64x64xbf16, #tpu.memory_space<vmem>>, vector<1x64x64xbf16>
    %938 = vector.shape_cast %937 : vector<1x64x64xbf16> to vector<64x64xbf16>
    %cst_353 = arith.constant dense<0.000000e+00> : vector<9x64xf32>
    %939 = tpu.matmul %936, %938, %cst_353 {dimension_numbers = #tpu.dot_dimension_numbers<[1], [0], [0], [1], [0, 0, 1, 1], [], []>} : vector<9x64xbf16>, vector<64x64xbf16>, vector<9x64xf32> -> vector<9x64xf32>
    %940 = arith.addf %934, %939 : vector<9x64xf32>
    %c0_354 = arith.constant 0 : index
    %c0_355 = arith.constant 0 : index
    %c0_356 = arith.constant 0 : index
    %941 = vector.load %arg9[%c0_354, %c0_355, %c0_356] : memref<2x3x32xf32, #tpu.memory_space<vmem>>, vector<1x3x32xf32>
    %942 = vector.shape_cast %941 : vector<1x3x32xf32> to vector<3x32xf32>
    %943 = vector.extract_strided_slice %940 {offsets = [0, 0], sizes = [4, 32], strides = [1, 1]} : vector<9x64xf32> to vector<4x32xf32>
    %944 = vector.extract_strided_slice %942 {offsets = [0, 0], sizes = [1, 32], strides = [1, 1]} : vector<3x32xf32> to vector<1x32xf32>
    %945 = vector.broadcast %944 : vector<1x32xf32> to vector<4x32xf32>
    %946 = arith.addf %943, %945 : vector<4x32xf32>
    %cst_357 = arith.constant dense<0.000000e+00> : vector<4xf32>
    %947 = vector.multi_reduction <add>, %946, %cst_357 [1] : vector<4x32xf32> to vector<4xf32>
    %948 = vector.shape_cast %947 : vector<4xf32> to vector<4x1xf32>
    %cst_358 = arith.constant 3.200000e+01 : f32
    %949 = vector.broadcast %cst_358 : f32 to vector<4x1xf32>
    %950 = arith.divf %948, %949 : vector<4x1xf32>
    %951 = vector.broadcast %950 : vector<4x1xf32> to vector<4x32xf32>
    %952 = arith.subf %946, %951 : vector<4x32xf32>
    %953 = arith.mulf %952, %952 : vector<4x32xf32>
    %cst_359 = arith.constant dense<0.000000e+00> : vector<4xf32>
    %954 = vector.multi_reduction <add>, %953, %cst_359 [1] : vector<4x32xf32> to vector<4xf32>
    %955 = vector.shape_cast %954 : vector<4xf32> to vector<4x1xf32>
    %cst_360 = arith.constant 3.200000e+01 : f32
    %956 = vector.broadcast %cst_360 : f32 to vector<4x1xf32>
    %957 = arith.divf %955, %956 : vector<4x1xf32>
    %958 = vector.broadcast %950 : vector<4x1xf32> to vector<4x32xf32>
    %959 = arith.subf %946, %958 : vector<4x32xf32>
    %cst_361 = arith.constant 9.99999974E-6 : f32
    %960 = vector.broadcast %cst_361 : f32 to vector<4x1xf32>
    %961 = arith.addf %957, %960 : vector<4x1xf32>
    %962 = math.rsqrt %961 : vector<4x1xf32>
    %963 = vector.broadcast %962 : vector<4x1xf32> to vector<4x32xf32>
    %964 = arith.mulf %959, %963 : vector<4x32xf32>
    %965 = vector.extract_strided_slice %942 {offsets = [1, 0], sizes = [1, 32], strides = [1, 1]} : vector<3x32xf32> to vector<1x32xf32>
    %966 = vector.broadcast %965 : vector<1x32xf32> to vector<4x32xf32>
    %967 = arith.mulf %964, %966 : vector<4x32xf32>
    %968 = vector.extract_strided_slice %942 {offsets = [2, 0], sizes = [1, 32], strides = [1, 1]} : vector<3x32xf32> to vector<1x32xf32>
    %969 = vector.broadcast %968 : vector<1x32xf32> to vector<4x32xf32>
    %970 = arith.addf %967, %969 : vector<4x32xf32>
    %cst_362 = arith.constant 0.000000e+00 : f32
    %971 = vector.broadcast %cst_362 : f32 to vector<4x32xf32>
    %972 = arith.maximumf %970, %971 : vector<4x32xf32>
    %c1_363 = arith.constant 1 : index
    %c0_364 = arith.constant 0 : index
    %c0_365 = arith.constant 0 : index
    %973 = vector.load %arg9[%c1_363, %c0_364, %c0_365] : memref<2x3x32xf32, #tpu.memory_space<vmem>>, vector<1x3x32xf32>
    %974 = vector.shape_cast %973 : vector<1x3x32xf32> to vector<3x32xf32>
    %975 = vector.extract_strided_slice %940 {offsets = [5, 32], sizes = [4, 32], strides = [1, 1]} : vector<9x64xf32> to vector<4x32xf32>
    %976 = vector.extract_strided_slice %974 {offsets = [0, 0], sizes = [1, 32], strides = [1, 1]} : vector<3x32xf32> to vector<1x32xf32>
    %977 = vector.broadcast %976 : vector<1x32xf32> to vector<4x32xf32>
    %978 = arith.addf %975, %977 : vector<4x32xf32>
    %cst_366 = arith.constant dense<0.000000e+00> : vector<4xf32>
    %979 = vector.multi_reduction <add>, %978, %cst_366 [1] : vector<4x32xf32> to vector<4xf32>
    %980 = vector.shape_cast %979 : vector<4xf32> to vector<4x1xf32>
    %cst_367 = arith.constant 3.200000e+01 : f32
    %981 = vector.broadcast %cst_367 : f32 to vector<4x1xf32>
    %982 = arith.divf %980, %981 : vector<4x1xf32>
    %983 = vector.broadcast %982 : vector<4x1xf32> to vector<4x32xf32>
    %984 = arith.subf %978, %983 : vector<4x32xf32>
    %985 = arith.mulf %984, %984 : vector<4x32xf32>
    %cst_368 = arith.constant dense<0.000000e+00> : vector<4xf32>
    %986 = vector.multi_reduction <add>, %985, %cst_368 [1] : vector<4x32xf32> to vector<4xf32>
    %987 = vector.shape_cast %986 : vector<4xf32> to vector<4x1xf32>
    %cst_369 = arith.constant 3.200000e+01 : f32
    %988 = vector.broadcast %cst_369 : f32 to vector<4x1xf32>
    %989 = arith.divf %987, %988 : vector<4x1xf32>
    %990 = vector.broadcast %982 : vector<4x1xf32> to vector<4x32xf32>
    %991 = arith.subf %978, %990 : vector<4x32xf32>
    %cst_370 = arith.constant 9.99999974E-6 : f32
    %992 = vector.broadcast %cst_370 : f32 to vector<4x1xf32>
    %993 = arith.addf %989, %992 : vector<4x1xf32>
    %994 = math.rsqrt %993 : vector<4x1xf32>
    %995 = vector.broadcast %994 : vector<4x1xf32> to vector<4x32xf32>
    %996 = arith.mulf %991, %995 : vector<4x32xf32>
    %997 = vector.extract_strided_slice %974 {offsets = [1, 0], sizes = [1, 32], strides = [1, 1]} : vector<3x32xf32> to vector<1x32xf32>
    %998 = vector.broadcast %997 : vector<1x32xf32> to vector<4x32xf32>
    %999 = arith.mulf %996, %998 : vector<4x32xf32>
    %1000 = vector.extract_strided_slice %974 {offsets = [2, 0], sizes = [1, 32], strides = [1, 1]} : vector<3x32xf32> to vector<1x32xf32>
    %1001 = vector.broadcast %1000 : vector<1x32xf32> to vector<4x32xf32>
    %1002 = arith.addf %999, %1001 : vector<4x32xf32>
    %cst_371 = arith.constant 0.000000e+00 : f32
    %1003 = vector.broadcast %cst_371 : f32 to vector<4x32xf32>
    %1004 = arith.maximumf %1002, %1003 : vector<4x32xf32>
    %1005 = arith.addf %972, %1004 : vector<4x32xf32>
    %1006 = vector.extract_strided_slice %1005 {offsets = [0, 0], sizes = [1, 32], strides = [1, 1]} : vector<4x32xf32> to vector<1x32xf32>
    %c0_372 = arith.constant 0 : index
    %c0_373 = arith.constant 0 : index
    %c0_374 = arith.constant 0 : index
    %1007 = vector.load %arg10[%c0_372, %c0_373, %c0_374] : memref<1x1x128xf32, #tpu.memory_space<vmem>>, vector<1x1x32xf32>
    %1008 = vector.shape_cast %1007 : vector<1x1x32xf32> to vector<1x32xf32>
    %1009 = vector.shape_cast %1006 : vector<1x32xf32> to vector<1x1x32xf32>
    tpu.vector_store %arg10[%c0_372, %c0_373, %c0_374], %1009 {strides = array<i32>} : memref<1x1x128xf32, #tpu.memory_space<vmem>>, vector<1x1x32xf32>,
    %1010 = vector.extract_strided_slice %1005 {offsets = [1, 0], sizes = [1, 32], strides = [1, 1]} : vector<4x32xf32> to vector<1x32xf32>
    %c0_375 = arith.constant 0 : index
    %c0_376 = arith.constant 0 : index
    %c32_377 = arith.constant 32 : index
    %1011 = vector.load %arg10[%c0_375, %c0_376, %c32_377] : memref<1x1x128xf32, #tpu.memory_space<vmem>>, vector<1x1x32xf32>
    %1012 = vector.shape_cast %1011 : vector<1x1x32xf32> to vector<1x32xf32>
    %1013 = vector.shape_cast %1010 : vector<1x32xf32> to vector<1x1x32xf32>
    tpu.vector_store %arg10[%c0_375, %c0_376, %c32_377], %1013 {strides = array<i32>} : memref<1x1x128xf32, #tpu.memory_space<vmem>>, vector<1x1x32xf32>,
    %1014 = vector.extract_strided_slice %1005 {offsets = [2, 0], sizes = [1, 32], strides = [1, 1]} : vector<4x32xf32> to vector<1x32xf32>
    %c0_378 = arith.constant 0 : index
    %c0_379 = arith.constant 0 : index
    %c64_380 = arith.constant 64 : index
    %1015 = vector.load %arg10[%c0_378, %c0_379, %c64_380] : memref<1x1x128xf32, #tpu.memory_space<vmem>>, vector<1x1x32xf32>
    %1016 = vector.shape_cast %1015 : vector<1x1x32xf32> to vector<1x32xf32>
    %1017 = vector.shape_cast %1014 : vector<1x32xf32> to vector<1x1x32xf32>
    tpu.vector_store %arg10[%c0_378, %c0_379, %c64_380], %1017 {strides = array<i32>} : memref<1x1x128xf32, #tpu.memory_space<vmem>>, vector<1x1x32xf32>,
    %1018 = vector.extract_strided_slice %1005 {offsets = [3, 0], sizes = [1, 32], strides = [1, 1]} : vector<4x32xf32> to vector<1x32xf32>
    %c0_381 = arith.constant 0 : index
    %c0_382 = arith.constant 0 : index
    %c96_383 = arith.constant 96 : index
    %1019 = vector.load %arg10[%c0_381, %c0_382, %c96_383] : memref<1x1x128xf32, #tpu.memory_space<vmem>>, vector<1x1x32xf32>
    %1020 = vector.shape_cast %1019 : vector<1x1x32xf32> to vector<1x32xf32>
    %1021 = vector.shape_cast %1018 : vector<1x32xf32> to vector<1x1x32xf32>
    tpu.vector_store %arg10[%c0_381, %c0_382, %c96_383], %1021 {strides = array<i32>} : memref<1x1x128xf32, #tpu.memory_space<vmem>>, vector<1x1x32xf32>,
    return
  }
  func.func @transform_0(%arg0: i32) -> (i32, i32, i32) {
    %c0_i32 = arith.constant 0 : i32
    %c0_i32_0 = arith.constant 0 : i32
    %c0_i32_1 = arith.constant 0 : i32
    return %arg0, %c0_i32, %c0_i32_0 : i32, i32, i32
  }
  func.func @transform_1(%arg0: i32) -> (i32, i32) {
    %c0_i32 = arith.constant 0 : i32
    %c0_i32_0 = arith.constant 0 : i32
    %c0_i32_1 = arith.constant 0 : i32
    return %c0_i32, %c0_i32_0 : i32, i32
  }
  func.func @transform_2(%arg0: i32) -> (i32, i32, i32) {
    %c0_i32 = arith.constant 0 : i32
    %c0_i32_0 = arith.constant 0 : i32
    %c0_i32_1 = arith.constant 0 : i32
    %c0_i32_2 = arith.constant 0 : i32
    return %c0_i32, %c0_i32_0, %c0_i32_1 : i32, i32, i32
  }
  func.func @transform_3(%arg0: i32) -> (i32, i32, i32) {
    %c0_i32 = arith.constant 0 : i32
    %c0_i32_0 = arith.constant 0 : i32
    %c0_i32_1 = arith.constant 0 : i32
    %c0_i32_2 = arith.constant 0 : i32
    return %c0_i32, %c0_i32_0, %c0_i32_1 : i32, i32, i32
  }
  func.func @transform_4(%arg0: i32) -> (i32, i32, i32) {
    %c0_i32 = arith.constant 0 : i32
    %c0_i32_0 = arith.constant 0 : i32
    %c0_i32_1 = arith.constant 0 : i32
    %c0_i32_2 = arith.constant 0 : i32
    return %c0_i32, %c0_i32_0, %c0_i32_1 : i32, i32, i32
  }
  func.func @transform_5(%arg0: i32) -> (i32, i32, i32) {
    %c0_i32 = arith.constant 0 : i32
    %c0_i32_0 = arith.constant 0 : i32
    %c0_i32_1 = arith.constant 0 : i32
    %c0_i32_2 = arith.constant 0 : i32
    return %c0_i32, %c0_i32_0, %c0_i32_1 : i32, i32, i32
  }
  func.func @transform_6(%arg0: i32) -> (i32, i32, i32) {
    %c0_i32 = arith.constant 0 : i32
    %c0_i32_0 = arith.constant 0 : i32
    %c0_i32_1 = arith.constant 0 : i32
    %c0_i32_2 = arith.constant 0 : i32
    return %c0_i32, %c0_i32_0, %c0_i32_1 : i32, i32, i32
  }
  func.func @transform_7(%arg0: i32) -> (i32, i32, i32) {
    %c0_i32 = arith.constant 0 : i32
    %c0_i32_0 = arith.constant 0 : i32
    %c0_i32_1 = arith.constant 0 : i32
    %c0_i32_2 = arith.constant 0 : i32
    return %c0_i32, %c0_i32_0, %c0_i32_1 : i32, i32, i32
  }
  func.func @transform_8(%arg0: i32) -> (i32, i32, i32) {
    %c0_i32 = arith.constant 0 : i32
    %c0_i32_0 = arith.constant 0 : i32
    %c0_i32_1 = arith.constant 0 : i32
    %c0_i32_2 = arith.constant 0 : i32
    return %c0_i32, %c0_i32_0, %c0_i32_1 : i32, i32, i32
  }
  func.func @transform_9(%arg0: i32) -> (i32, i32, i32) {
    %c0_i32 = arith.constant 0 : i32
    %c0_i32_0 = arith.constant 0 : i32
    %c0_i32_1 = arith.constant 0 : i32
    return %arg0, %c0_i32, %c0_i32_0 : i32, i32, i32
  }
}

</mosaic_0001>

<bundles_post_ra>
// kernel: fwd.1
= control target key start
LH: loop header
LB: loop body
LE: loop exit
PB: predicated region body
PF: predicated region fallthrough
CT: control target
= control target key end

     0   :  { %s6966_s30 = smov 0   ;;  %s9256_s0 = inlined_call_operand.vmem [shape: f32[2,512,16], index: 0, kind: input, shape index: {}]   ;;  %s9257_s1 = inlined_call_operand.vmem [shape: f32[16,32], index: 1, kind: input, shape index: {}]   ;;  %s9258_s2 = inlined_call_operand.vmem [shape: f32[5,3,32], index: 2, kind: input, shape index: {}]   ;;  %s9259_s3 = inlined_call_operand.vmem [shape: bf16[2,128,32], index: 3, kind: input, shape index: {}]   ;;  %s9260_s4 = inlined_call_operand.vmem [shape: bf16[2,64,32], index: 4, kind: input, shape index: {}]   ;;  %s9261_s5 = inlined_call_operand.vmem [shape: bf16[2,64,32], index: 5, kind: input, shape index: {}]   ;;  %s9262_s6 = inlined_call_operand.vmem [shape: bf16[2,64,32], index: 6, kind: input, shape index: {}]   ;;  %s9263_s7 = inlined_call_operand.vmem [shape: bf16[2,64,64], index: 7, kind: input, shape index: {}]   ;;  %s9264_s8 = inlined_call_operand.vmem [shape: f32[2,3,32], index: 8, kind: input, shape index: {}]   ;;  %s9265_s9 = inlined_call_operand.vmem [shape: f32[2,1,128], index: 9, kind: output, shape index: {}]  }
   0x1 LB: > { %s5569_s10 = sadd.s32 4294967295, %s6909_s30   ;;  %p5573_p0 = scmp.ge.s32.totalorder %s6909_s30, 1  ;;  %s6909_s30 = sphi %s6966_s30, %s19_s30  }
   0x2   : > { %p287_p1 = scmp.lt.s32.totalorder %s6909_s30, 3 }
   0x4   : > { %p288_p2 = pnand %p5573_p0, %p287_p1 }
   0x6   : > { %291 = sbr.rel (%p288_p2) target bundleno = 4585 (0x11e9), region = 56 }
   0xd   : > { %v355_v0 = vld [vmem:[%s9257_s1] sm:$0xff]  ;;  %v356_v1 = vld [vmem:[%s9257_s1 + $0x8] sm:$0xff]  ;;  %p321_p3 = scmp.lt.s32.totalorder %s5569_s10, 1  ;;  %vm389_vm0 = vcmask 130048   ;;  %vm595_vm1 = vcmask 261120   ;;  %s6912_s23 = smov 32  }
   0xe   : > { %v6571_v2 = vpack.c.bf16 %v356_v1, %v355_v0  ;;  %s6913_s21 = smov 96   ;;  %s6914_s27 = smov 64   ;;  %vm6915_vm2 = vmmov 0   ;;  %vm1278_vm3 = vcmask 523520   ;;  %vm1855_vm4 = vcmask 785920  }
   0xf   : > { %s9394_s10 = smov (!%p321_p3, %s5569_s10), 1  ;;  %vm2433_vm5 = vcmask 1048320   ;;  %vm3026_vm6 = vcmask 261121   ;;  %vm3039_vm7 = vcmask 253952   ;;  %vm336_vm8 = vcmask 517120  }
  0x10   : > { %6572 = vmatprep.subr.bf16.mxu0 %v6571_v2  ;;  %6576 = vmatprep.subr.bf16.mxu1 %v6571_v2  ;;  %s5908_s15 = sshll.u32 %s9394_s10, 9  ;;  %vm334_vm9 = vcmask 516096   ;;  %vm3614_vm10 = vcmask 523521   ;;  %vm3688_vm11 = vcmask 523264   ;;  %vm3619_vm12 = vcmask 516352   ;;  %s328_s19 = scalar_lea.vmem %s9265_s9, %s9394_s10 }
  0x11   : > { %6574 = vmatpush3.bf16.msra.mxu0 %v6571_v2  ;;  %6578 = vmatpush3.bf16.msra.mxu1 %v6571_v2  ;;  %s6986_s18 = scalar_lea.vmem %s9256_s0, %s5908_s15  ;;  %vm4968_vm13 = vcmask 261125   ;;  %vm4941_vm14 = vcmask 257024   ;;  %vm5184_vm15 = vcmask 519424  }
  0x12   : > { %6580 = vmatprep.subr.bf16.mxu0 %v6571_v2  ;;  %6584 = vmatprep.subr.bf16.mxu1 %v6571_v2  ;;  %v5576_v3 = vld [vmem:[%s6986_s18 + $0x2] ss:$4 sm:$0xff]  ;;  %v5608_v4 = vld [vmem:[%s6986_s18 + $0x3] ss:$4 sm:$0xff]  ;;  %v1463_v35 = vld [vmem:[%s6986_s18] ss:$4 sm:$0xff] }
  0x13   : > { %v5577_v5 = vld [vmem:[%s6986_s18 + $0x22] ss:$4 sm:$0xff]  ;;  %6119 = vmatprep.mubr.msk.f32.mxu0 %vm389_vm0, %v5576_v3  ;;  %6147 = vmatprep.mubr.msk.f32.mxu1 %vm389_vm0, %v5608_v4  ;;  %v5609_v6 = vld [vmem:[%s6986_s18 + $0x23] ss:$4 sm:$0xff]  ;;  %v5671_v36 = vld [vmem:[%s6986_s18 + $0x1] ss:$4 sm:$0xff]  ;;  %v583_v3 = vlaneseq }
  0x14   : > { %v5610_v7 = vld [vmem:[%s6986_s18 + $0x43] ss:$4 sm:$0xff]  ;;  %6120 = vmatmul.mubr.msk.f32.vlgmr.msra.gmra.mrb[0].mxu0 %vm389_vm0, %v5577_v5  ;;  %6148 = vmatmul.mubr.msk.f32.vlgmr.msra.gmra.mrb[0].mxu1 %vm389_vm0, %v5609_v6  ;;  %v5578_v8 = vld [vmem:[%s6986_s18 + $0x42] ss:$4 sm:$0xff]  ;;  %v5640_v37 = vld [vmem:[%s6986_s18 + $0x20] ss:$4 sm:$0xff] }
  0x15   : > { %6150 = vmatprep.mubr.msk.f32.mxu1 %vm389_vm0, %v5610_v7  ;;  %v5611_v9 = vld [vmem:[%s6986_s18 + $0x63] ss:$4 sm:$0xff]  ;;  %6122 = vmatprep.mubr.msk.f32.mxu0 %vm389_vm0, %v5578_v8  ;;  %v5579_v10 = vld [vmem:[%s6986_s18 + $0x62] ss:$4 sm:$0xff]  ;;  %v5672_v38 = vld [vmem:[%s6986_s18 + $0x21] ss:$4 sm:$0xff] }
  0x16   : > { %v5612_v11 = vld [vmem:[%s6986_s18 + $0x83] ss:$4 sm:$0xff]  ;;  %v5580_v12 = vld [vmem:[%s6986_s18 + $0x82] ss:$4 sm:$0xff]  ;;  %6582 = vmatpush3.bf16.msra.mxu0 %v6571_v2  ;;  %6586 = vmatpush3.bf16.msra.mxu1 %v6571_v2  ;;  %v5641_v39 = vld [vmem:[%s6986_s18 + $0x40] ss:$4 sm:$0xff] }
  0x17   : > { %v5613_v13 = vld [vmem:[%s6986_s18 + $0xa3] ss:$4 sm:$0xff]  ;;  %v5581_v14 = vld [vmem:[%s6986_s18 + $0xa2] ss:$4 sm:$0xff]  ;;  %v5673_v40 = vld [vmem:[%s6986_s18 + $0x41] ss:$4 sm:$0xff] }
  0x18   : > { %6151 = vmatmul.mubr.msk.f32.gmra.mrb[2].mxu1 %vm389_vm0, %v5611_v9  ;;  %6123 = vmatmul.mubr.msk.f32.gmra.mrb[2].mxu0 %vm389_vm0, %v5579_v10  ;;  %v5614_v15 = vld [vmem:[%s6986_s18 + $0xc3] ss:$4 sm:$0xff]  ;;  %v5582_v16 = vld [vmem:[%s6986_s18 + $0xc2] ss:$4 sm:$0xff]  ;;  %v5642_v41 = vld [vmem:[%s6986_s18 + $0x60] ss:$4 sm:$0xff] }
  0x19   : > { %6153 = vmatprep.mubr.msk.f32.mxu1 %vm389_vm0, %v5612_v11  ;;  %6125 = vmatprep.mubr.msk.f32.mxu0 %vm389_vm0, %v5580_v12  ;;  %v5615_v17 = vld [vmem:[%s6986_s18 + $0xe3] ss:$4 sm:$0xff]  ;;  %v5583_v18 = vld [vmem:[%s6986_s18 + $0xe2] ss:$4 sm:$0xff]  ;;  %v5674_v42 = vld [vmem:[%s6986_s18 + $0x61] ss:$4 sm:$0xff] }
  0x1a   : > { %v5616_v19 = vld [vmem:[%s6986_s18 + $0x103] ss:$4 sm:$0xff]  ;;  %v5584_v20 = vld [vmem:[%s6986_s18 + $0x102] ss:$4 sm:$0xff]  ;;  %v5643_v43 = vld [vmem:[%s6986_s18 + $0x80] ss:$4 sm:$0xff] }
  0x1b   : > { %v5617_v21 = vld [vmem:[%s6986_s18 + $0x123] ss:$4 sm:$0xff]  ;;  %v5585_v22 = vld [vmem:[%s6986_s18 + $0x122] ss:$4 sm:$0xff]  ;;  %v5675_v44 = vld [vmem:[%s6986_s18 + $0x81] ss:$4 sm:$0xff] }
  0x1c   : > { %6154 = vmatmul.mubr.msk.f32.gmra.mrb[4].mxu1 %vm389_vm0, %v5613_v13  ;;  %6126 = vmatmul.mubr.msk.f32.gmra.mrb[4].mxu0 %vm389_vm0, %v5581_v14  ;;  %v5618_v23 = vld [vmem:[%s6986_s18 + $0x143] ss:$4 sm:$0xff]  ;;  %v5586_v24 = vld [vmem:[%s6986_s18 + $0x142] ss:$4 sm:$0xff]  ;;  %v5644_v45 = vld [vmem:[%s6986_s18 + $0xa0] ss:$4 sm:$0xff] }
  0x1d   : > { %6156 = vmatprep.mubr.msk.f32.mxu1 %vm389_vm0, %v5614_v15  ;;  %6128 = vmatprep.mubr.msk.f32.mxu0 %vm389_vm0, %v5582_v16  ;;  %v5619_v25 = vld [vmem:[%s6986_s18 + $0x163] ss:$4 sm:$0xff]  ;;  %v5587_v26 = vld [vmem:[%s6986_s18 + $0x162] ss:$4 sm:$0xff]  ;;  %v5676_v46 = vld [vmem:[%s6986_s18 + $0xa1] ss:$4 sm:$0xff] }
  0x1e   : > { %v5620_v27 = vld [vmem:[%s6986_s18 + $0x183] ss:$4 sm:$0xff]  ;;  %v5588_v28 = vld [vmem:[%s6986_s18 + $0x182] ss:$4 sm:$0xff]  ;;  %v5645_v47 = vld [vmem:[%s6986_s18 + $0xc0] ss:$4 sm:$0xff] }
  0x1f   : > { %v5621_v29 = vld [vmem:[%s6986_s18 + $0x1a3] ss:$4 sm:$0xff]  ;;  %v5589_v30 = vld [vmem:[%s6986_s18 + $0x1a2] ss:$4 sm:$0xff]  ;;  %v5677_v48 = vld [vmem:[%s6986_s18 + $0xc1] ss:$4 sm:$0xff] }
  0x20   : > { %6157 = vmatmul.mubr.msk.f32.gmra.mrb[6].mxu1 %vm389_vm0, %v5615_v17  ;;  %6129 = vmatmul.mubr.msk.f32.gmra.mrb[6].mxu0 %vm389_vm0, %v5583_v18  ;;  %v5622_v31 = vld [vmem:[%s6986_s18 + $0x1c3] ss:$4 sm:$0xff]  ;;  %v5590_v32 = vld [vmem:[%s6986_s18 + $0x1c2] ss:$4 sm:$0xff]  ;;  %v5646_v49 = vld [vmem:[%s6986_s18 + $0xe0] ss:$4 sm:$0xff] }
  0x21   : > { %6159 = vmatprep.mubr.msk.f32.mxu1 %vm389_vm0, %v5616_v19  ;;  %6131 = vmatprep.mubr.msk.f32.mxu0 %vm389_vm0, %v5584_v20  ;;  %v5623_v33 = vld [vmem:[%s6986_s18 + $0x1e3] ss:$4 sm:$0xff]  ;;  %v5591_v34 = vld [vmem:[%s6986_s18 + $0x1e2] ss:$4 sm:$0xff]  ;;  %v5678_v50 = vld [vmem:[%s6986_s18 + $0xe1] ss:$4 sm:$0xff] }
  0x22   : > { %v5647_v51 = vld [vmem:[%s6986_s18 + $0x100] ss:$4 sm:$0xff]  ;;  %v5679_v52 = vld [vmem:[%s6986_s18 + $0x101] ss:$4 sm:$0xff]  ;;  %v7116_v4 = vshrl.u32 %v583_v3, 7 }
  0x23   : > { %v5648_v53 = vld [vmem:[%s6986_s18 + $0x120] ss:$4 sm:$0xff]  ;;  %v5680_v54 = vld [vmem:[%s6986_s18 + $0x121] ss:$4 sm:$0xff] }
  0x24   : > { %6160 = vmatmul.mubr.msk.f32.gmra.mrb[8].mxu1 %vm389_vm0, %v5617_v21  ;;  %6132 = vmatmul.mubr.msk.f32.gmra.mrb[8].mxu0 %vm389_vm0, %v5585_v22  ;;  %v5649_v55 = vld [vmem:[%s6986_s18 + $0x140] ss:$4 sm:$0xff]  ;;  %v5681_v56 = vld [vmem:[%s6986_s18 + $0x141] ss:$4 sm:$0xff]  ;;  %9312 = vst [vmem:[#allocation7_spill] sm:$0xff] %v7116_v4  ;;  %v7119_v5 = vsub.s32 0, %v7116_v4 }
  0x25   : > { %6162 = vmatprep.mubr.msk.f32.mxu1 %vm389_vm0, %v5618_v23  ;;  %6134 = vmatprep.mubr.msk.f32.mxu0 %vm389_vm0, %v5586_v24  ;;  %v5650_v57 = vld [vmem:[%s6986_s18 + $0x160] ss:$4 sm:$0xff]  ;;  %v5682_v58 = vld [vmem:[%s6986_s18 + $0x161] ss:$4 sm:$0xff] }
  0x26   : > { %v5651_v59 = vld [vmem:[%s6986_s18 + $0x180] ss:$4 sm:$0xff]  ;;  %v5683_v60 = vld [vmem:[%s6986_s18 + $0x181] ss:$4 sm:$0xff]  ;;  %9313 = vst [vmem:[#allocation8_spill] sm:$0xff] %v7119_v5 }
  0x27   : > { %v5652_v61 = vld [vmem:[%s6986_s18 + $0x1a0] ss:$4 sm:$0xff]  ;;  %v5684_v62 = vld [vmem:[%s6986_s18 + $0x1a1] ss:$4 sm:$0xff] }
  0x28   : > { %6163 = vmatmul.mubr.msk.f32.gmra.mrb[10].mxu1 %vm389_vm0, %v5619_v25  ;;  %6135 = vmatmul.mubr.msk.f32.gmra.mrb[10].mxu0 %vm389_vm0, %v5587_v26  ;;  %v5653_v63 = vld [vmem:[%s6986_s18 + $0x1c0] ss:$4 sm:$0xff]  ;;  %v5685_v0 = vld [vmem:[%s6986_s18 + $0x1c1] ss:$4 sm:$0xff] }
  0x29   : > { %6165 = vmatprep.mubr.msk.f32.mxu1 %vm389_vm0, %v5620_v27  ;;  %6137 = vmatprep.mubr.msk.f32.mxu0 %vm389_vm0, %v5588_v28  ;;  %v5654_v1 = vld [vmem:[%s6986_s18 + $0x1e0] ss:$4 sm:$0xff]  ;;  %v5686_v2 = vld [vmem:[%s6986_s18 + $0x1e1] ss:$4 sm:$0xff] }
  0x2a   : > { %v350_v6 = vld [vmem:[%s9258_s2] sm:$0x7] }
  0x2b   : > { %v7125_v7 = vrot.slane %v350_v6, %v7119_v5 }
  0x2c   : > { %6166 = vmatmul.mubr.msk.f32.gmra.mrb[12].mxu1 %vm389_vm0, %v5621_v29  ;;  %6138 = vmatmul.mubr.msk.f32.gmra.mrb[12].mxu0 %vm389_vm0, %v5589_v30 }
  0x2d   : > { %6168 = vmatprep.mubr.msk.f32.mxu1 %vm389_vm0, %v5622_v31  ;;  %6140 = vmatprep.mubr.msk.f32.mxu0 %vm389_vm0, %v5590_v32 }
  0x30   : > { %6169 = vmatmul.mubr.msk.f32.gmra.mrb[14].mxu1 %vm389_vm0, %v5623_v33  ;;  %6141 = vmatmul.mubr.msk.f32.gmra.mrb[14].mxu0 %vm389_vm0, %v5591_v34 }
  0x31   : > { %6175 = vmatprep.mubr.msk.f32.mxu0 %vm389_vm0, %v1463_v35  ;;  %6203 = vmatprep.mubr.msk.f32.mxu1 %vm389_vm0, %v5671_v36 }
  0x34   : > { %6176 = vmatmul.mubr.msk.f32.vlgmr.msra.gmra.mrb[16].mxu0 %vm389_vm0, %v5640_v37  ;;  %6204 = vmatmul.mubr.msk.f32.vlgmr.msra.gmra.mrb[16].mxu1 %vm389_vm0, %v5672_v38 }
  0x35   : > { %6178 = vmatprep.mubr.msk.f32.mxu0 %vm389_vm0, %v5641_v39  ;;  %6206 = vmatprep.mubr.msk.f32.mxu1 %vm389_vm0, %v5673_v40 }
  0x38   : > { %6179 = vmatmul.mubr.msk.f32.gmra.mrb[18].mxu0 %vm389_vm0, %v5642_v41  ;;  %6207 = vmatmul.mubr.msk.f32.gmra.mrb[18].mxu1 %vm389_vm0, %v5674_v42 }
  0x39   : > { %6181 = vmatprep.mubr.msk.f32.mxu0 %vm389_vm0, %v5643_v43  ;;  %6209 = vmatprep.mubr.msk.f32.mxu1 %vm389_vm0, %v5675_v44 }
  0x3c   : > { %6182 = vmatmul.mubr.msk.f32.gmra.mrb[20].mxu0 %vm389_vm0, %v5644_v45  ;;  %6210 = vmatmul.mubr.msk.f32.gmra.mrb[20].mxu1 %vm389_vm0, %v5676_v46 }
  0x3d   : > { %6184 = vmatprep.mubr.msk.f32.mxu0 %vm389_vm0, %v5645_v47  ;;  %6212 = vmatprep.mubr.msk.f32.mxu1 %vm389_vm0, %v5677_v48 }
  0x40   : > { %6185 = vmatmul.mubr.msk.f32.gmra.mrb[22].mxu0 %vm389_vm0, %v5646_v49  ;;  %6213 = vmatmul.mubr.msk.f32.gmra.mrb[22].mxu1 %vm389_vm0, %v5678_v50 }
  0x41   : > { %6187 = vmatprep.mubr.msk.f32.mxu0 %vm389_vm0, %v5647_v51  ;;  %6215 = vmatprep.mubr.msk.f32.mxu1 %vm389_vm0, %v5679_v52 }
  0x44   : > { %6188 = vmatmul.mubr.msk.f32.gmra.mrb[24].mxu0 %vm389_vm0, %v5648_v53  ;;  %6216 = vmatmul.mubr.msk.f32.gmra.mrb[24].mxu1 %vm389_vm0, %v5680_v54 }
  0x45   : > { %6190 = vmatprep.mubr.msk.f32.mxu0 %vm389_vm0, %v5649_v55  ;;  %6218 = vmatprep.mubr.msk.f32.mxu1 %vm389_vm0, %v5681_v56 }
  0x48   : > { %6191 = vmatmul.mubr.msk.f32.gmra.mrb[26].mxu0 %vm389_vm0, %v5650_v57  ;;  %6219 = vmatmul.mubr.msk.f32.gmra.mrb[26].mxu1 %vm389_vm0, %v5682_v58 }
  0x49   : > { %6193 = vmatprep.mubr.msk.f32.mxu0 %vm389_vm0, %v5651_v59  ;;  %6221 = vmatprep.mubr.msk.f32.mxu1 %vm389_vm0, %v5683_v60 }
  0x4c   : > { %6194 = vmatmul.mubr.msk.f32.gmra.mrb[28].mxu0 %vm389_vm0, %v5652_v61  ;;  %6222 = vmatmul.mubr.msk.f32.gmra.mrb[28].mxu1 %vm389_vm0, %v5684_v62 }
  0x4d   : > { %6196 = vmatprep.mubr.msk.f32.mxu0 %vm389_vm0, %v5653_v63  ;;  %6224 = vmatprep.mubr.msk.f32.mxu1 %vm389_vm0, %v5685_v0 }
  0x50   : > { %6197 = vmatmul.mubr.msk.f32.gmra.mrb[30].mxu0 %vm389_vm0, %v5654_v1  ;;  %6225 = vmatmul.mubr.msk.f32.gmra.mrb[30].mxu1 %vm389_vm0, %v5686_v2  ;;  %vm5227_vm0 = vcmask 523525  }
  0xe7   : > { %v6121_v8 = vpop.f32.mrb[0].mxu0  ;;  %v6149_v9 = vpop.f32.mrb[0].mxu1 }
  0xe8   : > { %v7128_v10 = vadd.f32 %v6121_v8, %v7125_v7  ;;  %v7131_v11 = vadd.f32 %v6149_v9, %v7125_v7  ;;  %v504_v12 = vpop.f32.mrb[1].mxu0  ;;  %v1031_v13 = vpop.f32.mrb[1].mxu1 }
  0xe9   : > { %v7134_v14 = vadd.f32 %v1031_v13, %v7125_v7  ;;  %v7147_v23 = vadd.f32 %v7125_v7, %v504_v12 }
  0xea   : > { %v1121_v15 = vsel %vm595_vm1, %v7131_v11, 0.0  ;;  %v599_v16 = vsel %vm595_vm1, %v7128_v10, 0.0 }
  0xeb   : > { %1122 = vadd.xlane.f32.xlu0 %v1121_v15  ;;  %v6152_v17 = vpop.f32.mrb[2].mxu1  ;;  %600 = vadd.xlane.f32.xlu1 %v599_v16  ;;  %v6124_v18 = vpop.f32.mrb[2].mxu0  ;;  %v1118_v24 = vsel %vm595_vm1, %v7134_v14, 0.0  ;;  %v596_v33 = vsel %vm595_vm1, %v7147_v23, 0.0 }
  0xec   : > { %v7141_v19 = vadd.f32 %v6152_v17, %v7125_v7  ;;  %v1041_v20 = vpop.f32.mrb[3].mxu1  ;;  %v7144_v21 = vadd.f32 %v6124_v18, %v7125_v7  ;;  %v514_v22 = vpop.f32.mrb[3].mxu0 }
  0xed   : > { %v7156_v31 = vadd.f32 %v1041_v20, %v7125_v7  ;;  %v7159_v32 = vadd.f32 %v7125_v7, %v514_v22 }
  0xee   : > { %v1127_v25 = vsel %vm595_vm1, %v7141_v19, 0.0  ;;  %v605_v28 = vsel %vm595_vm1, %v7144_v21, 0.0 }
  0xef   : > { %1119 = vadd.xlane.f32.xlu0 %v1118_v24  ;;  %1128 = vadd.xlane.f32.xlu1 %v1127_v25  ;;  %v6155_v26 = vpop.f32.mrb[4].mxu1  ;;  %v6127_v27 = vpop.f32.mrb[4].mxu0  ;;  %v1124_v40 = vsel %vm595_vm1, %v7156_v31, 0.0  ;;  %v602_v41 = vsel %vm595_vm1, %v7159_v32, 0.0 }
  0xf0   : > { %v1051_v29 = vpop.f32.mrb[5].mxu1  ;;  %v524_v30 = vpop.f32.mrb[5].mxu0  ;;  %v7164_v36 = vadd.f32 %v6155_v26, %v7125_v7  ;;  %v7174_v44 = vadd.f32 %v6127_v27, %v7125_v7 }
  0xf1   : > { %v7167_v37 = vadd.f32 %v1051_v29, %v7125_v7  ;;  %v7181_v47 = vadd.f32 %v7125_v7, %v524_v30 }
  0xf2   : > { %v1133_v45 = vsel %vm595_vm1, %v7164_v36, 0.0  ;;  %v611_v54 = vsel %vm595_vm1, %v7174_v44, 0.0 }
  0xf3   : > { %597 = vadd.xlane.f32.xlu0 %v596_v33  ;;  %606 = vadd.xlane.f32.xlu1 %v605_v28  ;;  %v6158_v34 = vpop.f32.mrb[6].mxu1  ;;  %v6130_v35 = vpop.f32.mrb[6].mxu0  ;;  %v1130_v46 = vsel %vm595_vm1, %v7167_v37, 0.0  ;;  %v608_v55 = vsel %vm595_vm1, %v7181_v47, 0.0 }
  0xf4   : > { %v1061_v38 = vpop.f32.mrb[7].mxu1  ;;  %v534_v39 = vpop.f32.mrb[7].mxu0  ;;  %v7184_v52 = vadd.f32 %v6158_v34, %v7125_v7  ;;  %v7198_v60 = vadd.f32 %v6130_v35, %v7125_v7 }
  0xf5   : > { %v7187_v53 = vadd.f32 %v1061_v38, %v7125_v7  ;;  %v7205_v63 = vadd.f32 %v7125_v7, %v534_v39 }
  0xf6   : > { %v1139_v61 = vsel %vm595_vm1, %v7184_v52, 0.0  ;;  %v617_v9 = vsel %vm595_vm1, %v7198_v60, 0.0 }
  0xf7   : > { %1125 = vadd.xlane.f32.xlu1 %v1124_v40  ;;  %603 = vadd.xlane.f32.xlu0 %v602_v41  ;;  %v6161_v42 = vpop.f32.mrb[8].mxu1  ;;  %v6133_v43 = vpop.f32.mrb[8].mxu0  ;;  %v1136_v62 = vsel %vm595_vm1, %v7187_v53, 0.0  ;;  %v614_v12 = vsel %vm595_vm1, %v7205_v63, 0.0 }
  0xf8   : > { %v1071_v48 = vpop.f32.mrb[9].mxu1  ;;  %v544_v49 = vpop.f32.mrb[9].mxu0  ;;  %v7214_v6 = vadd.f32 %v6161_v42, %v7125_v7  ;;  %v7228_v16 = vadd.f32 %v6133_v43, %v7125_v7 }
  0xf9   : > { %v7217_v8 = vadd.f32 %v1071_v48, %v7125_v7  ;;  %v7231_v17 = vadd.f32 %v7125_v7, %v544_v49 }
  0xfa   : > { %v1298_v22 = vsel %vm595_vm1, %v7214_v6, 0.0  ;;  %v752_v33 = vsel %vm595_vm1, %v7228_v16, 0.0 }
  0xfb   : > { %1134 = vadd.xlane.f32.xlu1 %v1133_v45  ;;  %1131 = vadd.xlane.f32.xlu0 %v1130_v46  ;;  %v6164_v50 = vpop.f32.mrb[10].mxu1  ;;  %v6136_v51 = vpop.f32.mrb[10].mxu0  ;;  %v1295_v24 = vsel %vm595_vm1, %v7217_v8, 0.0  ;;  %v749_v34 = vsel %vm595_vm1, %v7231_v17, 0.0 }
  0xfc   : > { %v1081_v56 = vpop.f32.mrb[11].mxu1  ;;  %v554_v57 = vpop.f32.mrb[11].mxu0  ;;  %v7254_v39 = vadd.f32 %v6164_v50, %v7125_v7  ;;  %v7272_v49 = vadd.f32 %v6136_v51, %v7125_v7 }
  0xfd   : > { %v7257_v40 = vadd.f32 %v1081_v56, %v7125_v7  ;;  %v7275_v50 = vadd.f32 %v7125_v7, %v554_v57 }
  0xfe   : > { %9314 = vst [vmem:[#allocation9_spill] sm:$0xff] %v7272_v49  ;;  %v1304_v56 = vsel %vm595_vm1, %v7254_v39, 0.0 }
  0xff   : > { %612 = vadd.xlane.f32.xlu1 %v611_v54  ;;  %609 = vadd.xlane.f32.xlu0 %v608_v55  ;;  %v7193_v58 = vpop.f32.mrb[12].mxu1  ;;  %v7195_v59 = vpop.f32.mrb[12].mxu0  ;;  %9315 = vst [vmem:[#allocation10_spill] sm:$0xff] %v7275_v50 }
 0x100   : > { %v1091_v0 = vpop.f32.mrb[13].mxu1  ;;  %v7207_v1 = vpop.f32.mrb[13].mxu0 }
 0x103   : > { %1140 = vadd.xlane.f32.xlu1 %v1139_v61  ;;  %1137 = vadd.xlane.f32.xlu0 %v1136_v62  ;;  %v7209_v2 = vpop.f32.mrb[14].mxu1  ;;  %v7211_v3 = vpop.f32.mrb[14].mxu0  ;;  %v1301_v61 = vsel %vm595_vm1, %v7257_v40, 0.0 }
 0x104   : > { %v7223_v13 = vpop.f32.mrb[15].mxu1  ;;  %v7225_v15 = vpop.f32.mrb[15].mxu0 }
 0x107   : > { %618 = vadd.xlane.f32.xlu1 %v617_v9  ;;  %615 = vadd.xlane.f32.xlu0 %v614_v12  ;;  %v6205_v18 = vpop.f32.mrb[16].mxu1  ;;  %v6177_v20 = vpop.f32.mrb[16].mxu0 }
 0x108   : > { %v7238_v25 = vadd.f32 %v6205_v18, %v7125_v7  ;;  %v7241_v26 = vadd.f32 %v6177_v20, %v7125_v7  ;;  %v2186_v27 = vpop.f32.mrb[17].mxu1  ;;  %v1608_v28 = vpop.f32.mrb[17].mxu0  ;;  %v758_v20 = vsel %vm595_vm1, %v7272_v49, 0.0 }
 0x109   : > { %v7244_v29 = vadd.f32 %v2186_v27, %v7125_v7  ;;  %v7247_v30 = vadd.f32 %v1608_v28, %v7125_v7  ;;  %v7299_v28 = vadd.f32 %v7193_v58, %v7125_v7  ;;  %v7318_v58 = vadd.f32 %v7195_v59, %v7125_v7 }
 0x10b   : > { %1299 = vadd.xlane.f32.xlu1 %v1298_v22  ;;  %1296 = vadd.xlane.f32.xlu0 %v1295_v24  ;;  %v6208_v35 = vpop.f32.mrb[18].mxu1  ;;  %v6180_v38 = vpop.f32.mrb[18].mxu0  ;;  %v755_v22 = vsel %vm595_vm1, %v7275_v50, 0.0  ;;  %9316 = vst [vmem:[#allocation11_spill] sm:$0xff] %v7299_v28  ;;  %9318 = vst [vmem:[#allocation13_spill] sm:$0xff] %v7318_v58 }
 0x10c   : > { %v7260_v41 = vadd.f32 %v6208_v35, %v7125_v7  ;;  %v7263_v42 = vadd.f32 %v6180_v38, %v7125_v7  ;;  %v2196_v43 = vpop.f32.mrb[19].mxu1  ;;  %v1618_v45 = vpop.f32.mrb[19].mxu0 }
 0x10d   : > { %v7266_v46 = vadd.f32 %v2196_v43, %v7125_v7  ;;  %v7269_v48 = vadd.f32 %v1618_v45, %v7125_v7 }
 0x10f   : > { %753 = vadd.xlane.f32.xlu1 %v752_v33  ;;  %750 = vadd.xlane.f32.xlu0 %v749_v34  ;;  %v6211_v54 = vpop.f32.mrb[20].mxu1  ;;  %v6183_v55 = vpop.f32.mrb[20].mxu0  ;;  %v7302_v33 = vadd.f32 %v1091_v0, %v7125_v7  ;;  %v7322_v0 = vadd.f32 %v7125_v7, %v7207_v1 }
 0x110   : > { %v7282_v62 = vadd.f32 %v6211_v54, %v7125_v7  ;;  %v7285_v9 = vadd.f32 %v6183_v55, %v7125_v7  ;;  %v2206_v12 = vpop.f32.mrb[21].mxu1  ;;  %v1628_v51 = vpop.f32.mrb[21].mxu0 }
 0x111   : > { %v7288_v18 = vadd.f32 %v2206_v12, %v7125_v7  ;;  %v7291_v57 = vadd.f32 %v1628_v51, %v7125_v7  ;;  %9317 = vst [vmem:[#allocation12_spill] sm:$0xff] %v7302_v33  ;;  %9319 = vst [vmem:[#allocation14_spill] sm:$0xff] %v7322_v0  ;;  %v1307_v12 = vsel %vm595_vm1, %v7302_v33, 0.0 }
 0x113   : > { %1305 = vadd.xlane.f32.xlu1 %v1304_v56  ;;  %1302 = vadd.xlane.f32.xlu0 %v1301_v61  ;;  %v6214_v24 = vpop.f32.mrb[22].mxu1  ;;  %v6186_v27 = vpop.f32.mrb[22].mxu0  ;;  %v1310_v61 = vsel %vm595_vm1, %v7299_v28, 0.0 }
 0x114   : > { %v7305_v34 = vadd.f32 %v6214_v24, %v7125_v7  ;;  %v7308_v35 = vadd.f32 %v6186_v27, %v7125_v7  ;;  %v2216_v38 = vpop.f32.mrb[23].mxu1  ;;  %v1638_v43 = vpop.f32.mrb[23].mxu0  ;;  %v764_v27 = vsel %vm595_vm1, %v7318_v58, 0.0 }
 0x115   : > { %v7311_v45 = vadd.f32 %v2216_v38, %v7125_v7  ;;  %v7314_v54 = vadd.f32 %v1638_v43, %v7125_v7  ;;  %v761_v38 = vsel %vm595_vm1, %v7322_v0, 0.0 }
 0x117   : > { %759 = vadd.xlane.f32.xlu1 %v758_v20  ;;  %756 = vadd.xlane.f32.xlu0 %v755_v22  ;;  %v6189_v55 = vpop.f32.mrb[24].mxu0  ;;  %v6217_v56 = vpop.f32.mrb[24].mxu1 }
 0x118   : > { %v7329_v51 = vadd.f32 %v6189_v55, %v7125_v7  ;;  %v1648_v20 = vpop.f32.mrb[25].mxu0  ;;  %v7332_v22 = vadd.f32 %v6217_v56, %v7125_v7  ;;  %v2226_v59 = vpop.f32.mrb[25].mxu1  ;;  %v7346_v56 = vadd.f32 %v7209_v2, %v7125_v7  ;;  %v7366_v2 = vadd.f32 %v7211_v3, %v7125_v7 }
 0x119   : > { %v7335_v24 = vadd.f32 %v1648_v20, %v7125_v7  ;;  %v7338_v1 = vadd.f32 %v2226_v59, %v7125_v7  ;;  %v7350_v20 = vadd.f32 %v7223_v13, %v7125_v7  ;;  %v7370_v13 = vadd.f32 %v7125_v7, %v7225_v15 }
 0x11a   : > { %9320 = vst [vmem:[#allocation15_spill] sm:$0xff] %v7346_v56  ;;  %v1316_v58 = vsel %vm595_vm1, %v7346_v56, 0.0 }
 0x11b   : > { %1311 = vadd.xlane.f32.xlu1 %v1310_v61  ;;  %1308 = vadd.xlane.f32.xlu0 %v1307_v12  ;;  %v6192_v43 = vpop.f32.mrb[26].mxu0  ;;  %v6220_v55 = vpop.f32.mrb[26].mxu1  ;;  %9321 = vst [vmem:[#allocation16_spill] sm:$0xff] %v7350_v20 }
 0x11c   : > { %v7353_v59 = vadd.f32 %v6192_v43, %v7125_v7  ;;  %v1658_v61 = vpop.f32.mrb[27].mxu0  ;;  %v7356_v12 = vadd.f32 %v6220_v55, %v7125_v7  ;;  %v2236_v5 = vpop.f32.mrb[27].mxu1 }
 0x11d   : > { %v7359_v4 = vadd.f32 %v1658_v61, %v7125_v7  ;;  %v7362_v0 = vadd.f32 %v2236_v5, %v7125_v7  ;;  %v1313_v61 = vsel %vm595_vm1, %v7350_v20, 0.0  ;;  %v770_v20 = vsel %vm595_vm1, %v7366_v2, 0.0 }
 0x11f   : > { %765 = vadd.xlane.f32.xlu1 %v764_v27  ;;  %762 = vadd.xlane.f32.xlu0 %v761_v38  ;;  %v6195_v43 = vpop.f32.mrb[28].mxu0  ;;  %v6223_v55 = vpop.f32.mrb[28].mxu1 }
 0x120   : > { %v7377_v5 = vadd.f32 %v6195_v43, %v7125_v7  ;;  %v1668_v27 = vpop.f32.mrb[29].mxu0  ;;  %v7380_v38 = vadd.f32 %v6223_v55, %v7125_v7  ;;  %v2246_v3 = vpop.f32.mrb[29].mxu1  ;;  %v767_v43 = vsel %vm595_vm1, %v7370_v13, 0.0 }
 0x121   : > { %v7383_v33 = vadd.f32 %v1668_v27, %v7125_v7  ;;  %v7386_v15 = vadd.f32 %v2246_v3, %v7125_v7 }
 0x122   : > { %9322 = vst [vmem:[#allocation17_spill] sm:$0xff] %v7380_v38 }
 0x123   : > { %9323 = vst [vmem:[#allocation18_spill] sm:$0xff] %v7386_v15  ;;  %1317 = vadd.xlane.f32.xlu1 %v1316_v58  ;;  %1314 = vadd.xlane.f32.xlu0 %v1313_v61  ;;  %v6198_v56 = vpop.f32.mrb[30].mxu0  ;;  %v6226_v28 = vpop.f32.mrb[30].mxu1  ;;  %v2276_v61 = vsel %vm595_vm1, %v7238_v25, 0.0 }
 0x124   : > { %v7393_v55 = vadd.f32 %v6198_v56, %v7125_v7  ;;  %v1678_v50 = vpop.f32.mrb[31].mxu0  ;;  %v7396_v27 = vadd.f32 %v6226_v28, %v7125_v7  ;;  %v2256_v49 = vpop.f32.mrb[31].mxu1  ;;  %v1698_v56 = vsel %vm595_vm1, %v7241_v26, 0.0  ;;  %v1695_v28 = vsel %vm595_vm1, %v7247_v30, 0.0 }
 0x125   : > { %v7399_v3 = vadd.f32 %v1678_v50, %v7125_v7  ;;  %v7402_v58 = vadd.f32 %v2256_v49, %v7125_v7  ;;  %v2273_v50 = vsel %vm595_vm1, %v7244_v29, 0.0  ;;  %v2282_v7 = vsel %vm595_vm1, %v7260_v41, 0.0 }
 0x126   : > { %9324 = vst [vmem:[#allocation19_spill] sm:$0xff] %v7393_v55  ;;  %9325 = vst [vmem:[#allocation20_spill] sm:$0xff] %v7396_v27  ;;  %v1704_v49 = vsel %vm595_vm1, %v7263_v42, 0.0 }
 0x127   : > { %9326 = vst [vmem:[#allocation21_spill] sm:$0xff] %v7399_v3  ;;  %771 = vadd.xlane.f32.xlu1 %v770_v20  ;;  %768 = vadd.xlane.f32.xlu0 %v767_v43  ;;  %v1701_v20 = vsel %vm595_vm1, %v7269_v48, 0.0  ;;  %v2279_v43 = vsel %vm595_vm1, %v7266_v46, 0.0 }
 0x12b   : > { %2277 = vadd.xlane.f32.xlu1 %v2276_v61  ;;  %1699 = vadd.xlane.f32.xlu0 %v1698_v56  ;;  %v2288_v61 = vsel %vm595_vm1, %v7282_v62, 0.0  ;;  %v1710_v56 = vsel %vm595_vm1, %v7285_v9, 0.0 }
 0x12f   : > { %1696 = vadd.xlane.f32.xlu1 %v1695_v28  ;;  %2274 = vadd.xlane.f32.xlu0 %v2273_v50  ;;  %v1707_v28 = vsel %vm595_vm1, %v7291_v57, 0.0  ;;  %v2285_v50 = vsel %vm595_vm1, %v7288_v18, 0.0 }
 0x133   : > { %2283 = vadd.xlane.f32.xlu1 %v2282_v7  ;;  %1705 = vadd.xlane.f32.xlu0 %v1704_v49  ;;  %v2294_v7 = vsel %vm595_vm1, %v7305_v34, 0.0  ;;  %v1716_v49 = vsel %vm595_vm1, %v7308_v35, 0.0 }
 0x137   : > { %1702 = vadd.xlane.f32.xlu1 %v1701_v20  ;;  %2280 = vadd.xlane.f32.xlu0 %v2279_v43  ;;  %v1713_v20 = vsel %vm595_vm1, %v7314_v54, 0.0  ;;  %v2291_v43 = vsel %vm595_vm1, %v7311_v45, 0.0 }
 0x13b   : > { %2289 = vadd.xlane.f32.xlu1 %v2288_v61  ;;  %1711 = vadd.xlane.f32.xlu0 %v1710_v56  ;;  %v1875_v61 = vsel %vm595_vm1, %v7329_v51, 0.0  ;;  %v1872_v56 = vsel %vm595_vm1, %v7335_v24, 0.0 }
 0x13f   : > { %1708 = vadd.xlane.f32.xlu1 %v1707_v28  ;;  %2286 = vadd.xlane.f32.xlu0 %v2285_v50  ;;  %v2453_v28 = vsel %vm595_vm1, %v7332_v22, 0.0  ;;  %v2450_v50 = vsel %vm595_vm1, %v7338_v1, 0.0 }
 0x143   : > { %2295 = vadd.xlane.f32.xlu1 %v2294_v7  ;;  %1717 = vadd.xlane.f32.xlu0 %v1716_v49  ;;  %v1881_v7 = vsel %vm595_vm1, %v7353_v59, 0.0  ;;  %v1878_v49 = vsel %vm595_vm1, %v7359_v4, 0.0 }
 0x147   : > { %1714 = vadd.xlane.f32.xlu1 %v1713_v20  ;;  %2292 = vadd.xlane.f32.xlu0 %v2291_v43  ;;  %v2459_v20 = vsel %vm595_vm1, %v7356_v12, 0.0  ;;  %v2456_v43 = vsel %vm595_vm1, %v7362_v0, 0.0 }
 0x14b   : > { %1876 = vadd.xlane.f32.xlu1 %v1875_v61  ;;  %1873 = vadd.xlane.f32.xlu0 %v1872_v56  ;;  %v1887_v61 = vsel %vm595_vm1, %v7377_v5, 0.0  ;;  %v1884_v56 = vsel %vm595_vm1, %v7383_v33, 0.0 }
 0x14f   : > { %2454 = vadd.xlane.f32.xlu1 %v2453_v28  ;;  %2451 = vadd.xlane.f32.xlu0 %v2450_v50  ;;  %v2465_v28 = vsel %vm595_vm1, %v7380_v38, 0.0  ;;  %v2462_v50 = vsel %vm595_vm1, %v7386_v15, 0.0 }
 0x153   : > { %1882 = vadd.xlane.f32.xlu1 %v1881_v7  ;;  %1879 = vadd.xlane.f32.xlu0 %v1878_v49  ;;  %v1893_v7 = vsel %vm595_vm1, %v7393_v55, 0.0  ;;  %v1890_v49 = vsel %vm595_vm1, %v7399_v3, 0.0 }
 0x157   : > { %2460 = vadd.xlane.f32.xlu1 %v2459_v20  ;;  %2457 = vadd.xlane.f32.xlu0 %v2456_v43  ;;  %v2471_v20 = vsel %vm595_vm1, %v7396_v27, 0.0  ;;  %v2468_v43 = vsel %vm595_vm1, %v7402_v58, 0.0 }
 0x15b   : > { %1888 = vadd.xlane.f32.xlu1 %v1887_v61  ;;  %1885 = vadd.xlane.f32.xlu0 %v1884_v56 }
 0x15f   : > { %2466 = vadd.xlane.f32.xlu1 %v2465_v28  ;;  %2463 = vadd.xlane.f32.xlu0 %v2462_v50 }
 0x163   : > { %1894 = vadd.xlane.f32.xlu1 %v1893_v7  ;;  %1891 = vadd.xlane.f32.xlu0 %v1890_v49 }
 0x167   : > { %2472 = vadd.xlane.f32.xlu1 %v2471_v20  ;;  %2469 = vadd.xlane.f32.xlu0 %v2468_v43 }
 0x178   : > { %v1123_v61 = vpop.xlane.xlu0 %1122  ;;  %v601_v56 = vpop.xlane.xlu1 %600 }
 0x179   : > { %v1143_v28 = vmul.f32 0.03125, %v1123_v61  ;;  %v622_v50 = vmul.f32 0.03125, %v601_v56 }
 0x17b   : > { %v7469_v15 = vsub.f32 %v7131_v11, %v1143_v28  ;;  %v7472_v55 = vsub.f32 %v7128_v10, %v622_v50 }
 0x17c   : > { %v1120_v7 = vpop.xlane.xlu0 %1119  ;;  %v1129_v49 = vpop.xlane.xlu1 %1128 }
 0x17d   : > { %v1142_v3 = vmul.f32 0.03125, %v1120_v7  ;;  %v1145_v38 = vmul.f32 0.03125, %v1129_v49  ;;  %v1159_v27 = vmul.f32 %v7469_v15, %v7469_v15  ;;  %v638_v11 = vmul.f32 %v7472_v55, %v7472_v55 }
 0x17f   : > { %v7477_v20 = vsub.f32 %v7134_v14, %v1142_v3  ;;  %v7480_v43 = vsub.f32 %v7141_v19, %v1145_v38  ;;  %v1169_v61 = vsel %vm595_vm1, %v1159_v27, 0.0  ;;  %v648_v38 = vsel %vm595_vm1, %v638_v11, 0.0 }
 0x180   : > { %v598_v10 = vpop.xlane.xlu0 %597  ;;  %v607_v56 = vpop.xlane.xlu1 %606  ;;  %1170 = vadd.xlane.f32.xlu1 %v1169_v61 }
 0x181   : > { %9327 = vst [vmem:[#allocation22_spill] sm:$0xff] %v7477_v20  ;;  %9328 = vst [vmem:[#allocation23_spill] sm:$0xff] %v7480_v43  ;;  %v621_v28 = vmul.f32 0.03125, %v598_v10  ;;  %v624_v50 = vmul.f32 0.03125, %v607_v56  ;;  %v1158_v7 = vmul.f32 %v7477_v20, %v7477_v20  ;;  %v1161_v14 = vmul.f32 %v7480_v43, %v7480_v43 }
 0x183   : > { %v7490_v3 = vsub.f32 %v7147_v23, %v621_v28  ;;  %v7493_v19 = vsub.f32 %v7144_v21, %v624_v50  ;;  %v1166_v27 = vsel %vm595_vm1, %v1158_v7, 0.0  ;;  %v1175_v43 = vsel %vm595_vm1, %v1161_v14, 0.0 }
 0x184   : > { %v1126_v49 = vpop.xlane.xlu1 %1125  ;;  %v604_v61 = vpop.xlane.xlu0 %603  ;;  %649 = vadd.xlane.f32.xlu1 %v648_v38  ;;  %1167 = vadd.xlane.f32.xlu0 %v1166_v27 }
 0x185   : > { %v1144_v10 = vmul.f32 0.03125, %v1126_v49  ;;  %v623_v56 = vmul.f32 0.03125, %v604_v61  ;;  %v637_v20 = vmul.f32 %v7490_v3, %v7490_v3  ;;  %v640_v28 = vmul.f32 %v7493_v19, %v7493_v19 }
 0x187   : > { %v7501_v23 = vsub.f32 %v7156_v31, %v1144_v10  ;;  %v7504_v21 = vsub.f32 %v7159_v32, %v623_v56  ;;  %v645_v11 = vsel %vm595_vm1, %v637_v20, 0.0  ;;  %v654_v49 = vsel %vm595_vm1, %v640_v28, 0.0 }
 0x188   : > { %v1135_v50 = vpop.xlane.xlu1 %1134  ;;  %v1132_v7 = vpop.xlane.xlu0 %1131  ;;  %1176 = vadd.xlane.f32.xlu1 %v1175_v43  ;;  %646 = vadd.xlane.f32.xlu0 %v645_v11 }
 0x189   : > { %v1147_v38 = vmul.f32 0.03125, %v1135_v50  ;;  %v1146_v27 = vmul.f32 0.03125, %v1132_v7  ;;  %v1160_v14 = vmul.f32 %v7501_v23, %v7501_v23  ;;  %v639_v31 = vmul.f32 %v7504_v21, %v7504_v21 }
 0x18b   : > { %v7514_v32 = vsub.f32 %v7164_v36, %v1147_v38  ;;  %v7517_v20 = vsub.f32 %v7167_v37, %v1146_v27  ;;  %v1172_v61 = vsel %vm595_vm1, %v1160_v14, 0.0  ;;  %v651_v7 = vsel %vm595_vm1, %v639_v31, 0.0 }
 0x18c   : > { %v613_v43 = vpop.xlane.xlu1 %612  ;;  %v610_v10 = vpop.xlane.xlu0 %609  ;;  %655 = vadd.xlane.f32.xlu1 %v654_v49  ;;  %1173 = vadd.xlane.f32.xlu0 %v1172_v61 }
 0x18d   : > { %v626_v56 = vmul.f32 0.03125, %v613_v43  ;;  %v625_v11 = vmul.f32 0.03125, %v610_v10  ;;  %v1163_v50 = vmul.f32 %v7514_v32, %v7514_v32  ;;  %v1162_v38 = vmul.f32 %v7517_v20, %v7517_v20 }
 0x18f   : > { %v7525_v36 = vsub.f32 %v7174_v44, %v626_v56  ;;  %v7528_v37 = vsub.f32 %v7181_v47, %v625_v11  ;;  %v1181_v28 = vsel %vm595_vm1, %v1163_v50, 0.0  ;;  %v1178_v56 = vsel %vm595_vm1, %v1162_v38, 0.0 }
 0x190   : > { %v1141_v27 = vpop.xlane.xlu1 %1140  ;;  %v1138_v14 = vpop.xlane.xlu0 %1137  ;;  %1182 = vadd.xlane.f32.xlu1 %v1181_v28  ;;  %652 = vadd.xlane.f32.xlu0 %v651_v7 }
 0x191   : > { %v1149_v49 = vmul.f32 0.03125, %v1141_v27  ;;  %v1148_v61 = vmul.f32 0.03125, %v1138_v14  ;;  %v642_v31 = vmul.f32 %v7525_v36, %v7525_v36  ;;  %v641_v44 = vmul.f32 %v7528_v37, %v7528_v37 }
 0x193   : > { %v7538_v47 = vsub.f32 %v7184_v52, %v1149_v49  ;;  %v7541_v43 = vsub.f32 %v7187_v53, %v1148_v61  ;;  %v660_v10 = vsel %vm595_vm1, %v642_v31, 0.0  ;;  %v657_v14 = vsel %vm595_vm1, %v641_v44, 0.0 }
 0x194   : > { %v619_v11 = vpop.xlane.xlu1 %618  ;;  %v616_v50 = vpop.xlane.xlu0 %615  ;;  %661 = vadd.xlane.f32.xlu1 %v660_v10  ;;  %1179 = vadd.xlane.f32.xlu0 %v1178_v56 }
 0x195   : > { %v628_v7 = vmul.f32 0.03125, %v619_v11  ;;  %v627_v28 = vmul.f32 0.03125, %v616_v50  ;;  %v1165_v27 = vmul.f32 %v7538_v47, %v7538_v47  ;;  %v1164_v38 = vmul.f32 %v7541_v43, %v7541_v43 }
 0x197   : > { %v7549_v52 = vsub.f32 %v7198_v60, %v628_v7  ;;  %v7552_v53 = vsub.f32 %v7205_v63, %v627_v28  ;;  %v1187_v49 = vsel %vm595_vm1, %v1165_v27, 0.0  ;;  %v1184_v7 = vsel %vm595_vm1, %v1164_v38, 0.0 }
 0x198   : > { %v1300_v61 = vpop.xlane.xlu1 %1299  ;;  %v1297_v31 = vpop.xlane.xlu0 %1296  ;;  %1188 = vadd.xlane.f32.xlu1 %v1187_v49  ;;  %658 = vadd.xlane.f32.xlu0 %v657_v14 }
 0x199   : > { %v1320_v10 = vmul.f32 0.03125, %v1300_v61  ;;  %v1319_v56 = vmul.f32 0.03125, %v1297_v31  ;;  %v644_v44 = vmul.f32 %v7549_v52, %v7549_v52  ;;  %v643_v60 = vmul.f32 %v7552_v53, %v7552_v53 }
 0x19b   : > { %v7562_v63 = vsub.f32 %v7214_v6, %v1320_v10  ;;  %v7565_v11 = vsub.f32 %v7217_v8, %v1319_v56  ;;  %v666_v50 = vsel %vm595_vm1, %v644_v44, 0.0  ;;  %v663_v31 = vsel %vm595_vm1, %v643_v60, 0.0 }
 0x19c   : > { %v754_v28 = vpop.xlane.xlu1 %753  ;;  %v751_v27 = vpop.xlane.xlu0 %750  ;;  %667 = vadd.xlane.f32.xlu1 %v666_v50  ;;  %1185 = vadd.xlane.f32.xlu0 %v1184_v7 }
 0x19d   : > { %v774_v14 = vmul.f32 0.03125, %v754_v28  ;;  %v773_v49 = vmul.f32 0.03125, %v751_v27  ;;  %v1336_v61 = vmul.f32 %v7562_v63, %v7562_v63  ;;  %v1335_v38 = vmul.f32 %v7565_v11, %v7565_v11 }
 0x19f   : > { %v7573_v6 = vsub.f32 %v7228_v16, %v774_v14  ;;  %v7576_v8 = vsub.f32 %v7231_v17, %v773_v49  ;;  %v1346_v10 = vsel %vm595_vm1, %v1336_v61, 0.0  ;;  %v1343_v14 = vsel %vm595_vm1, %v1335_v38, 0.0 }
 0x1a0   : > { %v1306_v56 = vpop.xlane.xlu1 %1305  ;;  %v1303_v44 = vpop.xlane.xlu0 %1302  ;;  %1347 = vadd.xlane.f32.xlu1 %v1346_v10  ;;  %664 = vadd.xlane.f32.xlu0 %v663_v31 }
 0x1a1   : > { %9329 = vst [vmem:[#allocation24_spill] sm:$0xff] %v7576_v8  ;;  %v1322_v50 = vmul.f32 0.03125, %v1306_v56  ;;  %v1321_v7 = vmul.f32 0.03125, %v1303_v44  ;;  %v790_v60 = vmul.f32 %v7573_v6, %v7573_v6  ;;  %v789_v16 = vmul.f32 %v7576_v8, %v7576_v8 }
 0x1a3   : > { %v7586_v17 = vsub.f32 %v7254_v39, %v1322_v50  ;;  %v7589_v28 = vsub.f32 %v7257_v40, %v1321_v7  ;;  %v800_v27 = vsel %vm595_vm1, %v790_v60, 0.0  ;;  %v797_v44 = vsel %vm595_vm1, %v789_v16, 0.0  ;;  %v9331_v39 = vld [vmem:[#allocation9_spill] sm:$0xff]  ;;  %v9333_v40 = vld [vmem:[#allocation10_spill] sm:$0xff] }
 0x1a4   : > { %v760_v49 = vpop.xlane.xlu1 %759  ;;  %v757_v61 = vpop.xlane.xlu0 %756  ;;  %801 = vadd.xlane.f32.xlu1 %v800_v27  ;;  %1344 = vadd.xlane.f32.xlu0 %v1343_v14 }
 0x1a5   : > { %9330 = vst [vmem:[#allocation25_spill] sm:$0xff] %v7589_v28  ;;  %v776_v31 = vmul.f32 0.03125, %v760_v49  ;;  %v775_v10 = vmul.f32 0.03125, %v757_v61  ;;  %v1338_v56 = vmul.f32 %v7586_v17, %v7586_v17  ;;  %v1337_v38 = vmul.f32 %v7589_v28, %v7589_v28 }
 0x1a7   : > { %v7597_v50 = vsub.f32 %v9331_v39, %v776_v31  ;;  %v7600_v7 = vsub.f32 %v9333_v40, %v775_v10  ;;  %v1352_v60 = vsel %vm595_vm1, %v1338_v56, 0.0  ;;  %v9335_v39 = vld [vmem:[#allocation11_spill] sm:$0xff]  ;;  %v9337_v40 = vld [vmem:[#allocation12_spill] sm:$0xff]  ;;  %v1349_v8 = vsel %vm595_vm1, %v1337_v38, 0.0 }
 0x1a8   : > { %v1312_v27 = vpop.xlane.xlu1 %1311  ;;  %v1309_v14 = vpop.xlane.xlu0 %1308  ;;  %1353 = vadd.xlane.f32.xlu1 %v1352_v60  ;;  %798 = vadd.xlane.f32.xlu0 %v797_v44 }
 0x1a9   : > { %9332 = vst [vmem:[#allocation9_spill] sm:$0xff] %v7597_v50  ;;  %9334 = vst [vmem:[#allocation10_spill] sm:$0xff] %v7600_v7  ;;  %v1324_v49 = vmul.f32 0.03125, %v1312_v27  ;;  %v1323_v61 = vmul.f32 0.03125, %v1309_v14  ;;  %v792_v16 = vmul.f32 %v7597_v50, %v7597_v50  ;;  %v791_v31 = vmul.f32 %v7600_v7, %v7600_v7 }
 0x1ab   : > { %v7610_v10 = vsub.f32 %v9335_v39, %v1324_v49  ;;  %v7613_v56 = vsub.f32 %v9337_v40, %v1323_v61  ;;  %v806_v28 = vsel %vm595_vm1, %v792_v16, 0.0  ;;  %v803_v7 = vsel %vm595_vm1, %v791_v31, 0.0  ;;  %v9339_v49 = vld [vmem:[#allocation13_spill] sm:$0xff]  ;;  %v9341_v61 = vld [vmem:[#allocation14_spill] sm:$0xff] }
 0x1ac   : > { %v766_v60 = vpop.xlane.xlu1 %765  ;;  %v763_v44 = vpop.xlane.xlu0 %762  ;;  %807 = vadd.xlane.f32.xlu1 %v806_v28  ;;  %1350 = vadd.xlane.f32.xlu0 %v1349_v8 }
 0x1ad   : > { %9336 = vst [vmem:[#allocation11_spill] sm:$0xff] %v7610_v10  ;;  %9338 = vst [vmem:[#allocation12_spill] sm:$0xff] %v7613_v56  ;;  %v778_v27 = vmul.f32 0.03125, %v766_v60  ;;  %v777_v14 = vmul.f32 0.03125, %v763_v44  ;;  %v1340_v50 = vmul.f32 %v7610_v10, %v7610_v10  ;;  %v1339_v38 = vmul.f32 %v7613_v56, %v7613_v56 }
 0x1af   : > { %v7621_v39 = vsub.f32 %v9339_v49, %v778_v27  ;;  %v7624_v40 = vsub.f32 %v9341_v61, %v777_v14  ;;  %v1358_v16 = vsel %vm595_vm1, %v1340_v50, 0.0  ;;  %v9343_v49 = vld [vmem:[#allocation15_spill] sm:$0xff]  ;;  %v9344_v61 = vld [vmem:[#allocation16_spill] sm:$0xff]  ;;  %v1355_v10 = vsel %vm595_vm1, %v1339_v38, 0.0 }
 0x1b0   : > { %v1318_v28 = vpop.xlane.xlu1 %1317  ;;  %v1315_v8 = vpop.xlane.xlu0 %1314  ;;  %1359 = vadd.xlane.f32.xlu1 %v1358_v16  ;;  %804 = vadd.xlane.f32.xlu0 %v803_v7 }
 0x1b1   : > { %9340 = vst [vmem:[#allocation13_spill] sm:$0xff] %v7621_v39  ;;  %9342 = vst [vmem:[#allocation14_spill] sm:$0xff] %v7624_v40  ;;  %v1326_v60 = vmul.f32 0.03125, %v1318_v28  ;;  %v1325_v44 = vmul.f32 0.03125, %v1315_v8  ;;  %v794_v31 = vmul.f32 %v7621_v39, %v7621_v39  ;;  %v793_v27 = vmul.f32 %v7624_v40, %v7624_v40 }
 0x1b3   : > { %v7634_v14 = vsub.f32 %v9343_v49, %v1326_v60  ;;  %v7637_v50 = vsub.f32 %v9344_v61, %v1325_v44  ;;  %v812_v56 = vsel %vm595_vm1, %v794_v31, 0.0  ;;  %v809_v40 = vsel %vm595_vm1, %v793_v27, 0.0 }
 0x1b4   : > { %v772_v16 = vpop.xlane.xlu1 %771  ;;  %813 = vadd.xlane.f32.xlu1 %v812_v56  ;;  %1356 = vadd.xlane.f32.xlu0 %v1355_v10  ;;  %v769_v7 = vpop.xlane.xlu0 %768 }
 0x1b5   : > { %v780_v28 = vmul.f32 0.03125, %v772_v16  ;;  %v779_v8 = vmul.f32 0.03125, %v769_v7  ;;  %v1342_v39 = vmul.f32 %v7634_v14, %v7634_v14  ;;  %v1341_v56 = vmul.f32 %v7637_v50, %v7637_v50 }
 0x1b7   : > { %v7645_v60 = vsub.f32 %v7366_v2, %v780_v28  ;;  %v7648_v44 = vsub.f32 %v7370_v13, %v779_v8  ;;  %v1364_v31 = vsel %vm595_vm1, %v1342_v39, 0.0  ;;  %v1361_v7 = vsel %vm595_vm1, %v1341_v56, 0.0 }
 0x1b8   : > { %v2278_v10 = vpop.xlane.xlu1 %2277  ;;  %1365 = vadd.xlane.f32.xlu1 %v1364_v31  ;;  %810 = vadd.xlane.f32.xlu0 %v809_v40  ;;  %v1700_v38 = vpop.xlane.xlu0 %1699 }
 0x1b9   : > { %v2298_v49 = vmul.f32 0.03125, %v2278_v10  ;;  %v1720_v61 = vmul.f32 0.03125, %v1700_v38  ;;  %v796_v27 = vmul.f32 %v7645_v60, %v7645_v60  ;;  %v795_v2 = vmul.f32 %v7648_v44, %v7648_v44 }
 0x1bb   : > { %v7658_v13 = vsub.f32 %v7238_v25, %v2298_v49  ;;  %v7661_v39 = vsub.f32 %v7241_v26, %v1720_v61  ;;  %v818_v16 = vsel %vm595_vm1, %v796_v27, 0.0  ;;  %v815_v38 = vsel %vm595_vm1, %v795_v2, 0.0 }
 0x1bc   : > { %v1697_v40 = vpop.xlane.xlu1 %1696  ;;  %819 = vadd.xlane.f32.xlu1 %v818_v16  ;;  %1362 = vadd.xlane.f32.xlu0 %v1361_v7  ;;  %v2275_v28 = vpop.xlane.xlu0 %2274 }
 0x1bd   : > { %v1719_v8 = vmul.f32 0.03125, %v1697_v40  ;;  %v2297_v31 = vmul.f32 0.03125, %v2275_v28  ;;  %v2314_v10 = vmul.f32 %v7658_v13, %v7658_v13  ;;  %v1736_v56 = vmul.f32 %v7661_v39, %v7661_v39 }
 0x1bf   : > { %v7669_v25 = vsub.f32 %v7247_v30, %v1719_v8  ;;  %v7672_v26 = vsub.f32 %v7244_v29, %v2297_v31  ;;  %v2324_v49 = vsel %vm595_vm1, %v2314_v10, 0.0  ;;  %v1746_v8 = vsel %vm595_vm1, %v1736_v56, 0.0 }
 0x1c0   : > { %v2284_v61 = vpop.xlane.xlu1 %2283  ;;  %2325 = vadd.xlane.f32.xlu1 %v2324_v49  ;;  %816 = vadd.xlane.f32.xlu0 %v815_v38  ;;  %v1706_v27 = vpop.xlane.xlu0 %1705  ;;  %v9293_v31 = vmov 0.0  }
 0x1c1   : > { %v2300_v16 = vmul.f32 0.03125, %v2284_v61  ;;  %v1722_v7 = vmul.f32 0.03125, %v1706_v27  ;;  %v1735_v2 = vmul.f32 %v7669_v25, %v7669_v25  ;;  %v2313_v30 = vmul.f32 %v7672_v26, %v7672_v26  ;;  %331 = vst [vmem:[#allocation2 + $0x40] sm:$0x3] %v9293_v31  ;;  %330 = vst [vmem:[#allocation2] sm:$0x1] %v9293_v31  ;;  %6263 = vmatprep.subr.bf16.mxu1 %v9293_v31 }
 0x1c2   : > { %332 = vst [vmem:[#allocation2 + $0x42] sm:$0x1] %v9293_v31  ;;  %333 = vst [vmem:[#allocation2 + $0x82] sm:$0x3] %v9293_v31  ;;  %6227 = vmatprep.subr.bf16.mxu0 %v9293_v31 }
 0x1c3   : > { %v7682_v29 = vsub.f32 %v7260_v41, %v2300_v16  ;;  %v7685_v40 = vsub.f32 %v7263_v42, %v1722_v7  ;;  %v1743_v28 = vsel %vm595_vm1, %v1735_v2, 0.0  ;;  %v2321_v56 = vsel %vm595_vm1, %v2313_v30, 0.0 }
 0x1c4   : > { %v1703_v41 = vpop.xlane.xlu1 %1702  ;;  %1744 = vadd.xlane.f32.xlu1 %v1743_v28  ;;  %1747 = vadd.xlane.f32.xlu0 %v1746_v8  ;;  %v2281_v42 = vpop.xlane.xlu0 %2280 }
 0x1c5   : > { %v1721_v10 = vmul.f32 0.03125, %v1703_v41  ;;  %v2299_v38 = vmul.f32 0.03125, %v2281_v42  ;;  %v2316_v49 = vmul.f32 %v7682_v29, %v7682_v29  ;;  %v1738_v7 = vmul.f32 %v7685_v40, %v7685_v40 }
 0x1c7   : > { %v7699_v61 = vsub.f32 %v7269_v48, %v1721_v10  ;;  %v7702_v27 = vsub.f32 %v7266_v46, %v2299_v38  ;;  %v2330_v16 = vsel %vm595_vm1, %v2316_v49, 0.0  ;;  %v1752_v38 = vsel %vm595_vm1, %v1738_v7, 0.0 }
 0x1c8   : > { %v2290_v2 = vpop.xlane.xlu1 %2289  ;;  %2331 = vadd.xlane.f32.xlu1 %v2330_v16  ;;  %2322 = vadd.xlane.f32.xlu0 %v2321_v56  ;;  %v1712_v28 = vpop.xlane.xlu0 %1711 }
 0x1c9   : > { %v2302_v8 = vmul.f32 0.03125, %v2290_v2  ;;  %v1724_v41 = vmul.f32 0.03125, %v1712_v28  ;;  %v1737_v30 = vmul.f32 %v7699_v61, %v7699_v61  ;;  %v2315_v48 = vmul.f32 %v7702_v27, %v7702_v27 }
 0x1cb   : > { %v7712_v46 = vsub.f32 %v7282_v62, %v2302_v8  ;;  %v7715_v42 = vsub.f32 %v7285_v9, %v1724_v41  ;;  %v1749_v10 = vsel %vm595_vm1, %v1737_v30, 0.0  ;;  %v2327_v31 = vsel %vm595_vm1, %v2315_v48, 0.0 }
 0x1cc   : > { %v1709_v49 = vpop.xlane.xlu1 %1708  ;;  %1750 = vadd.xlane.f32.xlu1 %v1749_v10  ;;  %1753 = vadd.xlane.f32.xlu0 %v1752_v38  ;;  %v2287_v56 = vpop.xlane.xlu0 %2286 }
 0x1cd   : > { %v1723_v16 = vmul.f32 0.03125, %v1709_v49  ;;  %v2301_v2 = vmul.f32 0.03125, %v2287_v56  ;;  %v2318_v28 = vmul.f32 %v7712_v46, %v7712_v46  ;;  %v1740_v7 = vmul.f32 %v7715_v42, %v7715_v42 }
 0x1cf   : > { %v7723_v62 = vsub.f32 %v7291_v57, %v1723_v16  ;;  %v7726_v9 = vsub.f32 %v7288_v18, %v2301_v2  ;;  %v2336_v8 = vsel %vm595_vm1, %v2318_v28, 0.0  ;;  %v1758_v16 = vsel %vm595_vm1, %v1740_v7, 0.0 }
 0x1d0   : > { %v2296_v41 = vpop.xlane.xlu1 %2295  ;;  %2337 = vadd.xlane.f32.xlu1 %v2336_v8  ;;  %2328 = vadd.xlane.f32.xlu0 %v2327_v31  ;;  %v1718_v30 = vpop.xlane.xlu0 %1717 }
 0x1d1   : > { %v2304_v10 = vmul.f32 0.03125, %v2296_v41  ;;  %v1726_v38 = vmul.f32 0.03125, %v1718_v30  ;;  %v1739_v48 = vmul.f32 %v7723_v62, %v7723_v62  ;;  %v2317_v57 = vmul.f32 %v7726_v9, %v7726_v9 }
 0x1d3   : > { %v7736_v18 = vsub.f32 %v7305_v34, %v2304_v10  ;;  %v7739_v49 = vsub.f32 %v7308_v35, %v1726_v38  ;;  %v1755_v56 = vsel %vm595_vm1, %v1739_v48, 0.0  ;;  %v2333_v30 = vsel %vm595_vm1, %v2317_v57, 0.0 }
 0x1d4   : > { %v1715_v31 = vpop.xlane.xlu1 %1714  ;;  %1756 = vadd.xlane.f32.xlu1 %v1755_v56  ;;  %1759 = vadd.xlane.f32.xlu0 %v1758_v16  ;;  %v2293_v2 = vpop.xlane.xlu0 %2292 }
 0x1d5   : > { %v1725_v28 = vmul.f32 0.03125, %v1715_v31  ;;  %v2303_v8 = vmul.f32 0.03125, %v2293_v2  ;;  %v2320_v41 = vmul.f32 %v7736_v18, %v7736_v18  ;;  %v1742_v7 = vmul.f32 %v7739_v49, %v7739_v49 }
 0x1d7   : > { %v7747_v34 = vsub.f32 %v7314_v54, %v1725_v28  ;;  %v7750_v35 = vsub.f32 %v7311_v45, %v2303_v8  ;;  %v2342_v10 = vsel %vm595_vm1, %v2320_v41, 0.0  ;;  %v1764_v28 = vsel %vm595_vm1, %v1742_v7, 0.0 }
 0x1d8   : > { %v1877_v38 = vpop.xlane.xlu1 %1876  ;;  %2343 = vadd.xlane.f32.xlu1 %v2342_v10  ;;  %2334 = vadd.xlane.f32.xlu0 %v2333_v30  ;;  %v1874_v48 = vpop.xlane.xlu0 %1873 }
 0x1d9   : > { %v1897_v56 = vmul.f32 0.03125, %v1877_v38  ;;  %v1896_v16 = vmul.f32 0.03125, %v1874_v48  ;;  %v1741_v57 = vmul.f32 %v7747_v34, %v7747_v34  ;;  %v2319_v54 = vmul.f32 %v7750_v35, %v7750_v35 }
 0x1db   : > { %v7760_v45 = vsub.f32 %v7329_v51, %v1897_v56  ;;  %v7763_v31 = vsub.f32 %v7335_v24, %v1896_v16  ;;  %v1761_v2 = vsel %vm595_vm1, %v1741_v57, 0.0  ;;  %v2339_v48 = vsel %vm595_vm1, %v2319_v54, 0.0 }
 0x1dc   : > { %v2455_v8 = vpop.xlane.xlu1 %2454  ;;  %1762 = vadd.xlane.f32.xlu1 %v1761_v2  ;;  %1765 = vadd.xlane.f32.xlu0 %v1764_v28  ;;  %v2452_v41 = vpop.xlane.xlu0 %2451 }
 0x1dd   : > { %v2475_v30 = vmul.f32 0.03125, %v2455_v8  ;;  %v2474_v10 = vmul.f32 0.03125, %v2452_v41  ;;  %v1913_v38 = vmul.f32 %v7760_v45, %v7760_v45  ;;  %v1912_v7 = vmul.f32 %v7763_v31, %v7763_v31 }
 0x1df   : > { %v7771_v51 = vsub.f32 %v7332_v22, %v2475_v30  ;;  %v7774_v24 = vsub.f32 %v7338_v1, %v2474_v10  ;;  %v1923_v56 = vsel %vm595_vm1, %v1913_v38, 0.0  ;;  %v1920_v30 = vsel %vm595_vm1, %v1912_v7, 0.0 }
 0x1e0   : > { %v1883_v16 = vpop.xlane.xlu1 %1882  ;;  %1924 = vadd.xlane.f32.xlu1 %v1923_v56  ;;  %2340 = vadd.xlane.f32.xlu0 %v2339_v48  ;;  %v1880_v57 = vpop.xlane.xlu0 %1879 }
 0x1e1   : > { %9345 = vst [vmem:[#allocation15_spill] sm:$0xff] %v7774_v24  ;;  %v1899_v2 = vmul.f32 0.03125, %v1883_v16  ;;  %v1898_v28 = vmul.f32 0.03125, %v1880_v57  ;;  %v2491_v54 = vmul.f32 %v7771_v51, %v7771_v51  ;;  %v2490_v22 = vmul.f32 %v7774_v24, %v7774_v24 }
 0x1e3   : > { %v7784_v1 = vsub.f32 %v7353_v59, %v1899_v2  ;;  %v7787_v8 = vsub.f32 %v7359_v4, %v1898_v28  ;;  %v2501_v41 = vsel %vm595_vm1, %v2491_v54, 0.0  ;;  %v2498_v57 = vsel %vm595_vm1, %v2490_v22, 0.0 }
 0x1e4   : > { %v2461_v10 = vpop.xlane.xlu1 %2460  ;;  %2502 = vadd.xlane.f32.xlu1 %v2501_v41  ;;  %1921 = vadd.xlane.f32.xlu0 %v1920_v30  ;;  %v2458_v38 = vpop.xlane.xlu0 %2457 }
 0x1e5   : > { %9346 = vst [vmem:[#allocation16_spill] sm:$0xff] %v7784_v1  ;;  %9347 = vst [vmem:[#allocation26_spill] sm:$0xff] %v7787_v8  ;;  %v2477_v48 = vmul.f32 0.03125, %v2461_v10  ;;  %v2476_v56 = vmul.f32 0.03125, %v2458_v38  ;;  %v1915_v16 = vmul.f32 %v7784_v1, %v7784_v1  ;;  %v1914_v7 = vmul.f32 %v7787_v8, %v7787_v8 }
 0x1e7   : > { %v7795_v59 = vsub.f32 %v7356_v12, %v2477_v48  ;;  %v7798_v4 = vsub.f32 %v7362_v0, %v2476_v56  ;;  %v1929_v2 = vsel %vm595_vm1, %v1915_v16, 0.0  ;;  %v1926_v48 = vsel %vm595_vm1, %v1914_v7, 0.0 }
 0x1e8   : > { %v1889_v28 = vpop.xlane.xlu1 %1888  ;;  %1930 = vadd.xlane.f32.xlu1 %v1929_v2  ;;  %2499 = vadd.xlane.f32.xlu0 %v2498_v57  ;;  %v1886_v54 = vpop.xlane.xlu0 %1885 }
 0x1e9   : > { %9348 = vst [vmem:[#allocation27_spill] sm:$0xff] %v7795_v59  ;;  %9349 = vst [vmem:[#allocation28_spill] sm:$0xff] %v7798_v4  ;;  %v1901_v41 = vmul.f32 0.03125, %v1889_v28  ;;  %v1900_v30 = vmul.f32 0.03125, %v1886_v54  ;;  %v2493_v22 = vmul.f32 %v7795_v59, %v7795_v59  ;;  %v2492_v12 = vmul.f32 %v7798_v4, %v7798_v4 }
 0x1eb   : > { %v7808_v0 = vsub.f32 %v7377_v5, %v1901_v41  ;;  %v7811_v10 = vsub.f32 %v7383_v33, %v1900_v30  ;;  %v2507_v38 = vsel %vm595_vm1, %v2493_v22, 0.0  ;;  %v2504_v54 = vsel %vm595_vm1, %v2492_v12, 0.0  ;;  %v9352_v5 = vld [vmem:[#allocation17_spill] sm:$0xff]  ;;  %v9354_v33 = vld [vmem:[#allocation18_spill] sm:$0xff] }
 0x1ec   : > { %v2467_v56 = vpop.xlane.xlu1 %2466  ;;  %2508 = vadd.xlane.f32.xlu1 %v2507_v38  ;;  %1927 = vadd.xlane.f32.xlu0 %v1926_v48  ;;  %v2464_v16 = vpop.xlane.xlu0 %2463 }
 0x1ed   : > { %9350 = vst [vmem:[#allocation29_spill] sm:$0xff] %v7808_v0  ;;  %9351 = vst [vmem:[#allocation30_spill] sm:$0xff] %v7811_v10  ;;  %v2479_v57 = vmul.f32 0.03125, %v2467_v56  ;;  %v2478_v2 = vmul.f32 0.03125, %v2464_v16  ;;  %v1917_v28 = vmul.f32 %v7808_v0, %v7808_v0  ;;  %v1916_v7 = vmul.f32 %v7811_v10, %v7811_v10 }
 0x1ef   : > { %v7819_v41 = vsub.f32 %v9352_v5, %v2479_v57  ;;  %v7822_v30 = vsub.f32 %v9354_v33, %v2478_v2  ;;  %v1935_v22 = vsel %vm595_vm1, %v1917_v28, 0.0  ;;  %v9356_v5 = vld [vmem:[#allocation19_spill] sm:$0xff]  ;;  %v9358_v33 = vld [vmem:[#allocation21_spill] sm:$0xff] }
 0x1f0   : > { %1936 = vadd.xlane.f32.xlu1 %v1935_v22  ;;  %v1895_v38 = vpop.xlane.xlu1 %1894  ;;  %2505 = vadd.xlane.f32.xlu0 %v2504_v54  ;;  %v1892_v48 = vpop.xlane.xlu0 %1891  ;;  %v1932_v22 = vsel %vm595_vm1, %v1916_v7, 0.0 }
 0x1f1   : > { %9353 = vst [vmem:[#allocation17_spill] sm:$0xff] %v7819_v41  ;;  %9355 = vst [vmem:[#allocation18_spill] sm:$0xff] %v7822_v30  ;;  %v1903_v56 = vmul.f32 0.03125, %v1895_v38  ;;  %v1902_v16 = vmul.f32 0.03125, %v1892_v48  ;;  %v2495_v12 = vmul.f32 %v7819_v41, %v7819_v41  ;;  %v2494_v57 = vmul.f32 %v7822_v30, %v7822_v30 }
 0x1f3   : > { %v7832_v2 = vsub.f32 %v9356_v5, %v1903_v56  ;;  %v7835_v28 = vsub.f32 %v9358_v33, %v1902_v16  ;;  %v2513_v10 = vsel %vm595_vm1, %v2495_v12, 0.0  ;;  %v2510_v30 = vsel %vm595_vm1, %v2494_v57, 0.0  ;;  %v9360_v56 = vld [vmem:[#allocation20_spill] sm:$0xff] }
 0x1f4   : > { %2514 = vadd.xlane.f32.xlu1 %v2513_v10  ;;  %v2473_v54 = vpop.xlane.xlu1 %2472  ;;  %1933 = vadd.xlane.f32.xlu0 %v1932_v22  ;;  %v2470_v38 = vpop.xlane.xlu0 %2469 }
 0x1f5   : > { %9357 = vst [vmem:[#allocation19_spill] sm:$0xff] %v7832_v2  ;;  %9359 = vst [vmem:[#allocation21_spill] sm:$0xff] %v7835_v28  ;;  %v2481_v48 = vmul.f32 0.03125, %v2473_v54  ;;  %v2480_v4 = vmul.f32 0.03125, %v2470_v38  ;;  %v1919_v41 = vmul.f32 %v7832_v2, %v7832_v2  ;;  %v1918_v10 = vmul.f32 %v7835_v28, %v7835_v28 }
 0x1f7   : > { %v7843_v5 = vsub.f32 %v9360_v56, %v2481_v48  ;;  %v7846_v16 = vsub.f32 %v7402_v58, %v2480_v4  ;;  %v1941_v12 = vsel %vm595_vm1, %v1919_v41, 0.0  ;;  %v1938_v57 = vsel %vm595_vm1, %v1918_v10, 0.0 }
 0x1f8   : > { %1942 = vadd.xlane.f32.xlu1 %v1941_v12  ;;  %2511 = vadd.xlane.f32.xlu0 %v2510_v30 }
 0x1f9   : > { %9361 = vst [vmem:[#allocation20_spill] sm:$0xff] %v7843_v5  ;;  %9362 = vst [vmem:[#allocation31_spill] sm:$0xff] %v7846_v16  ;;  %v2497_v7 = vmul.f32 %v7843_v5, %v7843_v5  ;;  %v2496_v22 = vmul.f32 %v7846_v16, %v7846_v16 }
 0x1fb   : > { %v2519_v33 = vsel %vm595_vm1, %v2497_v7, 0.0  ;;  %v2516_v58 = vsel %vm595_vm1, %v2496_v22, 0.0 }
 0x1fc   : > { %2520 = vadd.xlane.f32.xlu1 %v2519_v33  ;;  %1939 = vadd.xlane.f32.xlu0 %v1938_v57  ;;  %v9363_v33 = vld [vmem:[#allocation7_spill] sm:$0xff] }
 0x1fd   : > { %v7859_v57 = vsub.s32 1, %v9363_v33 }
 0x1ff   : > { %9364 = vst [vmem:[#allocation7_spill] sm:$0xff] %v7859_v57 }
 0x200   : > { %2517 = vadd.xlane.f32.xlu0 %v2516_v58 }
 0x20d   : > { %v1171_v4 = vpop.xlane.xlu1 %1170 }
 0x20e   : > { %v1191_v41 = vmul.f32 0.03125, %v1171_v4  ;;  %v7862_v4 = vsub.s32 2, %v9363_v33 }
 0x210   : > { %v1199_v54 = vadd.f32 1e-05, %v1191_v41  ;;  %9365 = vst [vmem:[#allocation32_spill] sm:$0xff] %v7862_v4 }
 0x211   : > { %v650_v38 = vpop.xlane.xlu1 %649  ;;  %v1168_v30 = vpop.xlane.xlu0 %1167 }
 0x212   : > { %6688 = vrsqrt.f32 %v1199_v54  ;;  %v670_v48 = vmul.f32 0.03125, %v650_v38  ;;  %v1190_v56 = vmul.f32 0.03125, %v1168_v30 }
 0x214   : > { %v678_v12 = vadd.f32 1e-05, %v670_v48  ;;  %v1198_v7 = vadd.f32 1e-05, %v1190_v56  ;;  %v6902_v48 = vld [vmem:[%s9258_s2] sm:$0x7] }
 0x215   : > { %v1177_v28 = vpop.xlane.xlu1 %1176  ;;  %v647_v10 = vpop.xlane.xlu0 %646 }
 0x216   : > { %6690 = vrsqrt.f32 %v678_v12  ;;  %v1193_v5 = vmul.f32 0.03125, %v1177_v28  ;;  %v669_v16 = vmul.f32 0.03125, %v647_v10  ;;  %v7868_v28 = vrot.slane %v6902_v48, %v7859_v57 }
 0x217   : > { %6692 = vrsqrt.f32 %v1198_v7 }
 0x218   : > { %v1201_v22 = vadd.f32 1e-05, %v1193_v5  ;;  %v677_v58 = vadd.f32 1e-05, %v669_v16  ;;  %v7871_v16 = vrot.slane %v6902_v48, %v7862_v4 }
 0x219   : > { %v656_v41 = vpop.xlane.xlu1 %655  ;;  %v1174_v54 = vpop.xlane.xlu0 %1173 }
 0x21a   : > { %6694 = vrsqrt.f32 %v1201_v22  ;;  %v672_v38 = vmul.f32 0.03125, %v656_v41  ;;  %v1192_v30 = vmul.f32 0.03125, %v1174_v54 }
 0x21b   : > { %6696 = vrsqrt.f32 %v677_v58 }
 0x21c   : > { %v6689_v56 = vpop.eup %6688  ;;  %v680_v12 = vadd.f32 1e-05, %v672_v38  ;;  %v1200_v5 = vadd.f32 1e-05, %v1192_v30 }
 0x21d   : > { %v1183_v7 = vpop.xlane.xlu1 %1182  ;;  %v653_v10 = vpop.xlane.xlu0 %652  ;;  %v1215_v33 = vmul.f32 %v6689_v56, %v7469_v15  ;;  %v9366_v15 = vld [vmem:[#allocation22_spill] sm:$0xff] }
 0x21e   : > { %6698 = vrsqrt.f32 %v680_v12  ;;  %v1195_v22 = vmul.f32 0.03125, %v1183_v7  ;;  %v671_v41 = vmul.f32 0.03125, %v653_v10 }
 0x21f   : > { %6700 = vrsqrt.f32 %v1200_v5  ;;  %v1223_v54 = vmul.f32 %v1215_v33, %v7868_v28 }
 0x220   : > { %v6691_v2 = vpop.eup %6690  ;;  %v1203_v57 = vadd.f32 1e-05, %v1195_v22  ;;  %v679_v0 = vadd.f32 1e-05, %v671_v41 }
 0x221   : > { %v6693_v58 = vpop.eup %6692  ;;  %v662_v8 = vpop.xlane.xlu1 %661  ;;  %v1231_v30 = vadd.f32 %v1223_v54, %v7871_v16  ;;  %v694_v48 = vmul.f32 %v6691_v2, %v7472_v55  ;;  %v9367_v2 = vld [vmem:[#allocation23_spill] sm:$0xff] }
 0x222   : > { %v1180_v38 = vpop.xlane.xlu0 %1179  ;;  %6702 = vrsqrt.f32 %v1203_v57  ;;  %v674_v4 = vmul.f32 0.03125, %v662_v8  ;;  %v1214_v56 = vmul.f32 %v6693_v58, %v9366_v15 }
 0x223   : > { %v1194_v59 = vmul.f32 0.03125, %v1180_v38  ;;  %6704 = vrsqrt.f32 %v679_v0  ;;  %v1239_v12 = vmax.f32 %v1231_v30, 0.0  ;;  %v706_v5 = vmul.f32 %v7868_v28, %v694_v48 }
 0x224   : > { %v6695_v7 = vpop.eup %6694  ;;  %v682_v10 = vadd.f32 1e-05, %v674_v4  ;;  %v1222_v22 = vmul.f32 %v1214_v56, %v7868_v28 }
 0x225   : > { %v1202_v33 = vadd.f32 1e-05, %v1194_v59  ;;  %v6697_v41 = vpop.eup %6696  ;;  %1256 = vrot.lane.b32.xlu1 %v1239_v12, %s6912_s23  ;;  %v1189_v54 = vpop.xlane.xlu1 %1188  ;;  %v1217_v8 = vmul.f32 %v6695_v7, %v9367_v2  ;;  %v718_v57 = vadd.f32 %v7871_v16, %v706_v5 }
 0x226   : > { %v659_v55 = vpop.xlane.xlu0 %658  ;;  %6706 = vrsqrt.f32 %v682_v10  ;;  %v1197_v0 = vmul.f32 0.03125, %v1189_v54  ;;  %v1230_v38 = vadd.f32 %v1222_v22, %v7871_v16  ;;  %v693_v30 = vmul.f32 %v6697_v41, %v7490_v3 }
 0x227   : > { %v673_v58 = vmul.f32 0.03125, %v659_v55  ;;  %6708 = vrsqrt.f32 %v1202_v33  ;;  %v1225_v59 = vmul.f32 %v1217_v8, %v7868_v28  ;;  %v726_v4 = vmax.f32 %v718_v57, 0.0 }
 0x228   : > { %v6699_v48 = vpop.eup %6698  ;;  %v1205_v15 = vadd.f32 1e-05, %v1197_v0  ;;  %v1238_v12 = vmax.f32 %v1230_v38, 0.0  ;;  %v705_v10 = vmul.f32 %v7868_v28, %v693_v30 }
 0x229   : > { %v681_v56 = vadd.f32 1e-05, %v673_v58  ;;  %v6701_v24 = vpop.eup %6700  ;;  %v668_v1 = vpop.xlane.xlu1 %667  ;;  %v1233_v5 = vadd.f32 %v1225_v59, %v7871_v16  ;;  %734 = vst.msk [vmem:[#allocation2 + $0x9] sm:$0xff] %vm595_vm1, %v726_v4  ;;  %v696_v33 = vmul.f32 %v6699_v48, %v7493_v19 }
 0x22a   : > { %v1186_v7 = vpop.xlane.xlu0 %1185  ;;  %6710 = vrsqrt.f32 %v1205_v15  ;;  %v676_v22 = vmul.f32 0.03125, %v668_v1  ;;  %1254 = vrot.lane.b32.xlu0 %v1238_v12, %s6912_s23  ;;  %v1216_v41 = vmul.f32 %v6701_v24, %v7501_v23  ;;  %v717_v55 = vadd.f32 %v7871_v16, %v705_v10 }
 0x22b   : > { %v1196_v3 = vmul.f32 0.03125, %v1186_v7  ;;  %6712 = vrsqrt.f32 %v681_v56  ;;  %v1241_v54 = vmax.f32 %v1233_v5, 0.0  ;;  %v708_v2 = vmul.f32 %v7868_v28, %v696_v33 }
 0x22c   : > { %v6703_v8 = vpop.eup %6702  ;;  %v684_v57 = vadd.f32 1e-05, %v676_v22  ;;  %v1224_v58 = vmul.f32 %v1216_v41, %v7868_v28  ;;  %v725_v4 = vmax.f32 %v717_v55, 0.0 }
 0x22d   : > { %v1204_v0 = vadd.f32 1e-05, %v1196_v3  ;;  %v6705_v38 = vpop.eup %6704  ;;  %1260 = vrot.lane.b32.xlu1 %v1241_v54, %s6912_s23  ;;  %v1348_v19 = vpop.xlane.xlu1 %1347  ;;  %v1219_v59 = vmul.f32 %v6703_v8, %v7514_v32  ;;  %v720_v23 = vadd.f32 %v7871_v16, %v708_v2 }
 0x22e   : > { %v665_v1 = vpop.xlane.xlu0 %664  ;;  %6714 = vrsqrt.f32 %v684_v57  ;;  %v1368_v24 = vmul.f32 0.03125, %v1348_v19  ;;  %v1232_v48 = vadd.f32 %v1224_v58, %v7871_v16  ;;  %733 = vst.msk [vmem:[#allocation2 + $0x1] sm:$0xff] %vm595_vm1, %v725_v4  ;;  %v695_v12 = vmul.f32 %v6705_v38, %v7504_v21 }
 0x22f   : > { %v675_v30 = vmul.f32 0.03125, %v665_v1  ;;  %6716 = vrsqrt.f32 %v1204_v0  ;;  %v1227_v15 = vmul.f32 %v1219_v59, %v7868_v28  ;;  %v728_v56 = vmax.f32 %v720_v23, 0.0 }
 0x230   : > { %v6707_v7 = vpop.eup %6706  ;;  %v1376_v5 = vadd.f32 1e-05, %v1368_v24  ;;  %v1240_v32 = vmax.f32 %v1232_v48, 0.0  ;;  %v707_v54 = vmul.f32 %v7868_v28, %v695_v12 }
 0x231   : > { %v683_v10 = vadd.f32 1e-05, %v675_v30  ;;  %v6709_v33 = vpop.eup %6708  ;;  %v802_v22 = vpop.xlane.xlu1 %801  ;;  %v1235_v41 = vadd.f32 %v1227_v15, %v7871_v16  ;;  %736 = vst.msk [vmem:[#allocation2 + $0x19] sm:$0xff] %vm595_vm1, %v728_v56  ;;  %v698_v55 = vmul.f32 %v6707_v7, %v7525_v36 }
 0x232   : > { %v1345_v3 = vpop.xlane.xlu0 %1344  ;;  %6718 = vrsqrt.f32 %v1376_v5  ;;  %v822_v2 = vmul.f32 0.03125, %v802_v22  ;;  %1258 = vrot.lane.b32.xlu1 %v1240_v32, %s6912_s23  ;;  %v1218_v8 = vmul.f32 %v6709_v33, %v7517_v20  ;;  %v719_v0 = vadd.f32 %v7871_v16, %v707_v54 }
 0x233   : > { %v1367_v21 = vmul.f32 0.03125, %v1345_v3  ;;  %6720 = vrsqrt.f32 %v683_v10  ;;  %v1243_v57 = vmax.f32 %v1235_v41, 0.0  ;;  %v710_v58 = vmul.f32 %v7868_v28, %v698_v55 }
 0x234   : > { %v6711_v38 = vpop.eup %6710  ;;  %v830_v19 = vadd.f32 1e-05, %v822_v2  ;;  %v1226_v59 = vmul.f32 %v1218_v8, %v7868_v28  ;;  %v727_v30 = vmax.f32 %v719_v0, 0.0 }
 0x235   : > { %v1375_v1 = vadd.f32 1e-05, %v1367_v21  ;;  %v6713_v4 = vpop.eup %6712  ;;  %v1354_v36 = vpop.xlane.xlu1 %1353  ;;  %v1221_v24 = vmul.f32 %v6711_v38, %v7538_v47  ;;  %v722_v48 = vadd.f32 %v7871_v16, %v710_v58 }
 0x236   : > { %v799_v23 = vpop.xlane.xlu0 %798  ;;  %6722 = vrsqrt.f32 %v830_v19  ;;  %v1370_v20 = vmul.f32 0.03125, %v1354_v36  ;;  %1264 = vrot.lane.b32.xlu1 %v1243_v57, %s6912_s23  ;;  %v1234_v56 = vadd.f32 %v1226_v59, %v7871_v16  ;;  %735 = vst.msk [vmem:[#allocation2 + $0x11] sm:$0xff] %vm595_vm1, %v727_v30  ;;  %v697_v5 = vmul.f32 %v6713_v4, %v7528_v37 }
 0x237   : > { %v821_v15 = vmul.f32 0.03125, %v799_v23  ;;  %6724 = vrsqrt.f32 %v1375_v1  ;;  %v1229_v12 = vmul.f32 %v1221_v24, %v7868_v28  ;;  %v730_v7 = vmax.f32 %v722_v48, 0.0 }
 0x238   : > { %v6715_v10 = vpop.eup %6714  ;;  %v1378_v47 = vadd.f32 1e-05, %v1370_v20  ;;  %v1242_v33 = vmax.f32 %v1234_v56, 0.0  ;;  %v709_v55 = vmul.f32 %v7868_v28, %v697_v5 }
 0x239   : > { %v829_v32 = vadd.f32 1e-05, %v821_v15  ;;  %v6717_v22 = vpop.eup %6716  ;;  %v808_v3 = vpop.xlane.xlu1 %807  ;;  %v1237_v54 = vadd.f32 %v1229_v12, %v7871_v16  ;;  %738 = vst.msk [vmem:[#allocation2 + $0x29] sm:$0xff] %vm595_vm1, %v730_v7  ;;  %v700_v2 = vmul.f32 %v6715_v10, %v7549_v52 }
 0x23a   : > { %v1351_v41 = vpop.xlane.xlu0 %1350  ;;  %6726 = vrsqrt.f32 %v1378_v47  ;;  %v824_v21 = vmul.f32 0.03125, %v808_v3  ;;  %1262 = vrot.lane.b32.xlu0 %v1242_v33, %s6912_s23  ;;  %v1220_v8 = vmul.f32 %v6717_v22, %v7541_v43  ;;  %v721_v0 = vadd.f32 %v7871_v16, %v709_v55 }
 0x23b   : > { %v1369_v37 = vmul.f32 0.03125, %v1351_v41  ;;  %6728 = vrsqrt.f32 %v829_v32  ;;  %v1245_v57 = vmax.f32 %v1237_v54, 0.0  ;;  %v712_v58 = vmul.f32 %v7868_v28, %v700_v2 }
 0x23c   : > { %v6719_v38 = vpop.eup %6718  ;;  %v832_v19 = vadd.f32 1e-05, %v824_v21  ;;  %v1228_v59 = vmul.f32 %v1220_v8, %v7868_v28  ;;  %v729_v24 = vmax.f32 %v721_v0, 0.0 }
 0x23d   : > { %v1377_v1 = vadd.f32 1e-05, %v1369_v37  ;;  %v6721_v4 = vpop.eup %6720  ;;  %v1360_v52 = vpop.xlane.xlu1 %1359  ;;  %1268 = vrot.lane.b32.xlu1 %v1245_v57, %s6912_s23  ;;  %v1392_v23 = vmul.f32 %v6719_v38, %v7562_v63  ;;  %v724_v43 = vadd.f32 %v7871_v16, %v712_v58 }
 0x23e   : > { %v805_v36 = vpop.xlane.xlu0 %804  ;;  %6730 = vrsqrt.f32 %v832_v19  ;;  %v1372_v30 = vmul.f32 0.03125, %v1360_v52  ;;  %v1236_v20 = vadd.f32 %v1228_v59, %v7871_v16  ;;  %737 = vst.msk [vmem:[#allocation2 + $0x21] sm:$0xff] %vm595_vm1, %v729_v24  ;;  %v699_v12 = vmul.f32 %v6721_v4, %v7552_v53 }
 0x23f   : > { %v823_v48 = vmul.f32 0.03125, %v805_v36  ;;  %6732 = vrsqrt.f32 %v1377_v1  ;;  %v1400_v15 = vmul.f32 %v1392_v23, %v7868_v28  ;;  %v732_v56 = vmax.f32 %v724_v43, 0.0  ;;  %v9368_v43 = vld [vmem:[#allocation24_spill] sm:$0xff] }
 0x240   : > { %v6723_v7 = vpop.eup %6722  ;;  %v1380_v5 = vadd.f32 1e-05, %v1372_v30  ;;  %v1244_v63 = vmax.f32 %v1236_v20, 0.0  ;;  %v711_v3 = vmul.f32 %v7868_v28, %v699_v12 }
 0x241   : > { %v831_v10 = vadd.f32 1e-05, %v823_v48  ;;  %v6725_v47 = vpop.eup %6724  ;;  %v814_v32 = vpop.xlane.xlu1 %813  ;;  %v1408_v22 = vadd.f32 %v1400_v15, %v7871_v16  ;;  %740 = vst.msk [vmem:[#allocation2 + $0x39] sm:$0xff] %vm595_vm1, %v732_v56  ;;  %v846_v41 = vmul.f32 %v6723_v7, %v7573_v6 }
 0x242   : > { %v1357_v33 = vpop.xlane.xlu0 %1356  ;;  %6734 = vrsqrt.f32 %v1380_v5  ;;  %v826_v54 = vmul.f32 0.03125, %v814_v32  ;;  %1266 = vrot.lane.b32.xlu0 %v1244_v63, %s6912_s23  ;;  %v1391_v55 = vmul.f32 %v6725_v47, %v7565_v11  ;;  %v723_v21 = vadd.f32 %v7871_v16, %v711_v3  ;;  %v9369_v63 = vld [vmem:[#allocation9_spill] sm:$0xff] }
 0x243   : > { %v1371_v53 = vmul.f32 0.03125, %v1357_v33  ;;  %6736 = vrsqrt.f32 %v831_v10  ;;  %v1416_v2 = vmax.f32 %v1408_v22, 0.0  ;;  %v854_v37 = vmul.f32 %v846_v41, %v7868_v28  ;;  %v9370_v22 = vld [vmem:[#allocation25_spill] sm:$0xff] }
 0x244   : > { %v6727_v8 = vpop.eup %6726  ;;  %v834_v57 = vadd.f32 1e-05, %v826_v54  ;;  %v1399_v58 = vmul.f32 %v1391_v55, %v7868_v28  ;;  %v731_v59 = vmax.f32 %v723_v21, 0.0 }
 0x245   : > { %v1379_v0 = vadd.f32 1e-05, %v1371_v53  ;;  %v6729_v38 = vpop.eup %6728  ;;  %v1366_v6 = vpop.xlane.xlu1 %1365  ;;  %1433 = vrot.lane.b32.xlu1 %v1416_v2, %s6912_s23  ;;  %v1394_v1 = vmul.f32 %v6727_v8, %v7586_v17  ;;  %v862_v11 = vadd.f32 %v854_v37, %v7871_v16 }
 0x246   : > { %v811_v19 = vpop.xlane.xlu0 %810  ;;  %6738 = vrsqrt.f32 %v834_v57  ;;  %v1374_v4 = vmul.f32 0.03125, %v1366_v6  ;;  %v1407_v36 = vadd.f32 %v1399_v58, %v7871_v16  ;;  %739 = vst.msk [vmem:[#allocation2 + $0x31] sm:$0xff] %vm595_vm1, %v731_v59  ;;  %v845_v30 = vmul.f32 %v6729_v38, %v9368_v43  ;;  %v9371_v58 = vld [vmem:[#allocation11_spill] sm:$0xff] }
 0x247   : > { %v825_v52 = vmul.f32 0.03125, %v811_v19  ;;  %6740 = vrsqrt.f32 %v1379_v0  ;;  %v1402_v23 = vmul.f32 %v1394_v1, %v7868_v28  ;;  %v870_v24 = vmax.f32 %v862_v11, 0.0 }
 0x248   : > { %v6731_v48 = vpop.eup %6730  ;;  %v1382_v20 = vadd.f32 1e-05, %v1374_v4  ;;  %v1415_v17 = vmax.f32 %v1407_v36, 0.0  ;;  %v853_v10 = vmul.f32 %v845_v30, %v7868_v28  ;;  %v9372_v36 = vld [vmem:[#allocation10_spill] sm:$0xff] }
 0x249   : > { %v833_v15 = vadd.f32 1e-05, %v825_v52  ;;  %v6733_v56 = vpop.eup %6732  ;;  %v820_v12 = vpop.xlane.xlu1 %819  ;;  %v1410_v5 = vadd.f32 %v1402_v23, %v7871_v16  ;;  %878 = vst.msk [vmem:[#allocation2 + $0x4b] sm:$0xff] %vm595_vm1, %v870_v24  ;;  %v848_v47 = vmul.f32 %v6731_v48, %v9369_v63 }
 0x24a   : > { %v1363_v7 = vpop.xlane.xlu0 %1362  ;;  %6742 = vrsqrt.f32 %v1382_v20  ;;  %v828_v32 = vmul.f32 0.03125, %v820_v12  ;;  %1431 = vrot.lane.b32.xlu0 %v1415_v17, %s6912_s23  ;;  %v1393_v3 = vmul.f32 %v6733_v56, %v9370_v22  ;;  %v861_v54 = vadd.f32 %v853_v10, %v7871_v16  ;;  %v6600_v20 = vld [vmem:[%s9259_s3] sm:$0xff]  }
 0x24b   : > { %v1373_v33 = vmul.f32 0.03125, %v1363_v7  ;;  %6744 = vrsqrt.f32 %v833_v15  ;;  %v1418_v41 = vmax.f32 %v1410_v5, 0.0  ;;  %v856_v53 = vmul.f32 %v848_v47, %v7868_v28  ;;  %v9373_v5 = vld [vmem:[#allocation13_spill] sm:$0xff]  ;;  %6264 = vmatpush3.bf16.msra.mxu1 %v6600_v20 }
 0x24c   : > { %v6735_v55 = vpop.eup %6734  ;;  %v836_v2 = vadd.f32 1e-05, %v828_v32  ;;  %v1401_v37 = vmul.f32 %v1393_v3, %v7868_v28  ;;  %v869_v6 = vmax.f32 %v861_v54, 0.0  ;;  %v9374_v32 = vld [vmem:[#allocation12_spill] sm:$0xff]  ;;  %v9375_v54 = vmov 0.0  }
 0x24d   : > { %v1381_v21 = vadd.f32 1e-05, %v1373_v33  ;;  %v6737_v8 = vpop.eup %6736  ;;  %v2326_v57 = vpop.xlane.xlu1 %2325  ;;  %1437 = vrot.lane.b32.xlu1 %v1418_v41, %s6912_s23  ;;  %v1396_v38 = vmul.f32 %v6735_v55, %v9371_v58  ;;  %v864_v19 = vadd.f32 %v856_v53, %v7871_v16  ;;  %6265 = vmatprep.subr.bf16.mxu1 %v9375_v54  ;;  %337 = vst.msk [vmem:[#allocation3 + $0x20] sm:$0x3] %vm336_vm8, %v9375_v54  ;;  %339 = vst.msk [vmem:[#allocation3 + $0x42] sm:$0x3] %vm336_vm8, %v9375_v54 }
 0x24e   : > { %v817_v0 = vpop.xlane.xlu0 %816  ;;  %6746 = vrsqrt.f32 %v836_v2  ;;  %v2346_v1 = vmul.f32 0.03125, %v2326_v57  ;;  %v1409_v11 = vadd.f32 %v1401_v37, %v7871_v16  ;;  %877 = vst.msk [vmem:[#allocation2 + $0x43] sm:$0xff] %vm595_vm1, %v869_v6  ;;  %v847_v23 = vmul.f32 %v6737_v8, %v9372_v36  ;;  %v6601_v6 = vld [vmem:[%s9259_s3 + $0x8] sm:$0xff]   ;;  %v6602_v36 = vld [vmem:[%s9259_s3 + $0x40] sm:$0xff]   ;;  %6279 = vmatprep.mubr.msk.bf16.mxu1 %vm6915_vm2, %v9375_v54  ;;  %6243 = vmatprep.mubr.msk.bf16.mxu0 %vm6915_vm2, %v9375_v54 }
 0x24f   : > { %v827_v59 = vmul.f32 0.03125, %v817_v0  ;;  %6748 = vrsqrt.f32 %v1381_v21  ;;  %v1404_v4 = vmul.f32 %v1396_v38, %v7868_v28  ;;  %v872_v52 = vmax.f32 %v864_v19, 0.0  ;;  %6266 = vmatpush3.bf16.msra.mxu1 %v6601_v6  ;;  %6228 = vmatpush3.bf16.msra.mxu0 %v6602_v36  ;;  %341 = vst.msk [vmem:[#allocation4 + $0x10] sm:$0x3] %vm336_vm8, %v9375_v54  ;;  %343 = vst.msk [vmem:[#allocation4 + $0x22] sm:$0x3] %vm336_vm8, %v9375_v54 }
 0x250   : > { %v6739_v24 = vpop.eup %6738  ;;  %v2354_v43 = vadd.f32 1e-05, %v2346_v1  ;;  %v1417_v48 = vmax.f32 %v1409_v11, 0.0  ;;  %v855_v7 = vmul.f32 %v847_v23, %v7868_v28  ;;  %v6603_v23 = vld [vmem:[%s9259_s3 + $0x10] sm:$0xff]   ;;  %6267 = vmatprep.subr.bf16.mxu1 %v9375_v54  ;;  %6229 = vmatprep.subr.bf16.mxu0 %v9375_v54  ;;  %345 = vst.msk [vmem:[#allocation5 + $0x8] sm:$0x3] %vm336_vm8, %v9375_v54 }
 0x251   : > { %v835_v30 = vadd.f32 1e-05, %v827_v59  ;;  %v6741_v15 = vpop.eup %6740  ;;  %v1745_v17 = vpop.xlane.xlu1 %1744  ;;  %v1412_v12 = vadd.f32 %v1404_v4, %v7871_v16  ;;  %880 = vst.msk [vmem:[#allocation2 + $0x5b] sm:$0xff] %vm595_vm1, %v872_v52  ;;  %v850_v10 = vmul.f32 %v6739_v24, %v9373_v5  ;;  %v9376_v52 = vld [vmem:[#allocation14_spill] sm:$0xff] }
 0x252   : > { %v1748_v56 = vpop.xlane.xlu0 %1747  ;;  %6750 = vrsqrt.f32 %v2354_v43  ;;  %v1767_v63 = vmul.f32 0.03125, %v1745_v17  ;;  %1435 = vrot.lane.b32.xlu0 %v1417_v48, %s6912_s23  ;;  %v1395_v33 = vmul.f32 %v6741_v15, %v9374_v32  ;;  %v863_v3 = vadd.f32 %v855_v7, %v7871_v16  ;;  %347 = vst.msk [vmem:[#allocation5 + $0x12] sm:$0x3] %vm336_vm8, %v9375_v54 }
 0x253   : > { %v1768_v47 = vmul.f32 0.03125, %v1748_v56  ;;  %6752 = vrsqrt.f32 %v835_v30  ;;  %v1420_v22 = vmax.f32 %v1412_v12, 0.0  ;;  %v858_v41 = vmul.f32 %v850_v10, %v7868_v28  ;;  %6268 = vmatpush3.bf16.msra.mxu1 %v6603_v23  ;;  %335 = vst.msk [vmem:[#allocation3] sm:$0x1] %vm334_vm9, %v9375_v54  ;;  %348 = vst.msk [vmem:[#allocation6] sm:$0x1] %vm334_vm9, %v9375_v54 }
 0x254   : > { %v6743_v53 = vpop.eup %6742  ;;  %v1775_v55 = vadd.f32 1e-05, %v1767_v63  ;;  %v1403_v21 = vmul.f32 %v1395_v33, %v7868_v28  ;;  %v871_v58 = vmax.f32 %v863_v3, 0.0  ;;  %6269 = vmatprep.subr.bf16.mxu1 %v9375_v54  ;;  %349 = vst.msk [vmem:[#allocation6 + $0x5] sm:$0x1] %vm334_vm9, %v9375_v54 }
 0x255   : > { %v1776_v2 = vadd.f32 1e-05, %v1768_v47  ;;  %v6745_v37 = vpop.eup %6744  ;;  %v2332_v8 = vpop.xlane.xlu1 %2331  ;;  %1441 = vrot.lane.b32.xlu1 %v1420_v22, %s6912_s23  ;;  %v1398_v0 = vmul.f32 %v6743_v53, %v7634_v14  ;;  %v866_v38 = vadd.f32 %v858_v41, %v7871_v16  ;;  %338 = vst.msk [vmem:[#allocation3 + $0x22] sm:$0x1] %vm334_vm9, %v9375_v54  ;;  %340 = vst.msk [vmem:[#allocation4] sm:$0x1] %vm334_vm9, %v9375_v54 }
 0x256   : > { %v2323_v57 = vpop.xlane.xlu0 %2322  ;;  %6754 = vrsqrt.f32 %v1775_v55  ;;  %v2348_v19 = vmul.f32 0.03125, %v2332_v8  ;;  %v1411_v59 = vadd.f32 %v1403_v21, %v7871_v16  ;;  %879 = vst.msk [vmem:[#allocation2 + $0x53] sm:$0xff] %vm595_vm1, %v871_v58  ;;  %v849_v14 = vmul.f32 %v6745_v37, %v9376_v52  ;;  %v6604_v58 = vld [vmem:[%s9259_s3 + $0x48] sm:$0xff]  }
 0x257   : > { %v2345_v1 = vmul.f32 0.03125, %v2323_v57  ;;  %6756 = vrsqrt.f32 %v1776_v2  ;;  %v1406_v11 = vmul.f32 %v1398_v0, %v7868_v28  ;;  %v874_v4 = vmax.f32 %v866_v38, 0.0  ;;  %v6605_v38 = vld [vmem:[%s9259_s3 + $0x18] sm:$0xff]   ;;  %6230 = vmatpush3.bf16.msra.mxu0 %v6604_v58  ;;  %342 = vst.msk [vmem:[#allocation4 + $0x12] sm:$0x1] %vm334_vm9, %v9375_v54 }
 0x258   : > { %v6747_v24 = vpop.eup %6746  ;;  %v2356_v43 = vadd.f32 1e-05, %v2348_v19  ;;  %v1419_v48 = vmax.f32 %v1411_v59, 0.0  ;;  %v857_v12 = vmul.f32 %v849_v14, %v7868_v28  ;;  %6270 = vmatpush3.bf16.msra.mxu1 %v6605_v38  ;;  %6231 = vmatprep.subr.bf16.mxu0 %v9375_v54  ;;  %344 = vst.msk [vmem:[#allocation5] sm:$0x1] %vm334_vm9, %v9375_v54 }
 0x259   : > { %v2353_v30 = vadd.f32 1e-05, %v2345_v1  ;;  %v6749_v20 = vpop.eup %6748  ;;  %v1751_v15 = vpop.xlane.xlu1 %1750  ;;  %v1414_v56 = vadd.f32 %v1406_v11, %v7871_v16  ;;  %882 = vst.msk [vmem:[#allocation2 + $0x6b] sm:$0xff] %vm595_vm1, %v874_v4  ;;  %v852_v7 = vmul.f32 %v6747_v24, %v7645_v60  ;;  %6271 = vmatprep.subr.bf16.mxu1 %v9375_v54 }
 0x25a   : > { %v1754_v17 = vpop.xlane.xlu0 %1753  ;;  %6758 = vrsqrt.f32 %v2356_v43  ;;  %v1769_v5 = vmul.f32 0.03125, %v1751_v15  ;;  %1439 = vrot.lane.b32.xlu0 %v1419_v48, %s6912_s23  ;;  %v1397_v63 = vmul.f32 %v6749_v20, %v7637_v50  ;;  %v865_v32 = vadd.f32 %v857_v12, %v7871_v16  ;;  %v6606_v20 = vld [vmem:[%s9259_s3 + $0x50] sm:$0xff]   ;;  %346 = vst.msk [vmem:[#allocation5 + $0xa] sm:$0x1] %vm334_vm9, %v9375_v54 }
 0x25b   : > { %v1770_v10 = vmul.f32 0.03125, %v1754_v17  ;;  %6760 = vrsqrt.f32 %v2353_v30  ;;  %v1422_v47 = vmax.f32 %v1414_v56, 0.0  ;;  %v860_v33 = vmul.f32 %v852_v7, %v7868_v28  ;;  %6232 = vmatpush3.bf16.msra.mxu0 %v6606_v20 }
 0x25c   : > { %v6751_v22 = vpop.eup %6750  ;;  %v1777_v3 = vadd.f32 1e-05, %v1769_v5  ;;  %v1405_v41 = vmul.f32 %v1397_v63, %v7868_v28  ;;  %v873_v21 = vmax.f32 %v865_v32, 0.0  ;;  %6233 = vmatprep.subr.bf16.mxu0 %v9375_v54 }
 0x25d   : > { %v1778_v60 = vadd.f32 1e-05, %v1770_v10  ;;  %v6753_v53 = vpop.eup %6752  ;;  %v2338_v55 = vpop.xlane.xlu1 %2337  ;;  %1445 = vrot.lane.b32.xlu1 %v1422_v47, %s6912_s23  ;;  %v2370_v2 = vmul.f32 %v6751_v22, %v7658_v13  ;;  %v868_v37 = vadd.f32 %v860_v33, %v7871_v16 }
 0x25e   : > { %v2329_v50 = vpop.xlane.xlu0 %2328  ;;  %6762 = vrsqrt.f32 %v1777_v3  ;;  %v2350_v8 = vmul.f32 0.03125, %v2338_v55  ;;  %v1413_v0 = vadd.f32 %v1405_v41, %v7871_v16  ;;  %881 = vst.msk [vmem:[#allocation2 + $0x63] sm:$0xff] %vm595_vm1, %v873_v21  ;;  %v851_v19 = vmul.f32 %v6753_v53, %v7648_v44 }
 0x25f   : > { %v2347_v57 = vmul.f32 0.03125, %v2329_v50  ;;  %6764 = vrsqrt.f32 %v1778_v60  ;;  %v2378_v6 = vmul.f32 %v2370_v2, %v7868_v28  ;;  %v876_v13 = vmax.f32 %v868_v37, 0.0  ;;  %v6609_v2 = vld [vmem:[%s9259_s3 + $0x28] sm:$0xff]  }
 0x260   : > { %v6755_v1 = vpop.eup %6754  ;;  %v2358_v59 = vadd.f32 1e-05, %v2350_v8  ;;  %v1421_v4 = vmax.f32 %v1413_v0, 0.0  ;;  %v859_v43 = vmul.f32 %v851_v19, %v7868_v28 }
 0x261   : > { %v2355_v11 = vadd.f32 1e-05, %v2347_v57  ;;  %v6757_v52 = vpop.eup %6756  ;;  %v1757_v14 = vpop.xlane.xlu1 %1756  ;;  %v2386_v23 = vadd.f32 %v2378_v6, %v7871_v16  ;;  %v1791_v24 = vmul.f32 %v6755_v1, %v7669_v25  ;;  %884 = vst.msk [vmem:[#allocation2 + $0x7b] sm:$0xff] %vm595_vm1, %v876_v13  ;;  %v6607_v25 = vld [vmem:[%s9259_s3 + $0x20] sm:$0xff]  }
 0x262   : > { %v1760_v36 = vpop.xlane.xlu0 %1759  ;;  %6766 = vrsqrt.f32 %v2358_v59  ;;  %v1771_v44 = vmul.f32 0.03125, %v1757_v14  ;;  %1443 = vrot.lane.b32.xlu0 %v1421_v4, %s6912_s23  ;;  %v1792_v48 = vmul.f32 %v6757_v52, %v7661_v39  ;;  %v867_v56 = vadd.f32 %v859_v43, %v7871_v16  ;;  %6272 = vmatpush3.bf16.msra.mxu1 %v6607_v25  ;;  %v6611_v4 = vld [vmem:[%s9259_s3 + $0x30] sm:$0xff]  }
 0x263   : > { %v1772_v30 = vmul.f32 0.03125, %v1760_v36  ;;  %6768 = vrsqrt.f32 %v2355_v11  ;;  %v2394_v15 = vmax.f32 %v2386_v23, 0.0  ;;  %v1799_v17 = vmul.f32 %v1791_v24, %v7868_v28  ;;  %6273 = vmatprep.subr.bf16.mxu1 %v9375_v54  ;;  %v6610_v11 = vld [vmem:[%s9259_s3 + $0x60] sm:$0xff]  }
 0x264   : > { %v6759_v12 = vpop.eup %6758  ;;  %v1779_v7 = vadd.f32 1e-05, %v1771_v44  ;;  %v1800_v10 = vmul.f32 %v1792_v48, %v7868_v28  ;;  %v875_v22 = vmax.f32 %v867_v56, 0.0 }
 0x265   : > { %v1780_v5 = vadd.f32 1e-05, %v1772_v30  ;;  %v6761_v39 = vpop.eup %6760  ;;  %v2344_v63 = vpop.xlane.xlu1 %2343  ;;  %2411 = vrot.lane.b32.xlu1 %v2394_v15, %s6913_s21  ;;  %v1807_v32 = vadd.f32 %v1799_v17, %v7871_v16  ;;  %v2372_v33 = vmul.f32 %v6759_v12, %v7682_v29  ;;  %v6608_v29 = vld [vmem:[%s9259_s3 + $0x58] sm:$0xff]  }
 0x266   : > { %v2335_v47 = vpop.xlane.xlu0 %2334  ;;  %6770 = vrsqrt.f32 %v1779_v7  ;;  %v2352_v3 = vmul.f32 0.03125, %v2344_v63  ;;  %v1808_v41 = vadd.f32 %v1800_v10, %v7871_v16  ;;  %v2369_v50 = vmul.f32 %v6761_v39, %v7672_v26  ;;  %883 = vst.msk [vmem:[#allocation2 + $0x73] sm:$0xff] %vm595_vm1, %v875_v22  ;;  %6234 = vmatpush3.bf16.msra.mxu0 %v6608_v29  ;;  %6274 = vmatpush3.bf16.msra.mxu1 %v6609_v2  ;;  %v6613_v10 = vld [vmem:[%s9259_s3 + $0x38] sm:$0xff]  }
 0x267   : > { %v2349_v60 = vmul.f32 0.03125, %v2335_v47  ;;  %6772 = vrsqrt.f32 %v1780_v5  ;;  %v1815_v53 = vmax.f32 %v1807_v32, 0.0  ;;  %v2380_v55 = vmul.f32 %v2372_v33, %v7868_v28  ;;  %6235 = vmatprep.subr.bf16.mxu0 %v9375_v54  ;;  %6275 = vmatprep.subr.bf16.mxu1 %v9375_v54 }
 0x268   : > { %v6763_v21 = vpop.eup %6762  ;;  %v2360_v37 = vadd.f32 1e-05, %v2352_v3  ;;  %v1816_v57 = vmax.f32 %v1808_v41, 0.0  ;;  %v2377_v6 = vmul.f32 %v2369_v50, %v7868_v28 }
 0x269   : > { %v2357_v8 = vadd.f32 1e-05, %v2349_v60  ;;  %v6765_v0 = vpop.eup %6764  ;;  %v1763_v58 = vpop.xlane.xlu1 %1762  ;;  %1831 = vrot.lane.b32.xlu1 %v1815_v53, %s6914_s27  ;;  %v2388_v38 = vadd.f32 %v2380_v55, %v7871_v16  ;;  %v1793_v13 = vmul.f32 %v6763_v21, %v7699_v61 }
 0x26a   : > { %v1766_v26 = vpop.xlane.xlu0 %1765  ;;  %6774 = vrsqrt.f32 %v2360_v37  ;;  %v1773_v19 = vmul.f32 0.03125, %v1763_v58  ;;  %1833 = vrot.lane.b32.xlu0 %v1816_v57, %s6914_s27  ;;  %v1794_v59 = vmul.f32 %v6765_v0, %v7685_v40  ;;  %v2385_v61 = vadd.f32 %v2377_v6, %v7871_v16  ;;  %6236 = vmatpush3.bf16.msra.mxu0 %v6610_v11 }
 0x26b   : > { %v1774_v1 = vmul.f32 0.03125, %v1766_v26  ;;  %6776 = vrsqrt.f32 %v2357_v8  ;;  %v2396_v52 = vmax.f32 %v2388_v38, 0.0  ;;  %v1801_v14 = vmul.f32 %v1793_v13, %v7868_v28  ;;  %6276 = vmatpush3.bf16.msra.mxu1 %v6611_v4  ;;  %6237 = vmatprep.subr.bf16.mxu0 %v9375_v54 }
 0x26c   : > { %v6767_v40 = vpop.eup %6766  ;;  %v1781_v36 = vadd.f32 1e-05, %v1773_v19  ;;  %v1802_v24 = vmul.f32 %v1794_v59, %v7868_v28  ;;  %v2393_v30 = vmax.f32 %v2385_v61, 0.0  ;;  %6277 = vmatprep.subr.bf16.mxu1 %v9375_v54 }
 0x26d   : > { %v1782_v23 = vadd.f32 1e-05, %v1774_v1  ;;  %v6769_v43 = vpop.eup %6768  ;;  %v1925_v44 = vpop.xlane.xlu1 %1924  ;;  %2415 = vrot.lane.b32.xlu1 %v2396_v52, %s6913_s21  ;;  %v1809_v20 = vadd.f32 %v1801_v14, %v7871_v16  ;;  %v2374_v25 = vmul.f32 %v6767_v40, %v7712_v46  ;;  %v6612_v46 = vld [vmem:[%s9259_s3 + $0x68] sm:$0xff]   ;;  %v6615_v52 = vld [vmem:[%s9259_s3 + $0x78] sm:$0xff]  }
 0x26e   : > { %v2341_v48 = vpop.xlane.xlu0 %2340  ;;  %6778 = vrsqrt.f32 %v1781_v36  ;;  %v1945_v15 = vmul.f32 0.03125, %v1925_v44  ;;  %v1810_v56 = vadd.f32 %v1802_v24, %v7871_v16  ;;  %2409 = vrot.lane.b32.xlu0 %v2393_v30, %s6913_s21  ;;  %v2371_v5 = vmul.f32 %v6769_v43, %v7702_v27  ;;  %6238 = vmatpush3.bf16.msra.mxu0 %v6612_v46 }
 0x26f   : > { %v2351_v17 = vmul.f32 0.03125, %v2341_v48  ;;  %6780 = vrsqrt.f32 %v1782_v23  ;;  %v1817_v12 = vmax.f32 %v1809_v20, 0.0  ;;  %v2382_v7 = vmul.f32 %v2374_v25, %v7868_v28  ;;  %6278 = vmatpush3.bf16.msra.mxu1 %v6613_v10  ;;  %6239 = vmatprep.subr.bf16.mxu0 %v9375_v54 }
 0x270   : > { %v6771_v39 = vpop.eup %6770  ;;  %v1953_v63 = vadd.f32 1e-05, %v1945_v15  ;;  %v1818_v32 = vmax.f32 %v1810_v56, 0.0  ;;  %v2379_v60 = vmul.f32 %v2371_v5, %v7868_v28  ;;  %6335 = vmatprep.subr.bf16.mxu1 %v9375_v54 }
 0x271   : > { %v2359_v47 = vadd.f32 1e-05, %v2351_v17  ;;  %v6773_v33 = vpop.eup %6772  ;;  %v2503_v22 = vpop.xlane.xlu1 %2502  ;;  %1835 = vrot.lane.b32.xlu1 %v1817_v12, %s6914_s27  ;;  %v2390_v27 = vadd.f32 %v2382_v7, %v7871_v16  ;;  %v1795_v41 = vmul.f32 %v6771_v39, %v7723_v62  ;;  %v6614_v62 = vld [vmem:[%s9259_s3 + $0x70] sm:$0xff]  }
 0x272   : > { %v1922_v3 = vpop.xlane.xlu0 %1921  ;;  %6782 = vrsqrt.f32 %v1953_v63  ;;  %v2523_v53 = vmul.f32 0.03125, %v2503_v22  ;;  %v1796_v50 = vmul.f32 %v6773_v33, %v7715_v42  ;;  %1837 = vrot.lane.b32.xlu0 %v1818_v32, %s6914_s27  ;;  %v2387_v2 = vadd.f32 %v2379_v60, %v7871_v16  ;;  %6240 = vmatpush3.bf16.msra.mxu0 %v6614_v62 }
 0x273   : > { %v1944_v55 = vmul.f32 0.03125, %v1922_v3  ;;  %6784 = vrsqrt.f32 %v2359_v47  ;;  %v2398_v29 = vmax.f32 %v2390_v27, 0.0  ;;  %v1803_v21 = vmul.f32 %v1795_v41, %v7868_v28  ;;  %6241 = vmatprep.subr.bf16.mxu0 %v9375_v54 }
 0x274   : > { %v6775_v37 = vpop.eup %6774  ;;  %v2531_v8 = vadd.f32 1e-05, %v2523_v53  ;;  %v1804_v57 = vmul.f32 %v1796_v50, %v7868_v28  ;;  %v2395_v26 = vmax.f32 %v2387_v2, 0.0 }
 0x275   : > { %v1952_v42 = vadd.f32 1e-05, %v1944_v55  ;;  %v6777_v0 = vpop.eup %6776  ;;  %v1931_v58 = vpop.xlane.xlu1 %1930  ;;  %2419 = vrot.lane.b32.xlu1 %v2398_v29, %s6913_s21  ;;  %v1811_v6 = vadd.f32 %v1803_v21, %v7871_v16  ;;  %v2376_v13 = vmul.f32 %v6775_v37, %v7736_v18 }
 0x276   : > { %v2500_v38 = vpop.xlane.xlu0 %2499  ;;  %6786 = vrsqrt.f32 %v2531_v8  ;;  %v1947_v19 = vmul.f32 0.03125, %v1931_v58  ;;  %v1812_v59 = vadd.f32 %v1804_v57, %v7871_v16  ;;  %2413 = vrot.lane.b32.xlu0 %v2395_v26, %s6913_s21  ;;  %v2373_v18 = vmul.f32 %v6777_v0, %v7726_v9  ;;  %6242 = vmatpush3.bf16.msra.mxu0 %v6615_v52 }
 0x277   : > { %v2522_v1 = vmul.f32 0.03125, %v2500_v38  ;;  %6788 = vrsqrt.f32 %v1952_v42  ;;  %v1819_v11 = vmax.f32 %v1811_v6, 0.0  ;;  %v2384_v4 = vmul.f32 %v2376_v13, %v7868_v28  ;;  %6299 = vmatprep.subr.bf16.mxu0 %v9375_v54 }
 0x278   : > { %v6779_v61 = vpop.eup %6778  ;;  %v1955_v14 = vadd.f32 1e-05, %v1947_v19  ;;  %v1820_v36 = vmax.f32 %v1812_v59, 0.0  ;;  %v2381_v30 = vmul.f32 %v2373_v18, %v7868_v28 }
 0x279   : > { %v2530_v40 = vadd.f32 1e-05, %v2522_v1  ;;  %v6781_v23 = vpop.eup %6780  ;;  %v2509_v24 = vpop.xlane.xlu1 %2508  ;;  %1839 = vrot.lane.b32.xlu1 %v1819_v11, %s6914_s27  ;;  %v2392_v44 = vadd.f32 %v2384_v4, %v7871_v16  ;;  %v1797_v9 = vmul.f32 %v6779_v61, %v7747_v34  ;;  %v9377_v11 = vld [vmem:[#allocation16_spill] sm:$0xff] }
 0x27a   : > { %v1928_v43 = vpop.xlane.xlu0 %1927  ;;  %6790 = vrsqrt.f32 %v1955_v14  ;;  %v2525_v48 = vmul.f32 0.03125, %v2509_v24  ;;  %v1798_v25 = vmul.f32 %v6781_v23, %v7739_v49  ;;  %1841 = vrot.lane.b32.xlu0 %v1820_v36, %s6914_s27  ;;  %v2389_v17 = vadd.f32 %v2381_v30, %v7871_v16  ;;  %v9378_v36 = vld [vmem:[#allocation15_spill] sm:$0xff] }
 0x27b   : > { %v1946_v20 = vmul.f32 0.03125, %v1928_v43  ;;  %6792 = vrsqrt.f32 %v2530_v40  ;;  %v2400_v15 = vmax.f32 %v2392_v44, 0.0  ;;  %v1805_v56 = vmul.f32 %v1797_v9, %v7868_v28 }
 0x27c   : > { %v6783_v12 = vpop.eup %6782  ;;  %v2533_v7 = vadd.f32 1e-05, %v2525_v48  ;;  %v1806_v34 = vmul.f32 %v1798_v25, %v7868_v28  ;;  %v2397_v49 = vmax.f32 %v2389_v17, 0.0  ;;  %v9379_v17 = vld [vmem:[#allocation27_spill] sm:$0xff] }
 0x27d   : > { %v1954_v5 = vadd.f32 1e-05, %v1946_v20  ;;  %v6785_v46 = vpop.eup %6784  ;;  %v1937_v10 = vpop.xlane.xlu1 %1936  ;;  %2423 = vrot.lane.b32.xlu1 %v2400_v15, %s6913_s21  ;;  %v1813_v63 = vadd.f32 %v1805_v56, %v7871_v16  ;;  %v1969_v47 = vmul.f32 %v6783_v12, %v7760_v45 }
 0x27e   : > { %v2506_v39 = vpop.xlane.xlu0 %2505  ;;  %6794 = vrsqrt.f32 %v2533_v7  ;;  %v1949_v32 = vmul.f32 0.03125, %v1937_v10  ;;  %v1814_v22 = vadd.f32 %v1806_v34, %v7871_v16  ;;  %2417 = vrot.lane.b32.xlu0 %v2397_v49, %s6913_s21  ;;  %v2375_v60 = vmul.f32 %v6785_v46, %v7750_v35 }
 0x27f   : > { %v2524_v33 = vmul.f32 0.03125, %v2506_v39  ;;  %6796 = vrsqrt.f32 %v1954_v5  ;;  %v1821_v3 = vmax.f32 %v1813_v63, 0.0  ;;  %v1977_v27 = vmul.f32 %v1969_v47, %v7868_v28  ;;  %v9380_v5 = vld [vmem:[#allocation26_spill] sm:$0xff] }
 0x280   : > { %v6787_v41 = vpop.eup %6786  ;;  %v1957_v53 = vadd.f32 1e-05, %v1949_v32  ;;  %v1822_v50 = vmax.f32 %v1814_v22, 0.0  ;;  %v2383_v62 = vmul.f32 %v2375_v60, %v7868_v28  ;;  %v9381_v60 = vld [vmem:[#allocation29_spill] sm:$0xff] }
 0x281   : > { %v2532_v55 = vadd.f32 1e-05, %v2524_v33  ;;  %v6789_v29 = vpop.eup %6788  ;;  %v2515_v2 = vpop.xlane.xlu1 %2514  ;;  %1843 = vrot.lane.b32.xlu1 %v1821_v3, %s6914_s27  ;;  %v1985_v21 = vadd.f32 %v1977_v27, %v7871_v16  ;;  %v2547_v37 = vmul.f32 %v6787_v41, %v7771_v51 }
 0x282   : > { %v1934_v45 = vpop.xlane.xlu0 %1933  ;;  %6798 = vrsqrt.f32 %v1957_v53  ;;  %v2527_v8 = vmul.f32 0.03125, %v2515_v2  ;;  %v1968_v35 = vmul.f32 %v6789_v29, %v7763_v31  ;;  %1845 = vrot.lane.b32.xlu0 %v1822_v50, %s6914_s27  ;;  %v2391_v0 = vadd.f32 %v2383_v62, %v7871_v16  ;;  %v9382_v50 = vld [vmem:[#allocation28_spill] sm:$0xff] }
 0x283   : > { %v1948_v42 = vmul.f32 0.03125, %v1934_v45  ;;  %6800 = vrsqrt.f32 %v2532_v55  ;;  %v1993_v57 = vmax.f32 %v1985_v21, 0.0  ;;  %v2555_v58 = vmul.f32 %v2547_v37, %v7868_v28 }
 0x284   : > { %v6791_v26 = vpop.eup %6790  ;;  %v2535_v38 = vadd.f32 1e-05, %v2527_v8  ;;  %v1976_v13 = vmul.f32 %v1968_v35, %v7868_v28  ;;  %v2399_v1 = vmax.f32 %v2391_v0, 0.0 }
 0x285   : > { %v1956_v6 = vadd.f32 1e-05, %v1948_v42  ;;  %v6793_v19 = vpop.eup %6792  ;;  %v1943_v51 = vpop.xlane.xlu1 %1942  ;;  %2010 = vrot.lane.b32.xlu1 %v1993_v57, %s6914_s27  ;;  %v2563_v31 = vadd.f32 %v2555_v58, %v7871_v16  ;;  %v1971_v4 = vmul.f32 %v6791_v26, %v9377_v11  ;;  %v9383_v57 = vld [vmem:[#allocation17_spill] sm:$0xff]  ;;  %v9384_v26 = vld [vmem:[#allocation30_spill] sm:$0xff]  ;;  %v9385_v11 = vld [vmem:[#allocation19_spill] sm:$0xff] }
 0x286   : > { %v2512_v59 = vpop.xlane.xlu0 %2511  ;;  %6802 = vrsqrt.f32 %v2535_v38  ;;  %v1951_v18 = vmul.f32 0.03125, %v1943_v51  ;;  %v1984_v61 = vadd.f32 %v1976_v13, %v7871_v16  ;;  %2421 = vrot.lane.b32.xlu0 %v2399_v1, %s6913_s21  ;;  %v2546_v23 = vmul.f32 %v6793_v19, %v9378_v36 }
 0x287   : > { %v2526_v52 = vmul.f32 0.03125, %v2512_v59  ;;  %6804 = vrsqrt.f32 %v1956_v6  ;;  %v2571_v14 = vmax.f32 %v2563_v31, 0.0  ;;  %v1979_v40 = vmul.f32 %v1971_v4, %v7868_v28 }
 0x288   : > { %v6795_v24 = vpop.eup %6794  ;;  %v1959_v43 = vadd.f32 1e-05, %v1951_v18  ;;  %v1992_v30 = vmax.f32 %v1984_v61, 0.0  ;;  %v2554_v15 = vmul.f32 %v2546_v23, %v7868_v28 }
 0x289   : > { %v2534_v44 = vadd.f32 1e-05, %v2526_v52  ;;  %v6797_v9 = vpop.eup %6796  ;;  %v2521_v48 = vpop.xlane.xlu1 %2520  ;;  %2588 = vrot.lane.b32.xlu1 %v2571_v14, %s6913_s21  ;;  %v1987_v25 = vadd.f32 %v1979_v40, %v7871_v16  ;;  %v2549_v56 = vmul.f32 %v6795_v24, %v9379_v17  ;;  %v9386_v52 = vld [vmem:[#allocation18_spill] sm:$0xff] }
 0x28a   : > { %v1940_v20 = vpop.xlane.xlu0 %1939  ;;  %6806 = vrsqrt.f32 %v1959_v43  ;;  %v2529_v12 = vmul.f32 0.03125, %v2521_v48  ;;  %v1970_v34 = vmul.f32 %v6797_v9, %v9380_v5  ;;  %2008 = vrot.lane.b32.xlu0 %v1992_v30, %s6914_s27  ;;  %v2562_v10 = vadd.f32 %v2554_v15, %v7871_v16  ;;  %v9387_v9 = vld [vmem:[#allocation20_spill] sm:$0xff] }
 0x28b   : > { %v1950_v7 = vmul.f32 0.03125, %v1940_v20  ;;  %6808 = vrsqrt.f32 %v2534_v44  ;;  %v1995_v46 = vmax.f32 %v1987_v25, 0.0  ;;  %v2557_v49 = vmul.f32 %v2549_v56, %v7868_v28  ;;  %v9388_v25 = vld [vmem:[#allocation21_spill] sm:$0xff] }
 0x28c   : > { %v6799_v39 = vpop.eup %6798  ;;  %v2537_v63 = vadd.f32 1e-05, %v2529_v12  ;;  %v1978_v32 = vmul.f32 %v1970_v34, %v7868_v28  ;;  %v2570_v22 = vmax.f32 %v2562_v10, 0.0  ;;  %v9389_v10 = vld [vmem:[#allocation31_spill] sm:$0xff] }
 0x28d   : > { %v1958_v47 = vadd.f32 1e-05, %v1950_v7  ;;  %v6801_v33 = vpop.eup %6800  ;;  %2014 = vrot.lane.b32.xlu1 %v1995_v46, %s6914_s27  ;;  %v2565_v27 = vadd.f32 %v2557_v49, %v7871_v16  ;;  %v1973_v41 = vmul.f32 %v6799_v39, %v9381_v60 }
 0x28e   : > { %v2518_v3 = vpop.xlane.xlu0 %2517  ;;  %6810 = vrsqrt.f32 %v2537_v63  ;;  %v1986_v55 = vadd.f32 %v1978_v32, %v7871_v16  ;;  %v2548_v29 = vmul.f32 %v6801_v33, %v9382_v50  ;;  %2586 = vrot.lane.b32.xlu0 %v2570_v22, %s6913_s21 }
 0x28f   : > { %v2528_v53 = vmul.f32 0.03125, %v2518_v3  ;;  %6812 = vrsqrt.f32 %v1958_v47  ;;  %v2573_v2 = vmax.f32 %v2565_v27, 0.0  ;;  %v1981_v45 = vmul.f32 %v1973_v41, %v7868_v28 }
 0x290   : > { %v6803_v21 = vpop.eup %6802  ;;  %v1994_v37 = vmax.f32 %v1986_v55, 0.0  ;;  %v2556_v8 = vmul.f32 %v2548_v29, %v7868_v28 }
 0x291   : > { %v2536_v62 = vadd.f32 1e-05, %v2528_v53  ;;  %v6805_v42 = vpop.eup %6804  ;;  %2592 = vrot.lane.b32.xlu1 %v2573_v2, %s6913_s21  ;;  %v1989_v35 = vadd.f32 %v1981_v45, %v7871_v16  ;;  %v2551_v0 = vmul.f32 %v6803_v21, %v9383_v57 }
 0x292   : > { %v2564_v58 = vadd.f32 %v2556_v8, %v7871_v16  ;;  %v1972_v38 = vmul.f32 %v6805_v42, %v9384_v26  ;;  %2012 = vrot.lane.b32.xlu0 %v1994_v37, %s6914_s27 }
 0x293   : > { %6814 = vrsqrt.f32 %v2536_v62  ;;  %v1997_v6 = vmax.f32 %v1989_v35, 0.0  ;;  %v2559_v13 = vmul.f32 %v2551_v0, %v7868_v28 }
 0x294   : > { %v6807_v19 = vpop.eup %6806  ;;  %v2572_v51 = vmax.f32 %v2564_v58, 0.0  ;;  %v1980_v1 = vmul.f32 %v1972_v38, %v7868_v28 }
 0x295   : > { %v6809_v59 = vpop.eup %6808  ;;  %2018 = vrot.lane.b32.xlu1 %v1997_v6, %s6914_s27  ;;  %v2567_v31 = vadd.f32 %v2559_v13, %v7871_v16  ;;  %v1975_v4 = vmul.f32 %v6807_v19, %v9385_v11 }
 0x296   : > { %v1988_v18 = vadd.f32 %v1980_v1, %v7871_v16  ;;  %v2550_v61 = vmul.f32 %v6809_v59, %v9386_v52  ;;  %2590 = vrot.lane.b32.xlu0 %v2572_v51, %s6913_s21  ;;  %v6619_v52 = vld [vmem:[%s9259_s3 + $0x8] sm:$0xff]  }
 0x297   : > { %v1257_v14 = vpop.permute.xlu1 %1256  ;;  %v2575_v40 = vmax.f32 %v2567_v31, 0.0  ;;  %v1983_v36 = vmul.f32 %v1975_v4, %v7868_v28  ;;  %v6617_v31 = vld [vmem:[%s9259_s3] sm:$0xff]  }
 0x298   : > { %v6811_v23 = vpop.eup %6810  ;;  %1280 = vst.msk [vmem:[#allocation2 + $0x9] sm:$0xff] %vm1278_vm3, %v1257_v14  ;;  %v1996_v24 = vmax.f32 %v1988_v18, 0.0  ;;  %v2558_v43 = vmul.f32 %v2550_v61, %v7868_v28 }
 0x299   : > { %v6813_v44 = vpop.eup %6812  ;;  %2596 = vrot.lane.b32.xlu1 %v2575_v40, %s6913_s21  ;;  %v1991_v30 = vadd.f32 %v1983_v36, %v7871_v16  ;;  %v2553_v48 = vmul.f32 %v6811_v23, %v9387_v9  ;;  %v6616_v23 = vld [vmem:[%s9259_s3 + $0x40] sm:$0xff]   ;;  %v6618_v9 = vld [vmem:[%s9259_s3 + $0x48] sm:$0xff]  }
 0x29a   : > { %v2566_v20 = vadd.f32 %v2558_v43, %v7871_v16  ;;  %v1974_v15 = vmul.f32 %v6813_v44, %v9388_v25  ;;  %2016 = vrot.lane.b32.xlu0 %v1996_v24, %s6914_s27  ;;  %v6621_v43 = vld [vmem:[%s9259_s3 + $0x10] sm:$0xff]  }
 0x29b   : > { %v1999_v17 = vmax.f32 %v1991_v30, 0.0  ;;  %v2561_v56 = vmul.f32 %v2553_v48, %v7868_v28  ;;  %v6623_v48 = vld [vmem:[%s9259_s3 + $0x18] sm:$0xff]  }
 0x29c   : > { %v1255_v7 = vpop.permute.xlu0 %1254  ;;  %v2574_v5 = vmax.f32 %v2566_v20, 0.0  ;;  %v1982_v34 = vmul.f32 %v1974_v15, %v7868_v28 }
 0x29d   : > { %v6815_v12 = vpop.eup %6814  ;;  %1279 = vst.msk [vmem:[#allocation2 + $0x1] sm:$0xff] %vm1278_vm3, %v1255_v7  ;;  %2022 = vrot.lane.b32.xlu1 %v1999_v17, %s6914_s27  ;;  %v2569_v46 = vadd.f32 %v2561_v56, %v7871_v16 }
 0x29e   : > { %v2552_v49 = vmul.f32 %v6815_v12, %v9389_v10  ;;  %v1990_v39 = vadd.f32 %v1982_v34, %v7871_v16  ;;  %2594 = vrot.lane.b32.xlu0 %v2574_v5, %s6913_s21  ;;  %v6620_v34 = vld [vmem:[%s9259_s3 + $0x50] sm:$0xff]  }
 0x29f   : > { %v1261_v63 = vpop.permute.xlu1 %1260  ;;  %v2577_v47 = vmax.f32 %v2569_v46, 0.0  ;;  %v6625_v46 = vld [vmem:[%s9259_s3 + $0x20] sm:$0xff]  }
 0x2a0   : > { %v2560_v32 = vmul.f32 %v2552_v49, %v7868_v28  ;;  %1282 = vst.msk [vmem:[#allocation2 + $0x19] sm:$0xff] %vm1278_vm3, %v1261_v63  ;;  %v1998_v33 = vmax.f32 %v1990_v39, 0.0  ;;  %v6622_v39 = vld [vmem:[%s9259_s3 + $0x58] sm:$0xff]   ;;  %v6627_v63 = vld [vmem:[%s9259_s3 + $0x28] sm:$0xff]  }
 0x2a1   : > { %2600 = vrot.lane.b32.xlu1 %v2577_v47, %s6913_s21 }
 0x2a2   : > { %v2568_v22 = vadd.f32 %v2560_v32, %v7871_v16  ;;  %2020 = vrot.lane.b32.xlu0 %v1998_v33, %s6914_s27  ;;  %v6624_v33 = vld [vmem:[%s9259_s3 + $0x60] sm:$0xff]  }
 0x2a4   : > { %v2576_v3 = vmax.f32 %v2568_v22, 0.0  ;;  %v1259_v27 = vpop.permute.xlu1 %1258  ;;  %v6629_v22 = vld [vmem:[%s9259_s3 + $0x30] sm:$0xff]  }
 0x2a5   : > { %1281 = vst.msk [vmem:[#allocation2 + $0x11] sm:$0xff] %vm1278_vm3, %v1259_v27 }
 0x2a6   : > { %2598 = vrot.lane.b32.xlu0 %v2576_v3, %s6913_s21 }
 0x2a8   : > { %v1265_v60 = vpop.permute.xlu1 %1264 }
 0x2a9   : > { %1284 = vst.msk [vmem:[#allocation2 + $0x29] sm:$0xff] %vm1278_vm3, %v1265_v60  ;;  %v6626_v60 = vld [vmem:[%s9259_s3 + $0x68] sm:$0xff]  }
 0x2ac   : > { %v1263_v41 = vpop.permute.xlu0 %1262 }
 0x2ad   : > { %1283 = vst.msk [vmem:[#allocation2 + $0x21] sm:$0xff] %vm1278_vm3, %v1263_v41  ;;  %v6631_v41 = vld [vmem:[%s9259_s3 + $0x38] sm:$0xff]  }
 0x2af   : > { %v1269_v28 = vpop.permute.xlu1 %1268 }
 0x2b0   : > { %1286 = vst.msk [vmem:[#allocation2 + $0x39] sm:$0xff] %vm1278_vm3, %v1269_v28 }
 0x2b4   : > { %v1267_v53 = vpop.permute.xlu0 %1266 }
 0x2b5   : > { %1285 = vst.msk [vmem:[#allocation2 + $0x31] sm:$0xff] %vm1278_vm3, %v1267_v53 }
 0x2b7   : > { %v1434_v16 = vpop.permute.xlu1 %1433 }
 0x2b8   : > { %1456 = vst.msk [vmem:[#allocation2 + $0x4b] sm:$0xff] %vm1278_vm3, %v1434_v16 }
 0x2bc   : > { %v1432_v55 = vpop.permute.xlu0 %1431 }
 0x2bd   : > { %1455 = vst.msk [vmem:[#allocation2 + $0x43] sm:$0xff] %vm1278_vm3, %v1432_v55 }
 0x2bf   : > { %v1438_v50 = vpop.permute.xlu1 %1437 }
 0x2c0   : > { %1458 = vst.msk [vmem:[#allocation2 + $0x5b] sm:$0xff] %vm1278_vm3, %v1438_v50 }
 0x2c4   : > { %v1436_v29 = vpop.permute.xlu0 %1435 }
 0x2c5   : > { %1457 = vst.msk [vmem:[#allocation2 + $0x53] sm:$0xff] %vm1278_vm3, %v1436_v29 }
 0x2c7   : > { %v1442_v2 = vpop.permute.xlu1 %1441 }
 0x2c8   : > { %1460 = vst.msk [vmem:[#allocation2 + $0x6b] sm:$0xff] %vm1278_vm3, %v1442_v2 }
 0x2cc   : > { %v1440_v45 = vpop.permute.xlu0 %1439 }
 0x2cd   : > { %1459 = vst.msk [vmem:[#allocation2 + $0x63] sm:$0xff] %vm1278_vm3, %v1440_v45 }
 0x2cf   : > { %v1446_v21 = vpop.permute.xlu1 %1445 }
 0x2d0   : > { %1462 = vst.msk [vmem:[#allocation2 + $0x7b] sm:$0xff] %vm1278_vm3, %v1446_v21  ;;  %v6628_v21 = vld [vmem:[%s9259_s3 + $0x70] sm:$0xff]  }
 0x2d4   : > { %v1444_v62 = vpop.permute.xlu0 %1443 }
 0x2d5   : > { %1461 = vst.msk [vmem:[#allocation2 + $0x73] sm:$0xff] %vm1278_vm3, %v1444_v62 }
 0x2d7   : > { %v2412_v37 = vpop.permute.xlu1 %2411 }
 0x2db   : > { %v1832_v8 = vpop.permute.xlu1 %1831 }
 0x2dc   : > { %1856 = vst.msk [vmem:[#allocation2] sm:$0xff] %vm1855_vm4, %v1832_v8  ;;  %v1834_v42 = vpop.permute.xlu0 %1833  ;;  %v6630_v8 = vld [vmem:[%s9259_s3 + $0x78] sm:$0xff]  }
 0x2dd   : > { %1857 = vst.msk [vmem:[#allocation2 + $0x8] sm:$0xff] %vm1855_vm4, %v1834_v42 }
 0x2de   : > { %2435 = vst.msk [vmem:[#allocation2 + $0x8] sm:$0xff] %vm2433_vm5, %v2412_v37 }
 0x2df   : > { %v2416_v35 = vpop.permute.xlu1 %2415 }
 0x2e0   : > { %v2410_v57 = vpop.permute.xlu0 %2409 }
 0x2e1   : > { %2434 = vst.msk [vmem:[#allocation2] sm:$0xff] %vm2433_vm5, %v2410_v57 }
 0x2e3   : > { %v1836_v0 = vpop.permute.xlu1 %1835 }
 0x2e4   : > { %1858 = vst.msk [vmem:[#allocation2 + $0x10] sm:$0xff] %vm1855_vm4, %v1836_v0  ;;  %v1838_v58 = vpop.permute.xlu0 %1837 }
 0x2e5   : > { %1859 = vst.msk [vmem:[#allocation2 + $0x18] sm:$0xff] %vm1855_vm4, %v1838_v58 }
 0x2e6   : > { %2437 = vst.msk [vmem:[#allocation2 + $0x18] sm:$0xff] %vm2433_vm5, %v2416_v35 }
 0x2e7   : > { %v2420_v26 = vpop.permute.xlu1 %2419 }
 0x2e8   : > { %v2414_v38 = vpop.permute.xlu0 %2413  ;;  %v2619_v1 = vld [vmem:[#allocation2 + $0x1] ss:$2 sm:$0xff] }
 0x2e9   : > { %2436 = vst.msk [vmem:[#allocation2 + $0x10] sm:$0xff] %vm2433_vm5, %v2414_v38 }
 0x2eb   : > { %v1840_v6 = vpop.permute.xlu1 %1839 }
 0x2ec   : > { %1860 = vst.msk [vmem:[#allocation2 + $0x20] sm:$0xff] %vm1855_vm4, %v1840_v6  ;;  %v1842_v13 = vpop.permute.xlu0 %1841  ;;  %v2674_v6 = vld [vmem:[#allocation2 + $0x82] ss:$2 sm:$0x1] }
 0x2ed   : > { %1861 = vst.msk [vmem:[#allocation2 + $0x28] sm:$0xff] %vm1855_vm4, %v1842_v13 }
 0x2ee   : > { %2439 = vst.msk [vmem:[#allocation2 + $0x28] sm:$0xff] %vm2433_vm5, %v2420_v26 }
 0x2ef   : > { %v2424_v19 = vpop.permute.xlu1 %2423 }
 0x2f0   : > { %v2418_v51 = vpop.permute.xlu0 %2417  ;;  %v2621_v59 = vld [vmem:[#allocation2 + $0x11] ss:$2 sm:$0xff]  ;;  %v2658_v40 = vld [vmem:[#allocation2 + $0x2] ss:$2 sm:$0xff] }
 0x2f1   : > { %2438 = vst.msk [vmem:[#allocation2 + $0x20] sm:$0xff] %vm2433_vm5, %v2418_v51  ;;  %v2636_v11 = vpack.c.bf16 %v2621_v59, %v2619_v1  ;;  %v3152_v1 = vld [vmem:[#allocation2 + $0x11] ss:$2 sm:$0xff]  ;;  %v3115_v59 = vld [vmem:[#allocation2 + $0x10] ss:$2 sm:$0xff] }
 0x2f3   : > { %v1844_v4 = vpop.permute.xlu1 %1843  ;;  %6280 = vmatmul.mubr.bf16.vlgmr.msra.gmra.mrb[32].mxu1 %v2636_v11  ;;  %v3113_v11 = vld [vmem:[#allocation2] ss:$2 sm:$0xff] }
 0x2f4   : > { %1862 = vst.msk [vmem:[#allocation2 + $0x30] sm:$0xff] %vm1855_vm4, %v1844_v4  ;;  %v1846_v18 = vpop.permute.xlu0 %1845  ;;  %6283 = vmatprep.mubr.msk.bf16.mxu1 %vm6915_vm2, %v9375_v54  ;;  %6336 = vmatpush3.bf16.msra.mxu1 %v6617_v31  ;;  %v3151_v31 = vld [vmem:[#allocation2 + $0x1] ss:$2 sm:$0xff] }
 0x2f5   : > { %1863 = vst.msk [vmem:[#allocation2 + $0x38] sm:$0xff] %vm1855_vm4, %v1846_v18  ;;  %6337 = vmatprep.subr.bf16.mxu1 %v9375_v54  ;;  %v3160_v4 = vpack.c.bf16 %v3152_v1, %v3151_v31  ;;  %v3130_v18 = vpack.c.bf16 %v3115_v59, %v3113_v11 }
 0x2f6   : > { %2441 = vst.msk [vmem:[#allocation2 + $0x38] sm:$0xff] %vm2433_vm5, %v2424_v19  ;;  %v2679_v19 = vpack.c.bf16 %v2674_v6, %v2674_v6 }
 0x2f7   : > { %v2011_v61 = vpop.permute.xlu1 %2010 }
 0x2f8   : > { %2033 = vst.msk [vmem:[#allocation2 + $0x4a] sm:$0xff] %vm1855_vm4, %v2011_v61  ;;  %v2422_v14 = vpop.permute.xlu0 %2421  ;;  %v2660_v36 = vld [vmem:[#allocation2 + $0x12] ss:$2 sm:$0xff]  ;;  %6338 = vmatpush3.bf16.msra.mxu1 %v6619_v52  ;;  %v2623_v25 = vld [vmem:[#allocation2 + $0x21] ss:$2 sm:$0xff] }
 0x2f9   : > { %2440 = vst.msk [vmem:[#allocation2 + $0x30] sm:$0xff] %vm2433_vm5, %v2422_v14  ;;  %v2675_v24 = vpack.c.bf16 %v2660_v36, %v2658_v40  ;;  %6339 = vmatprep.subr.bf16.mxu1 %v9375_v54  ;;  %v3153_v14 = vld [vmem:[#allocation2 + $0x21] ss:$2 sm:$0xff]  ;;  %v3117_v40 = vld [vmem:[#allocation2 + $0x20] ss:$2 sm:$0xff] }
 0x2fb   : > { %v2589_v44 = vpop.permute.xlu1 %2588  ;;  %6244 = vmatmul.mubr.bf16.vlgmr.msra.gmra.mrb[32].mxu0 %v2675_v24 }
 0x2fc   : > { %2611 = vst.msk [vmem:[#allocation2 + $0x4a] sm:$0xff] %vm2433_vm5, %v2589_v44  ;;  %v2009_v30 = vpop.permute.xlu0 %2008  ;;  %6247 = vmatprep.mubr.msk.bf16.mxu0 %vm6915_vm2, %v9375_v54  ;;  %6300 = vmatpush3.bf16.msra.mxu0 %v6616_v23 }
 0x2fd   : > { %2032 = vst.msk [vmem:[#allocation2 + $0x42] sm:$0xff] %vm1855_vm4, %v2009_v30  ;;  %6301 = vmatprep.subr.bf16.mxu0 %v9375_v54  ;;  %6340 = vmatpush3.bf16.msra.mxu1 %v6621_v43 }
 0x2fe   : > { %6341 = vmatprep.subr.bf16.mxu1 %v9375_v54 }
 0x2ff   : > { %v2015_v20 = vpop.permute.xlu1 %2014 }
 0x300   : > { %2035 = vst.msk [vmem:[#allocation2 + $0x5a] sm:$0xff] %vm1855_vm4, %v2015_v20  ;;  %v2587_v15 = vpop.permute.xlu0 %2586  ;;  %v2662_v17 = vld [vmem:[#allocation2 + $0x22] ss:$2 sm:$0xff]  ;;  %v2664_v56 = vld [vmem:[#allocation2 + $0x32] ss:$2 sm:$0xff]  ;;  %6302 = vmatpush3.bf16.msra.mxu0 %v6618_v9 }
 0x301   : > { %v2625_v12 = vld [vmem:[#allocation2 + $0x31] ss:$2 sm:$0xff]  ;;  %2610 = vst.msk [vmem:[#allocation2 + $0x42] sm:$0xff] %vm2433_vm5, %v2587_v15  ;;  %v2676_v7 = vpack.c.bf16 %v2664_v56, %v2662_v17  ;;  %6303 = vmatprep.subr.bf16.mxu0 %v9375_v54  ;;  %6342 = vmatpush3.bf16.msra.mxu1 %v6623_v48  ;;  %v3119_v61 = vld [vmem:[#allocation2 + $0x30] ss:$2 sm:$0xff] }
 0x302   : > { %v2637_v5 = vpack.c.bf16 %v2625_v12, %v2623_v25  ;;  %6343 = vmatprep.subr.bf16.mxu1 %v9375_v54  ;;  %v3154_v52 = vld [vmem:[#allocation2 + $0x31] ss:$2 sm:$0xff]  ;;  %v3131_v23 = vpack.c.bf16 %v3119_v61, %v3117_v40 }
 0x303   : > { %v2593_v10 = vpop.permute.xlu1 %2592  ;;  %6248 = vmatmul.mubr.bf16.gmra.mrb[36].mxu0 %v2676_v7  ;;  %v3161_v36 = vpack.c.bf16 %v3154_v52, %v3153_v14 }
 0x304   : > { %6284 = vmatmul.mubr.bf16.gmra.mrb[36].mxu1 %v2637_v5  ;;  %2613 = vst.msk [vmem:[#allocation2 + $0x5a] sm:$0xff] %vm2433_vm5, %v2593_v10  ;;  %v2013_v49 = vpop.permute.xlu0 %2012  ;;  %6251 = vmatprep.mubr.msk.bf16.mxu0 %vm6915_vm2, %v9375_v54 }
 0x305   : > { %6287 = vmatprep.mubr.msk.bf16.mxu1 %vm6915_vm2, %v9375_v54  ;;  %2034 = vst.msk [vmem:[#allocation2 + $0x52] sm:$0xff] %vm1855_vm4, %v2013_v49  ;;  %6304 = vmatpush3.bf16.msra.mxu0 %v6620_v34 }
 0x306   : > { %6344 = vmatpush3.bf16.msra.mxu1 %v6625_v46  ;;  %6305 = vmatprep.subr.bf16.mxu0 %v9375_v54 }
 0x307   : > { %v2019_v47 = vpop.permute.xlu1 %2018  ;;  %6345 = vmatprep.subr.bf16.mxu1 %v9375_v54 }
 0x308   : > { %2037 = vst.msk [vmem:[#allocation2 + $0x6a] sm:$0xff] %vm1855_vm4, %v2019_v47  ;;  %v2591_v32 = vpop.permute.xlu0 %2590  ;;  %v2666_v53 = vld [vmem:[#allocation2 + $0x42] ss:$2 sm:$0xff]  ;;  %v2627_v50 = vld [vmem:[#allocation2 + $0x41] ss:$2 sm:$0xff] }
 0x309   : > { %2612 = vst.msk [vmem:[#allocation2 + $0x52] sm:$0xff] %vm2433_vm5, %v2591_v32  ;;  %6306 = vmatpush3.bf16.msra.mxu0 %v6622_v39  ;;  %v3155_v44 = vld [vmem:[#allocation2 + $0x41] ss:$2 sm:$0xff]  ;;  %v3121_v30 = vld [vmem:[#allocation2 + $0x40] ss:$2 sm:$0xff] }
 0x30a   : > { %6346 = vmatpush3.bf16.msra.mxu1 %v6627_v63  ;;  %6307 = vmatprep.subr.bf16.mxu0 %v9375_v54 }
 0x30b   : > { %v2597_v3 = vpop.permute.xlu1 %2596  ;;  %6347 = vmatprep.subr.bf16.mxu1 %v9375_v54 }
 0x30c   : > { %2615 = vst.msk [vmem:[#allocation2 + $0x6a] sm:$0xff] %vm2433_vm5, %v2597_v3  ;;  %v2017_v27 = vpop.permute.xlu0 %2016 }
 0x30d   : > { %2036 = vst.msk [vmem:[#allocation2 + $0x62] sm:$0xff] %vm1855_vm4, %v2017_v27  ;;  %6308 = vmatpush3.bf16.msra.mxu0 %v6624_v33 }
 0x30e   : > { %6348 = vmatpush3.bf16.msra.mxu1 %v6629_v22  ;;  %6309 = vmatprep.subr.bf16.mxu0 %v9375_v54 }
 0x30f   : > { %v2023_v28 = vpop.permute.xlu1 %2022  ;;  %6349 = vmatprep.subr.bf16.mxu1 %v9375_v54 }
 0x310   : > { %2039 = vst.msk [vmem:[#allocation2 + $0x7a] sm:$0xff] %vm1855_vm4, %v2023_v28  ;;  %v2595_v16 = vpop.permute.xlu0 %2594  ;;  %v2668_v55 = vld [vmem:[#allocation2 + $0x52] ss:$2 sm:$0xff]  ;;  %v2629_v29 = vld [vmem:[#allocation2 + $0x51] ss:$2 sm:$0xff] }
 0x311   : > { %2614 = vst.msk [vmem:[#allocation2 + $0x62] sm:$0xff] %vm2433_vm5, %v2595_v16  ;;  %v2677_v2 = vpack.c.bf16 %v2668_v55, %v2666_v53  ;;  %v2638_v45 = vpack.c.bf16 %v2629_v29, %v2627_v50  ;;  %6310 = vmatpush3.bf16.msra.mxu0 %v6626_v60  ;;  %v3156_v24 = vld [vmem:[#allocation2 + $0x51] ss:$2 sm:$0xff]  ;;  %v3123_v43 = vld [vmem:[#allocation2 + $0x50] ss:$2 sm:$0xff] }
 0x312   : > { %6350 = vmatpush3.bf16.msra.mxu1 %v6631_v41  ;;  %6311 = vmatprep.subr.bf16.mxu0 %v9375_v54  ;;  %v3162_v9 = vpack.c.bf16 %v3156_v24, %v3155_v44  ;;  %v3132_v48 = vpack.c.bf16 %v3123_v43, %v3121_v30  ;;  %v8370_v44 = vld [vmem:[%s9258_s2 + $0x4] sm:$0x7] }
 0x313   : > { %v2601_v62 = vpop.permute.xlu1 %2600  ;;  %6391 = vmatprep.subr.bf16.mxu1 %v9375_v54  ;;  %6252 = vmatmul.mubr.bf16.gmra.mrb[40].mxu0 %v2677_v2 }
 0x314   : > { %6288 = vmatmul.mubr.bf16.gmra.mrb[40].mxu1 %v2638_v45  ;;  %2617 = vst.msk [vmem:[#allocation2 + $0x7a] sm:$0xff] %vm2433_vm5, %v2601_v62  ;;  %v2021_v37 = vpop.permute.xlu0 %2020  ;;  %6255 = vmatprep.mubr.msk.bf16.mxu0 %vm6915_vm2, %v9375_v54 }
 0x315   : > { %6291 = vmatprep.mubr.msk.bf16.mxu1 %vm6915_vm2, %v9375_v54  ;;  %2038 = vst.msk [vmem:[#allocation2 + $0x72] sm:$0xff] %vm1855_vm4, %v2021_v37  ;;  %6312 = vmatpush3.bf16.msra.mxu0 %v6628_v21  ;;  %vm5520_vm4 = vcmask 1044227  }
 0x316   : > { %6313 = vmatprep.subr.bf16.mxu0 %v9375_v54 }
 0x318   : > { %v2599_v42 = vpop.permute.xlu0 %2598  ;;  %v2670_v35 = vld [vmem:[#allocation2 + $0x62] ss:$2 sm:$0xff]  ;;  %v2631_v0 = vld [vmem:[#allocation2 + $0x61] ss:$2 sm:$0xff] }
 0x319   : > { %2616 = vst.msk [vmem:[#allocation2 + $0x72] sm:$0xff] %vm2433_vm5, %v2599_v42  ;;  %6314 = vmatpush3.bf16.msra.mxu0 %v6630_v8  ;;  %v3157_v15 = vld [vmem:[#allocation2 + $0x61] ss:$2 sm:$0xff]  ;;  %v3125_v17 = vld [vmem:[#allocation2 + $0x60] ss:$2 sm:$0xff] }
 0x31a   : > { %6371 = vmatprep.subr.bf16.mxu0 %v9375_v54 }
 0x31b   : > { %v2635_v13 = vld [vmem:[#allocation2 + $0x81] ss:$2 sm:$0x1]  ;;  %v3129_v5 = vld [vmem:[#allocation2 + $0x80] ss:$2 sm:$0x1] }
 0x31c   : > { %v2640_v51 = vpack.c.bf16 %v2635_v13, %v2635_v13  ;;  %v3159_v7 = vld [vmem:[#allocation2 + $0x81] ss:$2 sm:$0x1]  ;;  %v3134_v46 = vpack.c.bf16 %v3129_v5, %v3129_v5 }
 0x31d   : > { %v3164_v34 = vpack.c.bf16 %v3159_v7, %v3159_v7 }
 0x320   : > { %v2672_v57 = vld [vmem:[#allocation2 + $0x72] ss:$2 sm:$0xff]  ;;  %v2633_v58 = vld [vmem:[#allocation2 + $0x71] ss:$2 sm:$0xff] }
 0x321   : > { %v2678_v26 = vpack.c.bf16 %v2672_v57, %v2670_v35  ;;  %v2639_v38 = vpack.c.bf16 %v2633_v58, %v2631_v0  ;;  %v3158_v20 = vld [vmem:[#allocation2 + $0x71] ss:$2 sm:$0xff]  ;;  %v3127_v25 = vld [vmem:[#allocation2 + $0x70] ss:$2 sm:$0xff] }
 0x322   : > { %v3163_v56 = vpack.c.bf16 %v3158_v20, %v3157_v15  ;;  %v3133_v12 = vpack.c.bf16 %v3127_v25, %v3125_v17 }
 0x323   : > { %6256 = vmatmul.mubr.bf16.gmra.mrb[44].mxu0 %v2678_v26  ;;  %6292 = vmatmul.mubr.bf16.gmra.mrb[44].mxu1 %v2639_v38 }
 0x324   : > { %6259 = vmatprep.mubr.msk.bf16.mxu0 %vm6915_vm2, %v9375_v54  ;;  %6295 = vmatprep.mubr.msk.bf16.mxu1 %vm6915_vm2, %v9375_v54 }
 0x32b   : > { %6260 = vmatmul.mubr.bf16.gmra.mrb[48].mxu0 %v2679_v19  ;;  %6296 = vmatmul.mubr.bf16.gmra.mrb[48].mxu1 %v2640_v51 }
 0x32c   : > { %6315 = vmatprep.mubr.msk.bf16.mxu0 %vm6915_vm2, %v9375_v54  ;;  %6351 = vmatprep.mubr.msk.bf16.mxu1 %vm6915_vm2, %v9375_v54 }
 0x333   : > { %6316 = vmatmul.mubr.bf16.vlgmr.msra.gmra.mrb[52].mxu0 %v3160_v4  ;;  %6352 = vmatmul.mubr.bf16.vlgmr.msra.gmra.mrb[52].mxu1 %v3130_v18 }
 0x334   : > { %6319 = vmatprep.mubr.msk.bf16.mxu0 %vm6915_vm2, %v9375_v54  ;;  %6355 = vmatprep.mubr.msk.bf16.mxu1 %vm6915_vm2, %v9375_v54 }
 0x33b   : > { %6320 = vmatmul.mubr.bf16.gmra.mrb[56].mxu0 %v3161_v36  ;;  %6356 = vmatmul.mubr.bf16.gmra.mrb[56].mxu1 %v3131_v23 }
 0x33c   : > { %6323 = vmatprep.mubr.msk.bf16.mxu0 %vm6915_vm2, %v9375_v54  ;;  %6359 = vmatprep.mubr.msk.bf16.mxu1 %vm6915_vm2, %v9375_v54 }
 0x343   : > { %6324 = vmatmul.mubr.bf16.gmra.mrb[60].mxu0 %v3162_v9  ;;  %6360 = vmatmul.mubr.bf16.gmra.mrb[60].mxu1 %v3132_v48  ;;  %v9390_v48 = vld [vmem:[#allocation8_spill] sm:$0xff] }
 0x344   : > { %6327 = vmatprep.mubr.msk.bf16.mxu0 %vm6915_vm2, %v9375_v54  ;;  %6363 = vmatprep.mubr.msk.bf16.mxu1 %vm6915_vm2, %v9375_v54  ;;  %v8374_v20 = vrot.slane %v8370_v44, %v9390_v48 }
 0x34b   : > { %6328 = vmatmul.mubr.bf16.gmra.mrb[64].mxu0 %v3163_v56  ;;  %6364 = vmatmul.mubr.bf16.gmra.mrb[64].mxu1 %v3133_v12 }
 0x34c   : > { %6331 = vmatprep.mubr.msk.bf16.mxu0 %vm6915_vm2, %v9375_v54  ;;  %6367 = vmatprep.mubr.msk.bf16.mxu1 %vm6915_vm2, %v9375_v54 }
 0x353   : > { %6332 = vmatmul.mubr.bf16.gmra.mrb[68].mxu0 %v3164_v34  ;;  %6368 = vmatmul.mubr.bf16.gmra.mrb[68].mxu1 %v3134_v46 }
 0x354   : > { %6379 = vmatprep.mubr.msk.bf16.mxu0 %vm6915_vm2, %v9375_v54  ;;  %6399 = vmatprep.mubr.msk.bf16.mxu1 %vm6915_vm2, %v9375_v54 }
 0x3c6   : > { %v2899_v10 = vpop.f32.mrb[32].mxu1 }
 0x3c7   : > { %v6281_v49 = vpop.f32.mrb[33].mxu1 }
 0x3c8   : > { %v2902_v39 = vpop.f32.mrb[34].mxu1 }
 0x3c9   : > { %v6282_v63 = vpop.f32.mrb[35].mxu1 }
 0x3ce   : > { %v2779_v47 = vpop.f32.mrb[32].mxu0 }
 0x3cf   : > { %v8349_v32 = vadd.f32 %v2899_v10, %v2779_v47  ;;  %v6245_v33 = vpop.f32.mrb[33].mxu0 }
 0x3d0   : > { %v2782_v22 = vpop.f32.mrb[34].mxu0 }
 0x3d1   : > { %v8351_v3 = vadd.f32 %v2902_v39, %v2782_v22  ;;  %v6246_v27 = vpop.f32.mrb[35].mxu0 }
 0x3d6   : > { %v2787_v60 = vpop.f32.mrb[36].mxu0 }
 0x3d7   : > { %v2907_v41 = vpop.f32.mrb[36].mxu1  ;;  %v6249_v53 = vpop.f32.mrb[37].mxu0 }
 0x3d8   : > { %v8353_v28 = vadd.f32 %v2907_v41, %v2787_v60  ;;  %v6285_v16 = vpop.f32.mrb[37].mxu1  ;;  %v2790_v55 = vpop.f32.mrb[38].mxu0 }
 0x3d9   : > { %v2910_v50 = vpop.f32.mrb[38].mxu1  ;;  %v6250_v2 = vpop.f32.mrb[39].mxu0 }
 0x3da   : > { %v8355_v29 = vadd.f32 %v2910_v50, %v2790_v55  ;;  %v6286_v45 = vpop.f32.mrb[39].mxu1 }
 0x3e6   : > { %v2795_v21 = vpop.f32.mrb[40].mxu0 }
 0x3e7   : > { %v2915_v62 = vpop.f32.mrb[40].mxu1  ;;  %v6253_v8 = vpop.f32.mrb[41].mxu0 }
 0x3e8   : > { %v8357_v37 = vadd.f32 %v2915_v62, %v2795_v21  ;;  %v6289_v42 = vpop.f32.mrb[41].mxu1  ;;  %v2798_v35 = vpop.f32.mrb[42].mxu0 }
 0x3e9   : > { %v2918_v57 = vpop.f32.mrb[42].mxu1  ;;  %v6254_v58 = vpop.f32.mrb[43].mxu0 }
 0x3ea   : > { %v8359_v0 = vadd.f32 %v2918_v57, %v2798_v35  ;;  %v6290_v26 = vpop.f32.mrb[43].mxu1 }
 0x3f6   : > { %v2803_v38 = vpop.f32.mrb[44].mxu0  ;;  %v2923_v6 = vpop.f32.mrb[44].mxu1 }
 0x3f7   : > { %v8361_v13 = vadd.f32 %v2923_v6, %v2803_v38  ;;  %v6257_v19 = vpop.f32.mrb[45].mxu0  ;;  %v6293_v51 = vpop.f32.mrb[45].mxu1 }
 0x3f8   : > { %v2806_v1 = vpop.f32.mrb[46].mxu0  ;;  %v2926_v59 = vpop.f32.mrb[46].mxu1 }
 0x3f9   : > { %v8363_v31 = vadd.f32 %v2926_v59, %v2806_v1  ;;  %v6258_v11 = vpop.f32.mrb[47].mxu0  ;;  %v6294_v4 = vpop.f32.mrb[47].mxu1 }
 0x3fe   : > { %v2811_v18 = vpop.f32.mrb[48].mxu0  ;;  %v2931_v52 = vpop.f32.mrb[48].mxu1 }
 0x3ff   : > { %v8365_v61 = vadd.f32 %v2931_v52, %v2811_v18  ;;  %v6261_v14 = vpop.f32.mrb[49].mxu0  ;;  %v6297_v40 = vpop.f32.mrb[49].mxu1 }
 0x400   : > { %v2814_v36 = vpop.f32.mrb[50].mxu0  ;;  %v2934_v23 = vpop.f32.mrb[50].mxu1 }
 0x401   : > { %v6262_v24 = vpop.f32.mrb[51].mxu0  ;;  %v6298_v43 = vpop.f32.mrb[51].mxu1 }
 0x406   : > { %v3263_v30 = vpop.f32.mrb[52].mxu0  ;;  %v3383_v9 = vpop.f32.mrb[52].mxu1 }
 0x407   : > { %v3384_v25 = vadd.f32 %v3383_v9, %v3263_v30  ;;  %v6317_v15 = vpop.f32.mrb[53].mxu0  ;;  %v6353_v17 = vpop.f32.mrb[53].mxu1 }
 0x408   : > { %v3266_v56 = vpop.f32.mrb[54].mxu0  ;;  %v3386_v12 = vpop.f32.mrb[54].mxu1  ;;  %v8416_v17 = vadd.f32 %v8374_v20, %v8349_v32 }
 0x409   : > { %v8377_v7 = vadd.f32 %v3384_v25, %v8374_v20  ;;  %v3387_v5 = vadd.f32 %v3386_v12, %v3266_v56  ;;  %v6318_v34 = vpop.f32.mrb[55].mxu0  ;;  %v6354_v46 = vpop.f32.mrb[55].mxu1 }
 0x40b   : > { %v8380_v10 = vadd.f32 %v3387_v5, %v8374_v20  ;;  %v3425_v49 = vsel %vm595_vm1, %v8377_v7, 0.0 }
 0x40c   : > { %3426 = vadd.xlane.f32.xlu0 %v3425_v49 }
 0x40d   : > { %v3428_v39 = vsel %vm595_vm1, %v8380_v10, 0.0 }
 0x40e   : > { %v3271_v63 = vpop.f32.mrb[56].mxu0  ;;  %3429 = vadd.xlane.f32.xlu1 %v3428_v39  ;;  %v3391_v47 = vpop.f32.mrb[56].mxu1 }
 0x40f   : > { %v3392_v33 = vadd.f32 %v3391_v47, %v3271_v63  ;;  %v6321_v22 = vpop.f32.mrb[57].mxu0  ;;  %v6357_v27 = vpop.f32.mrb[57].mxu1  ;;  %v8422_v47 = vadd.f32 %v8374_v20, %v8353_v28  ;;  %v8437_v28 = vadd.f32 %v8374_v20, %v8357_v37 }
 0x410   : > { %v3274_v60 = vpop.f32.mrb[58].mxu0  ;;  %v3394_v41 = vpop.f32.mrb[58].mxu1  ;;  %v2945_v27 = vsel %vm595_vm1, %v8416_v17, 0.0 }
 0x411   : > { %v8387_v53 = vadd.f32 %v3392_v33, %v8374_v20  ;;  %v3395_v16 = vadd.f32 %v3394_v41, %v3274_v60  ;;  %v6322_v55 = vpop.f32.mrb[59].mxu0  ;;  %v6358_v50 = vpop.f32.mrb[59].mxu1  ;;  %v8431_v60 = vadd.f32 %v8374_v20, %v8351_v3  ;;  %v3027_v37 = vsel %vm3026_vm6, %v8437_v28, 0.0 }
 0x412   : > { %v8443_v55 = vadd.f32 %v8374_v20, %v8355_v29  ;;  %v8449_v50 = vadd.f32 %v8374_v20, %v8361_v13 }
 0x413   : > { %v8390_v2 = vadd.f32 %v3395_v16, %v8374_v20  ;;  %v3431_v45 = vsel %vm595_vm1, %v8387_v53, 0.0  ;;  %v2951_v16 = vsel %vm595_vm1, %v8422_v47, 0.0  ;;  %v2948_v3 = vsel %vm595_vm1, %v8431_v60, 0.0 }
 0x414   : > { %3432 = vadd.xlane.f32.xlu0 %v3431_v45  ;;  %v8455_v45 = vadd.f32 %v8374_v20, %v8359_v0  ;;  %v2954_v29 = vsel %vm595_vm1, %v8443_v55, 0.0  ;;  %v3033_v13 = vsel %vm595_vm1, %v8449_v50, 0.0 }
 0x415   : > { %v3434_v57 = vsel %vm595_vm1, %v8390_v2, 0.0 }
 0x416   : > { %v3279_v21 = vpop.f32.mrb[60].mxu0  ;;  %v3399_v62 = vpop.f32.mrb[60].mxu1  ;;  %v3030_v0 = vsel %vm595_vm1, %v8455_v45, 0.0 }
 0x417   : > { %v3400_v8 = vadd.f32 %v3399_v62, %v3279_v21  ;;  %v6325_v42 = vpop.f32.mrb[61].mxu0  ;;  %v6361_v35 = vpop.f32.mrb[61].mxu1  ;;  %v8461_v21 = vadd.f32 %v8374_v20, %v8365_v61  ;;  %v8467_v62 = vadd.f32 %v8374_v20, %v8363_v31 }
 0x418   : > { %v3282_v58 = vpop.f32.mrb[62].mxu0  ;;  %3435 = vadd.xlane.f32.xlu0 %v3434_v57  ;;  %v3402_v26 = vpop.f32.mrb[62].mxu1 }
 0x419   : > { %v8397_v38 = vadd.f32 %v3400_v8, %v8374_v20  ;;  %v3403_v6 = vadd.f32 %v3402_v26, %v3282_v58  ;;  %v6326_v19 = vpop.f32.mrb[63].mxu0  ;;  %v6362_v51 = vpop.f32.mrb[63].mxu1  ;;  %v3040_v8 = vsel %vm3039_vm7, %v8461_v21, 0.0  ;;  %v3036_v61 = vsel %vm595_vm1, %v8467_v62, 0.0 }
 0x41b   : > { %v8400_v1 = vadd.f32 %v3403_v6, %v8374_v20  ;;  %v3514_v59 = vsel %vm3026_vm6, %v8397_v38, 0.0 }
 0x41c   : > { %3515 = vadd.xlane.f32.xlu0 %v3514_v59 }
 0x41d   : > { %v3517_v11 = vsel %vm595_vm1, %v8400_v1, 0.0 }
 0x41e   : > { %v3287_v4 = vpop.f32.mrb[64].mxu0  ;;  %3518 = vadd.xlane.f32.xlu1 %v3517_v11  ;;  %v3407_v18 = vpop.f32.mrb[64].mxu1 }
 0x41f   : > { %v3408_v52 = vadd.f32 %v3407_v18, %v3287_v4  ;;  %v6329_v14 = vpop.f32.mrb[65].mxu0  ;;  %v6365_v40 = vpop.f32.mrb[65].mxu1 }
 0x420   : > { %v3290_v36 = vpop.f32.mrb[66].mxu0  ;;  %v3410_v23 = vpop.f32.mrb[66].mxu1 }
 0x421   : > { %v8407_v24 = vadd.f32 %v3408_v52, %v8374_v20  ;;  %v3411_v43 = vadd.f32 %v3410_v23, %v3290_v36  ;;  %v6330_v30 = vpop.f32.mrb[67].mxu0  ;;  %v6366_v9 = vpop.f32.mrb[67].mxu1 }
 0x423   : > { %v8410_v25 = vadd.f32 %v3411_v43, %v8374_v20  ;;  %v3520_v15 = vsel %vm595_vm1, %v8407_v24, 0.0 }
 0x424   : > { %3521 = vadd.xlane.f32.xlu0 %v3520_v15 }
 0x425   : > { %v3523_v56 = vsel %vm595_vm1, %v8410_v25, 0.0 }
 0x426   : > { %v3295_v12 = vpop.f32.mrb[68].mxu0  ;;  %3524 = vadd.xlane.f32.xlu1 %v3523_v56  ;;  %v3415_v5 = vpop.f32.mrb[68].mxu1 }
 0x427   : > { %v3416_v34 = vadd.f32 %v3415_v5, %v3295_v12  ;;  %v6333_v46 = vpop.f32.mrb[69].mxu0  ;;  %v6369_v49 = vpop.f32.mrb[69].mxu1 }
 0x428   : > { %v3298_v39 = vpop.f32.mrb[70].mxu0  ;;  %v3418_v63 = vpop.f32.mrb[70].mxu1 }
 0x429   : > { %v8425_v33 = vadd.f32 %v3416_v34, %v8374_v20  ;;  %v6334_v32 = vpop.f32.mrb[71].mxu0  ;;  %v6370_v22 = vpop.f32.mrb[71].mxu1 }
 0x42a   : > { %2946 = vadd.xlane.f32.xlu1 %v2945_v27 }
 0x42b   : > { %v3526_v41 = vsel %vm3039_vm7, %v8425_v33, 0.0 }
 0x42c   : > { %3527 = vadd.xlane.f32.xlu0 %v3526_v41 }
 0x42e   : > { %2952 = vadd.xlane.f32.xlu1 %v2951_v16 }
 0x430   : > { %2949 = vadd.xlane.f32.xlu0 %v2948_v3 }
 0x432   : > { %3028 = vadd.xlane.f32.xlu1 %v3027_v37 }
 0x434   : > { %2955 = vadd.xlane.f32.xlu0 %v2954_v29 }
 0x436   : > { %3034 = vadd.xlane.f32.xlu1 %v3033_v13 }
 0x438   : > { %3031 = vadd.xlane.f32.xlu0 %v3030_v0 }
 0x43a   : > { %3041 = vadd.xlane.f32.xlu1 %v3040_v8 }
 0x43c   : > { %3037 = vadd.xlane.f32.xlu0 %v3036_v61 }
 0x499   : > { %v3427_v42 = vpop.xlane.xlu0 %3426 }
 0x49a   : > { %v3437_v35 = vmul.f32 0.03125, %v3427_v42 }
 0x49b   : > { %v3430_v57 = vpop.xlane.xlu1 %3429 }
 0x49c   : > { %v8476_v58 = vsub.f32 %v8377_v7, %v3437_v35  ;;  %v3438_v31 = vmul.f32 0.03125, %v3430_v57 }
 0x49e   : > { %v8479_v20 = vsub.f32 %v8380_v10, %v3438_v31  ;;  %v3445_v26 = vmul.f32 %v8476_v58, %v8476_v58 }
 0x4a0   : > { %v3449_v6 = vsel %vm595_vm1, %v3445_v26, 0.0  ;;  %v3446_v19 = vmul.f32 %v8479_v20, %v8479_v20 }
 0x4a1   : > { %v3433_v51 = vpop.xlane.xlu0 %3432  ;;  %3450 = vadd.xlane.f32.xlu0 %v3449_v6 }
 0x4a2   : > { %v3439_v59 = vmul.f32 0.03125, %v3433_v51  ;;  %v3452_v11 = vsel %vm595_vm1, %v3446_v19, 0.0 }
 0x4a3   : > { %3453 = vadd.xlane.f32.xlu1 %v3452_v11 }
 0x4a4   : > { %v8488_v7 = vsub.f32 %v8387_v53, %v3439_v59 }
 0x4a5   : > { %v3436_v4 = vpop.xlane.xlu0 %3435 }
 0x4a6   : > { %v3440_v10 = vmul.f32 0.03125, %v3436_v4  ;;  %v3447_v18 = vmul.f32 %v8488_v7, %v8488_v7 }
 0x4a8   : > { %v8493_v52 = vsub.f32 %v8390_v2, %v3440_v10  ;;  %v3455_v14 = vsel %vm595_vm1, %v3447_v18, 0.0 }
 0x4a9   : > { %v3516_v40 = vpop.xlane.xlu0 %3515  ;;  %3456 = vadd.xlane.f32.xlu0 %v3455_v14 }
 0x4aa   : > { %v3529_v36 = vmul.f32 0.03125, %v3516_v40  ;;  %v3448_v23 = vmul.f32 %v8493_v52, %v8493_v52 }
 0x4ab   : > { %v3519_v43 = vpop.xlane.xlu1 %3518 }
 0x4ac   : > { %v8499_v53 = vsub.f32 %v8397_v38, %v3529_v36  ;;  %v3530_v30 = vmul.f32 0.03125, %v3519_v43  ;;  %v3458_v9 = vsel %vm595_vm1, %v3448_v23, 0.0 }
 0x4ad   : > { %3459 = vadd.xlane.f32.xlu1 %v3458_v9 }
 0x4ae   : > { %v8503_v15 = vsub.f32 %v8400_v1, %v3530_v30  ;;  %v3539_v2 = vmul.f32 %v8499_v53, %v8499_v53 }
 0x4b0   : > { %v3544_v56 = vsel %vm3026_vm6, %v3539_v2, 0.0  ;;  %v3540_v12 = vmul.f32 %v8503_v15, %v8503_v15 }
 0x4b1   : > { %v3522_v5 = vpop.xlane.xlu0 %3521  ;;  %3545 = vadd.xlane.f32.xlu0 %v3544_v56 }
 0x4b2   : > { %v3531_v34 = vmul.f32 0.03125, %v3522_v5  ;;  %v3547_v38 = vsel %vm595_vm1, %v3540_v12, 0.0 }
 0x4b3   : > { %3548 = vadd.xlane.f32.xlu1 %v3547_v38  ;;  %v3525_v46 = vpop.xlane.xlu1 %3524 }
 0x4b4   : > { %v8512_v49 = vsub.f32 %v8407_v24, %v3531_v34  ;;  %v3532_v1 = vmul.f32 0.03125, %v3525_v46 }
 0x4b6   : > { %v8515_v39 = vsub.f32 %v8410_v25, %v3532_v1  ;;  %v3541_v63 = vmul.f32 %v8512_v49, %v8512_v49 }
 0x4b7   : > { %v2947_v32 = vpop.xlane.xlu1 %2946 }
 0x4b8   : > { %v2957_v22 = vmul.f32 0.03125, %v2947_v32  ;;  %v3550_v27 = vsel %vm595_vm1, %v3541_v63, 0.0  ;;  %v3542_v41 = vmul.f32 %v8515_v39, %v8515_v39 }
 0x4b9   : > { %3551 = vadd.xlane.f32.xlu0 %v3550_v27  ;;  %v3528_v16 = vpop.xlane.xlu0 %3527  ;;  %v6634_v27 = vld [vmem:[%s9260_s4 + $0x28] sm:$0xff]  }
 0x4ba   : > { %v8523_v3 = vsub.f32 %v8416_v17, %v2957_v22  ;;  %v3533_v24 = vmul.f32 0.03125, %v3528_v16  ;;  %v3553_v37 = vsel %vm595_vm1, %v3542_v41, 0.0  ;;  %v6633_v22 = vld [vmem:[%s9260_s4] sm:$0xff]   ;;  %v6635_v41 = vld [vmem:[%s9260_s4 + $0x8] sm:$0xff]  }
 0x4bb   : > { %3554 = vadd.xlane.f32.xlu1 %v3553_v37  ;;  %v2953_v25 = vpop.xlane.xlu1 %2952  ;;  %6392 = vmatpush3.bf16.msra.mxu1 %v6633_v22 }
 0x4bc   : > { %v8527_v29 = vsub.f32 %v8425_v33, %v3533_v24  ;;  %v2959_v13 = vmul.f32 0.03125, %v2953_v25  ;;  %v2965_v0 = vmul.f32 %v8523_v3, %v8523_v3  ;;  %6393 = vmatprep.subr.bf16.mxu1 %v9375_v54 }
 0x4bd   : > { %v2950_v8 = vpop.xlane.xlu0 %2949 }
 0x4be   : > { %v8532_v61 = vsub.f32 %v8422_v47, %v2959_v13  ;;  %v2958_v42 = vmul.f32 0.03125, %v2950_v8  ;;  %v2969_v17 = vsel %vm595_vm1, %v2965_v0, 0.0  ;;  %v3543_v35 = vmul.f32 %v8527_v29, %v8527_v29 }
 0x4bf   : > { %2970 = vadd.xlane.f32.xlu1 %v2969_v17  ;;  %v3029_v57 = vpop.xlane.xlu1 %3028  ;;  %6394 = vmatpush3.bf16.msra.mxu1 %v6635_v41 }
 0x4c0   : > { %v8538_v31 = vsub.f32 %v8431_v60, %v2958_v42  ;;  %v3043_v33 = vmul.f32 0.03125, %v3029_v57  ;;  %v3556_v26 = vsel %vm3039_vm7, %v3543_v35, 0.0  ;;  %v2967_v6 = vmul.f32 %v8532_v61, %v8532_v61  ;;  %6395 = vmatprep.subr.bf16.mxu1 %v9375_v54 }
 0x4c1   : > { %3557 = vadd.xlane.f32.xlu0 %v3556_v26  ;;  %v2956_v47 = vpop.xlane.xlu0 %2955 }
 0x4c2   : > { %v8544_v19 = vsub.f32 %v8437_v28, %v3043_v33  ;;  %v2960_v51 = vmul.f32 0.03125, %v2956_v47  ;;  %v2975_v59 = vsel %vm595_vm1, %v2967_v6, 0.0  ;;  %v2966_v11 = vmul.f32 %v8538_v31, %v8538_v31  ;;  %v9391_v33 = vld [vmem:[#allocation7_spill] sm:$0xff] }
 0x4c3   : > { %2976 = vadd.xlane.f32.xlu1 %v2975_v59  ;;  %v3035_v60 = vpop.xlane.xlu1 %3034  ;;  %v8615_v26 = vrot.slane %v8370_v44, %v9391_v33 }
 0x4c4   : > { %v8550_v4 = vsub.f32 %v8443_v55, %v2960_v51  ;;  %v3045_v10 = vmul.f32 0.03125, %v3035_v60  ;;  %v2972_v18 = vsel %vm595_vm1, %v2966_v11, 0.0  ;;  %v3053_v14 = vmul.f32 %v8544_v19, %v8544_v19  ;;  %v9392_v51 = vld [vmem:[#allocation32_spill] sm:$0xff] }
 0x4c5   : > { %2973 = vadd.xlane.f32.xlu0 %v2972_v18  ;;  %v3032_v28 = vpop.xlane.xlu0 %3031  ;;  %v8619_v59 = vrot.slane %v8370_v44, %v9392_v51  ;;  %v6637_v44 = vld [vmem:[%s9260_s4 + $0x10] sm:$0xff]  }
 0x4c6   : > { %v8556_v40 = vsub.f32 %v8449_v50, %v3045_v10  ;;  %v3044_v36 = vmul.f32 0.03125, %v3032_v28  ;;  %v3058_v23 = vsel %vm3026_vm6, %v3053_v14, 0.0  ;;  %v2968_v43 = vmul.f32 %v8550_v4, %v8550_v4  ;;  %6396 = vmatpush3.bf16.msra.mxu1 %v6637_v44 }
 0x4c7   : > { %3059 = vadd.xlane.f32.xlu1 %v3058_v23  ;;  %v3042_v55 = vpop.xlane.xlu1 %3041  ;;  %6397 = vmatprep.subr.bf16.mxu1 %v9375_v54 }
 0x4c8   : > { %v8562_v30 = vsub.f32 %v8455_v45, %v3044_v36  ;;  %v3047_v9 = vmul.f32 0.03125, %v3042_v55  ;;  %v2978_v2 = vsel %vm595_vm1, %v2968_v43, 0.0  ;;  %v3055_v56 = vmul.f32 %v8556_v40, %v8556_v40  ;;  %v6636_v55 = vld [vmem:[%s9260_s4 + $0x30] sm:$0xff]  }
 0x4c9   : > { %2979 = vadd.xlane.f32.xlu0 %v2978_v2  ;;  %v3038_v50 = vpop.xlane.xlu0 %3037 }
 0x4ca   : > { %v8568_v12 = vsub.f32 %v8461_v21, %v3047_v9  ;;  %v3046_v5 = vmul.f32 0.03125, %v3038_v50  ;;  %v3064_v34 = vsel %vm595_vm1, %v3055_v56, 0.0  ;;  %v3054_v38 = vmul.f32 %v8562_v30, %v8562_v30 }
 0x4cb   : > { %3065 = vadd.xlane.f32.xlu1 %v3064_v34 }
 0x4cc   : > { %v8574_v45 = vsub.f32 %v8467_v62, %v3046_v5  ;;  %v3061_v46 = vsel %vm595_vm1, %v3054_v38, 0.0  ;;  %v3057_v1 = vmul.f32 %v8568_v12, %v8568_v12  ;;  %v6632_v62 = vld [vmem:[%s9260_s4 + $0x20] sm:$0xff]  }
 0x4cd   : > { %3062 = vadd.xlane.f32.xlu0 %v3061_v46  ;;  %6372 = vmatpush3.bf16.msra.mxu0 %v6632_v62 }
 0x4ce   : > { %v3070_v63 = vsel %vm3039_vm7, %v3057_v1, 0.0  ;;  %v3056_v21 = vmul.f32 %v8574_v45, %v8574_v45  ;;  %6373 = vmatprep.subr.bf16.mxu0 %v9375_v54 }
 0x4cf   : > { %3071 = vadd.xlane.f32.xlu1 %v3070_v63 }
 0x4d0   : > { %v3067_v32 = vsel %vm595_vm1, %v3056_v21, 0.0 }
 0x4d1   : > { %3068 = vadd.xlane.f32.xlu0 %v3067_v32  ;;  %6374 = vmatpush3.bf16.msra.mxu0 %v6634_v27 }
 0x4d2   : > { %6375 = vmatprep.subr.bf16.mxu0 %v9375_v54 }
 0x4d5   : > { %6376 = vmatpush3.bf16.msra.mxu0 %v6636_v55 }
 0x4d6   : > { %6377 = vmatprep.subr.bf16.mxu0 %v9375_v54 }
 0x52e   : > { %v3451_v16 = vpop.xlane.xlu0 %3450 }
 0x52f   : > { %v3461_v24 = vmul.f32 0.03125, %v3451_v16  ;;  %v6638_v16 = vld [vmem:[%s9260_s4 + $0x38] sm:$0xff]  }
 0x530   : > { %v3454_v37 = vpop.xlane.xlu1 %3453  ;;  %6378 = vmatpush3.bf16.msra.mxu0 %v6638_v16 }
 0x531   : > { %v3465_v25 = vadd.f32 1e-05, %v3461_v24  ;;  %v3462_v13 = vmul.f32 0.03125, %v3454_v37  ;;  %6411 = vmatprep.subr.bf16.mxu0 %v9375_v54 }
 0x533   : > { %6816 = vrsqrt.f32 %v3465_v25  ;;  %v3466_v0 = vadd.f32 1e-05, %v3462_v13 }
 0x535   : > { %6818 = vrsqrt.f32 %v3466_v0 }
 0x536   : > { %v3457_v8 = vpop.xlane.xlu0 %3456 }
 0x537   : > { %v3463_v42 = vmul.f32 0.03125, %v3457_v8 }
 0x539   : > { %v3467_v17 = vadd.f32 1e-05, %v3463_v42 }
 0x53a   : > { %v3460_v35 = vpop.xlane.xlu1 %3459 }
 0x53b   : > { %6820 = vrsqrt.f32 %v3467_v17  ;;  %v3464_v57 = vmul.f32 0.03125, %v3460_v35 }
 0x53d   : > { %v6817_v6 = vpop.eup %6816  ;;  %v3468_v47 = vadd.f32 1e-05, %v3464_v57 }
 0x53e   : > { %v3546_v11 = vpop.xlane.xlu0 %3545  ;;  %v3473_v60 = vmul.f32 %v6817_v6, %v8476_v58 }
 0x53f   : > { %v6819_v10 = vpop.eup %6818  ;;  %6822 = vrsqrt.f32 %v3468_v47  ;;  %v3559_v18 = vmul.f32 0.03125, %v3546_v11 }
 0x540   : > { %v3549_v14 = vpop.xlane.xlu1 %3548  ;;  %v3477_v28 = vmul.f32 %v3473_v60, %v8615_v26  ;;  %v3474_v36 = vmul.f32 %v6819_v10, %v8479_v20 }
 0x541   : > { %v3564_v23 = vadd.f32 1e-05, %v3559_v18  ;;  %v3560_v43 = vmul.f32 0.03125, %v3549_v14 }
 0x542   : > { %v3481_v58 = vadd.f32 %v3477_v28, %v8619_v59  ;;  %v3478_v9 = vmul.f32 %v3474_v36, %v8615_v26 }
 0x543   : > { %6824 = vrsqrt.f32 %v3564_v23  ;;  %v3565_v2 = vadd.f32 1e-05, %v3560_v43 }
 0x544   : > { %v3485_v56 = vmax.f32 %v3481_v58, 0.0  ;;  %v3482_v20 = vadd.f32 %v3478_v9, %v8619_v59 }
 0x545   : > { %v6821_v50 = vpop.eup %6820  ;;  %6826 = vrsqrt.f32 %v3565_v2 }
 0x546   : > { %3493 = vrot.lane.b32.xlu0 %v3485_v56, %s6912_s23  ;;  %v3552_v5 = vpop.xlane.xlu0 %3551  ;;  %v3486_v34 = vmax.f32 %v3482_v20, 0.0  ;;  %v3475_v38 = vmul.f32 %v6821_v50, %v8488_v7  ;;  %v6639_v7 = vld [vmem:[%s9260_s4 + $0x18] sm:$0xff]  }
 0x547   : > { %v3561_v46 = vmul.f32 0.03125, %v3552_v5  ;;  %6398 = vmatpush3.bf16.msra.mxu1 %v6639_v7 }
 0x548   : > { %3495 = vrot.lane.b32.xlu1 %v3486_v34, %s6912_s23  ;;  %v3555_v1 = vpop.xlane.xlu1 %3554  ;;  %v3479_v63 = vmul.f32 %v3475_v38, %v8615_v26  ;;  %6431 = vmatprep.subr.bf16.mxu1 %v9375_v54 }
 0x549   : > { %v6823_v21 = vpop.eup %6822  ;;  %v3566_v32 = vadd.f32 1e-05, %v3561_v46  ;;  %v3562_v62 = vmul.f32 0.03125, %v3555_v1 }
 0x54a   : > { %v3483_v22 = vadd.f32 %v3479_v63, %v8619_v59  ;;  %v3476_v27 = vmul.f32 %v6823_v21, %v8493_v52 }
 0x54b   : > { %6828 = vrsqrt.f32 %v3566_v32  ;;  %v3567_v41 = vadd.f32 1e-05, %v3562_v62 }
 0x54c   : > { %v2971_v24 = vpop.xlane.xlu1 %2970  ;;  %v3487_v37 = vmax.f32 %v3483_v22, 0.0  ;;  %v3480_v25 = vmul.f32 %v3476_v27, %v8615_v26 }
 0x54d   : > { %v6825_v13 = vpop.eup %6824  ;;  %6830 = vrsqrt.f32 %v3567_v41  ;;  %v2981_v0 = vmul.f32 0.03125, %v2971_v24 }
 0x54e   : > { %3497 = vrot.lane.b32.xlu1 %v3487_v37, %s6912_s23  ;;  %v3558_v52 = vpop.xlane.xlu0 %3557  ;;  %v3484_v8 = vadd.f32 %v3480_v25, %v8619_v59  ;;  %v3574_v42 = vmul.f32 %v6825_v13, %v8499_v53 }
 0x54f   : > { %v6827_v17 = vpop.eup %6826  ;;  %v2985_v35 = vadd.f32 1e-05, %v2981_v0  ;;  %v3563_v57 = vmul.f32 0.03125, %v3558_v52 }
 0x550   : > { %v2977_v6 = vpop.xlane.xlu1 %2976  ;;  %v3488_v47 = vmax.f32 %v3484_v8, 0.0  ;;  %v3579_v11 = vmul.f32 %v3574_v42, %v8615_v26  ;;  %v3575_v60 = vmul.f32 %v6827_v17, %v8503_v15 }
 0x551   : > { %6832 = vrsqrt.f32 %v2985_v35  ;;  %v3568_v10 = vadd.f32 1e-05, %v3563_v57  ;;  %v2983_v18 = vmul.f32 0.03125, %v2977_v6 }
 0x552   : > { %3499 = vrot.lane.b32.xlu1 %v3488_v47, %s6912_s23  ;;  %v2974_v14 = vpop.xlane.xlu0 %2973  ;;  %v3584_v53 = vadd.f32 %v3579_v11, %v8619_v59  ;;  %v3580_v28 = vmul.f32 %v3575_v60, %v8615_v26 }
 0x553   : > { %6834 = vrsqrt.f32 %v3568_v10  ;;  %v2987_v36 = vadd.f32 1e-05, %v2983_v18  ;;  %v2982_v23 = vmul.f32 0.03125, %v2974_v14 }
 0x554   : > { %v3060_v43 = vpop.xlane.xlu1 %3059  ;;  %v3589_v55 = vmax.f32 %v3584_v53, 0.0  ;;  %v3585_v44 = vadd.f32 %v3580_v28, %v8619_v59 }
 0x555   : > { %v6829_v58 = vpop.eup %6828  ;;  %6836 = vrsqrt.f32 %v2987_v36  ;;  %v2986_v15 = vadd.f32 1e-05, %v2982_v23  ;;  %v3073_v9 = vmul.f32 0.03125, %v3060_v43 }
 0x556   : > { %3599 = vrot.lane.b32.xlu0 %v3589_v55, %s6912_s23  ;;  %v2980_v2 = vpop.xlane.xlu0 %2979  ;;  %v3590_v56 = vmax.f32 %v3585_v44, 0.0  ;;  %v3576_v20 = vmul.f32 %v6829_v58, %v8512_v49 }
 0x557   : > { %v6831_v50 = vpop.eup %6830  ;;  %6838 = vrsqrt.f32 %v2986_v15  ;;  %v3078_v5 = vadd.f32 1e-05, %v3073_v9  ;;  %v2984_v34 = vmul.f32 0.03125, %v2980_v2 }
 0x558   : > { %v3066_v38 = vpop.xlane.xlu1 %3065  ;;  %3601 = vrot.lane.b32.xlu1 %v3590_v56, %s6912_s23  ;;  %v3581_v46 = vmul.f32 %v3576_v20, %v8615_v26  ;;  %v3577_v1 = vmul.f32 %v6831_v50, %v8515_v39 }
 0x559   : > { %6840 = vrsqrt.f32 %v3078_v5  ;;  %v2988_v63 = vadd.f32 1e-05, %v2984_v34  ;;  %v3075_v21 = vmul.f32 0.03125, %v3066_v38 }
 0x55a   : > { %v3063_v32 = vpop.xlane.xlu0 %3062  ;;  %v3586_v62 = vadd.f32 %v3581_v46, %v8619_v59  ;;  %v3582_v22 = vmul.f32 %v3577_v1, %v8615_v26 }
 0x55b   : > { %v6833_v49 = vpop.eup %6832  ;;  %6842 = vrsqrt.f32 %v2988_v63  ;;  %v3080_v27 = vadd.f32 1e-05, %v3075_v21  ;;  %v3074_v41 = vmul.f32 0.03125, %v3063_v32 }
 0x55c   : > { %v2993_v16 = vmul.f32 %v6833_v49, %v8523_v3  ;;  %v3072_v7 = vpop.xlane.xlu1 %3071  ;;  %v3591_v24 = vmax.f32 %v3586_v62, 0.0  ;;  %v3587_v37 = vadd.f32 %v3582_v22, %v8619_v59 }
 0x55d   : > { %v6835_v25 = vpop.eup %6834  ;;  %6844 = vrsqrt.f32 %v3080_v27  ;;  %v3079_v39 = vadd.f32 1e-05, %v3074_v41  ;;  %v3077_v13 = vmul.f32 0.03125, %v3072_v7 }
 0x55e   : > { %3603 = vrot.lane.b32.xlu0 %v3591_v24, %s6912_s23  ;;  %v3069_v0 = vpop.xlane.xlu0 %3068  ;;  %v3592_v52 = vmax.f32 %v3587_v37, 0.0  ;;  %v3578_v8 = vmul.f32 %v6835_v25, %v8527_v29  ;;  %v3001_v42 = vmul.f32 %v8615_v26, %v2993_v16 }
 0x55f   : > { %v6837_v17 = vpop.eup %6836  ;;  %6846 = vrsqrt.f32 %v3079_v39  ;;  %v3082_v35 = vadd.f32 1e-05, %v3077_v13  ;;  %v3076_v3 = vmul.f32 0.03125, %v3069_v0  ;;  %v6640_v13 = vld [vmem:[%s9260_s4 + $0x20] sm:$0xff]  }
 0x560   : > { %v2995_v57 = vmul.f32 %v6837_v17, %v8532_v61  ;;  %3605 = vrot.lane.b32.xlu1 %v3592_v52, %s6912_s23  ;;  %v3583_v6 = vmul.f32 %v3578_v8, %v8615_v26  ;;  %v3009_v47 = vadd.f32 %v8619_v59, %v3001_v42  ;;  %v6641_v0 = vld [vmem:[%s9260_s4] sm:$0xff]  }
 0x561   : > { %v6839_v11 = vpop.eup %6838  ;;  %6848 = vrsqrt.f32 %v3082_v35  ;;  %v3081_v60 = vadd.f32 1e-05, %v3076_v3 }
 0x562   : > { %v2994_v10 = vmul.f32 %v6839_v11, %v8538_v31  ;;  %v3588_v29 = vadd.f32 %v3583_v6, %v8619_v59  ;;  %v3013_v18 = vmax.f32 %v3009_v47, 0.0  ;;  %v3003_v14 = vmul.f32 %v8615_v26, %v2995_v57  ;;  %v6642_v57 = vld [vmem:[%s9260_s4 + $0x28] sm:$0xff]   ;;  %v6644_v11 = vld [vmem:[%s9260_s4 + $0x30] sm:$0xff]  }
 0x563   : > { %v6841_v53 = vpop.eup %6840  ;;  %6850 = vrsqrt.f32 %v3081_v60  ;;  %v6643_v6 = vld [vmem:[%s9260_s4 + $0x8] sm:$0xff]   ;;  %v6645_v60 = vld [vmem:[%s9260_s4 + $0x10] sm:$0xff]  }
 0x564   : > { %v3088_v61 = vmul.f32 %v6841_v53, %v8544_v19  ;;  %v3593_v28 = vmax.f32 %v3588_v29, 0.0  ;;  %3017 = vst.msk [vmem:[#allocation3 + $0x1] sm:$0xff] %vm595_vm1, %v3013_v18  ;;  %v3002_v36 = vmul.f32 %v8615_v26, %v2994_v10  ;;  %v3011_v23 = vadd.f32 %v8619_v59, %v3003_v14  ;;  %v6646_v29 = vld [vmem:[%s9260_s4 + $0x38] sm:$0xff]  }
 0x565   : > { %v6843_v43 = vpop.eup %6842  ;;  %v6647_v18 = vld [vmem:[%s9260_s4 + $0x18] sm:$0xff]  }
 0x566   : > { %v2996_v55 = vmul.f32 %v6843_v43, %v8550_v4  ;;  %3607 = vrot.lane.b32.xlu0 %v3593_v28, %s6912_s23  ;;  %v3010_v31 = vadd.f32 %v8619_v59, %v3002_v36  ;;  %v3015_v44 = vmax.f32 %v3011_v23, 0.0  ;;  %v3093_v58 = vmul.f32 %v3088_v61, %v8615_v26 }
 0x567   : > { %v6845_v15 = vpop.eup %6844 }
 0x568   : > { %v3090_v19 = vmul.f32 %v6845_v15, %v8556_v40  ;;  %v3014_v9 = vmax.f32 %v3010_v31, 0.0  ;;  %3019 = vst.msk [vmem:[#allocation3 + $0x11] sm:$0xff] %vm595_vm1, %v3015_v44  ;;  %v3004_v2 = vmul.f32 %v8615_v26, %v2996_v55  ;;  %v3098_v56 = vadd.f32 %v3093_v58, %v8619_v59 }
 0x569   : > { %v6847_v20 = vpop.eup %6846 }
 0x56a   : > { %v3089_v4 = vmul.f32 %v6847_v20, %v8562_v30  ;;  %3018 = vst.msk [vmem:[#allocation3 + $0x9] sm:$0xff] %vm595_vm1, %v3014_v9  ;;  %v3012_v50 = vadd.f32 %v8619_v59, %v3004_v2  ;;  %v3103_v5 = vmax.f32 %v3098_v56, 0.0  ;;  %v3095_v34 = vmul.f32 %v3090_v19, %v8615_v26 }
 0x56b   : > { %v6849_v38 = vpop.eup %6848 }
 0x56c   : > { %v3092_v40 = vmul.f32 %v6849_v38, %v8568_v12  ;;  %v3016_v46 = vmax.f32 %v3012_v50, 0.0  ;;  %3108 = vst.msk [vmem:[#allocation3 + $0x22] sm:$0xfe] %vm3026_vm6, %v3103_v5  ;;  %v3094_v1 = vmul.f32 %v3089_v4, %v8615_v26  ;;  %v3100_v63 = vadd.f32 %v3095_v34, %v8619_v59 }
 0x56d   : > { %v6851_v21 = vpop.eup %6850 }
 0x56e   : > { %v3097_v30 = vmul.f32 %v3092_v40, %v8615_v26  ;;  %v3091_v32 = vmul.f32 %v6851_v21, %v8574_v45  ;;  %3020 = vst.msk [vmem:[#allocation3 + $0x19] sm:$0xff] %vm595_vm1, %v3016_v46  ;;  %v3099_v62 = vadd.f32 %v3094_v1, %v8619_v59  ;;  %v3105_v22 = vmax.f32 %v3100_v63, 0.0 }
 0x570   : > { %v3102_v49 = vadd.f32 %v3097_v30, %v8619_v59  ;;  %v3104_v12 = vmax.f32 %v3099_v62, 0.0  ;;  %3110 = vst.msk [vmem:[#allocation3 + $0x32] sm:$0xff] %vm595_vm1, %v3105_v22  ;;  %v3096_v27 = vmul.f32 %v3091_v32, %v8615_v26 }
 0x572   : > { %v3107_v41 = vmax.f32 %v3102_v49, 0.0  ;;  %3109 = vst.msk [vmem:[#allocation3 + $0x2a] sm:$0xff] %vm595_vm1, %v3104_v12  ;;  %v3101_v16 = vadd.f32 %v3096_v27, %v8619_v59 }
 0x574   : > { %3112 = vst.msk [vmem:[#allocation3 + $0x42] sm:$0x1] %vm3039_vm7, %v3107_v41  ;;  %v3106_v45 = vmax.f32 %v3101_v16, 0.0 }
 0x576   : > { %3111 = vst.msk [vmem:[#allocation3 + $0x3a] sm:$0xff] %vm595_vm1, %v3106_v45 }
 0x57b   : > { %v3651_v43 = vld [vmem:[#allocation3 + $0x42] ss:$2 sm:$0x1] }
 0x57c   : > { %v3654_v31 = vpack.c.bf16 %v3651_v43, %v3651_v43 }
 0x5b8   : > { %v3494_v7 = vpop.permute.xlu0 %3493 }
 0x5b9   : > { %3505 = vst.msk [vmem:[#allocation3] sm:$0xff] %vm1278_vm3, %v3494_v7 }
 0x5ba   : > { %v3496_v24 = vpop.permute.xlu1 %3495 }
 0x5bb   : > { %3506 = vst.msk [vmem:[#allocation3 + $0x8] sm:$0xff] %vm1278_vm3, %v3496_v24 }
 0x5c0   : > { %v3498_v37 = vpop.permute.xlu1 %3497 }
 0x5c1   : > { %3507 = vst.msk [vmem:[#allocation3 + $0x10] sm:$0xff] %vm1278_vm3, %v3498_v37 }
 0x5c2   : > { %v3622_v39 = vld [vmem:[#allocation3 + $0x1] ss:$2 sm:$0xff]  ;;  %v3945_v9 = vld [vmem:[#allocation3] ss:$2 sm:$0xff] }
 0x5c3   : > { %v3965_v19 = vld [vmem:[#allocation3 + $0x1] ss:$2 sm:$0xff] }
 0x5c4   : > { %v3500_v26 = vpop.permute.xlu1 %3499 }
 0x5c5   : > { %3508 = vst.msk [vmem:[#allocation3 + $0x18] sm:$0xff] %vm1278_vm3, %v3500_v26 }
 0x5c8   : > { %v3600_v25 = vpop.permute.xlu0 %3599  ;;  %v3643_v52 = vld [vmem:[#allocation3 + $0x2] ss:$2 sm:$0xff] }
 0x5c9   : > { %3615 = vst.msk [vmem:[#allocation3 + $0x21] sm:$0xfe] %vm3614_vm10, %v3600_v25 }
 0x5ca   : > { %v3602_v59 = vpop.permute.xlu1 %3601 }
 0x5cb   : > { %3616 = vst.msk [vmem:[#allocation3 + $0x29] sm:$0xff] %vm1278_vm3, %v3602_v59 }
 0x5cc   : > { %v3645_v8 = vld [vmem:[#allocation3 + $0x12] ss:$2 sm:$0xff]  ;;  %v3624_v42 = vld [vmem:[#allocation3 + $0x11] ss:$2 sm:$0xff] }
 0x5cd   : > { %v3652_v17 = vpack.c.bf16 %v3645_v8, %v3643_v52  ;;  %v3631_v35 = vpack.c.bf16 %v3624_v42, %v3622_v39  ;;  %v3966_v58 = vld [vmem:[#allocation3 + $0x11] ss:$2 sm:$0xff]  ;;  %v3947_v15 = vld [vmem:[#allocation3 + $0x10] ss:$2 sm:$0xff] }
 0x5ce   : > { %v3970_v2 = vpack.c.bf16 %v3966_v58, %v3965_v19  ;;  %v3954_v56 = vpack.c.bf16 %v3947_v15, %v3945_v9 }
 0x5cf   : > { %6380 = vmatmul.mubr.msk.bf16.vlgmr.msra.gmra.mrb[72].mxu0 %vm3688_vm11, %v3652_v17  ;;  %6400 = vmatmul.mubr.msk.bf16.vlgmr.msra.gmra.mrb[72].mxu1 %vm3688_vm11, %v3631_v35 }
 0x5d0   : > { %v3604_v3 = vpop.permute.xlu0 %3603  ;;  %6412 = vmatpush3.bf16.msra.mxu0 %v6640_v13  ;;  %6432 = vmatpush3.bf16.msra.mxu1 %v6641_v0 }
 0x5d1   : > { %3617 = vst.msk [vmem:[#allocation3 + $0x31] sm:$0xff] %vm1278_vm3, %v3604_v3  ;;  %6413 = vmatprep.subr.bf16.mxu0 %v9375_v54  ;;  %6433 = vmatprep.subr.bf16.mxu1 %v9375_v54 }
 0x5d2   : > { %v3606_v47 = vpop.permute.xlu1 %3605  ;;  %6383 = vmatprep.mubr.msk.bf16.mxu0 %vm6915_vm2, %v9375_v54  ;;  %6403 = vmatprep.mubr.msk.bf16.mxu1 %vm6915_vm2, %v9375_v54  ;;  %v3647_v14 = vld [vmem:[#allocation3 + $0x22] ss:$2 sm:$0xff]  ;;  %v3626_v61 = vld [vmem:[#allocation3 + $0x21] ss:$2 sm:$0xff] }
 0x5d3   : > { %3618 = vst.msk [vmem:[#allocation3 + $0x39] sm:$0xff] %vm1278_vm3, %v3606_v47  ;;  %v3967_v50 = vld [vmem:[#allocation3 + $0x21] ss:$2 sm:$0xff]  ;;  %v3949_v5 = vld [vmem:[#allocation3 + $0x20] ss:$2 sm:$0xff] }
 0x5d4   : > { %6414 = vmatpush3.bf16.msra.mxu0 %v6642_v57  ;;  %6434 = vmatpush3.bf16.msra.mxu1 %v6643_v6 }
 0x5d5   : > { %6415 = vmatprep.subr.bf16.mxu0 %v9375_v54  ;;  %6435 = vmatprep.subr.bf16.mxu1 %v9375_v54 }
 0x5d8   : > { %v3608_v10 = vpop.permute.xlu0 %3607  ;;  %6416 = vmatpush3.bf16.msra.mxu0 %v6644_v11  ;;  %6436 = vmatpush3.bf16.msra.mxu1 %v6645_v60  ;;  %v8789_v11 = vld [vmem:[%s9258_s2 + $0x8] sm:$0x7] }
 0x5d9   : > { %3620 = vst.msk [vmem:[#allocation3 + $0x41] sm:$0x1] %vm3619_vm12, %v3608_v10  ;;  %6417 = vmatprep.subr.bf16.mxu0 %v9375_v54  ;;  %6437 = vmatprep.subr.bf16.mxu1 %v9375_v54 }
 0x5da   : > { %v3649_v53 = vld [vmem:[#allocation3 + $0x32] ss:$2 sm:$0xff]  ;;  %v3628_v28 = vld [vmem:[#allocation3 + $0x31] ss:$2 sm:$0xff] }
 0x5db   : > { %v3653_v36 = vpack.c.bf16 %v3649_v53, %v3647_v14  ;;  %v3632_v23 = vpack.c.bf16 %v3628_v28, %v3626_v61  ;;  %v3968_v20 = vld [vmem:[#allocation3 + $0x31] ss:$2 sm:$0xff]  ;;  %v3951_v4 = vld [vmem:[#allocation3 + $0x30] ss:$2 sm:$0xff] }
 0x5dc   : > { %6418 = vmatpush3.bf16.msra.mxu0 %v6646_v29  ;;  %6438 = vmatpush3.bf16.msra.mxu1 %v6647_v18  ;;  %v3971_v34 = vpack.c.bf16 %v3968_v20, %v3967_v50  ;;  %v3955_v38 = vpack.c.bf16 %v3951_v4, %v3949_v5  ;;  %v3953_v46 = vld [vmem:[#allocation3 + $0x40] ss:$2 sm:$0x1]  ;;  %v3846_v29 = vrot.slane %v8789_v11, %v9390_v48 }
 0x5dd   : > { %6384 = vmatmul.mubr.msk.bf16.gmra.mrb[76].mxu0 %vm3688_vm11, %v3653_v36  ;;  %6404 = vmatmul.mubr.msk.bf16.gmra.mrb[76].mxu1 %vm3688_vm11, %v3632_v23  ;;  %v3956_v63 = vpack.c.bf16 %v3953_v46, %v3953_v46 }
 0x5de   : > { %6387 = vmatprep.mubr.msk.bf16.mxu0 %vm6915_vm2, %v9375_v54  ;;  %6407 = vmatprep.mubr.msk.bf16.mxu1 %vm6915_vm2, %v9375_v54 }
 0x5e0   : > { %v3630_v55 = vld [vmem:[#allocation3 + $0x41] ss:$2 sm:$0x1] }
 0x5e1   : > { %v3633_v44 = vpack.c.bf16 %v3630_v55, %v3630_v55  ;;  %v3969_v40 = vld [vmem:[#allocation3 + $0x41] ss:$2 sm:$0x1] }
 0x5e2   : > { %v3972_v1 = vpack.c.bf16 %v3969_v40, %v3969_v40 }
 0x5e5   : > { %6388 = vmatmul.mubr.msk.bf16.gmra.mrb[80].mxu0 %vm3688_vm11, %v3654_v31  ;;  %6408 = vmatmul.mubr.msk.bf16.gmra.mrb[80].mxu1 %vm3688_vm11, %v3633_v44 }
 0x5e6   : > { %6419 = vmatprep.mubr.msk.bf16.mxu0 %vm6915_vm2, %v9375_v54  ;;  %6439 = vmatprep.mubr.msk.bf16.mxu1 %vm6915_vm2, %v9375_v54 }
 0x5ed   : > { %6420 = vmatmul.mubr.msk.bf16.vlgmr.msra.gmra.mrb[84].mxu0 %vm3688_vm11, %v3970_v2  ;;  %6440 = vmatmul.mubr.msk.bf16.vlgmr.msra.gmra.mrb[84].mxu1 %vm3688_vm11, %v3954_v56 }
 0x5ee   : > { %6423 = vmatprep.mubr.msk.bf16.mxu0 %vm6915_vm2, %v9375_v54  ;;  %6443 = vmatprep.mubr.msk.bf16.mxu1 %vm6915_vm2, %v9375_v54 }
 0x5f5   : > { %6424 = vmatmul.mubr.msk.bf16.gmra.mrb[88].mxu0 %vm3688_vm11, %v3971_v34  ;;  %6444 = vmatmul.mubr.msk.bf16.gmra.mrb[88].mxu1 %vm3688_vm11, %v3955_v38 }
 0x5f6   : > { %6427 = vmatprep.mubr.msk.bf16.mxu0 %vm6915_vm2, %v9375_v54  ;;  %6447 = vmatprep.mubr.msk.bf16.mxu1 %vm6915_vm2, %v9375_v54 }
 0x5fd   : > { %6428 = vmatmul.mubr.msk.bf16.gmra.mrb[92].mxu0 %vm3688_vm11, %v3972_v1  ;;  %6448 = vmatmul.mubr.msk.bf16.gmra.mrb[92].mxu1 %vm3688_vm11, %v3956_v63 }
 0x6a2   : > { %v3732_v21 = vpop.f32.mrb[72].mxu0  ;;  %v3821_v30 = vpop.f32.mrb[72].mxu1 }
 0x6a3   : > { %v3822_v32 = vadd.f32 %v3821_v30, %v3732_v21  ;;  %v6381_v62 = vpop.f32.mrb[73].mxu0  ;;  %v6401_v22 = vpop.f32.mrb[73].mxu1 }
 0x6a4   : > { %v3735_v49 = vpop.f32.mrb[74].mxu0  ;;  %v3824_v12 = vpop.f32.mrb[74].mxu1 }
 0x6a5   : > { %v8780_v27 = vadd.f32 %v3824_v12, %v3735_v49  ;;  %v6382_v41 = vpop.f32.mrb[75].mxu0  ;;  %v6402_v16 = vpop.f32.mrb[75].mxu1  ;;  %v3847_v21 = vadd.f32 %v3846_v29, %v3822_v32 }
 0x6b0   : > { %v3740_v45 = vpop.f32.mrb[76].mxu0  ;;  %v3829_v7 = vpop.f32.mrb[76].mxu1 }
 0x6b1   : > { %v8782_v24 = vadd.f32 %v3829_v7, %v3740_v45  ;;  %v6385_v37 = vpop.f32.mrb[77].mxu0  ;;  %v6405_v26 = vpop.f32.mrb[77].mxu1 }
 0x6b2   : > { %v3743_v25 = vpop.f32.mrb[78].mxu0  ;;  %v3832_v59 = vpop.f32.mrb[78].mxu1  ;;  %v3848_v37 = vadd.f32 %v3846_v29, %v8780_v27 }
 0x6b3   : > { %v8784_v39 = vadd.f32 %v3832_v59, %v3743_v25  ;;  %v6386_v13 = vpop.f32.mrb[79].mxu0  ;;  %v6406_v0 = vpop.f32.mrb[79].mxu1  ;;  %v3891_v26 = vadd.f32 %v3846_v29, %v8782_v24  ;;  %v3849_v25 = vsel %vm595_vm1, %v3847_v21, 0.0 }
 0x6b5   : > { %v3892_v32 = vadd.f32 %v3846_v29, %v8784_v39  ;;  %v3894_v0 = vsel %vm3026_vm6, %v3891_v26, 0.0 }
 0x6b7   : > { %v3897_v27 = vsel %vm595_vm1, %v3892_v32, 0.0 }
 0x6b8   : > { %v3748_v52 = vpop.f32.mrb[80].mxu0  ;;  %v3837_v8 = vpop.f32.mrb[80].mxu1 }
 0x6b9   : > { %v3838_v42 = vadd.f32 %v3837_v8, %v3748_v52  ;;  %v6389_v17 = vpop.f32.mrb[81].mxu0  ;;  %v6409_v35 = vpop.f32.mrb[81].mxu1  ;;  %v3852_v52 = vsel %vm595_vm1, %v3848_v37, 0.0 }
 0x6ba   : > { %v3751_v3 = vpop.f32.mrb[82].mxu0  ;;  %v3840_v57 = vpop.f32.mrb[82].mxu1 }
 0x6bb   : > { %v6390_v6 = vpop.f32.mrb[83].mxu0  ;;  %v6410_v47 = vpop.f32.mrb[83].mxu1  ;;  %v3893_v13 = vadd.f32 %v3846_v29, %v3838_v42 }
 0x6bd   : > { %v3900_v8 = vsel %vm3039_vm7, %v3893_v13, 0.0 }
 0x6c0   : > { %v4048_v60 = vpop.f32.mrb[84].mxu0  ;;  %v4137_v10 = vpop.f32.mrb[84].mxu1 }
 0x6c1   : > { %v4138_v18 = vadd.f32 %v4137_v10, %v4048_v60  ;;  %v6421_v14 = vpop.f32.mrb[85].mxu0  ;;  %v6441_v53 = vpop.f32.mrb[85].mxu1 }
 0x6c2   : > { %v4051_v61 = vpop.f32.mrb[86].mxu0  ;;  %v4140_v28 = vpop.f32.mrb[86].mxu1 }
 0x6c3   : > { %v4159_v36 = vadd.f32 %v4138_v18, %v3846_v29  ;;  %v4141_v23 = vadd.f32 %v4140_v28, %v4051_v61  ;;  %v6422_v43 = vpop.f32.mrb[87].mxu0  ;;  %v6442_v55 = vpop.f32.mrb[87].mxu1 }
 0x6c5   : > { %v4160_v31 = vadd.f32 %v4141_v23, %v3846_v29  ;;  %v4161_v44 = vsel %vm595_vm1, %v4159_v36, 0.0 }
 0x6c6   : > { %4162 = vadd.xlane.f32.xlu1 %v4161_v44 }
 0x6c7   : > { %v4164_v58 = vsel %vm595_vm1, %v4160_v31, 0.0 }
 0x6c8   : > { %v4056_v15 = vpop.f32.mrb[88].mxu0  ;;  %4165 = vadd.xlane.f32.xlu0 %v4164_v58  ;;  %v4145_v19 = vpop.f32.mrb[88].mxu1 }
 0x6c9   : > { %v4146_v9 = vadd.f32 %v4145_v19, %v4056_v15  ;;  %v6425_v2 = vpop.f32.mrb[89].mxu0  ;;  %v6445_v56 = vpop.f32.mrb[89].mxu1 }
 0x6ca   : > { %v4059_v20 = vpop.f32.mrb[90].mxu0  ;;  %v4148_v4 = vpop.f32.mrb[90].mxu1 }
 0x6cb   : > { %v4203_v50 = vadd.f32 %v4146_v9, %v3846_v29  ;;  %v4149_v5 = vadd.f32 %v4148_v4, %v4059_v20  ;;  %v6426_v34 = vpop.f32.mrb[91].mxu0  ;;  %v6446_v38 = vpop.f32.mrb[91].mxu1 }
 0x6cd   : > { %v4204_v40 = vadd.f32 %v4149_v5, %v3846_v29  ;;  %v4206_v46 = vsel %vm3026_vm6, %v4203_v50, 0.0 }
 0x6ce   : > { %4207 = vadd.xlane.f32.xlu0 %v4206_v46 }
 0x6cf   : > { %v4209_v49 = vsel %vm595_vm1, %v4204_v40, 0.0 }
 0x6d0   : > { %v4064_v1 = vpop.f32.mrb[92].mxu0  ;;  %v4153_v63 = vpop.f32.mrb[92].mxu1 }
 0x6d1   : > { %v4154_v30 = vadd.f32 %v4153_v63, %v4064_v1  ;;  %v6429_v62 = vpop.f32.mrb[93].mxu0  ;;  %v6449_v22 = vpop.f32.mrb[93].mxu1 }
 0x6d2   : > { %v4067_v12 = vpop.f32.mrb[94].mxu0  ;;  %4210 = vadd.xlane.f32.xlu0 %v4209_v49  ;;  %v4156_v41 = vpop.f32.mrb[94].mxu1 }
 0x6d3   : > { %v4205_v16 = vadd.f32 %v4154_v30, %v3846_v29  ;;  %v6430_v45 = vpop.f32.mrb[95].mxu0  ;;  %v6450_v7 = vpop.f32.mrb[95].mxu1 }
 0x6d5   : > { %v4212_v59 = vsel %vm3039_vm7, %v4205_v16, 0.0 }
 0x6d6   : > { %3850 = vadd.xlane.f32.xlu0 %v3849_v25  ;;  %4213 = vadd.xlane.f32.xlu1 %v4212_v59 }
 0x6da   : > { %3895 = vadd.xlane.f32.xlu0 %v3894_v0  ;;  %3853 = vadd.xlane.f32.xlu1 %v3852_v52 }
 0x6de   : > { %3901 = vadd.xlane.f32.xlu0 %v3900_v8  ;;  %3898 = vadd.xlane.f32.xlu1 %v3897_v27 }
 0x753   : > { %v4163_v24 = vpop.xlane.xlu1 %4162 }
 0x754   : > { %v4167_v17 = vmul.f32 0.03125, %v4163_v24  ;;  %v6648_v24 = vld [vmem:[%s9261_s5 + $0x20] sm:$0xff]  }
 0x755   : > { %v4166_v35 = vpop.xlane.xlu0 %4165  ;;  %6451 = vmatprep.subr.bf16.mxu0 %v6648_v24 }
 0x756   : > { %v8806_v3 = vsub.f32 %v4159_v36, %v4167_v17  ;;  %v4168_v57 = vmul.f32 0.03125, %v4166_v35  ;;  %v6649_v17 = vld [vmem:[%s9261_s5] sm:$0xff]   ;;  %6452 = vmatpush3.bf16.msra.mxu0 %v6648_v24 }
 0x757   : > { %6463 = vmatprep.subr.bf16.mxu1 %v6649_v17 }
 0x758   : > { %v8808_v39 = vsub.f32 %v4160_v31, %v4168_v57  ;;  %v4171_v42 = vmul.f32 %v8806_v3, %v8806_v3  ;;  %6464 = vmatpush3.bf16.msra.mxu1 %v6649_v17 }
 0x75a   : > { %v4173_v6 = vsel %vm595_vm1, %v4171_v42, 0.0  ;;  %v4172_v47 = vmul.f32 %v8808_v39, %v8808_v39  ;;  %v6650_v42 = vld [vmem:[%s9261_s5 + $0x28] sm:$0xff]  }
 0x75b   : > { %v4208_v60 = vpop.xlane.xlu0 %4207  ;;  %4174 = vadd.xlane.f32.xlu1 %v4173_v6  ;;  %v6651_v6 = vld [vmem:[%s9261_s5 + $0x8] sm:$0xff]   ;;  %6453 = vmatprep.subr.bf16.mxu0 %v6650_v42 }
 0x75c   : > { %v4215_v10 = vmul.f32 0.03125, %v4208_v60  ;;  %v4176_v29 = vsel %vm595_vm1, %v4172_v47, 0.0  ;;  %v8870_v47 = vrot.slane %v8789_v11, %v9391_v33  ;;  %6465 = vmatprep.subr.bf16.mxu1 %v6651_v6  ;;  %6454 = vmatpush3.bf16.msra.mxu0 %v6650_v42 }
 0x75d   : > { %4177 = vadd.xlane.f32.xlu0 %v4176_v29  ;;  %v8874_v29 = vrot.slane %v8789_v11, %v9392_v51  ;;  %6466 = vmatpush3.bf16.msra.mxu1 %v6651_v6 }
 0x75e   : > { %v8816_v18 = vsub.f32 %v4203_v50, %v4215_v10 }
 0x75f   : > { %v4211_v14 = vpop.xlane.xlu0 %4210 }
 0x760   : > { %v4216_v53 = vmul.f32 0.03125, %v4211_v14  ;;  %v4221_v61 = vmul.f32 %v8816_v18, %v8816_v18 }
 0x762   : > { %v8820_v28 = vsub.f32 %v4204_v40, %v4216_v53  ;;  %v4224_v36 = vsel %vm3026_vm6, %v4221_v61, 0.0 }
 0x763   : > { %v3851_v23 = vpop.xlane.xlu0 %3850  ;;  %4225 = vadd.xlane.f32.xlu1 %v4224_v36  ;;  %v4214_v43 = vpop.xlane.xlu1 %4213 }
 0x764   : > { %v3855_v55 = vmul.f32 0.03125, %v3851_v23  ;;  %v4217_v31 = vmul.f32 0.03125, %v4214_v43  ;;  %v4222_v44 = vmul.f32 %v8820_v28, %v8820_v28 }
 0x766   : > { %v8825_v58 = vsub.f32 %v3847_v21, %v3855_v55  ;;  %v8827_v15 = vsub.f32 %v4205_v16, %v4217_v31  ;;  %v4227_v19 = vsel %vm595_vm1, %v4222_v44, 0.0 }
 0x767   : > { %4228 = vadd.xlane.f32.xlu0 %v4227_v19  ;;  %v3896_v9 = vpop.xlane.xlu0 %3895  ;;  %v3854_v2 = vpop.xlane.xlu1 %3853 }
 0x768   : > { %v3903_v56 = vmul.f32 0.03125, %v3896_v9  ;;  %v3856_v20 = vmul.f32 0.03125, %v3854_v2  ;;  %v3859_v4 = vmul.f32 %v8825_v58, %v8825_v58  ;;  %v4223_v50 = vmul.f32 %v8827_v15, %v8827_v15 }
 0x76a   : > { %v8834_v5 = vsub.f32 %v3891_v26, %v3903_v56  ;;  %v8836_v34 = vsub.f32 %v3848_v37, %v3856_v20  ;;  %v3861_v38 = vsel %vm595_vm1, %v3859_v4, 0.0  ;;  %v4230_v40 = vsel %vm3039_vm7, %v4223_v50, 0.0 }
 0x76b   : > { %3862 = vadd.xlane.f32.xlu0 %v3861_v38  ;;  %v3902_v46 = vpop.xlane.xlu0 %3901  ;;  %4231 = vadd.xlane.f32.xlu1 %v4230_v40  ;;  %v3899_v1 = vpop.xlane.xlu1 %3898 }
 0x76c   : > { %v3905_v63 = vmul.f32 0.03125, %v3902_v46  ;;  %v3904_v21 = vmul.f32 0.03125, %v3899_v1  ;;  %v3909_v30 = vmul.f32 %v8834_v5, %v8834_v5  ;;  %v3860_v62 = vmul.f32 %v8836_v34, %v8836_v34  ;;  %v6652_v46 = vld [vmem:[%s9261_s5 + $0x30] sm:$0xff]  }
 0x76d   : > { %v6653_v1 = vld [vmem:[%s9261_s5 + $0x10] sm:$0xff]   ;;  %6455 = vmatprep.subr.bf16.mxu0 %v6652_v46 }
 0x76e   : > { %v8844_v22 = vsub.f32 %v3893_v13, %v3905_v63  ;;  %v8846_v49 = vsub.f32 %v3892_v32, %v3904_v21  ;;  %v3912_v12 = vsel %vm3026_vm6, %v3909_v30, 0.0  ;;  %v3864_v41 = vsel %vm595_vm1, %v3860_v62, 0.0  ;;  %6467 = vmatprep.subr.bf16.mxu1 %v6653_v1  ;;  %6456 = vmatpush3.bf16.msra.mxu0 %v6652_v46 }
 0x76f   : > { %3913 = vadd.xlane.f32.xlu0 %v3912_v12  ;;  %3865 = vadd.xlane.f32.xlu1 %v3864_v41 }
 0x770   : > { %v3911_v16 = vmul.f32 %v8844_v22, %v8844_v22  ;;  %v3910_v45 = vmul.f32 %v8846_v49, %v8846_v49  ;;  %6468 = vmatpush3.bf16.msra.mxu1 %v6653_v1 }
 0x772   : > { %v3918_v7 = vsel %vm3039_vm7, %v3911_v16, 0.0  ;;  %v3915_v37 = vsel %vm595_vm1, %v3910_v45, 0.0 }
 0x773   : > { %3919 = vadd.xlane.f32.xlu0 %v3918_v7  ;;  %3916 = vadd.xlane.f32.xlu1 %v3915_v37 }
 0x7e8   : > { %v4175_v26 = vpop.xlane.xlu1 %4174 }
 0x7e9   : > { %v4179_v25 = vmul.f32 0.03125, %v4175_v26 }
 0x7ea   : > { %v4178_v59 = vpop.xlane.xlu0 %4177 }
 0x7eb   : > { %v4181_v32 = vadd.f32 1e-05, %v4179_v25  ;;  %v4180_v13 = vmul.f32 0.03125, %v4178_v59  ;;  %v6655_v59 = vld [vmem:[%s9261_s5 + $0x18] sm:$0xff]  }
 0x7ec   : > { %6469 = vmatprep.subr.bf16.mxu1 %v6655_v59 }
 0x7ed   : > { %6852 = vrsqrt.f32 %v4181_v32  ;;  %v4182_v0 = vadd.f32 1e-05, %v4180_v13  ;;  %6470 = vmatpush3.bf16.msra.mxu1 %v6655_v59 }
 0x7ef   : > { %6854 = vrsqrt.f32 %v4182_v0 }
 0x7f0   : > { %v4226_v52 = vpop.xlane.xlu1 %4225 }
 0x7f1   : > { %v4233_v8 = vmul.f32 0.03125, %v4226_v52 }
 0x7f3   : > { %v4236_v27 = vadd.f32 1e-05, %v4233_v8 }
 0x7f4   : > { %v4229_v35 = vpop.xlane.xlu0 %4228 }
 0x7f5   : > { %6856 = vrsqrt.f32 %v4236_v27  ;;  %v4234_v57 = vmul.f32 0.03125, %v4229_v35  ;;  %v8907_v27 = vld [vmem:[%s9261_s5 + $0x20] sm:$0xff]  }
 0x7f7   : > { %v6853_v60 = vpop.eup %6852  ;;  %v4237_v10 = vadd.f32 1e-05, %v4234_v57 }
 0x7f8   : > { %v3863_v14 = vpop.xlane.xlu0 %3862  ;;  %v4232_v53 = vpop.xlane.xlu1 %4231  ;;  %v4185_v61 = vmul.f32 %v6853_v60, %v8806_v3 }
 0x7f9   : > { %v6855_v36 = vpop.eup %6854  ;;  %6858 = vrsqrt.f32 %v4237_v10  ;;  %v3867_v23 = vmul.f32 0.03125, %v3863_v14  ;;  %v4235_v43 = vmul.f32 0.03125, %v4232_v53 }
 0x7fa   : > { %v4187_v55 = vmul.f32 %v4185_v61, %v8870_v47  ;;  %v4186_v31 = vmul.f32 %v6855_v36, %v8808_v39 }
 0x7fb   : > { %v3869_v44 = vadd.f32 1e-05, %v3867_v23  ;;  %v4238_v19 = vadd.f32 1e-05, %v4235_v43 }
 0x7fc   : > { %v3914_v9 = vpop.xlane.xlu0 %3913  ;;  %v3866_v2 = vpop.xlane.xlu1 %3865  ;;  %v4189_v11 = vadd.f32 %v4187_v55, %v8874_v29  ;;  %v4188_v56 = vmul.f32 %v4186_v31, %v8870_v47 }
 0x7fd   : > { %6860 = vrsqrt.f32 %v3869_v44  ;;  %v3921_v3 = vmul.f32 0.03125, %v3914_v9  ;;  %v3868_v20 = vmul.f32 0.03125, %v3866_v2 }
 0x7fe   : > { %6862 = vrsqrt.f32 %v4238_v19  ;;  %v4191_v4 = vmax.f32 %v4189_v11, 0.0  ;;  %v4190_v50 = vadd.f32 %v4188_v56, %v8874_v29 }
 0x7ff   : > { %v6857_v38 = vpop.eup %6856  ;;  %v3924_v40 = vadd.f32 1e-05, %v3921_v3  ;;  %v3870_v39 = vadd.f32 1e-05, %v3868_v20 }
 0x800   : > { %v3920_v63 = vpop.xlane.xlu0 %3919  ;;  %4195 = vrot.lane.b32.xlu1 %v4191_v4, %s6912_s23  ;;  %v3917_v21 = vpop.xlane.xlu1 %3916  ;;  %v4192_v30 = vmax.f32 %v4190_v50, 0.0  ;;  %v4242_v62 = vmul.f32 %v6857_v38, %v8816_v18  ;;  %v6654_v18 = vld [vmem:[%s9261_s5 + $0x38] sm:$0xff]  }
 0x801   : > { %6864 = vrsqrt.f32 %v3924_v40  ;;  %v3923_v12 = vmul.f32 0.03125, %v3920_v63  ;;  %v3922_v41 = vmul.f32 0.03125, %v3917_v21  ;;  %6457 = vmatprep.subr.bf16.mxu0 %v6654_v18 }
 0x802   : > { %6866 = vrsqrt.f32 %v3870_v39  ;;  %4197 = vrot.lane.b32.xlu0 %v4192_v30, %s6912_s23  ;;  %v4245_v16 = vmul.f32 %v4242_v62, %v8870_v47  ;;  %6458 = vmatpush3.bf16.msra.mxu0 %v6654_v18  ;;  %v6660_v18 = vld [vmem:[%s9261_s5 + $0x30] sm:$0xff]  }
 0x803   : > { %v6859_v45 = vpop.eup %6858  ;;  %v3926_v7 = vadd.f32 1e-05, %v3923_v12  ;;  %v3925_v37 = vadd.f32 1e-05, %v3922_v41  ;;  %6475 = vmatprep.subr.bf16.mxu0 %v8907_v27  ;;  %v6658_v41 = vld [vmem:[%s9261_s5 + $0x28] sm:$0xff]  }
 0x804   : > { %v4248_v26 = vadd.f32 %v4245_v16, %v8874_v29  ;;  %v4243_v25 = vmul.f32 %v6859_v45, %v8820_v28 }
 0x805   : > { %6868 = vrsqrt.f32 %v3926_v7 }
 0x806   : > { %6870 = vrsqrt.f32 %v3925_v37  ;;  %v4251_v32 = vmax.f32 %v4248_v26, 0.0  ;;  %v4246_v13 = vmul.f32 %v4243_v25, %v8870_v47  ;;  %v6659_v26 = vld [vmem:[%s9261_s5 + $0x8] sm:$0xff]  }
 0x807   : > { %v6861_v0 = vpop.eup %6860 }
 0x808   : > { %v6863_v52 = vpop.eup %6862  ;;  %v3873_v28 = vmul.f32 %v6861_v0, %v8825_v58  ;;  %4257 = vrot.lane.b32.xlu1 %v4251_v32, %s6912_s23  ;;  %v4249_v8 = vadd.f32 %v4246_v13, %v8874_v29  ;;  %v8916_v58 = vld [vmem:[%s9261_s5] sm:$0xff]   ;;  %v6661_v32 = vld [vmem:[%s9261_s5 + $0x10] sm:$0xff]   ;;  %v6662_v13 = vld [vmem:[%s9261_s5 + $0x38] sm:$0xff]  }
 0x809   : > { %v4244_v24 = vmul.f32 %v6863_v52, %v8827_v15  ;;  %6487 = vmatprep.subr.bf16.mxu1 %v8916_v58  ;;  %v6663_v0 = vld [vmem:[%s9261_s5 + $0x18] sm:$0xff]  }
 0x80a   : > { %v4252_v17 = vmax.f32 %v4249_v8, 0.0  ;;  %v3879_v35 = vmul.f32 %v8870_v47, %v3873_v28 }
 0x80b   : > { %v6865_v57 = vpop.eup %6864  ;;  %v4247_v42 = vmul.f32 %v4244_v24, %v8870_v47 }
 0x80c   : > { %v6867_v6 = vpop.eup %6866  ;;  %v3930_v60 = vmul.f32 %v6865_v57, %v8834_v5  ;;  %4259 = vrot.lane.b32.xlu1 %v4252_v17, %s6912_s23  ;;  %v3885_v15 = vadd.f32 %v8874_v29, %v3879_v35 }
 0x80d   : > { %v3874_v10 = vmul.f32 %v6867_v6, %v8836_v34  ;;  %v4250_v14 = vadd.f32 %v4247_v42, %v8874_v29 }
 0x80e   : > { %v3887_v53 = vmax.f32 %v3885_v15, 0.0  ;;  %v3933_v61 = vmul.f32 %v3930_v60, %v8870_v47 }
 0x80f   : > { %v6869_v36 = vpop.eup %6868  ;;  %v4253_v23 = vmax.f32 %v4250_v14, 0.0  ;;  %v3880_v43 = vmul.f32 %v8870_v47, %v3874_v10 }
 0x810   : > { %v6871_v55 = vpop.eup %6870  ;;  %v3932_v5 = vmul.f32 %v6869_v36, %v8844_v22  ;;  %3889 = vst.msk [vmem:[#allocation4 + $0x1] sm:$0xff] %vm595_vm1, %v3887_v53  ;;  %v3936_v31 = vadd.f32 %v3933_v61, %v8874_v29 }
 0x811   : > { %v3931_v34 = vmul.f32 %v6871_v55, %v8846_v49  ;;  %4261 = vrot.lane.b32.xlu1 %v4253_v23, %s6912_s23  ;;  %v3886_v44 = vadd.f32 %v8874_v29, %v3880_v43  ;;  %v8982_v23 = vld [vmem:[%s9258_s2 + $0xc] sm:$0x7] }
 0x812   : > { %v3935_v19 = vmul.f32 %v3932_v5, %v8870_v47  ;;  %v3939_v9 = vmax.f32 %v3936_v31, 0.0 }
 0x813   : > { %v3888_v2 = vmax.f32 %v3886_v44, 0.0  ;;  %v3934_v11 = vmul.f32 %v3931_v34, %v8870_v47  ;;  %v4461_v34 = vrot.slane %v8982_v23, %v9390_v48 }
 0x814   : > { %v3938_v56 = vadd.f32 %v3935_v19, %v8874_v29  ;;  %3942 = vst.msk [vmem:[#allocation4 + $0x12] sm:$0xfe] %vm3026_vm6, %v3939_v9 }
 0x815   : > { %3890 = vst.msk [vmem:[#allocation4 + $0x9] sm:$0xff] %vm595_vm1, %v3888_v2  ;;  %v3937_v22 = vadd.f32 %v3934_v11, %v8874_v29 }
 0x816   : > { %v3941_v3 = vmax.f32 %v3938_v56, 0.0 }
 0x817   : > { %v3940_v49 = vmax.f32 %v3937_v22, 0.0 }
 0x818   : > { %3944 = vst.msk [vmem:[#allocation4 + $0x22] sm:$0x1] %vm3039_vm7, %v3941_v3 }
 0x819   : > { %3943 = vst.msk [vmem:[#allocation4 + $0x1a] sm:$0xff] %vm595_vm1, %v3940_v49 }
 0x81f   : > { %v4290_v29 = vld [vmem:[#allocation4 + $0x22] ss:$2 sm:$0x1] }
 0x820   : > { %v4292_v62 = vpack.c.bf16 %v4290_v29, %v4290_v29 }
 0x872   : > { %v4196_v20 = vpop.permute.xlu1 %4195 }
 0x873   : > { %4201 = vst.msk [vmem:[#allocation4] sm:$0xff] %vm1278_vm3, %v4196_v20 }
 0x874   : > { %v4198_v4 = vpop.permute.xlu0 %4197 }
 0x875   : > { %4202 = vst.msk [vmem:[#allocation4 + $0x8] sm:$0xff] %vm1278_vm3, %v4198_v4 }
 0x87a   : > { %v4258_v47 = vpop.permute.xlu1 %4257 }
 0x87b   : > { %4266 = vst.msk [vmem:[#allocation4 + $0x11] sm:$0xfe] %vm3614_vm10, %v4258_v47 }
 0x87c   : > { %v4286_v40 = vld [vmem:[#allocation4 + $0x2] ss:$2 sm:$0xff]  ;;  %v4270_v39 = vld [vmem:[#allocation4 + $0x1] ss:$2 sm:$0xff] }
 0x87d   : > { %v4539_v12 = vld [vmem:[#allocation4 + $0x1] ss:$2 sm:$0xff]  ;;  %v4524_v25 = vld [vmem:[#allocation4] ss:$2 sm:$0xff] }
 0x87e   : > { %v4260_v50 = vpop.permute.xlu1 %4259 }
 0x87f   : > { %4267 = vst.msk [vmem:[#allocation4 + $0x19] sm:$0xff] %vm1278_vm3, %v4260_v50 }
 0x883   : > { %v4262_v38 = vpop.permute.xlu1 %4261 }
 0x884   : > { %4268 = vst.msk [vmem:[#allocation4 + $0x21] sm:$0x1] %vm3619_vm12, %v4262_v38 }
 0x886   : > { %v4288_v46 = vld [vmem:[#allocation4 + $0x12] ss:$2 sm:$0xff]  ;;  %v4272_v1 = vld [vmem:[#allocation4 + $0x11] ss:$2 sm:$0xff] }
 0x887   : > { %v4540_v63 = vld [vmem:[#allocation4 + $0x11] ss:$2 sm:$0xff]  ;;  %v4291_v21 = vpack.c.bf16 %v4288_v46, %v4286_v40  ;;  %v4275_v30 = vpack.c.bf16 %v4272_v1, %v4270_v39  ;;  %v4526_v7 = vld [vmem:[#allocation4 + $0x10] ss:$2 sm:$0xff] }
 0x888   : > { %v4542_v16 = vpack.c.bf16 %v4540_v63, %v4539_v12  ;;  %v4529_v59 = vpack.c.bf16 %v4526_v7, %v4524_v25  ;;  %v4528_v8 = vld [vmem:[#allocation4 + $0x20] ss:$2 sm:$0x1] }
 0x889   : > { %6459 = vmatprep.mubr.msk.bf16.mxu0 %vm3688_vm11, %v4291_v21  ;;  %6471 = vmatprep.mubr.msk.bf16.mxu1 %vm3688_vm11, %v4275_v30 }
 0x88a   : > { %6460 = vmatmul.mubr.msk.bf16.vlgmr.msra.gmra.mrb[96].mxu0 %vm3688_vm11, %v4292_v62 }
 0x88b   : > { %6476 = vmatpush3.bf16.msra.mxu0 %v8907_v27  ;;  %6483 = vmatprep.mubr.msk.bf16.mxu0 %vm3688_vm11, %v4542_v16  ;;  %v4274_v45 = vld [vmem:[#allocation4 + $0x21] ss:$2 sm:$0x1]  ;;  %v4530_v27 = vpack.c.bf16 %v4528_v8, %v4528_v8 }
 0x88c   : > { %v4276_v37 = vpack.c.bf16 %v4274_v45, %v4274_v45  ;;  %6477 = vmatprep.subr.bf16.mxu0 %v6658_v41  ;;  %v4541_v52 = vld [vmem:[#allocation4 + $0x21] ss:$2 sm:$0x1] }
 0x88d   : > { %v4543_v28 = vpack.c.bf16 %v4541_v52, %v4541_v52 }
 0x88e   : > { %6472 = vmatmul.mubr.msk.bf16.vlgmr.msra.gmra.mrb[96].mxu1 %vm3688_vm11, %v4276_v37 }
 0x88f   : > { %6488 = vmatpush3.bf16.msra.mxu1 %v8916_v58  ;;  %6478 = vmatpush3.bf16.msra.mxu0 %v6658_v41 }
 0x890   : > { %6495 = vmatprep.mubr.msk.bf16.mxu1 %vm3688_vm11, %v4529_v59  ;;  %6489 = vmatprep.subr.bf16.mxu1 %v6659_v26 }
 0x891   : > { %6479 = vmatprep.subr.bf16.mxu0 %v6660_v18 }
 0x893   : > { %6490 = vmatpush3.bf16.msra.mxu1 %v6659_v26  ;;  %6480 = vmatpush3.bf16.msra.mxu0 %v6660_v18 }
 0x894   : > { %6491 = vmatprep.subr.bf16.mxu1 %v6661_v32  ;;  %6481 = vmatprep.subr.bf16.mxu0 %v6662_v13 }
 0x897   : > { %6492 = vmatpush3.bf16.msra.mxu1 %v6661_v32  ;;  %6482 = vmatpush3.bf16.msra.mxu0 %v6662_v13 }
 0x898   : > { %6493 = vmatprep.subr.bf16.mxu1 %v6663_v0  ;;  %6499 = vmatprep.subr.bf16.mxu0 %v9375_v54 }
 0x89a   : > { %6484 = vmatmul.mubr.msk.bf16.vlgmr.msra.gmra.mrb[100].mxu0 %vm3688_vm11, %v4543_v28 }
 0x89b   : > { %6494 = vmatpush3.bf16.msra.mxu1 %v6663_v0  ;;  %6507 = vmatprep.mubr.msk.bf16.mxu0 %vm6915_vm2, %v9375_v54 }
 0x89c   : > { %6511 = vmatprep.subr.bf16.mxu1 %v9375_v54 }
 0x89e   : > { %6496 = vmatmul.mubr.msk.bf16.vlgmr.msra.gmra.mrb[100].mxu1 %vm3688_vm11, %v4530_v27 }
 0x89f   : > { %6519 = vmatprep.mubr.msk.bf16.mxu1 %vm6915_vm2, %v9375_v54 }
 0x95d   : > { %v6461_v24 = vpop.f32.mrb[96].mxu0 }
 0x95e   : > { %v4366_v17 = vpop.f32.mrb[97].mxu0 }
 0x95f   : > { %v6462_v35 = vpop.f32.mrb[98].mxu0 }
 0x960   : > { %v4369_v57 = vpop.f32.mrb[99].mxu0 }
 0x961   : > { %v6473_v42 = vpop.f32.mrb[96].mxu1 }
 0x962   : > { %v4453_v58 = vadd.f32 %v6473_v42, %v6461_v24  ;;  %v4444_v6 = vpop.f32.mrb[97].mxu1 }
 0x963   : > { %v4445_v60 = vadd.f32 %v4444_v6, %v4366_v17  ;;  %v6474_v15 = vpop.f32.mrb[98].mxu1  ;;  %v6664_v6 = vld [vmem:[%s9262_s6] sm:$0xff]  }
 0x964   : > { %v4447_v10 = vpop.f32.mrb[99].mxu1  ;;  %v4489_v49 = vadd.f32 %v4461_v34, %v4453_v58  ;;  %6512 = vmatpush3.bf16.msra.mxu1 %v6664_v6 }
 0x965   : > { %v4448_v14 = vadd.f32 %v4447_v10, %v4369_v57  ;;  %v4462_v4 = vadd.f32 %v4461_v34, %v4445_v60  ;;  %6513 = vmatprep.subr.bf16.mxu1 %v9375_v54 }
 0x966   : > { %v4493_v50 = vsel %vm3039_vm7, %v4489_v49, 0.0 }
 0x967   : > { %v4488_v38 = vadd.f32 %v4461_v34, %v4448_v14  ;;  %v4463_v29 = vsel %vm595_vm1, %v4462_v4, 0.0 }
 0x969   : > { %v4490_v40 = vsel %vm3026_vm6, %v4488_v38, 0.0 }
 0x96d   : > { %v6485_v53 = vpop.f32.mrb[100].mxu0 }
 0x96e   : > { %v4616_v61 = vpop.f32.mrb[101].mxu0 }
 0x96f   : > { %v6486_v36 = vpop.f32.mrb[102].mxu0 }
 0x970   : > { %v4619_v43 = vpop.f32.mrb[103].mxu0 }
 0x971   : > { %v6497_v55 = vpop.f32.mrb[100].mxu1 }
 0x972   : > { %v4703_v5 = vadd.f32 %v6497_v55, %v6485_v53  ;;  %v4694_v31 = vpop.f32.mrb[101].mxu1 }
 0x973   : > { %v4695_v44 = vadd.f32 %v4694_v31, %v4616_v61  ;;  %v6498_v19 = vpop.f32.mrb[102].mxu1 }
 0x974   : > { %v4697_v9 = vpop.f32.mrb[103].mxu1  ;;  %v4731_v56 = vadd.f32 %v4703_v5, %v4461_v34 }
 0x975   : > { %v4708_v2 = vadd.f32 %v4695_v44, %v4461_v34  ;;  %v4698_v11 = vadd.f32 %v4697_v9, %v4619_v43  ;;  %v6666_v44 = vld [vmem:[%s9262_s6 + $0x8] sm:$0xff]  }
 0x976   : > { %v4735_v47 = vsel %vm3039_vm7, %v4731_v56, 0.0  ;;  %6514 = vmatpush3.bf16.msra.mxu1 %v6666_v44  ;;  %v6678_v44 = vld [vmem:[%s9262_s6 + $0x18] sm:$0xff]  }
 0x977   : > { %v4730_v22 = vadd.f32 %v4698_v11, %v4461_v34  ;;  %v4709_v3 = vsel %vm595_vm1, %v4708_v2, 0.0  ;;  %v6665_v34 = vld [vmem:[%s9262_s6 + $0x20] sm:$0xff]   ;;  %6515 = vmatprep.subr.bf16.mxu1 %v9375_v54 }
 0x978   : > { %4710 = vadd.xlane.f32.xlu0 %v4709_v3  ;;  %6500 = vmatpush3.bf16.msra.mxu0 %v6665_v34  ;;  %v6668_v3 = vld [vmem:[%s9262_s6 + $0x10] sm:$0xff]  }
 0x979   : > { %v4732_v20 = vsel %vm3026_vm6, %v4730_v22, 0.0  ;;  %6501 = vmatprep.subr.bf16.mxu0 %v9375_v54  ;;  %v6677_v34 = vld [vmem:[%s9262_s6 + $0x30] sm:$0xff]  }
 0x97a   : > { %4733 = vadd.xlane.f32.xlu1 %v4732_v20  ;;  %6516 = vmatpush3.bf16.msra.mxu1 %v6668_v3 }
 0x97b   : > { %6517 = vmatprep.subr.bf16.mxu1 %v9375_v54 }
 0x97c   : > { %4736 = vadd.xlane.f32.xlu0 %v4735_v47 }
 0x97e   : > { %4494 = vadd.xlane.f32.xlu1 %v4493_v50  ;;  %v4484_v50 = vrot.slane %v8982_v23, %v9392_v51 }
 0x980   : > { %4464 = vadd.xlane.f32.xlu0 %v4463_v29 }
 0x984   : > { %4491 = vadd.xlane.f32.xlu0 %v4490_v40  ;;  %v6669_v40 = vld [vmem:[%s9262_s6 + $0x30] sm:$0xff]  }
 0xa05   : > { %v4711_v39 = vpop.xlane.xlu0 %4710 }
 0xa06   : > { %v4712_v46 = vmul.f32 0.03125, %v4711_v39  ;;  %v6670_v39 = vld [vmem:[%s9262_s6 + $0x18] sm:$0xff]  }
 0xa07   : > { %v4734_v1 = vpop.xlane.xlu1 %4733  ;;  %6518 = vmatpush3.bf16.msra.mxu1 %v6670_v39 }
 0xa08   : > { %v8992_v63 = vsub.f32 %v4708_v2, %v4712_v46  ;;  %v4738_v21 = vmul.f32 0.03125, %v4734_v1  ;;  %6535 = vmatprep.subr.bf16.mxu1 %v9375_v54 }
 0xa09   : > { %v4737_v30 = vpop.xlane.xlu0 %4736 }
 0xa0a   : > { %v8994_v62 = vsub.f32 %v4730_v22, %v4738_v21  ;;  %v4739_v12 = vmul.f32 0.03125, %v4737_v30  ;;  %v4714_v41 = vmul.f32 %v8992_v63, %v8992_v63  ;;  %v6667_v22 = vld [vmem:[%s9262_s6 + $0x28] sm:$0xff]  }
 0xa0b   : > { %v4495_v16 = vpop.xlane.xlu1 %4494  ;;  %6502 = vmatpush3.bf16.msra.mxu0 %v6667_v22 }
 0xa0c   : > { %v8998_v45 = vsub.f32 %v4731_v56, %v4739_v12  ;;  %v4497_v7 = vmul.f32 0.03125, %v4495_v16  ;;  %v4715_v37 = vsel %vm595_vm1, %v4714_v41, 0.0  ;;  %v4742_v26 = vmul.f32 %v8994_v62, %v8994_v62  ;;  %6503 = vmatprep.subr.bf16.mxu0 %v9375_v54  ;;  %v6671_v12 = vld [vmem:[%s9262_s6 + $0x38] sm:$0xff]  }
 0xa0d   : > { %4716 = vadd.xlane.f32.xlu0 %v4715_v37  ;;  %v4465_v25 = vpop.xlane.xlu0 %4464 }
 0xa0e   : > { %v4466_v18 = vmul.f32 0.03125, %v4465_v25  ;;  %v4744_v59 = vsel %vm3026_vm6, %v4742_v26, 0.0  ;;  %v4743_v32 = vmul.f32 %v8998_v45, %v8998_v45  ;;  %v9006_v13 = vsub.f32 %v4489_v49, %v4497_v7 }
 0xa0f   : > { %4745 = vadd.xlane.f32.xlu1 %v4744_v59  ;;  %v4479_v49 = vrot.slane %v8982_v23, %v9391_v33  ;;  %6504 = vmatpush3.bf16.msra.mxu0 %v6669_v40 }
 0xa10   : > { %v9008_v0 = vsub.f32 %v4462_v4, %v4466_v18  ;;  %v4747_v52 = vsel %vm3039_vm7, %v4743_v32, 0.0  ;;  %v4501_v35 = vmul.f32 %v9006_v13, %v9006_v13  ;;  %6505 = vmatprep.subr.bf16.mxu0 %v9375_v54 }
 0xa11   : > { %4748 = vadd.xlane.f32.xlu0 %v4747_v52  ;;  %v4492_v28 = vpop.xlane.xlu0 %4491 }
 0xa12   : > { %v4496_v8 = vmul.f32 0.03125, %v4492_v28  ;;  %v4468_v27 = vmul.f32 %v9008_v0, %v9008_v0  ;;  %v4505_v42 = vsel %vm3039_vm7, %v4501_v35, 0.0 }
 0xa13   : > { %6506 = vmatpush3.bf16.msra.mxu0 %v6671_v12 }
 0xa14   : > { %v9013_v24 = vsub.f32 %v4488_v38, %v4496_v8  ;;  %v4469_v17 = vsel %vm595_vm1, %v4468_v27, 0.0  ;;  %6523 = vmatprep.subr.bf16.mxu0 %v9375_v54 }
 0xa15   : > { %4470 = vadd.xlane.f32.xlu1 %v4469_v17 }
 0xa16   : > { %v4500_v57 = vmul.f32 %v9013_v24, %v9013_v24 }
 0xa18   : > { %v4502_v58 = vsel %vm3026_vm6, %v4500_v57, 0.0 }
 0xa19   : > { %4506 = vadd.xlane.f32.xlu1 %v4505_v42  ;;  %4503 = vadd.xlane.f32.xlu0 %v4502_v58 }
 0xa9a   : > { %v4717_v60 = vpop.xlane.xlu0 %4716 }
 0xa9b   : > { %v4718_v15 = vmul.f32 0.03125, %v4717_v60 }
 0xa9c   : > { %v4746_v10 = vpop.xlane.xlu1 %4745 }
 0xa9d   : > { %v4719_v14 = vadd.f32 1e-05, %v4718_v15  ;;  %v4750_v53 = vmul.f32 0.03125, %v4746_v10  ;;  %v6672_v10 = vld [vmem:[%s9262_s6] sm:$0xff]  }
 0xa9e   : > { %v4749_v61 = vpop.xlane.xlu0 %4748 }
 0xa9f   : > { %6872 = vrsqrt.f32 %v4719_v14  ;;  %v4752_v36 = vadd.f32 1e-05, %v4750_v53  ;;  %v4751_v43 = vmul.f32 0.03125, %v4749_v61  ;;  %v6673_v53 = vld [vmem:[%s9262_s6 + $0x20] sm:$0xff]  }
 0xaa1   : > { %6874 = vrsqrt.f32 %v4752_v36  ;;  %v4753_v55 = vadd.f32 1e-05, %v4751_v43  ;;  %v6674_v43 = vld [vmem:[%s9262_s6 + $0x8] sm:$0xff]  }
 0xaa2   : > { %v4471_v5 = vpop.xlane.xlu1 %4470 }
 0xaa3   : > { %6876 = vrsqrt.f32 %v4753_v55  ;;  %v4472_v31 = vmul.f32 0.03125, %v4471_v5  ;;  %v6675_v5 = vld [vmem:[%s9262_s6 + $0x28] sm:$0xff]  }
 0xaa5   : > { %v4473_v19 = vadd.f32 1e-05, %v4472_v31  ;;  %v6676_v31 = vld [vmem:[%s9262_s6 + $0x10] sm:$0xff]  }
 0xaa6   : > { %v4507_v9 = vpop.xlane.xlu1 %4506  ;;  %v4504_v2 = vpop.xlane.xlu0 %4503 }
 0xaa7   : > { %6878 = vrsqrt.f32 %v4473_v19  ;;  %v4509_v11 = vmul.f32 0.03125, %v4507_v9  ;;  %v4508_v56 = vmul.f32 0.03125, %v4504_v2  ;;  %v6679_v2 = vld [vmem:[%s9262_s6 + $0x38] sm:$0xff]  }
 0xaa9   : > { %v6873_v20 = vpop.eup %6872  ;;  %v4511_v4 = vadd.f32 1e-05, %v4509_v11  ;;  %v4510_v47 = vadd.f32 1e-05, %v4508_v56 }
 0xaaa   : > { %v4721_v38 = vmul.f32 %v6873_v20, %v8992_v63 }
 0xaab   : > { %v6875_v29 = vpop.eup %6874  ;;  %6880 = vrsqrt.f32 %v4511_v4 }
 0xaac   : > { %6882 = vrsqrt.f32 %v4510_v47  ;;  %v4722_v23 = vmul.f32 %v4721_v38, %v4479_v49  ;;  %v4756_v46 = vmul.f32 %v6875_v29, %v8994_v62 }
 0xaad   : > { %v6877_v1 = vpop.eup %6876 }
 0xaae   : > { %v4723_v63 = vadd.f32 %v4722_v23, %v4484_v50  ;;  %v4758_v21 = vmul.f32 %v4756_v46, %v4479_v49  ;;  %v4757_v30 = vmul.f32 %v6877_v1, %v8998_v45 }
 0xab0   : > { %v4724_v41 = vmax.f32 %v4723_v63, 0.0  ;;  %v4760_v16 = vadd.f32 %v4758_v21, %v4484_v50  ;;  %v4759_v7 = vmul.f32 %v4757_v30, %v4479_v49  ;;  %v9120_v63 = vld [vmem:[%s9258_s2 + $0x10] sm:$0x7] }
 0xab1   : > { %v6879_v37 = vpop.eup %6878 }
 0xab2   : > { %v4475_v62 = vmul.f32 %v6879_v37, %v9008_v0  ;;  %4726 = vrot.lane.b32.xlu0 %v4724_v41, %s6912_s23  ;;  %v4762_v26 = vmax.f32 %v4760_v16, 0.0  ;;  %v4761_v45 = vadd.f32 %v4759_v7, %v4484_v50  ;;  %v4939_v41 = vrot.slane %v9120_v63, %v9390_v48 }
 0xab4   : > { %4766 = vrot.lane.b32.xlu1 %v4762_v26, %s6912_s23  ;;  %v4480_v25 = vmul.f32 %v4479_v49, %v4475_v62  ;;  %v4763_v52 = vmax.f32 %v4761_v45, 0.0 }
 0xab5   : > { %v6881_v18 = vpop.eup %6880 }
 0xab6   : > { %v6883_v59 = vpop.eup %6882  ;;  %v4515_v32 = vmul.f32 %v6881_v18, %v9006_v13  ;;  %v4485_v28 = vadd.f32 %v4484_v50, %v4480_v25 }
 0xab7   : > { %v4514_v8 = vmul.f32 %v6883_v59, %v9013_v24 }
 0xab8   : > { %v4517_v27 = vmul.f32 %v4515_v32, %v4479_v49  ;;  %4768 = vrot.lane.b32.xlu1 %v4763_v52, %s6912_s23  ;;  %v4486_v0 = vmax.f32 %v4485_v28, 0.0 }
 0xab9   : > { %v4516_v17 = vmul.f32 %v4514_v8, %v4479_v49 }
 0xaba   : > { %v4519_v35 = vadd.f32 %v4517_v27, %v4484_v50  ;;  %4487 = vst.msk [vmem:[#allocation5 + $0x1] sm:$0xff] %vm595_vm1, %v4486_v0  ;;  %vm5497_vm1 = vcmask 1042432  }
 0xabb   : > { %v4518_v57 = vadd.f32 %v4516_v17, %v4484_v50 }
 0xabc   : > { %v4521_v42 = vmax.f32 %v4519_v35, 0.0 }
 0xabd   : > { %v4520_v58 = vmax.f32 %v4518_v57, 0.0 }
 0xabe   : > { %4523 = vst.msk [vmem:[#allocation5 + $0x12] sm:$0x1] %vm3039_vm7, %v4521_v42 }
 0xabf   : > { %4522 = vst.msk [vmem:[#allocation5 + $0xa] sm:$0xfe] %vm3026_vm6, %v4520_v58 }
 0xac5   : > { %v5017_v22 = vld [vmem:[#allocation5 + $0x12] ss:$2 sm:$0x1] }
 0xb24   : > { %v4727_v13 = vpop.permute.xlu0 %4726 }
 0xb25   : > { %4729 = vst.msk [vmem:[#allocation5] sm:$0xff] %vm1278_vm3, %v4727_v13  ;;  %vm5515_vm3 = vcmask 780802  }
 0xb26   : > { %v4767_v6 = vpop.permute.xlu1 %4766 }
 0xb27   : > { %4772 = vst.msk [vmem:[#allocation5 + $0x9] sm:$0xfe] %vm3614_vm10, %v4767_v6 }
 0xb2a   : > { %v4769_v24 = vpop.permute.xlu1 %4768 }
 0xb2b   : > { %4773 = vst.msk [vmem:[#allocation5 + $0x11] sm:$0x1] %vm3619_vm12, %v4769_v24 }
 0xb2e   : > { %v4774_v60 = vld [vmem:[#allocation5] ss:$2 sm:$0xff]  ;;  %v4776_v15 = vld [vmem:[#allocation5 + $0x10] ss:$2 sm:$0x1] }
 0xb2f   : > { %v4777_v14 = vpack.c.bf16 %v4776_v15, %v4774_v60  ;;  %v4787_v61 = vld [vmem:[#allocation5 + $0x1] ss:$2 sm:$0xff]  ;;  %v5015_v56 = vld [vmem:[#allocation5 + $0x2] ss:$2 sm:$0xff] }
 0xb30   : > { %v5003_v9 = vld [vmem:[#allocation5 + $0x1] ss:$2 sm:$0xff]  ;;  %v5018_v3 = vpack.c.bf16 %v5017_v22, %v5015_v56 }
 0xb31   : > { %6520 = vmatmul.mubr.msk.bf16.vlgmr.msra.gmra.mrb[104].mxu1 %vm3688_vm11, %v4777_v14 }
 0xb32   : > { %6536 = vmatpush3.bf16.msra.mxu1 %v6672_v10  ;;  %v4789_v36 = vld [vmem:[#allocation5 + $0x11] ss:$2 sm:$0x1]  ;;  %6543 = vmatprep.mubr.msk.bf16.mxu1 %vm6915_vm2, %v9375_v54 }
 0xb33   : > { %6537 = vmatprep.subr.bf16.mxu1 %v9375_v54  ;;  %v4790_v55 = vpack.c.bf16 %v4789_v36, %v4787_v61  ;;  %v5004_v19 = vld [vmem:[#allocation5 + $0x11] ss:$2 sm:$0x1] }
 0xb34   : > { %v5005_v11 = vpack.c.bf16 %v5004_v19, %v5003_v9 }
 0xb35   : > { %6508 = vmatmul.mubr.msk.bf16.vlgmr.msra.gmra.mrb[104].mxu0 %vm3688_vm11, %v4790_v55 }
 0xb36   : > { %6524 = vmatpush3.bf16.msra.mxu0 %v6673_v53  ;;  %6538 = vmatpush3.bf16.msra.mxu1 %v6674_v43 }
 0xb37   : > { %6525 = vmatprep.subr.bf16.mxu0 %v9375_v54  ;;  %6539 = vmatprep.subr.bf16.mxu1 %v9375_v54 }
 0xb38   : > { %6531 = vmatprep.mubr.msk.bf16.mxu0 %vm6915_vm2, %v9375_v54 }
 0xb3a   : > { %6526 = vmatpush3.bf16.msra.mxu0 %v6675_v5  ;;  %6540 = vmatpush3.bf16.msra.mxu1 %v6676_v31 }
 0xb3b   : > { %6527 = vmatprep.subr.bf16.mxu0 %v9375_v54  ;;  %6541 = vmatprep.subr.bf16.mxu1 %v9375_v54 }
 0xb3e   : > { %6528 = vmatpush3.bf16.msra.mxu0 %v6677_v34  ;;  %6542 = vmatpush3.bf16.msra.mxu1 %v6678_v44 }
 0xb3f   : > { %6529 = vmatprep.subr.bf16.mxu0 %v9375_v54  ;;  %6559 = vmatprep.subr.bf16.mxu1 %v9375_v54 }
 0xb41   : > { %6544 = vmatmul.mubr.msk.bf16.vlgmr.msra.gmra.mrb[108].mxu1 %vm3688_vm11, %v5005_v11 }
 0xb42   : > { %6530 = vmatpush3.bf16.msra.mxu0 %v6679_v2  ;;  %6567 = vmatprep.mubr.msk.bf16.mxu1 %vm6915_vm2, %v9375_v54 }
 0xb43   : > { %6547 = vmatprep.subr.bf16.mxu0 %v9375_v54 }
 0xb45   : > { %6532 = vmatmul.mubr.msk.bf16.vlgmr.msra.gmra.mrb[108].mxu0 %vm3688_vm11, %v5018_v3 }
 0xb46   : > { %6555 = vmatprep.mubr.msk.bf16.mxu0 %vm6915_vm2, %v9375_v54  ;;  %vm5510_vm2 = vcmask 517377  }
 0xc04   : > { %v4929_v49 = vpop.f32.mrb[104].mxu1 }
 0xc05   : > { %v6521_v20 = vpop.f32.mrb[105].mxu1 }
 0xc06   : > { %v4932_v4 = vpop.f32.mrb[106].mxu1 }
 0xc07   : > { %v6522_v47 = vpop.f32.mrb[107].mxu1 }
 0xc08   : > { %v4861_v50 = vpop.f32.mrb[104].mxu0  ;;  %v6681_v47 = vld [vmem:[%s9263_s7 + $0x20] sm:$0xff]  }
 0xc09   : > { %v4930_v38 = vadd.f32 %v4929_v49, %v4861_v50  ;;  %v6509_v29 = vpop.f32.mrb[105].mxu0  ;;  %6548 = vmatpush3.bf16.msra.mxu0 %v6681_v47  ;;  %v6682_v50 = vld [vmem:[%s9263_s7 + $0x8] sm:$0xff]  }
 0xc0a   : > { %v4864_v40 = vpop.f32.mrb[106].mxu0  ;;  %6549 = vmatprep.subr.bf16.mxu0 %v9375_v54 }
 0xc0b   : > { %v4933_v39 = vadd.f32 %v4932_v4, %v4864_v40  ;;  %v6510_v23 = vpop.f32.mrb[107].mxu0  ;;  %v4940_v25 = vadd.f32 %v4939_v41, %v4930_v38  ;;  %v6680_v4 = vld [vmem:[%s9263_s7] sm:$0xff]  }
 0xc0c   : > { %6560 = vmatpush3.bf16.msra.mxu1 %v6680_v4 }
 0xc0d   : > { %v4969_v52 = vsel %vm4968_vm13, %v4940_v25, 0.0  ;;  %v4967_v8 = vadd.f32 %v4939_v41, %v4933_v39  ;;  %v4942_v27 = vsel %vm4941_vm14, %v4940_v25, 0.0  ;;  %6561 = vmatprep.subr.bf16.mxu1 %v9375_v54 }
 0xc0f   : > { %v4972_v0 = vsel %vm3039_vm7, %v4967_v8, 0.0 }
 0xc10   : > { %6562 = vmatpush3.bf16.msra.mxu1 %v6682_v50 }
 0xc11   : > { %6563 = vmatprep.subr.bf16.mxu1 %v9375_v54 }
 0xc14   : > { %v5156_v46 = vpop.f32.mrb[108].mxu1 }
 0xc15   : > { %v6545_v1 = vpop.f32.mrb[109].mxu1 }
 0xc16   : > { %v5159_v21 = vpop.f32.mrb[110].mxu1 }
 0xc17   : > { %v6546_v30 = vpop.f32.mrb[111].mxu1 }
 0xc18   : > { %v5088_v12 = vpop.f32.mrb[108].mxu0 }
 0xc19   : > { %v5157_v16 = vadd.f32 %v5156_v46, %v5088_v12  ;;  %v6533_v7 = vpop.f32.mrb[109].mxu0 }
 0xc1a   : > { %v5091_v37 = vpop.f32.mrb[110].mxu0 }
 0xc1b   : > { %v5163_v62 = vadd.f32 %v5157_v16, %v4939_v41  ;;  %v5160_v26 = vadd.f32 %v5159_v21, %v5091_v37  ;;  %v6534_v45 = vpop.f32.mrb[111].mxu0 }
 0xc1c   : > { %v6683_v45 = vld [vmem:[%s9263_s7 + $0x28] sm:$0xff]  }
 0xc1d   : > { %v5186_v18 = vadd.f32 %v5160_v26, %v4939_v41  ;;  %v5187_v59 = vsel %vm4968_vm13, %v5163_v62, 0.0  ;;  %v5164_v32 = vsel %vm4941_vm14, %v5163_v62, 0.0  ;;  %6550 = vmatpush3.bf16.msra.mxu0 %v6683_v45 }
 0xc1e   : > { %5188 = vadd.xlane.f32.xlu0 %v5187_v59  ;;  %5165 = vadd.xlane.f32.xlu1 %v5164_v32  ;;  %v4958_v59 = vrot.slane %v9120_v63, %v9391_v33 }
 0xc1f   : > { %v5190_v28 = vsel %vm3039_vm7, %v5186_v18, 0.0  ;;  %6551 = vmatprep.subr.bf16.mxu0 %v9375_v54 }
 0xc22   : > { %4970 = vadd.xlane.f32.xlu1 %v4969_v52  ;;  %5191 = vadd.xlane.f32.xlu0 %v5190_v28  ;;  %v6685_v28 = vld [vmem:[%s9263_s7 + $0x30] sm:$0xff]  }
 0xc23   : > { %6552 = vmatpush3.bf16.msra.mxu0 %v6685_v28 }
 0xc24   : > { %6553 = vmatprep.subr.bf16.mxu0 %v9375_v54 }
 0xc26   : > { %4943 = vadd.xlane.f32.xlu0 %v4942_v27 }
 0xc2a   : > { %4973 = vadd.xlane.f32.xlu0 %v4972_v0  ;;  %v4963_v0 = vrot.slane %v9120_v63, %v9392_v51  ;;  %v6687_v63 = vld [vmem:[%s9263_s7 + $0x38] sm:$0xff]  }
 0xc2b   : > { %6554 = vmatpush3.bf16.msra.mxu0 %v6687_v63 }
 0xcab   : > { %v5189_v17 = vpop.xlane.xlu0 %5188  ;;  %v5166_v35 = vpop.xlane.xlu1 %5165 }
 0xcac   : > { %v5193_v57 = vmul.f32 0.03125, %v5189_v17  ;;  %v5167_v42 = vmul.f32 0.03125, %v5166_v35 }
 0xcae   : > { %v9130_v58 = vsub.f32 %v5163_v62, %v5193_v57  ;;  %v9132_v13 = vsub.f32 %v5163_v62, %v5167_v42 }
 0xcaf   : > { %v4971_v6 = vpop.xlane.xlu1 %4970  ;;  %v5192_v24 = vpop.xlane.xlu0 %5191 }
 0xcb0   : > { %v4975_v60 = vmul.f32 0.03125, %v4971_v6  ;;  %v5194_v15 = vmul.f32 0.03125, %v5192_v24  ;;  %v5169_v10 = vmul.f32 %v9132_v13, %v9132_v13  ;;  %v5197_v14 = vmul.f32 %v9130_v58, %v9130_v58 }
 0xcb2   : > { %v9138_v53 = vsub.f32 %v4940_v25, %v4975_v60  ;;  %v9140_v61 = vsub.f32 %v5186_v18, %v5194_v15  ;;  %v5170_v36 = vsel %vm4941_vm14, %v5169_v10, 0.0  ;;  %v5199_v43 = vsel %vm4968_vm13, %v5197_v14, 0.0 }
 0xcb3   : > { %5171 = vadd.xlane.f32.xlu1 %v5170_v36  ;;  %5200 = vadd.xlane.f32.xlu0 %v5199_v43  ;;  %v4944_v55 = vpop.xlane.xlu0 %4943 }
 0xcb4   : > { %v4945_v5 = vmul.f32 0.03125, %v4944_v55  ;;  %v5198_v31 = vmul.f32 %v9140_v61, %v9140_v61  ;;  %v4979_v19 = vmul.f32 %v9138_v53, %v9138_v53 }
 0xcb6   : > { %v9146_v34 = vsub.f32 %v4940_v25, %v4945_v5  ;;  %v5202_v44 = vsel %vm3039_vm7, %v5198_v31, 0.0  ;;  %v4981_v22 = vsel %vm4968_vm13, %v4979_v19, 0.0  ;;  %v6684_v25 = vld [vmem:[%s9263_s7 + $0x10] sm:$0xff]  }
 0xcb7   : > { %5203 = vadd.xlane.f32.xlu1 %v5202_v44  ;;  %v4974_v9 = vpop.xlane.xlu0 %4973  ;;  %6564 = vmatpush3.bf16.msra.mxu1 %v6684_v25 }
 0xcb8   : > { %v4976_v2 = vmul.f32 0.03125, %v4974_v9  ;;  %v4947_v11 = vmul.f32 %v9146_v34, %v9146_v34  ;;  %6565 = vmatprep.subr.bf16.mxu1 %v9375_v54 }
 0xcba   : > { %v9153_v56 = vsub.f32 %v4967_v8, %v4976_v2  ;;  %v4948_v3 = vsel %vm4941_vm14, %v4947_v11, 0.0  ;;  %v6686_v8 = vld [vmem:[%s9263_s7 + $0x18] sm:$0xff]  }
 0xcbb   : > { %4982 = vadd.xlane.f32.xlu1 %v4981_v22  ;;  %4949 = vadd.xlane.f32.xlu0 %v4948_v3 }
 0xcbc   : > { %v4980_v49 = vmul.f32 %v9153_v56, %v9153_v56  ;;  %6566 = vmatpush3.bf16.msra.mxu1 %v6686_v8 }
 0xcbe   : > { %v4984_v20 = vsel %vm3039_vm7, %v4980_v49, 0.0 }
 0xcbf   : > { %4985 = vadd.xlane.f32.xlu0 %v4984_v20 }
 0xd40   : > { %v5172_v38 = vpop.xlane.xlu1 %5171  ;;  %v5201_v29 = vpop.xlane.xlu0 %5200 }
 0xd41   : > { %v5173_v40 = vmul.f32 0.03125, %v5172_v38  ;;  %v5205_v39 = vmul.f32 0.03125, %v5201_v29 }
 0xd43   : > { %v5174_v23 = vadd.f32 1e-05, %v5173_v40  ;;  %v5207_v46 = vadd.f32 1e-05, %v5205_v39 }
 0xd44   : > { %v5204_v1 = vpop.xlane.xlu1 %5203 }
 0xd45   : > { %6884 = vrsqrt.f32 %v5174_v23  ;;  %v5206_v21 = vmul.f32 0.03125, %v5204_v1 }
 0xd46   : > { %6886 = vrsqrt.f32 %v5207_v46 }
 0xd47   : > { %v5208_v30 = vadd.f32 1e-05, %v5206_v21 }
 0xd48   : > { %v4983_v12 = vpop.xlane.xlu1 %4982  ;;  %v4950_v41 = vpop.xlane.xlu0 %4949 }
 0xd49   : > { %6888 = vrsqrt.f32 %v5208_v30  ;;  %v4987_v16 = vmul.f32 0.03125, %v4983_v12  ;;  %v4951_v7 = vmul.f32 0.03125, %v4950_v41 }
 0xd4b   : > { %v4989_v37 = vadd.f32 1e-05, %v4987_v16  ;;  %v4952_v62 = vadd.f32 1e-05, %v4951_v7 }
 0xd4c   : > { %v4986_v26 = vpop.xlane.xlu0 %4985 }
 0xd4d   : > { %6890 = vrsqrt.f32 %v4989_v37  ;;  %v4988_v18 = vmul.f32 0.03125, %v4986_v26 }
 0xd4e   : > { %6892 = vrsqrt.f32 %v4952_v62 }
 0xd4f   : > { %v6885_v32 = vpop.eup %6884  ;;  %v4990_v52 = vadd.f32 1e-05, %v4988_v18  ;;  %v9222_v18 = vld [vmem:[%s9264_s8] sm:$0x7] }
 0xd50   : > { %v6887_v27 = vpop.eup %6886  ;;  %v5176_v17 = vmul.f32 %v6885_v32, %v9132_v13 }
 0xd51   : > { %6894 = vrsqrt.f32 %v4990_v52  ;;  %v5211_v35 = vmul.f32 %v6887_v27, %v9130_v58 }
 0xd52   : > { %v5177_v57 = vmul.f32 %v5176_v17, %v4958_v59 }
 0xd53   : > { %v6889_v42 = vpop.eup %6888  ;;  %v5213_v6 = vmul.f32 %v5211_v35, %v4958_v59 }
 0xd54   : > { %v5178_v24 = vadd.f32 %v5177_v57, %v4963_v0  ;;  %v5212_v60 = vmul.f32 %v6889_v42, %v9140_v61  ;;  %v9204_v61 = vld [vmem:[%s9264_s8 + $0x4] sm:$0x7] }
 0xd55   : > { %v5215_v15 = vadd.f32 %v5213_v6, %v4963_v0 }
 0xd56   : > { %v5179_v10 = vmax.f32 %v5178_v24, 0.0  ;;  %v5214_v13 = vmul.f32 %v5212_v60, %v4958_v59 }
 0xd57   : > { %v6891_v14 = vpop.eup %6890  ;;  %v5217_v36 = vmax.f32 %v5215_v15, 0.0 }
 0xd58   : > { %v6893_v58 = vpop.eup %6892  ;;  %5181 = vrot.lane.b32.xlu1 %v5179_v10, %s6912_s23  ;;  %v5216_v43 = vadd.f32 %v5214_v13, %v4963_v0  ;;  %v4993_v55 = vmul.f32 %v6891_v14, %v9138_v53  ;;  %v5424_v53 = vrot.slane %v9204_v61, %v9390_v48 }
 0xd59   : > { %5221 = vrot.lane.b32.xlu0 %v5217_v36, %s6912_s23  ;;  %v4954_v54 = vmul.f32 %v6893_v58, %v9146_v34 }
 0xd5a   : > { %v5218_v5 = vmax.f32 %v5216_v43, 0.0  ;;  %v4995_v31 = vmul.f32 %v4993_v55, %v4958_v59  ;;  %v5476_v43 = vrot.slane %v9204_v61, %v9391_v33 }
 0xd5b   : > { %v6895_v44 = vpop.eup %6894  ;;  %v4959_v19 = vmul.f32 %v4958_v59, %v4954_v54 }
 0xd5c   : > { %5223 = vrot.lane.b32.xlu1 %v5218_v5, %s6912_s23  ;;  %v4997_v9 = vadd.f32 %v4995_v31, %v4963_v0  ;;  %v4994_v2 = vmul.f32 %v6895_v44, %v9153_v56  ;;  %v5486_v31 = vrot.slane %v9204_v61, %v9392_v51 }
 0xd5d   : > { %v4964_v11 = vadd.f32 %v4963_v0, %v4959_v19 }
 0xd5e   : > { %v4999_v22 = vmax.f32 %v4997_v9, 0.0  ;;  %v4996_v34 = vmul.f32 %v4994_v2, %v4958_v59  ;;  %v5393_v59 = vrot.slane %v9222_v18, %v9390_v48 }
 0xd5f   : > { %v4965_v3 = vmax.f32 %v4964_v11, 0.0 }
 0xd60   : > { %5001 = vst.msk [vmem:[#allocation6 + $0x1] sm:$0xe0] %vm4968_vm13, %v4999_v22  ;;  %v4998_v49 = vadd.f32 %v4996_v34, %v4963_v0  ;;  %5426 = vrot.lane.b32.xlu1 %v5424_v53, %s6912_s23 }
 0xd61   : > { %4966 = vst.msk [vmem:[#allocation6 + $0x1] sm:$0xf] %vm4941_vm14, %v4965_v3 }
 0xd62   : > { %v5000_v20 = vmax.f32 %v4998_v49, 0.0 }
 0xd64   : > { %5002 = vst.msk [vmem:[#allocation6 + $0x9] sm:$0x1] %vm3039_vm7, %v5000_v20 }
 0xdca   : > { %v5182_v56 = vpop.permute.xlu1 %5181 }
 0xdcb   : > { %5185 = vst.msk [vmem:[#allocation6 + $0x1] sm:$0xf] %vm5184_vm15, %v5182_v56  ;;  %v5222_v4 = vpop.permute.xlu0 %5221 }
 0xdcc   : > { %5228 = vst.msk [vmem:[#allocation6 + $0x1] sm:$0xe0] %vm5227_vm0, %v5222_v4 }
 0xdce   : > { %v5224_v47 = vpop.permute.xlu1 %5223 }
 0xdcf   : > { %5229 = vst.msk [vmem:[#allocation6 + $0x9] sm:$0x1] %vm3619_vm12, %v5224_v47 }
 0xdd2   : > { %v5427_v30 = vpop.permute.xlu1 %5426 }
 0xdd3   : > { %v5230_v50 = vld [vmem:[#allocation6] sm:$0xff]  ;;  %v5231_v38 = vld [vmem:[#allocation6 + $0x8] sm:$0x1] }
 0xdd4   : > { %v5232_v29 = vpack.c.bf16 %v5231_v38, %v5230_v50  ;;  %v5241_v40 = vld [vmem:[#allocation6 + $0x1] sm:$0xff] }
 0xdd6   : > { %6568 = vmatmul.mubr.msk.bf16.vlgmr.msra.gmra.mrb[112].mxu1 %vm3688_vm11, %v5232_v29  ;;  %v5242_v39 = vld [vmem:[#allocation6 + $0x9] sm:$0x1] }
 0xdd7   : > { %v5243_v23 = vpack.c.bf16 %v5242_v39, %v5241_v40 }
 0xdd9   : > { %6556 = vmatmul.mubr.msk.bf16.vlgmr.msra.gmra.mrb[112].mxu0 %vm3688_vm11, %v5243_v23 }
 0xea9   : > { %v5382_v46 = vpop.f32.mrb[112].mxu1 }
 0xeaa   : > { %v6569_v1 = vpop.f32.mrb[113].mxu1 }
 0xeab   : > { %v5385_v21 = vpop.f32.mrb[114].mxu1 }
 0xeac   : > { %v6570_v12 = vpop.f32.mrb[115].mxu1  ;;  %v5314_v41 = vpop.f32.mrb[112].mxu0 }
 0xead   : > { %v5383_v16 = vadd.f32 %v5382_v46, %v5314_v41  ;;  %v6557_v7 = vpop.f32.mrb[113].mxu0  ;;  %v5411_v12 = vrot.slane %v9222_v18, %v9391_v33 }
 0xeae   : > { %v5317_v37 = vpop.f32.mrb[114].mxu0 }
 0xeaf   : > { %v5429_v62 = vadd.f32 %v5427_v30, %v5383_v16  ;;  %v5386_v26 = vadd.f32 %v5385_v21, %v5317_v37  ;;  %v6558_v45 = vpop.f32.mrb[115].mxu0  ;;  %v5394_v8 = vadd.f32 %v5393_v59, %v5383_v16  ;;  %v5416_v16 = vrot.slane %v9222_v18, %v9392_v51 }
 0xeb1   : > { %v5430_v25 = vadd.f32 %v5427_v30, %v5386_v26  ;;  %5433 = vrot.lane.b32.xlu1 %v5429_v62, %s6913_s21  ;;  %v5395_v0 = vsel %vm4941_vm14, %v5394_v8, 0.0 }
 0xeb3   : > { %5435 = vrot.lane.b32.xlu0 %v5430_v25, %s6913_s21 }
 0xf23   : > { %v5434_v32 = vpop.permute.xlu1 %5433 }
 0xf24   : > { %v5439_v52 = vsel %vm4968_vm13, %v5434_v32, 0.0 }
 0xf25   : > { %5440 = vadd.xlane.f32.xlu1 %v5439_v52  ;;  %v5436_v28 = vpop.permute.xlu0 %5435 }
 0xf26   : > { %v5442_v27 = vsel %vm3039_vm7, %v5436_v28, 0.0 }
 0xf27   : > { %5443 = vadd.xlane.f32.xlu0 %v5442_v27 }
 0xf2b   : > { %5396 = vadd.xlane.f32.xlu0 %v5395_v0 }
 0xfb2   : > { %v5441_v17 = vpop.xlane.xlu1 %5440 }
 0xfb3   : > { %v5445_v35 = vmul.f32 0.03125, %v5441_v17 }
 0xfb4   : > { %v5444_v57 = vpop.xlane.xlu0 %5443 }
 0xfb5   : > { %v5447_v42 = vsub.f32 %v5429_v62, %v5445_v35  ;;  %v5446_v10 = vmul.f32 0.03125, %v5444_v57 }
 0xfb7   : > { %v5449_v6 = vmul.f32 %v5447_v42, %v5447_v42  ;;  %v5448_v13 = vsub.f32 %v5430_v25, %v5446_v10 }
 0xfb8   : > { %v5397_v24 = vpop.xlane.xlu0 %5396 }
 0xfb9   : > { %v5398_v60 = vmul.f32 0.03125, %v5397_v24  ;;  %5453 = vrot.lane.b32.xlu1 %v5449_v6, %s6913_s21  ;;  %v5450_v14 = vmul.f32 %v5448_v13, %v5448_v13 }
 0xfbb   : > { %v5399_v48 = vsub.f32 %v5394_v8, %v5398_v60 }
 0xfbd   : > { %v5400_v15 = vmul.f32 %v5399_v48, %v5399_v48 }
 0xfbf   : > { %v5401_v63 = vsel %vm4941_vm14, %v5400_v15, 0.0 }
 0xfc0   : > { %5402 = vadd.xlane.f32.xlu0 %v5401_v63 }
 0xfd6   : > { %5455 = vrot.lane.b32.xlu0 %v5450_v14, %s6913_s21 }
0x102b   : > { %v5454_v36 = vpop.permute.xlu1 %5453 }
0x102c   : > { %v5459_v58 = vsel %vm4968_vm13, %v5454_v36, 0.0 }
0x102d   : > { %5460 = vadd.xlane.f32.xlu1 %v5459_v58 }
0x103e   : > { %5478 = vrot.lane.b32.xlu1 %v5476_v43, %s6912_s23 }
0x104d   : > { %v5403_v55 = vpop.xlane.xlu0 %5402 }
0x104e   : > { %v5404_v46 = vmul.f32 0.03125, %v5403_v55 }
0x1050   : > { %v5405_v1 = vadd.f32 1e-05, %v5404_v46 }
0x1051   : > { %v5456_v54 = vpop.permute.xlu0 %5455 }
0x1052   : > { %v5462_v5 = vsel %vm3039_vm7, %v5456_v54, 0.0 }
0x1053   : > { %5463 = vadd.xlane.f32.xlu0 %v5462_v5 }
0x1069   : > { %5488 = vrot.lane.b32.xlu0 %v5486_v31, %s6912_s23 }
0x10ba   : > { %v5461_v44 = vpop.xlane.xlu1 %5460 }
0x10bb   : > { %v5465_v19 = vmul.f32 0.03125, %v5461_v44 }
0x10bd   : > { %v5467_v9 = vadd.f32 1e-05, %v5465_v19 }
0x10be   : > { %v5479_v3 = vpop.permute.xlu1 %5478 }
0x10bf   : > { %6896 = vrsqrt.f32 %v5467_v9 }
0x10c9   : > { %v6897_v22 = vpop.eup %6896 }
0x10ca   : > { %v5471_v34 = vmul.f32 %v6897_v22, %v5447_v42 }
0x10cc   : > { %v5481_v20 = vmul.f32 %v5479_v3, %v5471_v34 }
0x10e0   : > { %v5464_v2 = vpop.xlane.xlu0 %5463 }
0x10e1   : > { %v5466_v53 = vmul.f32 0.03125, %v5464_v2 }
0x10e3   : > { %v5468_v11 = vadd.f32 1e-05, %v5466_v53 }
0x10e4   : > { %v5489_v49 = vpop.permute.xlu0 %5488 }
0x10e5   : > { %6898 = vrsqrt.f32 %v5468_v11  ;;  %v5491_v47 = vadd.f32 %v5489_v49, %v5481_v20 }
0x10e6   : > { %6900 = vrsqrt.f32 %v5405_v1 }
0x10e7   : > { %v5493_v38 = vmax.f32 %v5491_v47, 0.0 }
0x10e9   : > { %v5498_v40 = vrot.slane %v5493_v38, 5 }
0x10ef   : > { %v6899_v56 = vpop.eup %6898 }
0x10f0   : > { %v5472_v4 = vmul.f32 %v6899_v56, %v5448_v13  ;;  %v6901_v21 = vpop.eup %6900 }
0x10f1   : > { %v5407_v30 = vmul.f32 %v6901_v21, %v5399_v48 }
0x10f2   : > { %v5482_v50 = vmul.f32 %v5479_v3, %v5472_v4 }
0x10f3   : > { %v5412_v41 = vmul.f32 %v5411_v12, %v5407_v30 }
0x10f4   : > { %v5492_v61 = vadd.f32 %v5489_v49, %v5482_v50 }
0x10f5   : > { %v5417_v7 = vadd.f32 %v5416_v16, %v5412_v41 }
0x10f6   : > { %v5494_v29 = vmax.f32 %v5492_v61, 0.0 }
0x10f7   : > { %v5418_v37 = vmax.f32 %v5417_v7, 0.0 }
0x10f8   : > { %v5499_v39 = vrot.slane %v5494_v29, 5 }
0x10fa   : > { %v5500_v23 = vsel %vm5497_vm1, %v5498_v40, %v5499_v39 }
0x10fb   : > { %5501 = vrot.lane.b32.xlu1 %v5500_v23, %s6913_s21 }
0x116d   : > { %v5502_v62 = vpop.permute.xlu1 %5501 }
0x116e   : > { %v5504_v26 = vadd.f32 %v5502_v62, %v5418_v37 }
0x1170   : > { %5517 = vrot.lane.b32.xlu0 %v5504_v26, %s6913_s21  ;;  %5507 = vrot.lane.b32.xlu1 %v5504_v26, %s6912_s23  ;;  %5505 = vst.msk [vmem:[%s328_s19] sm:$0x1] %vm3039_vm7, %v5504_v26 }
0x1174   : > { %5512 = vrot.lane.b32.xlu1 %v5504_v26, %s6914_s27 }
0x11e2   : > { %v5508_v33 = vpop.permute.xlu1 %5507  ;;  %v5518_v45 = vpop.permute.xlu0 %5517 }
0x11e3   : > { %5511 = vst.msk [vmem:[%s328_s19 - $0x1] sm:$0x2] %vm5510_vm2, %v5508_v33 }
0x11e6   : > { %v5513_v51 = vpop.permute.xlu1 %5512 }
0x11e7   : > { %5516 = vst.msk [vmem:[%s328_s19 - $0x2] sm:$0x4] %vm5515_vm3, %v5513_v51 }
0x11e8   : > { %5521 = vst.msk [vmem:[%s328_s19 - $0x3] sm:$0x8] %vm5520_vm4, %v5518_v45 }
0x11e9 PF: > { %s19_s30 = sadd.s32 1, %s6909_s30  }
0x11ea   : > { %p16_p4 = scmp.ge.s32.totalorder %s19_s30, 4  }
0x11ec   :  { %18 = sbr.rel (!%p16_p4) target bundleno = 1 (0x1), region = 208 }

</bundles_post_ra>
